<compile_context>
chip_gen: v7x
topology: tpu7x:2x2x1
jax: 0.10.0
libtpu: 0.0.40
codegen_flags: <defaults>
</compile_context>

<pallas_src>
from functools import partial

import jax
import jax.numpy as jnp
from jax import lax
from jax.experimental import pallas as pl
from jax.experimental.pallas import tpu as pltpu

C_BASE = 16   # `c` in the PyTorch module
LANE = 128    # lane-dense padded channel width


def _rup(x, m):
    return ((x + m - 1) // m) * m


# ---------------------------------------------------------------------------
# Static geometry for the 4 Conv2 blocks
# ---------------------------------------------------------------------------
def _geometry(H, W):
    dims = [(3, C_BASE), (C_BASE, 2 * C_BASE),
            (2 * C_BASE, 4 * C_BASE), (4 * C_BASE, 8 * C_BASE)]
    geom = []
    h, w = H, W
    prev_mp = 0
    for cin, cout in dims:
        ho, wo = h // 2, w // 2
        m = ho * wo
        mp = max(8, _rup(m, 8))
        gmid = max(8, _rup(wo + 1, 8))   # guard for the conv1->conv2 scratch
        gin = max(8, _rup(w + 1, 8))     # guard for this block's input scratch
        geom.append(dict(Hin=h, Win=w, Ho=ho, Wo=wo, M=m, Mp=mp,
                         Cin=cin, Cout=cout, gmid=gmid, gin=gin,
                         mid_rows=2 * gmid + mp,
                         in_rows=gin + prev_mp + 16))
        prev_mp = mp
        h, w = ho, wo
    return geom


# ---------------------------------------------------------------------------
# Fused Pallas kernel: all four Conv2 blocks, one image per grid step
# ---------------------------------------------------------------------------
def _contextnet_kernel(geom, p_ref, w1a_ref, wst_ref, bst_ref, ast_ref,
                       o1_ref, o2_ref, o3_ref, o4_ref,
                       mid0, in1, mid1, in2, mid2, in3, mid3):
    """p_ref : (1, Mp1, 128) bf16  im2col patches of block-1's stride-2 conv
       w1a   : (128, 128)    bf16  block-1 conv1 weights (K=27, Cout=16 padded)
       wst   : (7, 9, 128, 128) bf16  per-tap (Cin,Cout) slabs for
               [w2_1, w1_2, w2_2, w1_3, w2_3, w1_4, w2_4]
       bst/ast: (8, 128) f32  biases / PReLU alphas, order (b, conv) row-major
       o*    : (1, Mp_b, 128) f32 per-block outputs
       mid*  : f32 VMEM scratch for each block's conv1 output (+ zero guards)
       in*   : f32 VMEM scratch for each block's input (+ zero guards)."""
    mids = (mid0, mid1, mid2, mid3)
    xins = (None, in1, in2, in3)
    outs = (o1_ref, o2_ref, o3_ref, o4_ref)

    def zero_rows(ref, lo, hi):
        if hi > lo:
            ref[pl.ds(lo, hi - lo), :] = jnp.zeros((hi - lo, LANE), ref.dtype)

    # Zero ONLY guard / tail rows (data rows are fully rewritten below).
    # Done every step so the kernel is correct when the batch grid axis is
    # sharded across v7x's two TensorCores (no cross-step persistence needed).
    for b, g in enumerate(geom):
        zero_rows(mids[b], 0, g['gmid'])
        zero_rows(mids[b], g['gmid'] + g['M'], g['mid_rows'])
        if b > 0:
            zero_rows(xins[b], 0, g['gin'])
            zero_rows(xins[b], g['gin'] + geom[b - 1]['Mp'], g['in_rows'])

    def prelu(v, alpha):
        return jnp.where(v >= 0.0, v, v * alpha)

    # Row-0 mask for dx == -1 taps of the stride-2 convs (input column -1 is
    # only ever hit by output column j == 0).
    row_id8 = lax.broadcasted_iota(jnp.int32, (8, 1), 0)
    not_row0 = (row_id8 != 0).astype(jnp.float32)

    for b, g in enumerate(geom):
        Ho, Wo, M, Mp = g['Ho'], g['Wo'], g['M'], g['Mp']
        Win = g['Win']
        gmid = g['gmid']
        b1 = bst_ref[pl.ds(2 * b, 1), :]
        a1 = ast_ref[pl.ds(2 * b, 1), :]
        b2 = bst_ref[pl.ds(2 * b + 1, 1), :]
        a2 = ast_ref[pl.ds(2 * b + 1, 1), :]

        # ------ conv1: 3x3, stride 2, pad 1, + PReLU -> mids[b] -------------
        if b == 0:
            # im2col path (single lane-dense matmul, Cin = 3).
            h = jnp.dot(p_ref[0], w1a_ref[...],
                        preferred_element_type=jnp.float32)
            h = prelu(h + b1, a1)
            mids[0][pl.ds(gmid, M), :] = h[0:M, :]
        else:
            gin = g['gin']
            slab1 = 2 * b - 1
            for i in range(Ho):
                acc = jnp.zeros((8, LANE), jnp.float32)
                t = 0
                for dy in (-1, 0, 1):
                    for dx in (-1, 0, 1):
                        # flat index of input pixel (2i+dy, 2j+dx); top guard
                        # rows are zero so the dy = -1 / i = 0 taps vanish.
                        start = gin + (2 * i + dy) * Win + dx
                        # Always read 8 strided rows to keep the matmul at the
                        # native (8,128) tile; rows >= Wo are junk, dropped
                        # when storing.
                        src = xins[b][pl.ds(start, 8, stride=2), :]
                        if dx == -1:
                            src = src * not_row0
                        acc = acc + jnp.dot(src.astype(jnp.bfloat16),
                                            wst_ref[slab1, t],
                                            preferred_element_type=jnp.float32)
                        t += 1
                hrow = prelu(acc + b1, a1)
                mids[b][pl.ds(gmid + i * Wo, Wo), :] = hrow[0:Wo, :]

        # ------ conv2: 3x3, stride 1, pad 1, + PReLU -------------------------
        # Vertical OOB handled by zero guard + tail rows of mids[b]; only the
        # two horizontal predicates are needed, computed once per block and
        # applied to the SOURCE so the accumulation is a pure dot chain.
        slab2 = 2 * b
        col = lax.broadcasted_iota(jnp.int32, (Mp, 1), 0) % Wo
        left_ok = col != 0           # dx == -1 invalid at column 0
        right_ok = col != (Wo - 1)   # dx == +1 invalid at the last column
        acc = jnp.zeros((Mp, LANE), jnp.float32)
        t = 0
        for dy in (-1, 0, 1):
            for dx in (-1, 0, 1):
                off = dy * Wo + dx
                src = mids[b][pl.ds(gmid + off, Mp), :]
                if dx == -1:
                    src = jnp.where(left_ok, src, 0.0)
                elif dx == 1:
                    src = jnp.where(right_ok, src, 0.0)
                acc = acc + jnp.dot(src.astype(jnp.bfloat16),
                                    wst_ref[slab2, t],
                                    preferred_element_type=jnp.float32)
                t += 1
        y = prelu(acc + b2, a2)
        outs[b][0] = y                                   # lane-dense f32 store
        if b + 1 < len(geom):
            xins[b + 1][pl.ds(geom[b + 1]['gin'], Mp), :] = y


# ---------------------------------------------------------------------------
# Parameter packing (lane-dense, bf16 weights)
# ---------------------------------------------------------------------------
def _pack_params(params):
    w11 = params[0][0][0]
    k1 = 9 * w11.shape[2]
    cout0 = w11.shape[3]
    w1a = jnp.pad(w11.reshape(k1, cout0),
                  ((0, LANE - k1), (0, LANE - cout0))).astype(jnp.bfloat16)

    slab_srcs = [params[0][1]] + [params[b][i] for b in range(1, 4)
                                  for i in range(2)]
    slabs = []
    for (w, _, _) in slab_srcs:
        cin, cout = w.shape[2], w.shape[3]
        wt = jnp.pad(w.reshape(9, cin, cout),
                     ((0, 0), (0, LANE - cin), (0, LANE - cout)))
        slabs.append(wt)
    wst = jnp.stack(slabs).astype(jnp.bfloat16)           # (7, 9, 128, 128)

    bs, al = [], []
    for blk in params:
        for (_, bb, aa) in blk:
            bs.append(jnp.pad(bb, (0, LANE - bb.shape[0])))
            al.append(jnp.pad(aa, (0, LANE - aa.shape[0])))
    bst = jnp.stack(bs).astype(jnp.float32)                # (8, 128)
    ast = jnp.stack(al).astype(jnp.float32)
    return w1a, wst, bst, ast


# ---------------------------------------------------------------------------
# Fused-network wrapper (NHWC in, list of NHWC feature maps out)
# ---------------------------------------------------------------------------
def contextnet_features_nhwc(params, x):
    N, H, W, Cin = x.shape
    assert Cin == 3
    assert H % 16 == 0 and W % 16 == 0, "Contextnet needs H, W divisible by 16"
    geom = _geometry(H, W)
    g1 = geom[0]
    Ho, Wo, M, Mp1 = g1['Ho'], g1['Wo'], g1['M'], g1['Mp']
    K1 = 9 * Cin

    # im2col for block-1's stride-2 conv only (XLA glue: pad + 9 slices).
    xp = jnp.pad(x, ((0, 0), (1, 1), (1, 1), (0, 0)))
    taps = [xp[:, ky:ky + 2 * Ho - 1:2, kx:kx + 2 * Wo - 1:2, :]
            for ky in range(3) for kx in range(3)]
    patches = jnp.concatenate(taps, axis=-1).reshape(N, M, K1)
    patches = jnp.pad(patches, ((0, 0), (0, Mp1 - M), (0, LANE - K1)))
    patches = patches.astype(jnp.bfloat16)        # halve HBM->VMEM DMA bytes

    w1a, wst, bst, ast = _pack_params(params)

    in_specs = [
        pl.BlockSpec((1, Mp1, LANE), lambda n: (n, 0, 0)),
        pl.BlockSpec((LANE, LANE), lambda n: (0, 0)),
        pl.BlockSpec((7, 9, LANE, LANE), lambda n: (0, 0, 0, 0)),
        pl.BlockSpec((8, LANE), lambda n: (0, 0)),
        pl.BlockSpec((8, LANE), lambda n: (0, 0)),
    ]
    out_specs = tuple(pl.BlockSpec((1, g['Mp'], LANE), lambda n: (n, 0, 0))
                      for g in geom)
    out_shape = tuple(jax.ShapeDtypeStruct((N, g['Mp'], LANE), jnp.float32)
                      for g in geom)
    scratch = []
    for b, g in enumerate(geom):
        if b > 0:
            scratch.append(pltpu.VMEM((g['in_rows'], LANE), jnp.float32))
        scratch.append(pltpu.VMEM((g['mid_rows'], LANE), jnp.float32))

    outs = pl.pallas_call(
        partial(_contextnet_kernel, geom),
        out_shape=out_shape,
        grid=(N,),
        in_specs=in_specs,
        out_specs=out_specs,
        scratch_shapes=scratch,
        compiler_params=pltpu.CompilerParams(
            dimension_semantics=("parallel",),        # batch across v7x cores
            vmem_limit_bytes=32 * 1024 * 1024),
    )(patches, w1a, wst, bst, ast)

    feats = []
    for g, o in zip(geom, outs):
        feats.append(o[:, :g['M'], :g['Cout']]
                     .reshape(N, g['Ho'], g['Wo'], g['Cout']))
    return feats


# ---------------------------------------------------------------------------
# Glue ops (exact PyTorch semantics)
# ---------------------------------------------------------------------------
def downsample_flow_half(flow):
    """F.interpolate(scale_factor=0.5, bilinear, align_corners=False) * 0.5
    == 2x2 average pool for even sizes.  flow: (N, H, W, 2)."""
    N, H, W, C = flow.shape
    assert H % 2 == 0 and W % 2 == 0, "even spatial dims required"
    f = flow.reshape(N, H // 2, 2, W // 2, 2, C).mean(axis=(2, 4))
    return f * 0.5


def warp_bilinear_border(x, flow):
    """Backward warp == grid_sample(bilinear, padding_mode='border',
    align_corners=True), pixel-space flow (ch 0 = dx, ch 1 = dy).
    x: (N, H, W, C), flow: (N, H, W, 2)."""
    N, H, W, C = x.shape
    xs = jnp.arange(W, dtype=jnp.float32)[None, None, :] + flow[..., 0]
    ys = jnp.arange(H, dtype=jnp.float32)[None, :, None] + flow[..., 1]
    xs = jnp.clip(xs, 0.0, W - 1.0)
    ys = jnp.clip(ys, 0.0, H - 1.0)
    x0 = jnp.floor(xs)
    y0 = jnp.floor(ys)
    wx = (xs - x0)[..., None]
    wy = (ys - y0)[..., None]
    x0i = x0.astype(jnp.int32)
    y0i = y0.astype(jnp.int32)
    x1i = jnp.minimum(x0i + 1, W - 1)
    y1i = jnp.minimum(y0i + 1, H - 1)

    def gather(img, yi, xi):
        return img[yi, xi]

    g = jax.vmap(gather)
    v00 = g(x, y0i, x0i)
    v01 = g(x, y0i, x1i)
    v10 = g(x, y1i, x0i)
    v11 = g(x, y1i, x1i)
    return (v00 * (1 - wx) * (1 - wy) + v01 * wx * (1 - wy)
            + v10 * (1 - wx) * wy + v11 * wx * wy)


# ---------------------------------------------------------------------------
# Parameters (deterministic synthetic init; PReLU alpha = PyTorch default 0.25)
# ---------------------------------------------------------------------------
def init_params(key):
    dims = [(3, C_BASE), (C_BASE, 2 * C_BASE),
            (2 * C_BASE, 4 * C_BASE), (4 * C_BASE, 8 * C_BASE)]
    params = []
    for cin, cout in dims:
        block = []
        for ci, co in [(cin, cout), (cout, cout)]:   # conv1 (s=2), conv2 (s=1)
            key, k1, k2 = jax.random.split(key, 3)
            w = jax.random.normal(k1, (3, 3, ci, co), jnp.float32) / jnp.sqrt(9.0 * ci)
            b = jax.random.normal(k2, (co,), jnp.float32) * 0.01
            a = jnp.full((co,), 0.25, jnp.float32)
            block.append((w, b, a))
        params.append(block)
    return params


# ---------------------------------------------------------------------------
# Contextnet forward (Pallas) and an f32 XLA reference for sanity checking
# ---------------------------------------------------------------------------
def contextnet_forward(params, x_nchw, flow_nchw):
    x = jnp.transpose(x_nchw, (0, 2, 3, 1)).astype(jnp.float32)
    flow = jnp.transpose(flow_nchw, (0, 2, 3, 1)).astype(jnp.float32)
    acts = contextnet_features_nhwc(params, x)      # one fused pallas_call
    feats = []
    for a in acts:
        flow = downsample_flow_half(flow)
        feats.append(warp_bilinear_border(a, flow))
    return [jnp.transpose(f, (0, 3, 1, 2)) for f in feats]


def _conv_prelu_ref(x, w, b, a, stride):
    y = lax.conv_general_dilated(
        x, w, window_strides=(stride, stride), padding=((1, 1), (1, 1)),
        dimension_numbers=('NHWC', 'HWIO', 'NHWC'))
    y = y + b
    return jnp.where(y >= 0.0, y, y * a)


def contextnet_forward_ref(params, x_nchw, flow_nchw):
    x = jnp.transpose(x_nchw, (0, 2, 3, 1)).astype(jnp.float32)
    flow = jnp.transpose(flow_nchw, (0, 2, 3, 1)).astype(jnp.float32)
    feats = []
    for (w1, b1, a1), (w2, b2, a2) in params:
        x = _conv_prelu_ref(x, w1, b1, a1, 2)
        x = _conv_prelu_ref(x, w2, b2, a2, 1)
        flow = downsample_flow_half(flow)
        feats.append(warp_bilinear_border(x, flow))
    return [jnp.transpose(f, (0, 3, 1, 2)) for f in feats]


if __name__ == "__main__":
    key = jax.random.PRNGKey(0)
    kp, kx, kf = jax.random.split(key, 3)
    params = init_params(kp)

    x = jax.random.normal(kx, (2, 3, 16, 16), jnp.float32)           # NCHW image
    flow = jax.random.normal(kf, (2, 2, 16, 16), jnp.float32) * 2.0  # NCHW flow

    fwd = jax.jit(contextnet_forward)
    feats = fwd(params, x, flow)
    jax.block_until_ready(feats)

    f1, f2, f3, f4 = feats
    assert f1.shape == (2, 16, 8, 8)
    assert f2.shape == (2, 32, 4, 4)
    assert f3.shape == (2, 64, 2, 2)
    assert f4.shape == (2, 128, 1, 1)

    # Numerical sanity vs. an f32 XLA reference (bf16 MXU inputs -> loose tol).
    ref = jax.jit(contextnet_forward_ref)(params, x, flow)
    jax.block_until_ready(ref)
    for got, want in zip(feats, ref):
        err = float(jnp.max(jnp.abs(got - want)))
        scale = float(jnp.max(jnp.abs(want)))
        assert err <= 0.08 * scale + 0.08, (err, scale)

    print("KERNEL_OK")
</pallas_src>

<mosaic_0001>
module attributes {stable_mosaic.version = 11 : i64} {
  func.func @_contextnet_kernel(%arg0: i32, %arg1: memref<1x64x128xbf16, #tpu.memory_space<vmem>>, %arg2: memref<128x128xbf16, #tpu.memory_space<vmem>>, %arg3: memref<7x9x128x128xbf16, #tpu.memory_space<vmem>>, %arg4: memref<8x128xf32, #tpu.memory_space<vmem>>, %arg5: memref<8x128xf32, #tpu.memory_space<vmem>>, %arg6: memref<1x64x128xf32, #tpu.memory_space<vmem>>, %arg7: memref<1x16x128xf32, #tpu.memory_space<vmem>>, %arg8: memref<1x8x128xf32, #tpu.memory_space<vmem>>, %arg9: memref<1x8x128xf32, #tpu.memory_space<vmem>>, %arg10: memref<96x128xf32, #tpu.memory_space<vmem>>, %arg11: memref<96x128xf32, #tpu.memory_space<vmem>>, %arg12: memref<32x128xf32, #tpu.memory_space<vmem>>, %arg13: memref<40x128xf32, #tpu.memory_space<vmem>>, %arg14: memref<24x128xf32, #tpu.memory_space<vmem>>, %arg15: memref<32x128xf32, #tpu.memory_space<vmem>>, %arg16: memref<24x128xf32, #tpu.memory_space<vmem>>) attributes {dimension_semantics = [#tpu.dimension_semantics<parallel>], iteration_bounds = array<i64: 2>, scalar_prefetch = 0 : i64, scratch_operands = 7 : i64, tpu.core_type = #tpu.core_type<tc>, window_params = [{transform_indices = @transform_0, window_bounds = array<i64: 1, 64, 128>}, {pipeline_mode = #tpu.pipeline_mode<synchronous>, transform_indices = @transform_1, window_bounds = array<i64: 128, 128>}, {pipeline_mode = #tpu.pipeline_mode<synchronous>, transform_indices = @transform_2, window_bounds = array<i64: 7, 9, 128, 128>}, {pipeline_mode = #tpu.pipeline_mode<synchronous>, transform_indices = @transform_3, window_bounds = array<i64: 8, 128>}, {pipeline_mode = #tpu.pipeline_mode<synchronous>, transform_indices = @transform_4, window_bounds = array<i64: 8, 128>}, {transform_indices = @transform_5, window_bounds = array<i64: 1, 64, 128>}, {transform_indices = @transform_6, window_bounds = array<i64: 1, 16, 128>}, {transform_indices = @transform_7, window_bounds = array<i64: 1, 8, 128>}, {transform_indices = @transform_8, window_bounds = array<i64: 1, 8, 128>}]} {
    %cst = arith.constant 0.000000e+00 : f32
    %0 = vector.broadcast %cst : f32 to vector<16x128xf32>
    %c0 = arith.constant 0 : index
    %c0_0 = arith.constant 0 : index
    %1 = vector.load %arg10[%c0, %c0_0] : memref<96x128xf32, #tpu.memory_space<vmem>>, vector<16x128xf32>
    tpu.vector_store %arg10[%c0, %c0_0], %0 {strides = array<i32>} : memref<96x128xf32, #tpu.memory_space<vmem>>, vector<16x128xf32>,
    %cst_1 = arith.constant 0.000000e+00 : f32
    %2 = vector.broadcast %cst_1 : f32 to vector<16x128xf32>
    %c80 = arith.constant 80 : index
    %c0_2 = arith.constant 0 : index
    %3 = vector.load %arg10[%c80, %c0_2] : memref<96x128xf32, #tpu.memory_space<vmem>>, vector<16x128xf32>
    tpu.vector_store %arg10[%c80, %c0_2], %2 {strides = array<i32>} : memref<96x128xf32, #tpu.memory_space<vmem>>, vector<16x128xf32>,
    %cst_3 = arith.constant 0.000000e+00 : f32
    %4 = vector.broadcast %cst_3 : f32 to vector<8x128xf32>
    %c0_4 = arith.constant 0 : index
    %c0_5 = arith.constant 0 : index
    %5 = vector.load %arg12[%c0_4, %c0_5] : memref<32x128xf32, #tpu.memory_space<vmem>>, vector<8x128xf32>
    tpu.vector_store %arg12[%c0_4, %c0_5], %4 {strides = array<i32>} : memref<32x128xf32, #tpu.memory_space<vmem>>, vector<8x128xf32>,
    %cst_6 = arith.constant 0.000000e+00 : f32
    %6 = vector.broadcast %cst_6 : f32 to vector<8x128xf32>
    %c24 = arith.constant 24 : index
    %c0_7 = arith.constant 0 : index
    %7 = vector.load %arg12[%c24, %c0_7] : memref<32x128xf32, #tpu.memory_space<vmem>>, vector<8x128xf32>
    tpu.vector_store %arg12[%c24, %c0_7], %6 {strides = array<i32>} : memref<32x128xf32, #tpu.memory_space<vmem>>, vector<8x128xf32>,
    %cst_8 = arith.constant 0.000000e+00 : f32
    %8 = vector.broadcast %cst_8 : f32 to vector<16x128xf32>
    %c0_9 = arith.constant 0 : index
    %c0_10 = arith.constant 0 : index
    %9 = vector.load %arg11[%c0_9, %c0_10] : memref<96x128xf32, #tpu.memory_space<vmem>>, vector<16x128xf32>
    tpu.vector_store %arg11[%c0_9, %c0_10], %8 {strides = array<i32>} : memref<96x128xf32, #tpu.memory_space<vmem>>, vector<16x128xf32>,
    %cst_11 = arith.constant 0.000000e+00 : f32
    %10 = vector.broadcast %cst_11 : f32 to vector<16x128xf32>
    %c80_12 = arith.constant 80 : index
    %c0_13 = arith.constant 0 : index
    %11 = vector.load %arg11[%c80_12, %c0_13] : memref<96x128xf32, #tpu.memory_space<vmem>>, vector<16x128xf32>
    tpu.vector_store %arg11[%c80_12, %c0_13], %10 {strides = array<i32>} : memref<96x128xf32, #tpu.memory_space<vmem>>, vector<16x128xf32>,
    %cst_14 = arith.constant 0.000000e+00 : f32
    %12 = vector.broadcast %cst_14 : f32 to vector<8x128xf32>
    %c0_15 = arith.constant 0 : index
    %c0_16 = arith.constant 0 : index
    %13 = vector.load %arg14[%c0_15, %c0_16] : memref<24x128xf32, #tpu.memory_space<vmem>>, vector<8x128xf32>
    tpu.vector_store %arg14[%c0_15, %c0_16], %12 {strides = array<i32>} : memref<24x128xf32, #tpu.memory_space<vmem>>, vector<8x128xf32>,
    %cst_17 = arith.constant 0.000000e+00 : f32
    %14 = vector.broadcast %cst_17 : f32 to vector<12x128xf32>
    %c12 = arith.constant 12 : index
    %c0_18 = arith.constant 0 : index
    %15 = vector.load %arg14[%c12, %c0_18] : memref<24x128xf32, #tpu.memory_space<vmem>>, vector<12x128xf32>
    tpu.vector_store %arg14[%c12, %c0_18], %14 {strides = array<i32>} : memref<24x128xf32, #tpu.memory_space<vmem>>, vector<12x128xf32>,
    %cst_19 = arith.constant 0.000000e+00 : f32
    %16 = vector.broadcast %cst_19 : f32 to vector<8x128xf32>
    %c0_20 = arith.constant 0 : index
    %c0_21 = arith.constant 0 : index
    %17 = vector.load %arg13[%c0_20, %c0_21] : memref<40x128xf32, #tpu.memory_space<vmem>>, vector<8x128xf32>
    tpu.vector_store %arg13[%c0_20, %c0_21], %16 {strides = array<i32>} : memref<40x128xf32, #tpu.memory_space<vmem>>, vector<8x128xf32>,
    %cst_22 = arith.constant 0.000000e+00 : f32
    %18 = vector.broadcast %cst_22 : f32 to vector<16x128xf32>
    %c24_23 = arith.constant 24 : index
    %c0_24 = arith.constant 0 : index
    %19 = vector.load %arg13[%c24_23, %c0_24] : memref<40x128xf32, #tpu.memory_space<vmem>>, vector<16x128xf32>
    tpu.vector_store %arg13[%c24_23, %c0_24], %18 {strides = array<i32>} : memref<40x128xf32, #tpu.memory_space<vmem>>, vector<16x128xf32>,
    %cst_25 = arith.constant 0.000000e+00 : f32
    %20 = vector.broadcast %cst_25 : f32 to vector<8x128xf32>
    %c0_26 = arith.constant 0 : index
    %c0_27 = arith.constant 0 : index
    %21 = vector.load %arg16[%c0_26, %c0_27] : memref<24x128xf32, #tpu.memory_space<vmem>>, vector<8x128xf32>
    tpu.vector_store %arg16[%c0_26, %c0_27], %20 {strides = array<i32>} : memref<24x128xf32, #tpu.memory_space<vmem>>, vector<8x128xf32>,
    %cst_28 = arith.constant 0.000000e+00 : f32
    %22 = vector.broadcast %cst_28 : f32 to vector<15x128xf32>
    %c9 = arith.constant 9 : index
    %c0_29 = arith.constant 0 : index
    %23 = vector.load %arg16[%c9, %c0_29] : memref<24x128xf32, #tpu.memory_space<vmem>>, vector<15x128xf32>
    tpu.vector_store %arg16[%c9, %c0_29], %22 {strides = array<i32>} : memref<24x128xf32, #tpu.memory_space<vmem>>, vector<15x128xf32>,
    %cst_30 = arith.constant 0.000000e+00 : f32
    %24 = vector.broadcast %cst_30 : f32 to vector<8x128xf32>
    %c0_31 = arith.constant 0 : index
    %c0_32 = arith.constant 0 : index
    %25 = vector.load %arg15[%c0_31, %c0_32] : memref<32x128xf32, #tpu.memory_space<vmem>>, vector<8x128xf32>
    tpu.vector_store %arg15[%c0_31, %c0_32], %24 {strides = array<i32>} : memref<32x128xf32, #tpu.memory_space<vmem>>, vector<8x128xf32>,
    %cst_33 = arith.constant 0.000000e+00 : f32
    %26 = vector.broadcast %cst_33 : f32 to vector<16x128xf32>
    %c16 = arith.constant 16 : index
    %c0_34 = arith.constant 0 : index
    %27 = vector.load %arg15[%c16, %c0_34] : memref<32x128xf32, #tpu.memory_space<vmem>>, vector<16x128xf32>
    tpu.vector_store %arg15[%c16, %c0_34], %26 {strides = array<i32>} : memref<32x128xf32, #tpu.memory_space<vmem>>, vector<16x128xf32>,
    %28 = tpu.iota {dimensions = array<i32: 0>} : vector<8x1xi32>
    %c0_i32 = arith.constant 0 : i32
    %29 = vector.broadcast %c0_i32 : i32 to vector<8x1xi32>
    %30 = arith.cmpi ne, %28, %29 : vector<8x1xi32>
    %31 = arith.extui %30 : vector<8x1xi1> to vector<8x1xi32>
    %32 = arith.sitofp %31 : vector<8x1xi32> to vector<8x1xf32>
    %c0_35 = arith.constant 0 : index
    %c0_36 = arith.constant 0 : index
    %33 = vector.load %arg4[%c0_35, %c0_36] : memref<8x128xf32, #tpu.memory_space<vmem>>, vector<1x128xf32>
    %c0_37 = arith.constant 0 : index
    %c0_38 = arith.constant 0 : index
    %34 = vector.load %arg5[%c0_37, %c0_38] : memref<8x128xf32, #tpu.memory_space<vmem>>, vector<1x128xf32>
    %c1 = arith.constant 1 : index
    %c0_39 = arith.constant 0 : index
    %35 = vector.load %arg4[%c1, %c0_39] : memref<8x128xf32, #tpu.memory_space<vmem>>, vector<1x128xf32>
    %c1_40 = arith.constant 1 : index
    %c0_41 = arith.constant 0 : index
    %36 = vector.load %arg5[%c1_40, %c0_41] : memref<8x128xf32, #tpu.memory_space<vmem>>, vector<1x128xf32>
    %c0_42 = arith.constant 0 : index
    %c0_43 = arith.constant 0 : index
    %c0_44 = arith.constant 0 : index
    %37 = vector.load %arg1[%c0_42, %c0_43, %c0_44] : memref<1x64x128xbf16, #tpu.memory_space<vmem>>, vector<1x64x128xbf16>
    %38 = vector.shape_cast %37 : vector<1x64x128xbf16> to vector<64x128xbf16>
    %c0_45 = arith.constant 0 : index
    %c0_46 = arith.constant 0 : index
    %39 = vector.load %arg2[%c0_45, %c0_46] : memref<128x128xbf16, #tpu.memory_space<vmem>>, vector<128x128xbf16>
    %cst_47 = arith.constant dense<0.000000e+00> : vector<64x128xf32>
    %40 = tpu.matmul %38, %39, %cst_47 {dimension_numbers = #tpu.dot_dimension_numbers<[1], [0], [0], [1], [0, 0, 1, 1], [], []>} : vector<64x128xbf16>, vector<128x128xbf16>, vector<64x128xf32> -> vector<64x128xf32>
    %41 = vector.broadcast %33 : vector<1x128xf32> to vector<64x128xf32>
    %42 = arith.addf %40, %41 : vector<64x128xf32>
    %cst_48 = arith.constant 0.000000e+00 : f32
    %43 = vector.broadcast %cst_48 : f32 to vector<64x128xf32>
    %44 = arith.cmpf oge, %42, %43 : vector<64x128xf32>
    %45 = vector.broadcast %34 : vector<1x128xf32> to vector<64x128xf32>
    %46 = arith.mulf %42, %45 : vector<64x128xf32>
    %47 = arith.select %44, %42, %46 : vector<64x128xi1>, vector<64x128xf32>
    %c16_49 = arith.constant 16 : index
    %c0_50 = arith.constant 0 : index
    %48 = vector.load %arg10[%c16_49, %c0_50] : memref<96x128xf32, #tpu.memory_space<vmem>>, vector<64x128xf32>
    tpu.vector_store %arg10[%c16_49, %c0_50], %47 {strides = array<i32>} : memref<96x128xf32, #tpu.memory_space<vmem>>, vector<64x128xf32>,
    %49 = tpu.iota {dimensions = array<i32: 0>} : vector<64x1xi32>
    %c8_i32 = arith.constant 8 : i32
    %c0_i32_51 = arith.constant 0 : i32
    %50 = arith.cmpi eq, %c8_i32, %c0_i32_51 : i32
    %c1_i32 = arith.constant 1 : i32
    %51 = arith.select %50, %c1_i32, %c8_i32 : i32
    %52 = vector.broadcast %51 : i32 to vector<64x1xi32>
    %53 = arith.remsi %49, %52 : vector<64x1xi32>
    %c0_i32_52 = arith.constant 0 : i32
    %54 = vector.broadcast %c0_i32_52 : i32 to vector<64x1xi32>
    %55 = arith.cmpi ne, %53, %54 : vector<64x1xi32>
    %c0_i32_53 = arith.constant 0 : i32
    %56 = vector.broadcast %c0_i32_53 : i32 to vector<64x1xi32>
    %57 = arith.cmpi slt, %53, %56 : vector<64x1xi32>
    %c0_i32_54 = arith.constant 0 : i32
    %58 = arith.cmpi slt, %51, %c0_i32_54 : i32
    %59 = vector.broadcast %58 : i1 to vector<64x1xi1>
    %60 = vector.broadcast %59 : vector<64x1xi1> to vector<64x1xi1>
    %61 = arith.xori %57, %60 : vector<64x1xi1>
    %62 = arith.andi %61, %55 : vector<64x1xi1>
    %63 = vector.broadcast %51 : i32 to vector<64x1xi32>
    %64 = arith.addi %53, %63 : vector<64x1xi32>
    %65 = arith.select %62, %64, %53 : vector<64x1xi1>, vector<64x1xi32>
    %c0_i32_55 = arith.constant 0 : i32
    %66 = vector.broadcast %c0_i32_55 : i32 to vector<64x1xi32>
    %67 = arith.cmpi ne, %65, %66 : vector<64x1xi32>
    %c7_i32 = arith.constant 7 : i32
    %68 = vector.broadcast %c7_i32 : i32 to vector<64x1xi32>
    %69 = arith.cmpi ne, %65, %68 : vector<64x1xi32>
    %cst_56 = arith.constant 0.000000e+00 : f32
    %70 = vector.broadcast %cst_56 : f32 to vector<64x128xf32>
    %c7 = arith.constant 7 : index
    %c0_57 = arith.constant 0 : index
    %71 = vector.load %arg10[%c7, %c0_57] : memref<96x128xf32, #tpu.memory_space<vmem>>, vector<64x128xf32>
    %cst_58 = arith.constant 0.000000e+00 : f32
    %72 = vector.shape_cast %67 : vector<64x1xi1> to vector<64x1xi1>
    %73 = vector.broadcast %72 : vector<64x1xi1> to vector<64x128xi1>
    %74 = vector.broadcast %cst_58 : f32 to vector<64x128xf32>
    %75 = arith.select %73, %71, %74 : vector<64x128xi1>, vector<64x128xf32>
    %76 = arith.truncf %75 : vector<64x128xf32> to vector<64x128xbf16>
    %c0_59 = arith.constant 0 : index
    %c0_60 = arith.constant 0 : index
    %c0_61 = arith.constant 0 : index
    %c0_62 = arith.constant 0 : index
    %77 = vector.load %arg3[%c0_59, %c0_60, %c0_61, %c0_62] : memref<7x9x128x128xbf16, #tpu.memory_space<vmem>>, vector<1x1x128x128xbf16>
    %78 = vector.shape_cast %77 : vector<1x1x128x128xbf16> to vector<128x128xbf16>
    %cst_63 = arith.constant dense<0.000000e+00> : vector<64x128xf32>
    %79 = tpu.matmul %76, %78, %cst_63 {dimension_numbers = #tpu.dot_dimension_numbers<[1], [0], [0], [1], [0, 0, 1, 1], [], []>} : vector<64x128xbf16>, vector<128x128xbf16>, vector<64x128xf32> -> vector<64x128xf32>
    %80 = arith.addf %70, %79 : vector<64x128xf32>
    %c8 = arith.constant 8 : index
    %c0_64 = arith.constant 0 : index
    %81 = vector.load %arg10[%c8, %c0_64] : memref<96x128xf32, #tpu.memory_space<vmem>>, vector<64x128xf32>
    %82 = arith.truncf %81 : vector<64x128xf32> to vector<64x128xbf16>
    %c0_65 = arith.constant 0 : index
    %c1_66 = arith.constant 1 : index
    %c0_67 = arith.constant 0 : index
    %c0_68 = arith.constant 0 : index
    %83 = vector.load %arg3[%c0_65, %c1_66, %c0_67, %c0_68] : memref<7x9x128x128xbf16, #tpu.memory_space<vmem>>, vector<1x1x128x128xbf16>
    %84 = vector.shape_cast %83 : vector<1x1x128x128xbf16> to vector<128x128xbf16>
    %cst_69 = arith.constant dense<0.000000e+00> : vector<64x128xf32>
    %85 = tpu.matmul %82, %84, %cst_69 {dimension_numbers = #tpu.dot_dimension_numbers<[1], [0], [0], [1], [0, 0, 1, 1], [], []>} : vector<64x128xbf16>, vector<128x128xbf16>, vector<64x128xf32> -> vector<64x128xf32>
    %86 = arith.addf %80, %85 : vector<64x128xf32>
    %c9_70 = arith.constant 9 : index
    %c0_71 = arith.constant 0 : index
    %87 = vector.load %arg10[%c9_70, %c0_71] : memref<96x128xf32, #tpu.memory_space<vmem>>, vector<64x128xf32>
    %cst_72 = arith.constant 0.000000e+00 : f32
    %88 = vector.shape_cast %69 : vector<64x1xi1> to vector<64x1xi1>
    %89 = vector.broadcast %88 : vector<64x1xi1> to vector<64x128xi1>
    %90 = vector.broadcast %cst_72 : f32 to vector<64x128xf32>
    %91 = arith.select %89, %87, %90 : vector<64x128xi1>, vector<64x128xf32>
    %92 = arith.truncf %91 : vector<64x128xf32> to vector<64x128xbf16>
    %c0_73 = arith.constant 0 : index
    %c2 = arith.constant 2 : index
    %c0_74 = arith.constant 0 : index
    %c0_75 = arith.constant 0 : index
    %93 = vector.load %arg3[%c0_73, %c2, %c0_74, %c0_75] : memref<7x9x128x128xbf16, #tpu.memory_space<vmem>>, vector<1x1x128x128xbf16>
    %94 = vector.shape_cast %93 : vector<1x1x128x128xbf16> to vector<128x128xbf16>
    %cst_76 = arith.constant dense<0.000000e+00> : vector<64x128xf32>
    %95 = tpu.matmul %92, %94, %cst_76 {dimension_numbers = #tpu.dot_dimension_numbers<[1], [0], [0], [1], [0, 0, 1, 1], [], []>} : vector<64x128xbf16>, vector<128x128xbf16>, vector<64x128xf32> -> vector<64x128xf32>
    %96 = arith.addf %86, %95 : vector<64x128xf32>
    %c15 = arith.constant 15 : index
    %c0_77 = arith.constant 0 : index
    %97 = vector.load %arg10[%c15, %c0_77] : memref<96x128xf32, #tpu.memory_space<vmem>>, vector<64x128xf32>
    %cst_78 = arith.constant 0.000000e+00 : f32
    %98 = vector.shape_cast %67 : vector<64x1xi1> to vector<64x1xi1>
    %99 = vector.broadcast %98 : vector<64x1xi1> to vector<64x128xi1>
    %100 = vector.broadcast %cst_78 : f32 to vector<64x128xf32>
    %101 = arith.select %99, %97, %100 : vector<64x128xi1>, vector<64x128xf32>
    %102 = arith.truncf %101 : vector<64x128xf32> to vector<64x128xbf16>
    %c0_79 = arith.constant 0 : index
    %c3 = arith.constant 3 : index
    %c0_80 = arith.constant 0 : index
    %c0_81 = arith.constant 0 : index
    %103 = vector.load %arg3[%c0_79, %c3, %c0_80, %c0_81] : memref<7x9x128x128xbf16, #tpu.memory_space<vmem>>, vector<1x1x128x128xbf16>
    %104 = vector.shape_cast %103 : vector<1x1x128x128xbf16> to vector<128x128xbf16>
    %cst_82 = arith.constant dense<0.000000e+00> : vector<64x128xf32>
    %105 = tpu.matmul %102, %104, %cst_82 {dimension_numbers = #tpu.dot_dimension_numbers<[1], [0], [0], [1], [0, 0, 1, 1], [], []>} : vector<64x128xbf16>, vector<128x128xbf16>, vector<64x128xf32> -> vector<64x128xf32>
    %106 = arith.addf %96, %105 : vector<64x128xf32>
    %c16_83 = arith.constant 16 : index
    %c0_84 = arith.constant 0 : index
    %107 = vector.load %arg10[%c16_83, %c0_84] : memref<96x128xf32, #tpu.memory_space<vmem>>, vector<64x128xf32>
    %108 = arith.truncf %107 : vector<64x128xf32> to vector<64x128xbf16>
    %c0_85 = arith.constant 0 : index
    %c4 = arith.constant 4 : index
    %c0_86 = arith.constant 0 : index
    %c0_87 = arith.constant 0 : index
    %109 = vector.load %arg3[%c0_85, %c4, %c0_86, %c0_87] : memref<7x9x128x128xbf16, #tpu.memory_space<vmem>>, vector<1x1x128x128xbf16>
    %110 = vector.shape_cast %109 : vector<1x1x128x128xbf16> to vector<128x128xbf16>
    %cst_88 = arith.constant dense<0.000000e+00> : vector<64x128xf32>
    %111 = tpu.matmul %108, %110, %cst_88 {dimension_numbers = #tpu.dot_dimension_numbers<[1], [0], [0], [1], [0, 0, 1, 1], [], []>} : vector<64x128xbf16>, vector<128x128xbf16>, vector<64x128xf32> -> vector<64x128xf32>
    %112 = arith.addf %106, %111 : vector<64x128xf32>
    %c17 = arith.constant 17 : index
    %c0_89 = arith.constant 0 : index
    %113 = vector.load %arg10[%c17, %c0_89] : memref<96x128xf32, #tpu.memory_space<vmem>>, vector<64x128xf32>
    %cst_90 = arith.constant 0.000000e+00 : f32
    %114 = vector.shape_cast %69 : vector<64x1xi1> to vector<64x1xi1>
    %115 = vector.broadcast %114 : vector<64x1xi1> to vector<64x128xi1>
    %116 = vector.broadcast %cst_90 : f32 to vector<64x128xf32>
    %117 = arith.select %115, %113, %116 : vector<64x128xi1>, vector<64x128xf32>
    %118 = arith.truncf %117 : vector<64x128xf32> to vector<64x128xbf16>
    %c0_91 = arith.constant 0 : index
    %c5 = arith.constant 5 : index
    %c0_92 = arith.constant 0 : index
    %c0_93 = arith.constant 0 : index
    %119 = vector.load %arg3[%c0_91, %c5, %c0_92, %c0_93] : memref<7x9x128x128xbf16, #tpu.memory_space<vmem>>, vector<1x1x128x128xbf16>
    %120 = vector.shape_cast %119 : vector<1x1x128x128xbf16> to vector<128x128xbf16>
    %cst_94 = arith.constant dense<0.000000e+00> : vector<64x128xf32>
    %121 = tpu.matmul %118, %120, %cst_94 {dimension_numbers = #tpu.dot_dimension_numbers<[1], [0], [0], [1], [0, 0, 1, 1], [], []>} : vector<64x128xbf16>, vector<128x128xbf16>, vector<64x128xf32> -> vector<64x128xf32>
    %122 = arith.addf %112, %121 : vector<64x128xf32>
    %c23 = arith.constant 23 : index
    %c0_95 = arith.constant 0 : index
    %123 = vector.load %arg10[%c23, %c0_95] : memref<96x128xf32, #tpu.memory_space<vmem>>, vector<64x128xf32>
    %cst_96 = arith.constant 0.000000e+00 : f32
    %124 = vector.shape_cast %67 : vector<64x1xi1> to vector<64x1xi1>
    %125 = vector.broadcast %124 : vector<64x1xi1> to vector<64x128xi1>
    %126 = vector.broadcast %cst_96 : f32 to vector<64x128xf32>
    %127 = arith.select %125, %123, %126 : vector<64x128xi1>, vector<64x128xf32>
    %128 = arith.truncf %127 : vector<64x128xf32> to vector<64x128xbf16>
    %c0_97 = arith.constant 0 : index
    %c6 = arith.constant 6 : index
    %c0_98 = arith.constant 0 : index
    %c0_99 = arith.constant 0 : index
    %129 = vector.load %arg3[%c0_97, %c6, %c0_98, %c0_99] : memref<7x9x128x128xbf16, #tpu.memory_space<vmem>>, vector<1x1x128x128xbf16>
    %130 = vector.shape_cast %129 : vector<1x1x128x128xbf16> to vector<128x128xbf16>
    %cst_100 = arith.constant dense<0.000000e+00> : vector<64x128xf32>
    %131 = tpu.matmul %128, %130, %cst_100 {dimension_numbers = #tpu.dot_dimension_numbers<[1], [0], [0], [1], [0, 0, 1, 1], [], []>} : vector<64x128xbf16>, vector<128x128xbf16>, vector<64x128xf32> -> vector<64x128xf32>
    %132 = arith.addf %122, %131 : vector<64x128xf32>
    %c24_101 = arith.constant 24 : index
    %c0_102 = arith.constant 0 : index
    %133 = vector.load %arg10[%c24_101, %c0_102] : memref<96x128xf32, #tpu.memory_space<vmem>>, vector<64x128xf32>
    %134 = arith.truncf %133 : vector<64x128xf32> to vector<64x128xbf16>
    %c0_103 = arith.constant 0 : index
    %c7_104 = arith.constant 7 : index
    %c0_105 = arith.constant 0 : index
    %c0_106 = arith.constant 0 : index
    %135 = vector.load %arg3[%c0_103, %c7_104, %c0_105, %c0_106] : memref<7x9x128x128xbf16, #tpu.memory_space<vmem>>, vector<1x1x128x128xbf16>
    %136 = vector.shape_cast %135 : vector<1x1x128x128xbf16> to vector<128x128xbf16>
    %cst_107 = arith.constant dense<0.000000e+00> : vector<64x128xf32>
    %137 = tpu.matmul %134, %136, %cst_107 {dimension_numbers = #tpu.dot_dimension_numbers<[1], [0], [0], [1], [0, 0, 1, 1], [], []>} : vector<64x128xbf16>, vector<128x128xbf16>, vector<64x128xf32> -> vector<64x128xf32>
    %138 = arith.addf %132, %137 : vector<64x128xf32>
    %c25 = arith.constant 25 : index
    %c0_108 = arith.constant 0 : index
    %139 = vector.load %arg10[%c25, %c0_108] : memref<96x128xf32, #tpu.memory_space<vmem>>, vector<64x128xf32>
    %cst_109 = arith.constant 0.000000e+00 : f32
    %140 = vector.shape_cast %69 : vector<64x1xi1> to vector<64x1xi1>
    %141 = vector.broadcast %140 : vector<64x1xi1> to vector<64x128xi1>
    %142 = vector.broadcast %cst_109 : f32 to vector<64x128xf32>
    %143 = arith.select %141, %139, %142 : vector<64x128xi1>, vector<64x128xf32>
    %144 = arith.truncf %143 : vector<64x128xf32> to vector<64x128xbf16>
    %c0_110 = arith.constant 0 : index
    %c8_111 = arith.constant 8 : index
    %c0_112 = arith.constant 0 : index
    %c0_113 = arith.constant 0 : index
    %145 = vector.load %arg3[%c0_110, %c8_111, %c0_112, %c0_113] : memref<7x9x128x128xbf16, #tpu.memory_space<vmem>>, vector<1x1x128x128xbf16>
    %146 = vector.shape_cast %145 : vector<1x1x128x128xbf16> to vector<128x128xbf16>
    %cst_114 = arith.constant dense<0.000000e+00> : vector<64x128xf32>
    %147 = tpu.matmul %144, %146, %cst_114 {dimension_numbers = #tpu.dot_dimension_numbers<[1], [0], [0], [1], [0, 0, 1, 1], [], []>} : vector<64x128xbf16>, vector<128x128xbf16>, vector<64x128xf32> -> vector<64x128xf32>
    %148 = arith.addf %138, %147 : vector<64x128xf32>
    %149 = vector.broadcast %35 : vector<1x128xf32> to vector<64x128xf32>
    %150 = arith.addf %148, %149 : vector<64x128xf32>
    %cst_115 = arith.constant 0.000000e+00 : f32
    %151 = vector.broadcast %cst_115 : f32 to vector<64x128xf32>
    %152 = arith.cmpf oge, %150, %151 : vector<64x128xf32>
    %153 = vector.broadcast %36 : vector<1x128xf32> to vector<64x128xf32>
    %154 = arith.mulf %150, %153 : vector<64x128xf32>
    %155 = arith.select %152, %150, %154 : vector<64x128xi1>, vector<64x128xf32>
    %c0_116 = arith.constant 0 : index
    %c0_117 = arith.constant 0 : index
    %c0_118 = arith.constant 0 : index
    %156 = vector.load %arg6[%c0_116, %c0_117, %c0_118] : memref<1x64x128xf32, #tpu.memory_space<vmem>>, vector<1x64x128xf32>
    %157 = vector.shape_cast %156 : vector<1x64x128xf32> to vector<64x128xf32>
    %158 = vector.shape_cast %155 : vector<64x128xf32> to vector<1x64x128xf32>
    tpu.vector_store %arg6[%c0_116, %c0_117, %c0_118], %158 {strides = array<i32>} : memref<1x64x128xf32, #tpu.memory_space<vmem>>, vector<1x64x128xf32>,
    %c16_119 = arith.constant 16 : index
    %c0_120 = arith.constant 0 : index
    %159 = vector.load %arg11[%c16_119, %c0_120] : memref<96x128xf32, #tpu.memory_space<vmem>>, vector<64x128xf32>
    tpu.vector_store %arg11[%c16_119, %c0_120], %155 {strides = array<i32>} : memref<96x128xf32, #tpu.memory_space<vmem>>, vector<64x128xf32>,
    %c2_121 = arith.constant 2 : index
    %c0_122 = arith.constant 0 : index
    %160 = vector.load %arg4[%c2_121, %c0_122] : memref<8x128xf32, #tpu.memory_space<vmem>>, vector<1x128xf32>
    %c2_123 = arith.constant 2 : index
    %c0_124 = arith.constant 0 : index
    %161 = vector.load %arg5[%c2_123, %c0_124] : memref<8x128xf32, #tpu.memory_space<vmem>>, vector<1x128xf32>
    %c3_125 = arith.constant 3 : index
    %c0_126 = arith.constant 0 : index
    %162 = vector.load %arg4[%c3_125, %c0_126] : memref<8x128xf32, #tpu.memory_space<vmem>>, vector<1x128xf32>
    %c3_127 = arith.constant 3 : index
    %c0_128 = arith.constant 0 : index
    %163 = vector.load %arg5[%c3_127, %c0_128] : memref<8x128xf32, #tpu.memory_space<vmem>>, vector<1x128xf32>
    %cst_129 = arith.constant 0.000000e+00 : f32
    %164 = vector.broadcast %cst_129 : f32 to vector<8x128xf32>
    %c7_130 = arith.constant 7 : index
    %c0_131 = arith.constant 0 : index
    %165 = tpu.strided_load %arg11[%c7_130, %c0_131] {strides = array<i32: 2, 1>} : memref<96x128xf32, #tpu.memory_space<vmem>>, vector<8x128xf32>
    %166 = vector.broadcast %32 : vector<8x1xf32> to vector<8x128xf32>
    %167 = arith.mulf %165, %166 : vector<8x128xf32>
    %168 = arith.truncf %167 : vector<8x128xf32> to vector<8x128xbf16>
    %c1_132 = arith.constant 1 : index
    %c0_133 = arith.constant 0 : index
    %c0_134 = arith.constant 0 : index
    %c0_135 = arith.constant 0 : index
    %169 = vector.load %arg3[%c1_132, %c0_133, %c0_134, %c0_135] : memref<7x9x128x128xbf16, #tpu.memory_space<vmem>>, vector<1x1x128x128xbf16>
    %170 = vector.shape_cast %169 : vector<1x1x128x128xbf16> to vector<128x128xbf16>
    %cst_136 = arith.constant dense<0.000000e+00> : vector<8x128xf32>
    %171 = tpu.matmul %168, %170, %cst_136 {dimension_numbers = #tpu.dot_dimension_numbers<[1], [0], [0], [1], [0, 0, 1, 1], [], []>} : vector<8x128xbf16>, vector<128x128xbf16>, vector<8x128xf32> -> vector<8x128xf32>
    %172 = arith.addf %164, %171 : vector<8x128xf32>
    %c8_137 = arith.constant 8 : index
    %c0_138 = arith.constant 0 : index
    %173 = tpu.strided_load %arg11[%c8_137, %c0_138] {strides = array<i32: 2, 1>} : memref<96x128xf32, #tpu.memory_space<vmem>>, vector<8x128xf32>
    %174 = arith.truncf %173 : vector<8x128xf32> to vector<8x128xbf16>
    %c1_139 = arith.constant 1 : index
    %c1_140 = arith.constant 1 : index
    %c0_141 = arith.constant 0 : index
    %c0_142 = arith.constant 0 : index
    %175 = vector.load %arg3[%c1_139, %c1_140, %c0_141, %c0_142] : memref<7x9x128x128xbf16, #tpu.memory_space<vmem>>, vector<1x1x128x128xbf16>
    %176 = vector.shape_cast %175 : vector<1x1x128x128xbf16> to vector<128x128xbf16>
    %cst_143 = arith.constant dense<0.000000e+00> : vector<8x128xf32>
    %177 = tpu.matmul %174, %176, %cst_143 {dimension_numbers = #tpu.dot_dimension_numbers<[1], [0], [0], [1], [0, 0, 1, 1], [], []>} : vector<8x128xbf16>, vector<128x128xbf16>, vector<8x128xf32> -> vector<8x128xf32>
    %178 = arith.addf %172, %177 : vector<8x128xf32>
    %c9_144 = arith.constant 9 : index
    %c0_145 = arith.constant 0 : index
    %179 = tpu.strided_load %arg11[%c9_144, %c0_145] {strides = array<i32: 2, 1>} : memref<96x128xf32, #tpu.memory_space<vmem>>, vector<8x128xf32>
    %180 = arith.truncf %179 : vector<8x128xf32> to vector<8x128xbf16>
    %c1_146 = arith.constant 1 : index
    %c2_147 = arith.constant 2 : index
    %c0_148 = arith.constant 0 : index
    %c0_149 = arith.constant 0 : index
    %181 = vector.load %arg3[%c1_146, %c2_147, %c0_148, %c0_149] : memref<7x9x128x128xbf16, #tpu.memory_space<vmem>>, vector<1x1x128x128xbf16>
    %182 = vector.shape_cast %181 : vector<1x1x128x128xbf16> to vector<128x128xbf16>
    %cst_150 = arith.constant dense<0.000000e+00> : vector<8x128xf32>
    %183 = tpu.matmul %180, %182, %cst_150 {dimension_numbers = #tpu.dot_dimension_numbers<[1], [0], [0], [1], [0, 0, 1, 1], [], []>} : vector<8x128xbf16>, vector<128x128xbf16>, vector<8x128xf32> -> vector<8x128xf32>
    %184 = arith.addf %178, %183 : vector<8x128xf32>
    %c15_151 = arith.constant 15 : index
    %c0_152 = arith.constant 0 : index
    %185 = tpu.strided_load %arg11[%c15_151, %c0_152] {strides = array<i32: 2, 1>} : memref<96x128xf32, #tpu.memory_space<vmem>>, vector<8x128xf32>
    %186 = vector.broadcast %32 : vector<8x1xf32> to vector<8x128xf32>
    %187 = arith.mulf %185, %186 : vector<8x128xf32>
    %188 = arith.truncf %187 : vector<8x128xf32> to vector<8x128xbf16>
    %c1_153 = arith.constant 1 : index
    %c3_154 = arith.constant 3 : index
    %c0_155 = arith.constant 0 : index
    %c0_156 = arith.constant 0 : index
    %189 = vector.load %arg3[%c1_153, %c3_154, %c0_155, %c0_156] : memref<7x9x128x128xbf16, #tpu.memory_space<vmem>>, vector<1x1x128x128xbf16>
    %190 = vector.shape_cast %189 : vector<1x1x128x128xbf16> to vector<128x128xbf16>
    %cst_157 = arith.constant dense<0.000000e+00> : vector<8x128xf32>
    %191 = tpu.matmul %188, %190, %cst_157 {dimension_numbers = #tpu.dot_dimension_numbers<[1], [0], [0], [1], [0, 0, 1, 1], [], []>} : vector<8x128xbf16>, vector<128x128xbf16>, vector<8x128xf32> -> vector<8x128xf32>
    %192 = arith.addf %184, %191 : vector<8x128xf32>
    %c16_158 = arith.constant 16 : index
    %c0_159 = arith.constant 0 : index
    %193 = tpu.strided_load %arg11[%c16_158, %c0_159] {strides = array<i32: 2, 1>} : memref<96x128xf32, #tpu.memory_space<vmem>>, vector<8x128xf32>
    %194 = arith.truncf %193 : vector<8x128xf32> to vector<8x128xbf16>
    %c1_160 = arith.constant 1 : index
    %c4_161 = arith.constant 4 : index
    %c0_162 = arith.constant 0 : index
    %c0_163 = arith.constant 0 : index
    %195 = vector.load %arg3[%c1_160, %c4_161, %c0_162, %c0_163] : memref<7x9x128x128xbf16, #tpu.memory_space<vmem>>, vector<1x1x128x128xbf16>
    %196 = vector.shape_cast %195 : vector<1x1x128x128xbf16> to vector<128x128xbf16>
    %cst_164 = arith.constant dense<0.000000e+00> : vector<8x128xf32>
    %197 = tpu.matmul %194, %196, %cst_164 {dimension_numbers = #tpu.dot_dimension_numbers<[1], [0], [0], [1], [0, 0, 1, 1], [], []>} : vector<8x128xbf16>, vector<128x128xbf16>, vector<8x128xf32> -> vector<8x128xf32>
    %198 = arith.addf %192, %197 : vector<8x128xf32>
    %c17_165 = arith.constant 17 : index
    %c0_166 = arith.constant 0 : index
    %199 = tpu.strided_load %arg11[%c17_165, %c0_166] {strides = array<i32: 2, 1>} : memref<96x128xf32, #tpu.memory_space<vmem>>, vector<8x128xf32>
    %200 = arith.truncf %199 : vector<8x128xf32> to vector<8x128xbf16>
    %c1_167 = arith.constant 1 : index
    %c5_168 = arith.constant 5 : index
    %c0_169 = arith.constant 0 : index
    %c0_170 = arith.constant 0 : index
    %201 = vector.load %arg3[%c1_167, %c5_168, %c0_169, %c0_170] : memref<7x9x128x128xbf16, #tpu.memory_space<vmem>>, vector<1x1x128x128xbf16>
    %202 = vector.shape_cast %201 : vector<1x1x128x128xbf16> to vector<128x128xbf16>
    %cst_171 = arith.constant dense<0.000000e+00> : vector<8x128xf32>
    %203 = tpu.matmul %200, %202, %cst_171 {dimension_numbers = #tpu.dot_dimension_numbers<[1], [0], [0], [1], [0, 0, 1, 1], [], []>} : vector<8x128xbf16>, vector<128x128xbf16>, vector<8x128xf32> -> vector<8x128xf32>
    %204 = arith.addf %198, %203 : vector<8x128xf32>
    %c23_172 = arith.constant 23 : index
    %c0_173 = arith.constant 0 : index
    %205 = tpu.strided_load %arg11[%c23_172, %c0_173] {strides = array<i32: 2, 1>} : memref<96x128xf32, #tpu.memory_space<vmem>>, vector<8x128xf32>
    %206 = vector.broadcast %32 : vector<8x1xf32> to vector<8x128xf32>
    %207 = arith.mulf %205, %206 : vector<8x128xf32>
    %208 = arith.truncf %207 : vector<8x128xf32> to vector<8x128xbf16>
    %c1_174 = arith.constant 1 : index
    %c6_175 = arith.constant 6 : index
    %c0_176 = arith.constant 0 : index
    %c0_177 = arith.constant 0 : index
    %209 = vector.load %arg3[%c1_174, %c6_175, %c0_176, %c0_177] : memref<7x9x128x128xbf16, #tpu.memory_space<vmem>>, vector<1x1x128x128xbf16>
    %210 = vector.shape_cast %209 : vector<1x1x128x128xbf16> to vector<128x128xbf16>
    %cst_178 = arith.constant dense<0.000000e+00> : vector<8x128xf32>
    %211 = tpu.matmul %208, %210, %cst_178 {dimension_numbers = #tpu.dot_dimension_numbers<[1], [0], [0], [1], [0, 0, 1, 1], [], []>} : vector<8x128xbf16>, vector<128x128xbf16>, vector<8x128xf32> -> vector<8x128xf32>
    %212 = arith.addf %204, %211 : vector<8x128xf32>
    %c24_179 = arith.constant 24 : index
    %c0_180 = arith.constant 0 : index
    %213 = tpu.strided_load %arg11[%c24_179, %c0_180] {strides = array<i32: 2, 1>} : memref<96x128xf32, #tpu.memory_space<vmem>>, vector<8x128xf32>
    %214 = arith.truncf %213 : vector<8x128xf32> to vector<8x128xbf16>
    %c1_181 = arith.constant 1 : index
    %c7_182 = arith.constant 7 : index
    %c0_183 = arith.constant 0 : index
    %c0_184 = arith.constant 0 : index
    %215 = vector.load %arg3[%c1_181, %c7_182, %c0_183, %c0_184] : memref<7x9x128x128xbf16, #tpu.memory_space<vmem>>, vector<1x1x128x128xbf16>
    %216 = vector.shape_cast %215 : vector<1x1x128x128xbf16> to vector<128x128xbf16>
    %cst_185 = arith.constant dense<0.000000e+00> : vector<8x128xf32>
    %217 = tpu.matmul %214, %216, %cst_185 {dimension_numbers = #tpu.dot_dimension_numbers<[1], [0], [0], [1], [0, 0, 1, 1], [], []>} : vector<8x128xbf16>, vector<128x128xbf16>, vector<8x128xf32> -> vector<8x128xf32>
    %218 = arith.addf %212, %217 : vector<8x128xf32>
    %c25_186 = arith.constant 25 : index
    %c0_187 = arith.constant 0 : index
    %219 = tpu.strided_load %arg11[%c25_186, %c0_187] {strides = array<i32: 2, 1>} : memref<96x128xf32, #tpu.memory_space<vmem>>, vector<8x128xf32>
    %220 = arith.truncf %219 : vector<8x128xf32> to vector<8x128xbf16>
    %c1_188 = arith.constant 1 : index
    %c8_189 = arith.constant 8 : index
    %c0_190 = arith.constant 0 : index
    %c0_191 = arith.constant 0 : index
    %221 = vector.load %arg3[%c1_188, %c8_189, %c0_190, %c0_191] : memref<7x9x128x128xbf16, #tpu.memory_space<vmem>>, vector<1x1x128x128xbf16>
    %222 = vector.shape_cast %221 : vector<1x1x128x128xbf16> to vector<128x128xbf16>
    %cst_192 = arith.constant dense<0.000000e+00> : vector<8x128xf32>
    %223 = tpu.matmul %220, %222, %cst_192 {dimension_numbers = #tpu.dot_dimension_numbers<[1], [0], [0], [1], [0, 0, 1, 1], [], []>} : vector<8x128xbf16>, vector<128x128xbf16>, vector<8x128xf32> -> vector<8x128xf32>
    %224 = arith.addf %218, %223 : vector<8x128xf32>
    %225 = vector.broadcast %160 : vector<1x128xf32> to vector<8x128xf32>
    %226 = arith.addf %224, %225 : vector<8x128xf32>
    %cst_193 = arith.constant 0.000000e+00 : f32
    %227 = vector.broadcast %cst_193 : f32 to vector<8x128xf32>
    %228 = arith.cmpf oge, %226, %227 : vector<8x128xf32>
    %229 = vector.broadcast %161 : vector<1x128xf32> to vector<8x128xf32>
    %230 = arith.mulf %226, %229 : vector<8x128xf32>
    %231 = arith.select %228, %226, %230 : vector<8x128xi1>, vector<8x128xf32>
    %232 = vector.extract_strided_slice %231 {offsets = [0, 0], sizes = [4, 128], strides = [1, 1]} : vector<8x128xf32> to vector<4x128xf32>
    %c8_194 = arith.constant 8 : index
    %c0_195 = arith.constant 0 : index
    %233 = vector.load %arg12[%c8_194, %c0_195] : memref<32x128xf32, #tpu.memory_space<vmem>>, vector<4x128xf32>
    tpu.vector_store %arg12[%c8_194, %c0_195], %232 {strides = array<i32>} : memref<32x128xf32, #tpu.memory_space<vmem>>, vector<4x128xf32>,
    %cst_196 = arith.constant 0.000000e+00 : f32
    %234 = vector.broadcast %cst_196 : f32 to vector<8x128xf32>
    %c23_197 = arith.constant 23 : index
    %c0_198 = arith.constant 0 : index
    %235 = tpu.strided_load %arg11[%c23_197, %c0_198] {strides = array<i32: 2, 1>} : memref<96x128xf32, #tpu.memory_space<vmem>>, vector<8x128xf32>
    %236 = vector.broadcast %32 : vector<8x1xf32> to vector<8x128xf32>
    %237 = arith.mulf %235, %236 : vector<8x128xf32>
    %238 = arith.truncf %237 : vector<8x128xf32> to vector<8x128xbf16>
    %c1_199 = arith.constant 1 : index
    %c0_200 = arith.constant 0 : index
    %c0_201 = arith.constant 0 : index
    %c0_202 = arith.constant 0 : index
    %239 = vector.load %arg3[%c1_199, %c0_200, %c0_201, %c0_202] : memref<7x9x128x128xbf16, #tpu.memory_space<vmem>>, vector<1x1x128x128xbf16>
    %240 = vector.shape_cast %239 : vector<1x1x128x128xbf16> to vector<128x128xbf16>
    %cst_203 = arith.constant dense<0.000000e+00> : vector<8x128xf32>
    %241 = tpu.matmul %238, %240, %cst_203 {dimension_numbers = #tpu.dot_dimension_numbers<[1], [0], [0], [1], [0, 0, 1, 1], [], []>} : vector<8x128xbf16>, vector<128x128xbf16>, vector<8x128xf32> -> vector<8x128xf32>
    %242 = arith.addf %234, %241 : vector<8x128xf32>
    %c24_204 = arith.constant 24 : index
    %c0_205 = arith.constant 0 : index
    %243 = tpu.strided_load %arg11[%c24_204, %c0_205] {strides = array<i32: 2, 1>} : memref<96x128xf32, #tpu.memory_space<vmem>>, vector<8x128xf32>
    %244 = arith.truncf %243 : vector<8x128xf32> to vector<8x128xbf16>
    %c1_206 = arith.constant 1 : index
    %c1_207 = arith.constant 1 : index
    %c0_208 = arith.constant 0 : index
    %c0_209 = arith.constant 0 : index
    %245 = vector.load %arg3[%c1_206, %c1_207, %c0_208, %c0_209] : memref<7x9x128x128xbf16, #tpu.memory_space<vmem>>, vector<1x1x128x128xbf16>
    %246 = vector.shape_cast %245 : vector<1x1x128x128xbf16> to vector<128x128xbf16>
    %cst_210 = arith.constant dense<0.000000e+00> : vector<8x128xf32>
    %247 = tpu.matmul %244, %246, %cst_210 {dimension_numbers = #tpu.dot_dimension_numbers<[1], [0], [0], [1], [0, 0, 1, 1], [], []>} : vector<8x128xbf16>, vector<128x128xbf16>, vector<8x128xf32> -> vector<8x128xf32>
    %248 = arith.addf %242, %247 : vector<8x128xf32>
    %c25_211 = arith.constant 25 : index
    %c0_212 = arith.constant 0 : index
    %249 = tpu.strided_load %arg11[%c25_211, %c0_212] {strides = array<i32: 2, 1>} : memref<96x128xf32, #tpu.memory_space<vmem>>, vector<8x128xf32>
    %250 = arith.truncf %249 : vector<8x128xf32> to vector<8x128xbf16>
    %c1_213 = arith.constant 1 : index
    %c2_214 = arith.constant 2 : index
    %c0_215 = arith.constant 0 : index
    %c0_216 = arith.constant 0 : index
    %251 = vector.load %arg3[%c1_213, %c2_214, %c0_215, %c0_216] : memref<7x9x128x128xbf16, #tpu.memory_space<vmem>>, vector<1x1x128x128xbf16>
    %252 = vector.shape_cast %251 : vector<1x1x128x128xbf16> to vector<128x128xbf16>
    %cst_217 = arith.constant dense<0.000000e+00> : vector<8x128xf32>
    %253 = tpu.matmul %250, %252, %cst_217 {dimension_numbers = #tpu.dot_dimension_numbers<[1], [0], [0], [1], [0, 0, 1, 1], [], []>} : vector<8x128xbf16>, vector<128x128xbf16>, vector<8x128xf32> -> vector<8x128xf32>
    %254 = arith.addf %248, %253 : vector<8x128xf32>
    %c31 = arith.constant 31 : index
    %c0_218 = arith.constant 0 : index
    %255 = tpu.strided_load %arg11[%c31, %c0_218] {strides = array<i32: 2, 1>} : memref<96x128xf32, #tpu.memory_space<vmem>>, vector<8x128xf32>
    %256 = vector.broadcast %32 : vector<8x1xf32> to vector<8x128xf32>
    %257 = arith.mulf %255, %256 : vector<8x128xf32>
    %258 = arith.truncf %257 : vector<8x128xf32> to vector<8x128xbf16>
    %c1_219 = arith.constant 1 : index
    %c3_220 = arith.constant 3 : index
    %c0_221 = arith.constant 0 : index
    %c0_222 = arith.constant 0 : index
    %259 = vector.load %arg3[%c1_219, %c3_220, %c0_221, %c0_222] : memref<7x9x128x128xbf16, #tpu.memory_space<vmem>>, vector<1x1x128x128xbf16>
    %260 = vector.shape_cast %259 : vector<1x1x128x128xbf16> to vector<128x128xbf16>
    %cst_223 = arith.constant dense<0.000000e+00> : vector<8x128xf32>
    %261 = tpu.matmul %258, %260, %cst_223 {dimension_numbers = #tpu.dot_dimension_numbers<[1], [0], [0], [1], [0, 0, 1, 1], [], []>} : vector<8x128xbf16>, vector<128x128xbf16>, vector<8x128xf32> -> vector<8x128xf32>
    %262 = arith.addf %254, %261 : vector<8x128xf32>
    %c32 = arith.constant 32 : index
    %c0_224 = arith.constant 0 : index
    %263 = tpu.strided_load %arg11[%c32, %c0_224] {strides = array<i32: 2, 1>} : memref<96x128xf32, #tpu.memory_space<vmem>>, vector<8x128xf32>
    %264 = arith.truncf %263 : vector<8x128xf32> to vector<8x128xbf16>
    %c1_225 = arith.constant 1 : index
    %c4_226 = arith.constant 4 : index
    %c0_227 = arith.constant 0 : index
    %c0_228 = arith.constant 0 : index
    %265 = vector.load %arg3[%c1_225, %c4_226, %c0_227, %c0_228] : memref<7x9x128x128xbf16, #tpu.memory_space<vmem>>, vector<1x1x128x128xbf16>
    %266 = vector.shape_cast %265 : vector<1x1x128x128xbf16> to vector<128x128xbf16>
    %cst_229 = arith.constant dense<0.000000e+00> : vector<8x128xf32>
    %267 = tpu.matmul %264, %266, %cst_229 {dimension_numbers = #tpu.dot_dimension_numbers<[1], [0], [0], [1], [0, 0, 1, 1], [], []>} : vector<8x128xbf16>, vector<128x128xbf16>, vector<8x128xf32> -> vector<8x128xf32>
    %268 = arith.addf %262, %267 : vector<8x128xf32>
    %c33 = arith.constant 33 : index
    %c0_230 = arith.constant 0 : index
    %269 = tpu.strided_load %arg11[%c33, %c0_230] {strides = array<i32: 2, 1>} : memref<96x128xf32, #tpu.memory_space<vmem>>, vector<8x128xf32>
    %270 = arith.truncf %269 : vector<8x128xf32> to vector<8x128xbf16>
    %c1_231 = arith.constant 1 : index
    %c5_232 = arith.constant 5 : index
    %c0_233 = arith.constant 0 : index
    %c0_234 = arith.constant 0 : index
    %271 = vector.load %arg3[%c1_231, %c5_232, %c0_233, %c0_234] : memref<7x9x128x128xbf16, #tpu.memory_space<vmem>>, vector<1x1x128x128xbf16>
    %272 = vector.shape_cast %271 : vector<1x1x128x128xbf16> to vector<128x128xbf16>
    %cst_235 = arith.constant dense<0.000000e+00> : vector<8x128xf32>
    %273 = tpu.matmul %270, %272, %cst_235 {dimension_numbers = #tpu.dot_dimension_numbers<[1], [0], [0], [1], [0, 0, 1, 1], [], []>} : vector<8x128xbf16>, vector<128x128xbf16>, vector<8x128xf32> -> vector<8x128xf32>
    %274 = arith.addf %268, %273 : vector<8x128xf32>
    %c39 = arith.constant 39 : index
    %c0_236 = arith.constant 0 : index
    %275 = tpu.strided_load %arg11[%c39, %c0_236] {strides = array<i32: 2, 1>} : memref<96x128xf32, #tpu.memory_space<vmem>>, vector<8x128xf32>
    %276 = vector.broadcast %32 : vector<8x1xf32> to vector<8x128xf32>
    %277 = arith.mulf %275, %276 : vector<8x128xf32>
    %278 = arith.truncf %277 : vector<8x128xf32> to vector<8x128xbf16>
    %c1_237 = arith.constant 1 : index
    %c6_238 = arith.constant 6 : index
    %c0_239 = arith.constant 0 : index
    %c0_240 = arith.constant 0 : index
    %279 = vector.load %arg3[%c1_237, %c6_238, %c0_239, %c0_240] : memref<7x9x128x128xbf16, #tpu.memory_space<vmem>>, vector<1x1x128x128xbf16>
    %280 = vector.shape_cast %279 : vector<1x1x128x128xbf16> to vector<128x128xbf16>
    %cst_241 = arith.constant dense<0.000000e+00> : vector<8x128xf32>
    %281 = tpu.matmul %278, %280, %cst_241 {dimension_numbers = #tpu.dot_dimension_numbers<[1], [0], [0], [1], [0, 0, 1, 1], [], []>} : vector<8x128xbf16>, vector<128x128xbf16>, vector<8x128xf32> -> vector<8x128xf32>
    %282 = arith.addf %274, %281 : vector<8x128xf32>
    %c40 = arith.constant 40 : index
    %c0_242 = arith.constant 0 : index
    %283 = tpu.strided_load %arg11[%c40, %c0_242] {strides = array<i32: 2, 1>} : memref<96x128xf32, #tpu.memory_space<vmem>>, vector<8x128xf32>
    %284 = arith.truncf %283 : vector<8x128xf32> to vector<8x128xbf16>
    %c1_243 = arith.constant 1 : index
    %c7_244 = arith.constant 7 : index
    %c0_245 = arith.constant 0 : index
    %c0_246 = arith.constant 0 : index
    %285 = vector.load %arg3[%c1_243, %c7_244, %c0_245, %c0_246] : memref<7x9x128x128xbf16, #tpu.memory_space<vmem>>, vector<1x1x128x128xbf16>
    %286 = vector.shape_cast %285 : vector<1x1x128x128xbf16> to vector<128x128xbf16>
    %cst_247 = arith.constant dense<0.000000e+00> : vector<8x128xf32>
    %287 = tpu.matmul %284, %286, %cst_247 {dimension_numbers = #tpu.dot_dimension_numbers<[1], [0], [0], [1], [0, 0, 1, 1], [], []>} : vector<8x128xbf16>, vector<128x128xbf16>, vector<8x128xf32> -> vector<8x128xf32>
    %288 = arith.addf %282, %287 : vector<8x128xf32>
    %c41 = arith.constant 41 : index
    %c0_248 = arith.constant 0 : index
    %289 = tpu.strided_load %arg11[%c41, %c0_248] {strides = array<i32: 2, 1>} : memref<96x128xf32, #tpu.memory_space<vmem>>, vector<8x128xf32>
    %290 = arith.truncf %289 : vector<8x128xf32> to vector<8x128xbf16>
    %c1_249 = arith.constant 1 : index
    %c8_250 = arith.constant 8 : index
    %c0_251 = arith.constant 0 : index
    %c0_252 = arith.constant 0 : index
    %291 = vector.load %arg3[%c1_249, %c8_250, %c0_251, %c0_252] : memref<7x9x128x128xbf16, #tpu.memory_space<vmem>>, vector<1x1x128x128xbf16>
    %292 = vector.shape_cast %291 : vector<1x1x128x128xbf16> to vector<128x128xbf16>
    %cst_253 = arith.constant dense<0.000000e+00> : vector<8x128xf32>
    %293 = tpu.matmul %290, %292, %cst_253 {dimension_numbers = #tpu.dot_dimension_numbers<[1], [0], [0], [1], [0, 0, 1, 1], [], []>} : vector<8x128xbf16>, vector<128x128xbf16>, vector<8x128xf32> -> vector<8x128xf32>
    %294 = arith.addf %288, %293 : vector<8x128xf32>
    %295 = vector.broadcast %160 : vector<1x128xf32> to vector<8x128xf32>
    %296 = arith.addf %294, %295 : vector<8x128xf32>
    %cst_254 = arith.constant 0.000000e+00 : f32
    %297 = vector.broadcast %cst_254 : f32 to vector<8x128xf32>
    %298 = arith.cmpf oge, %296, %297 : vector<8x128xf32>
    %299 = vector.broadcast %161 : vector<1x128xf32> to vector<8x128xf32>
    %300 = arith.mulf %296, %299 : vector<8x128xf32>
    %301 = arith.select %298, %296, %300 : vector<8x128xi1>, vector<8x128xf32>
    %302 = vector.extract_strided_slice %301 {offsets = [0, 0], sizes = [4, 128], strides = [1, 1]} : vector<8x128xf32> to vector<4x128xf32>
    %c12_255 = arith.constant 12 : index
    %c0_256 = arith.constant 0 : index
    %303 = vector.load %arg12[%c12_255, %c0_256] : memref<32x128xf32, #tpu.memory_space<vmem>>, vector<4x128xf32>
    tpu.vector_store %arg12[%c12_255, %c0_256], %302 {strides = array<i32>} : memref<32x128xf32, #tpu.memory_space<vmem>>, vector<4x128xf32>,
    %cst_257 = arith.constant 0.000000e+00 : f32
    %304 = vector.broadcast %cst_257 : f32 to vector<8x128xf32>
    %c39_258 = arith.constant 39 : index
    %c0_259 = arith.constant 0 : index
    %305 = tpu.strided_load %arg11[%c39_258, %c0_259] {strides = array<i32: 2, 1>} : memref<96x128xf32, #tpu.memory_space<vmem>>, vector<8x128xf32>
    %306 = vector.broadcast %32 : vector<8x1xf32> to vector<8x128xf32>
    %307 = arith.mulf %305, %306 : vector<8x128xf32>
    %308 = arith.truncf %307 : vector<8x128xf32> to vector<8x128xbf16>
    %c1_260 = arith.constant 1 : index
    %c0_261 = arith.constant 0 : index
    %c0_262 = arith.constant 0 : index
    %c0_263 = arith.constant 0 : index
    %309 = vector.load %arg3[%c1_260, %c0_261, %c0_262, %c0_263] : memref<7x9x128x128xbf16, #tpu.memory_space<vmem>>, vector<1x1x128x128xbf16>
    %310 = vector.shape_cast %309 : vector<1x1x128x128xbf16> to vector<128x128xbf16>
    %cst_264 = arith.constant dense<0.000000e+00> : vector<8x128xf32>
    %311 = tpu.matmul %308, %310, %cst_264 {dimension_numbers = #tpu.dot_dimension_numbers<[1], [0], [0], [1], [0, 0, 1, 1], [], []>} : vector<8x128xbf16>, vector<128x128xbf16>, vector<8x128xf32> -> vector<8x128xf32>
    %312 = arith.addf %304, %311 : vector<8x128xf32>
    %c40_265 = arith.constant 40 : index
    %c0_266 = arith.constant 0 : index
    %313 = tpu.strided_load %arg11[%c40_265, %c0_266] {strides = array<i32: 2, 1>} : memref<96x128xf32, #tpu.memory_space<vmem>>, vector<8x128xf32>
    %314 = arith.truncf %313 : vector<8x128xf32> to vector<8x128xbf16>
    %c1_267 = arith.constant 1 : index
    %c1_268 = arith.constant 1 : index
    %c0_269 = arith.constant 0 : index
    %c0_270 = arith.constant 0 : index
    %315 = vector.load %arg3[%c1_267, %c1_268, %c0_269, %c0_270] : memref<7x9x128x128xbf16, #tpu.memory_space<vmem>>, vector<1x1x128x128xbf16>
    %316 = vector.shape_cast %315 : vector<1x1x128x128xbf16> to vector<128x128xbf16>
    %cst_271 = arith.constant dense<0.000000e+00> : vector<8x128xf32>
    %317 = tpu.matmul %314, %316, %cst_271 {dimension_numbers = #tpu.dot_dimension_numbers<[1], [0], [0], [1], [0, 0, 1, 1], [], []>} : vector<8x128xbf16>, vector<128x128xbf16>, vector<8x128xf32> -> vector<8x128xf32>
    %318 = arith.addf %312, %317 : vector<8x128xf32>
    %c41_272 = arith.constant 41 : index
    %c0_273 = arith.constant 0 : index
    %319 = tpu.strided_load %arg11[%c41_272, %c0_273] {strides = array<i32: 2, 1>} : memref<96x128xf32, #tpu.memory_space<vmem>>, vector<8x128xf32>
    %320 = arith.truncf %319 : vector<8x128xf32> to vector<8x128xbf16>
    %c1_274 = arith.constant 1 : index
    %c2_275 = arith.constant 2 : index
    %c0_276 = arith.constant 0 : index
    %c0_277 = arith.constant 0 : index
    %321 = vector.load %arg3[%c1_274, %c2_275, %c0_276, %c0_277] : memref<7x9x128x128xbf16, #tpu.memory_space<vmem>>, vector<1x1x128x128xbf16>
    %322 = vector.shape_cast %321 : vector<1x1x128x128xbf16> to vector<128x128xbf16>
    %cst_278 = arith.constant dense<0.000000e+00> : vector<8x128xf32>
    %323 = tpu.matmul %320, %322, %cst_278 {dimension_numbers = #tpu.dot_dimension_numbers<[1], [0], [0], [1], [0, 0, 1, 1], [], []>} : vector<8x128xbf16>, vector<128x128xbf16>, vector<8x128xf32> -> vector<8x128xf32>
    %324 = arith.addf %318, %323 : vector<8x128xf32>
    %c47 = arith.constant 47 : index
    %c0_279 = arith.constant 0 : index
    %325 = tpu.strided_load %arg11[%c47, %c0_279] {strides = array<i32: 2, 1>} : memref<96x128xf32, #tpu.memory_space<vmem>>, vector<8x128xf32>
    %326 = vector.broadcast %32 : vector<8x1xf32> to vector<8x128xf32>
    %327 = arith.mulf %325, %326 : vector<8x128xf32>
    %328 = arith.truncf %327 : vector<8x128xf32> to vector<8x128xbf16>
    %c1_280 = arith.constant 1 : index
    %c3_281 = arith.constant 3 : index
    %c0_282 = arith.constant 0 : index
    %c0_283 = arith.constant 0 : index
    %329 = vector.load %arg3[%c1_280, %c3_281, %c0_282, %c0_283] : memref<7x9x128x128xbf16, #tpu.memory_space<vmem>>, vector<1x1x128x128xbf16>
    %330 = vector.shape_cast %329 : vector<1x1x128x128xbf16> to vector<128x128xbf16>
    %cst_284 = arith.constant dense<0.000000e+00> : vector<8x128xf32>
    %331 = tpu.matmul %328, %330, %cst_284 {dimension_numbers = #tpu.dot_dimension_numbers<[1], [0], [0], [1], [0, 0, 1, 1], [], []>} : vector<8x128xbf16>, vector<128x128xbf16>, vector<8x128xf32> -> vector<8x128xf32>
    %332 = arith.addf %324, %331 : vector<8x128xf32>
    %c48 = arith.constant 48 : index
    %c0_285 = arith.constant 0 : index
    %333 = tpu.strided_load %arg11[%c48, %c0_285] {strides = array<i32: 2, 1>} : memref<96x128xf32, #tpu.memory_space<vmem>>, vector<8x128xf32>
    %334 = arith.truncf %333 : vector<8x128xf32> to vector<8x128xbf16>
    %c1_286 = arith.constant 1 : index
    %c4_287 = arith.constant 4 : index
    %c0_288 = arith.constant 0 : index
    %c0_289 = arith.constant 0 : index
    %335 = vector.load %arg3[%c1_286, %c4_287, %c0_288, %c0_289] : memref<7x9x128x128xbf16, #tpu.memory_space<vmem>>, vector<1x1x128x128xbf16>
    %336 = vector.shape_cast %335 : vector<1x1x128x128xbf16> to vector<128x128xbf16>
    %cst_290 = arith.constant dense<0.000000e+00> : vector<8x128xf32>
    %337 = tpu.matmul %334, %336, %cst_290 {dimension_numbers = #tpu.dot_dimension_numbers<[1], [0], [0], [1], [0, 0, 1, 1], [], []>} : vector<8x128xbf16>, vector<128x128xbf16>, vector<8x128xf32> -> vector<8x128xf32>
    %338 = arith.addf %332, %337 : vector<8x128xf32>
    %c49 = arith.constant 49 : index
    %c0_291 = arith.constant 0 : index
    %339 = tpu.strided_load %arg11[%c49, %c0_291] {strides = array<i32: 2, 1>} : memref<96x128xf32, #tpu.memory_space<vmem>>, vector<8x128xf32>
    %340 = arith.truncf %339 : vector<8x128xf32> to vector<8x128xbf16>
    %c1_292 = arith.constant 1 : index
    %c5_293 = arith.constant 5 : index
    %c0_294 = arith.constant 0 : index
    %c0_295 = arith.constant 0 : index
    %341 = vector.load %arg3[%c1_292, %c5_293, %c0_294, %c0_295] : memref<7x9x128x128xbf16, #tpu.memory_space<vmem>>, vector<1x1x128x128xbf16>
    %342 = vector.shape_cast %341 : vector<1x1x128x128xbf16> to vector<128x128xbf16>
    %cst_296 = arith.constant dense<0.000000e+00> : vector<8x128xf32>
    %343 = tpu.matmul %340, %342, %cst_296 {dimension_numbers = #tpu.dot_dimension_numbers<[1], [0], [0], [1], [0, 0, 1, 1], [], []>} : vector<8x128xbf16>, vector<128x128xbf16>, vector<8x128xf32> -> vector<8x128xf32>
    %344 = arith.addf %338, %343 : vector<8x128xf32>
    %c55 = arith.constant 55 : index
    %c0_297 = arith.constant 0 : index
    %345 = tpu.strided_load %arg11[%c55, %c0_297] {strides = array<i32: 2, 1>} : memref<96x128xf32, #tpu.memory_space<vmem>>, vector<8x128xf32>
    %346 = vector.broadcast %32 : vector<8x1xf32> to vector<8x128xf32>
    %347 = arith.mulf %345, %346 : vector<8x128xf32>
    %348 = arith.truncf %347 : vector<8x128xf32> to vector<8x128xbf16>
    %c1_298 = arith.constant 1 : index
    %c6_299 = arith.constant 6 : index
    %c0_300 = arith.constant 0 : index
    %c0_301 = arith.constant 0 : index
    %349 = vector.load %arg3[%c1_298, %c6_299, %c0_300, %c0_301] : memref<7x9x128x128xbf16, #tpu.memory_space<vmem>>, vector<1x1x128x128xbf16>
    %350 = vector.shape_cast %349 : vector<1x1x128x128xbf16> to vector<128x128xbf16>
    %cst_302 = arith.constant dense<0.000000e+00> : vector<8x128xf32>
    %351 = tpu.matmul %348, %350, %cst_302 {dimension_numbers = #tpu.dot_dimension_numbers<[1], [0], [0], [1], [0, 0, 1, 1], [], []>} : vector<8x128xbf16>, vector<128x128xbf16>, vector<8x128xf32> -> vector<8x128xf32>
    %352 = arith.addf %344, %351 : vector<8x128xf32>
    %c56 = arith.constant 56 : index
    %c0_303 = arith.constant 0 : index
    %353 = tpu.strided_load %arg11[%c56, %c0_303] {strides = array<i32: 2, 1>} : memref<96x128xf32, #tpu.memory_space<vmem>>, vector<8x128xf32>
    %354 = arith.truncf %353 : vector<8x128xf32> to vector<8x128xbf16>
    %c1_304 = arith.constant 1 : index
    %c7_305 = arith.constant 7 : index
    %c0_306 = arith.constant 0 : index
    %c0_307 = arith.constant 0 : index
    %355 = vector.load %arg3[%c1_304, %c7_305, %c0_306, %c0_307] : memref<7x9x128x128xbf16, #tpu.memory_space<vmem>>, vector<1x1x128x128xbf16>
    %356 = vector.shape_cast %355 : vector<1x1x128x128xbf16> to vector<128x128xbf16>
    %cst_308 = arith.constant dense<0.000000e+00> : vector<8x128xf32>
    %357 = tpu.matmul %354, %356, %cst_308 {dimension_numbers = #tpu.dot_dimension_numbers<[1], [0], [0], [1], [0, 0, 1, 1], [], []>} : vector<8x128xbf16>, vector<128x128xbf16>, vector<8x128xf32> -> vector<8x128xf32>
    %358 = arith.addf %352, %357 : vector<8x128xf32>
    %c57 = arith.constant 57 : index
    %c0_309 = arith.constant 0 : index
    %359 = tpu.strided_load %arg11[%c57, %c0_309] {strides = array<i32: 2, 1>} : memref<96x128xf32, #tpu.memory_space<vmem>>, vector<8x128xf32>
    %360 = arith.truncf %359 : vector<8x128xf32> to vector<8x128xbf16>
    %c1_310 = arith.constant 1 : index
    %c8_311 = arith.constant 8 : index
    %c0_312 = arith.constant 0 : index
    %c0_313 = arith.constant 0 : index
    %361 = vector.load %arg3[%c1_310, %c8_311, %c0_312, %c0_313] : memref<7x9x128x128xbf16, #tpu.memory_space<vmem>>, vector<1x1x128x128xbf16>
    %362 = vector.shape_cast %361 : vector<1x1x128x128xbf16> to vector<128x128xbf16>
    %cst_314 = arith.constant dense<0.000000e+00> : vector<8x128xf32>
    %363 = tpu.matmul %360, %362, %cst_314 {dimension_numbers = #tpu.dot_dimension_numbers<[1], [0], [0], [1], [0, 0, 1, 1], [], []>} : vector<8x128xbf16>, vector<128x128xbf16>, vector<8x128xf32> -> vector<8x128xf32>
    %364 = arith.addf %358, %363 : vector<8x128xf32>
    %365 = vector.broadcast %160 : vector<1x128xf32> to vector<8x128xf32>
    %366 = arith.addf %364, %365 : vector<8x128xf32>
    %cst_315 = arith.constant 0.000000e+00 : f32
    %367 = vector.broadcast %cst_315 : f32 to vector<8x128xf32>
    %368 = arith.cmpf oge, %366, %367 : vector<8x128xf32>
    %369 = vector.broadcast %161 : vector<1x128xf32> to vector<8x128xf32>
    %370 = arith.mulf %366, %369 : vector<8x128xf32>
    %371 = arith.select %368, %366, %370 : vector<8x128xi1>, vector<8x128xf32>
    %372 = vector.extract_strided_slice %371 {offsets = [0, 0], sizes = [4, 128], strides = [1, 1]} : vector<8x128xf32> to vector<4x128xf32>
    %c16_316 = arith.constant 16 : index
    %c0_317 = arith.constant 0 : index
    %373 = vector.load %arg12[%c16_316, %c0_317] : memref<32x128xf32, #tpu.memory_space<vmem>>, vector<4x128xf32>
    tpu.vector_store %arg12[%c16_316, %c0_317], %372 {strides = array<i32>} : memref<32x128xf32, #tpu.memory_space<vmem>>, vector<4x128xf32>,
    %cst_318 = arith.constant 0.000000e+00 : f32
    %374 = vector.broadcast %cst_318 : f32 to vector<8x128xf32>
    %c55_319 = arith.constant 55 : index
    %c0_320 = arith.constant 0 : index
    %375 = tpu.strided_load %arg11[%c55_319, %c0_320] {strides = array<i32: 2, 1>} : memref<96x128xf32, #tpu.memory_space<vmem>>, vector<8x128xf32>
    %376 = vector.broadcast %32 : vector<8x1xf32> to vector<8x128xf32>
    %377 = arith.mulf %375, %376 : vector<8x128xf32>
    %378 = arith.truncf %377 : vector<8x128xf32> to vector<8x128xbf16>
    %c1_321 = arith.constant 1 : index
    %c0_322 = arith.constant 0 : index
    %c0_323 = arith.constant 0 : index
    %c0_324 = arith.constant 0 : index
    %379 = vector.load %arg3[%c1_321, %c0_322, %c0_323, %c0_324] : memref<7x9x128x128xbf16, #tpu.memory_space<vmem>>, vector<1x1x128x128xbf16>
    %380 = vector.shape_cast %379 : vector<1x1x128x128xbf16> to vector<128x128xbf16>
    %cst_325 = arith.constant dense<0.000000e+00> : vector<8x128xf32>
    %381 = tpu.matmul %378, %380, %cst_325 {dimension_numbers = #tpu.dot_dimension_numbers<[1], [0], [0], [1], [0, 0, 1, 1], [], []>} : vector<8x128xbf16>, vector<128x128xbf16>, vector<8x128xf32> -> vector<8x128xf32>
    %382 = arith.addf %374, %381 : vector<8x128xf32>
    %c56_326 = arith.constant 56 : index
    %c0_327 = arith.constant 0 : index
    %383 = tpu.strided_load %arg11[%c56_326, %c0_327] {strides = array<i32: 2, 1>} : memref<96x128xf32, #tpu.memory_space<vmem>>, vector<8x128xf32>
    %384 = arith.truncf %383 : vector<8x128xf32> to vector<8x128xbf16>
    %c1_328 = arith.constant 1 : index
    %c1_329 = arith.constant 1 : index
    %c0_330 = arith.constant 0 : index
    %c0_331 = arith.constant 0 : index
    %385 = vector.load %arg3[%c1_328, %c1_329, %c0_330, %c0_331] : memref<7x9x128x128xbf16, #tpu.memory_space<vmem>>, vector<1x1x128x128xbf16>
    %386 = vector.shape_cast %385 : vector<1x1x128x128xbf16> to vector<128x128xbf16>
    %cst_332 = arith.constant dense<0.000000e+00> : vector<8x128xf32>
    %387 = tpu.matmul %384, %386, %cst_332 {dimension_numbers = #tpu.dot_dimension_numbers<[1], [0], [0], [1], [0, 0, 1, 1], [], []>} : vector<8x128xbf16>, vector<128x128xbf16>, vector<8x128xf32> -> vector<8x128xf32>
    %388 = arith.addf %382, %387 : vector<8x128xf32>
    %c57_333 = arith.constant 57 : index
    %c0_334 = arith.constant 0 : index
    %389 = tpu.strided_load %arg11[%c57_333, %c0_334] {strides = array<i32: 2, 1>} : memref<96x128xf32, #tpu.memory_space<vmem>>, vector<8x128xf32>
    %390 = arith.truncf %389 : vector<8x128xf32> to vector<8x128xbf16>
    %c1_335 = arith.constant 1 : index
    %c2_336 = arith.constant 2 : index
    %c0_337 = arith.constant 0 : index
    %c0_338 = arith.constant 0 : index
    %391 = vector.load %arg3[%c1_335, %c2_336, %c0_337, %c0_338] : memref<7x9x128x128xbf16, #tpu.memory_space<vmem>>, vector<1x1x128x128xbf16>
    %392 = vector.shape_cast %391 : vector<1x1x128x128xbf16> to vector<128x128xbf16>
    %cst_339 = arith.constant dense<0.000000e+00> : vector<8x128xf32>
    %393 = tpu.matmul %390, %392, %cst_339 {dimension_numbers = #tpu.dot_dimension_numbers<[1], [0], [0], [1], [0, 0, 1, 1], [], []>} : vector<8x128xbf16>, vector<128x128xbf16>, vector<8x128xf32> -> vector<8x128xf32>
    %394 = arith.addf %388, %393 : vector<8x128xf32>
    %c63 = arith.constant 63 : index
    %c0_340 = arith.constant 0 : index
    %395 = tpu.strided_load %arg11[%c63, %c0_340] {strides = array<i32: 2, 1>} : memref<96x128xf32, #tpu.memory_space<vmem>>, vector<8x128xf32>
    %396 = vector.broadcast %32 : vector<8x1xf32> to vector<8x128xf32>
    %397 = arith.mulf %395, %396 : vector<8x128xf32>
    %398 = arith.truncf %397 : vector<8x128xf32> to vector<8x128xbf16>
    %c1_341 = arith.constant 1 : index
    %c3_342 = arith.constant 3 : index
    %c0_343 = arith.constant 0 : index
    %c0_344 = arith.constant 0 : index
    %399 = vector.load %arg3[%c1_341, %c3_342, %c0_343, %c0_344] : memref<7x9x128x128xbf16, #tpu.memory_space<vmem>>, vector<1x1x128x128xbf16>
    %400 = vector.shape_cast %399 : vector<1x1x128x128xbf16> to vector<128x128xbf16>
    %cst_345 = arith.constant dense<0.000000e+00> : vector<8x128xf32>
    %401 = tpu.matmul %398, %400, %cst_345 {dimension_numbers = #tpu.dot_dimension_numbers<[1], [0], [0], [1], [0, 0, 1, 1], [], []>} : vector<8x128xbf16>, vector<128x128xbf16>, vector<8x128xf32> -> vector<8x128xf32>
    %402 = arith.addf %394, %401 : vector<8x128xf32>
    %c64 = arith.constant 64 : index
    %c0_346 = arith.constant 0 : index
    %403 = tpu.strided_load %arg11[%c64, %c0_346] {strides = array<i32: 2, 1>} : memref<96x128xf32, #tpu.memory_space<vmem>>, vector<8x128xf32>
    %404 = arith.truncf %403 : vector<8x128xf32> to vector<8x128xbf16>
    %c1_347 = arith.constant 1 : index
    %c4_348 = arith.constant 4 : index
    %c0_349 = arith.constant 0 : index
    %c0_350 = arith.constant 0 : index
    %405 = vector.load %arg3[%c1_347, %c4_348, %c0_349, %c0_350] : memref<7x9x128x128xbf16, #tpu.memory_space<vmem>>, vector<1x1x128x128xbf16>
    %406 = vector.shape_cast %405 : vector<1x1x128x128xbf16> to vector<128x128xbf16>
    %cst_351 = arith.constant dense<0.000000e+00> : vector<8x128xf32>
    %407 = tpu.matmul %404, %406, %cst_351 {dimension_numbers = #tpu.dot_dimension_numbers<[1], [0], [0], [1], [0, 0, 1, 1], [], []>} : vector<8x128xbf16>, vector<128x128xbf16>, vector<8x128xf32> -> vector<8x128xf32>
    %408 = arith.addf %402, %407 : vector<8x128xf32>
    %c65 = arith.constant 65 : index
    %c0_352 = arith.constant 0 : index
    %409 = tpu.strided_load %arg11[%c65, %c0_352] {strides = array<i32: 2, 1>} : memref<96x128xf32, #tpu.memory_space<vmem>>, vector<8x128xf32>
    %410 = arith.truncf %409 : vector<8x128xf32> to vector<8x128xbf16>
    %c1_353 = arith.constant 1 : index
    %c5_354 = arith.constant 5 : index
    %c0_355 = arith.constant 0 : index
    %c0_356 = arith.constant 0 : index
    %411 = vector.load %arg3[%c1_353, %c5_354, %c0_355, %c0_356] : memref<7x9x128x128xbf16, #tpu.memory_space<vmem>>, vector<1x1x128x128xbf16>
    %412 = vector.shape_cast %411 : vector<1x1x128x128xbf16> to vector<128x128xbf16>
    %cst_357 = arith.constant dense<0.000000e+00> : vector<8x128xf32>
    %413 = tpu.matmul %410, %412, %cst_357 {dimension_numbers = #tpu.dot_dimension_numbers<[1], [0], [0], [1], [0, 0, 1, 1], [], []>} : vector<8x128xbf16>, vector<128x128xbf16>, vector<8x128xf32> -> vector<8x128xf32>
    %414 = arith.addf %408, %413 : vector<8x128xf32>
    %c71 = arith.constant 71 : index
    %c0_358 = arith.constant 0 : index
    %415 = tpu.strided_load %arg11[%c71, %c0_358] {strides = array<i32: 2, 1>} : memref<96x128xf32, #tpu.memory_space<vmem>>, vector<8x128xf32>
    %416 = vector.broadcast %32 : vector<8x1xf32> to vector<8x128xf32>
    %417 = arith.mulf %415, %416 : vector<8x128xf32>
    %418 = arith.truncf %417 : vector<8x128xf32> to vector<8x128xbf16>
    %c1_359 = arith.constant 1 : index
    %c6_360 = arith.constant 6 : index
    %c0_361 = arith.constant 0 : index
    %c0_362 = arith.constant 0 : index
    %419 = vector.load %arg3[%c1_359, %c6_360, %c0_361, %c0_362] : memref<7x9x128x128xbf16, #tpu.memory_space<vmem>>, vector<1x1x128x128xbf16>
    %420 = vector.shape_cast %419 : vector<1x1x128x128xbf16> to vector<128x128xbf16>
    %cst_363 = arith.constant dense<0.000000e+00> : vector<8x128xf32>
    %421 = tpu.matmul %418, %420, %cst_363 {dimension_numbers = #tpu.dot_dimension_numbers<[1], [0], [0], [1], [0, 0, 1, 1], [], []>} : vector<8x128xbf16>, vector<128x128xbf16>, vector<8x128xf32> -> vector<8x128xf32>
    %422 = arith.addf %414, %421 : vector<8x128xf32>
    %c72 = arith.constant 72 : index
    %c0_364 = arith.constant 0 : index
    %423 = tpu.strided_load %arg11[%c72, %c0_364] {strides = array<i32: 2, 1>} : memref<96x128xf32, #tpu.memory_space<vmem>>, vector<8x128xf32>
    %424 = arith.truncf %423 : vector<8x128xf32> to vector<8x128xbf16>
    %c1_365 = arith.constant 1 : index
    %c7_366 = arith.constant 7 : index
    %c0_367 = arith.constant 0 : index
    %c0_368 = arith.constant 0 : index
    %425 = vector.load %arg3[%c1_365, %c7_366, %c0_367, %c0_368] : memref<7x9x128x128xbf16, #tpu.memory_space<vmem>>, vector<1x1x128x128xbf16>
    %426 = vector.shape_cast %425 : vector<1x1x128x128xbf16> to vector<128x128xbf16>
    %cst_369 = arith.constant dense<0.000000e+00> : vector<8x128xf32>
    %427 = tpu.matmul %424, %426, %cst_369 {dimension_numbers = #tpu.dot_dimension_numbers<[1], [0], [0], [1], [0, 0, 1, 1], [], []>} : vector<8x128xbf16>, vector<128x128xbf16>, vector<8x128xf32> -> vector<8x128xf32>
    %428 = arith.addf %422, %427 : vector<8x128xf32>
    %c73 = arith.constant 73 : index
    %c0_370 = arith.constant 0 : index
    %429 = tpu.strided_load %arg11[%c73, %c0_370] {strides = array<i32: 2, 1>} : memref<96x128xf32, #tpu.memory_space<vmem>>, vector<8x128xf32>
    %430 = arith.truncf %429 : vector<8x128xf32> to vector<8x128xbf16>
    %c1_371 = arith.constant 1 : index
    %c8_372 = arith.constant 8 : index
    %c0_373 = arith.constant 0 : index
    %c0_374 = arith.constant 0 : index
    %431 = vector.load %arg3[%c1_371, %c8_372, %c0_373, %c0_374] : memref<7x9x128x128xbf16, #tpu.memory_space<vmem>>, vector<1x1x128x128xbf16>
    %432 = vector.shape_cast %431 : vector<1x1x128x128xbf16> to vector<128x128xbf16>
    %cst_375 = arith.constant dense<0.000000e+00> : vector<8x128xf32>
    %433 = tpu.matmul %430, %432, %cst_375 {dimension_numbers = #tpu.dot_dimension_numbers<[1], [0], [0], [1], [0, 0, 1, 1], [], []>} : vector<8x128xbf16>, vector<128x128xbf16>, vector<8x128xf32> -> vector<8x128xf32>
    %434 = arith.addf %428, %433 : vector<8x128xf32>
    %435 = vector.broadcast %160 : vector<1x128xf32> to vector<8x128xf32>
    %436 = arith.addf %434, %435 : vector<8x128xf32>
    %cst_376 = arith.constant 0.000000e+00 : f32
    %437 = vector.broadcast %cst_376 : f32 to vector<8x128xf32>
    %438 = arith.cmpf oge, %436, %437 : vector<8x128xf32>
    %439 = vector.broadcast %161 : vector<1x128xf32> to vector<8x128xf32>
    %440 = arith.mulf %436, %439 : vector<8x128xf32>
    %441 = arith.select %438, %436, %440 : vector<8x128xi1>, vector<8x128xf32>
    %442 = vector.extract_strided_slice %441 {offsets = [0, 0], sizes = [4, 128], strides = [1, 1]} : vector<8x128xf32> to vector<4x128xf32>
    %c20 = arith.constant 20 : index
    %c0_377 = arith.constant 0 : index
    %443 = vector.load %arg12[%c20, %c0_377] : memref<32x128xf32, #tpu.memory_space<vmem>>, vector<4x128xf32>
    tpu.vector_store %arg12[%c20, %c0_377], %442 {strides = array<i32>} : memref<32x128xf32, #tpu.memory_space<vmem>>, vector<4x128xf32>,
    %444 = tpu.iota {dimensions = array<i32: 0>} : vector<16x1xi32>
    %c4_i32 = arith.constant 4 : i32
    %c0_i32_378 = arith.constant 0 : i32
    %445 = arith.cmpi eq, %c4_i32, %c0_i32_378 : i32
    %c1_i32_379 = arith.constant 1 : i32
    %446 = arith.select %445, %c1_i32_379, %c4_i32 : i32
    %447 = vector.broadcast %446 : i32 to vector<16x1xi32>
    %448 = arith.remsi %444, %447 : vector<16x1xi32>
    %c0_i32_380 = arith.constant 0 : i32
    %449 = vector.broadcast %c0_i32_380 : i32 to vector<16x1xi32>
    %450 = arith.cmpi ne, %448, %449 : vector<16x1xi32>
    %c0_i32_381 = arith.constant 0 : i32
    %451 = vector.broadcast %c0_i32_381 : i32 to vector<16x1xi32>
    %452 = arith.cmpi slt, %448, %451 : vector<16x1xi32>
    %c0_i32_382 = arith.constant 0 : i32
    %453 = arith.cmpi slt, %446, %c0_i32_382 : i32
    %454 = vector.broadcast %453 : i1 to vector<16x1xi1>
    %455 = vector.broadcast %454 : vector<16x1xi1> to vector<16x1xi1>
    %456 = arith.xori %452, %455 : vector<16x1xi1>
    %457 = arith.andi %456, %450 : vector<16x1xi1>
    %458 = vector.broadcast %446 : i32 to vector<16x1xi32>
    %459 = arith.addi %448, %458 : vector<16x1xi32>
    %460 = arith.select %457, %459, %448 : vector<16x1xi1>, vector<16x1xi32>
    %c0_i32_383 = arith.constant 0 : i32
    %461 = vector.broadcast %c0_i32_383 : i32 to vector<16x1xi32>
    %462 = arith.cmpi ne, %460, %461 : vector<16x1xi32>
    %c3_i32 = arith.constant 3 : i32
    %463 = vector.broadcast %c3_i32 : i32 to vector<16x1xi32>
    %464 = arith.cmpi ne, %460, %463 : vector<16x1xi32>
    %cst_384 = arith.constant 0.000000e+00 : f32
    %465 = vector.broadcast %cst_384 : f32 to vector<16x128xf32>
    %c3_385 = arith.constant 3 : index
    %c0_386 = arith.constant 0 : index
    %466 = vector.load %arg12[%c3_385, %c0_386] : memref<32x128xf32, #tpu.memory_space<vmem>>, vector<16x128xf32>
    %cst_387 = arith.constant 0.000000e+00 : f32
    %467 = vector.shape_cast %462 : vector<16x1xi1> to vector<16x1xi1>
    %468 = vector.broadcast %467 : vector<16x1xi1> to vector<16x128xi1>
    %469 = vector.broadcast %cst_387 : f32 to vector<16x128xf32>
    %470 = arith.select %468, %466, %469 : vector<16x128xi1>, vector<16x128xf32>
    %471 = arith.truncf %470 : vector<16x128xf32> to vector<16x128xbf16>
    %c2_388 = arith.constant 2 : index
    %c0_389 = arith.constant 0 : index
    %c0_390 = arith.constant 0 : index
    %c0_391 = arith.constant 0 : index
    %472 = vector.load %arg3[%c2_388, %c0_389, %c0_390, %c0_391] : memref<7x9x128x128xbf16, #tpu.memory_space<vmem>>, vector<1x1x128x128xbf16>
    %473 = vector.shape_cast %472 : vector<1x1x128x128xbf16> to vector<128x128xbf16>
    %cst_392 = arith.constant dense<0.000000e+00> : vector<16x128xf32>
    %474 = tpu.matmul %471, %473, %cst_392 {dimension_numbers = #tpu.dot_dimension_numbers<[1], [0], [0], [1], [0, 0, 1, 1], [], []>} : vector<16x128xbf16>, vector<128x128xbf16>, vector<16x128xf32> -> vector<16x128xf32>
    %475 = arith.addf %465, %474 : vector<16x128xf32>
    %c4_393 = arith.constant 4 : index
    %c0_394 = arith.constant 0 : index
    %476 = vector.load %arg12[%c4_393, %c0_394] : memref<32x128xf32, #tpu.memory_space<vmem>>, vector<16x128xf32>
    %477 = arith.truncf %476 : vector<16x128xf32> to vector<16x128xbf16>
    %c2_395 = arith.constant 2 : index
    %c1_396 = arith.constant 1 : index
    %c0_397 = arith.constant 0 : index
    %c0_398 = arith.constant 0 : index
    %478 = vector.load %arg3[%c2_395, %c1_396, %c0_397, %c0_398] : memref<7x9x128x128xbf16, #tpu.memory_space<vmem>>, vector<1x1x128x128xbf16>
    %479 = vector.shape_cast %478 : vector<1x1x128x128xbf16> to vector<128x128xbf16>
    %cst_399 = arith.constant dense<0.000000e+00> : vector<16x128xf32>
    %480 = tpu.matmul %477, %479, %cst_399 {dimension_numbers = #tpu.dot_dimension_numbers<[1], [0], [0], [1], [0, 0, 1, 1], [], []>} : vector<16x128xbf16>, vector<128x128xbf16>, vector<16x128xf32> -> vector<16x128xf32>
    %481 = arith.addf %475, %480 : vector<16x128xf32>
    %c5_400 = arith.constant 5 : index
    %c0_401 = arith.constant 0 : index
    %482 = vector.load %arg12[%c5_400, %c0_401] : memref<32x128xf32, #tpu.memory_space<vmem>>, vector<16x128xf32>
    %cst_402 = arith.constant 0.000000e+00 : f32
    %483 = vector.shape_cast %464 : vector<16x1xi1> to vector<16x1xi1>
    %484 = vector.broadcast %483 : vector<16x1xi1> to vector<16x128xi1>
    %485 = vector.broadcast %cst_402 : f32 to vector<16x128xf32>
    %486 = arith.select %484, %482, %485 : vector<16x128xi1>, vector<16x128xf32>
    %487 = arith.truncf %486 : vector<16x128xf32> to vector<16x128xbf16>
    %c2_403 = arith.constant 2 : index
    %c2_404 = arith.constant 2 : index
    %c0_405 = arith.constant 0 : index
    %c0_406 = arith.constant 0 : index
    %488 = vector.load %arg3[%c2_403, %c2_404, %c0_405, %c0_406] : memref<7x9x128x128xbf16, #tpu.memory_space<vmem>>, vector<1x1x128x128xbf16>
    %489 = vector.shape_cast %488 : vector<1x1x128x128xbf16> to vector<128x128xbf16>
    %cst_407 = arith.constant dense<0.000000e+00> : vector<16x128xf32>
    %490 = tpu.matmul %487, %489, %cst_407 {dimension_numbers = #tpu.dot_dimension_numbers<[1], [0], [0], [1], [0, 0, 1, 1], [], []>} : vector<16x128xbf16>, vector<128x128xbf16>, vector<16x128xf32> -> vector<16x128xf32>
    %491 = arith.addf %481, %490 : vector<16x128xf32>
    %c7_408 = arith.constant 7 : index
    %c0_409 = arith.constant 0 : index
    %492 = vector.load %arg12[%c7_408, %c0_409] : memref<32x128xf32, #tpu.memory_space<vmem>>, vector<16x128xf32>
    %cst_410 = arith.constant 0.000000e+00 : f32
    %493 = vector.shape_cast %462 : vector<16x1xi1> to vector<16x1xi1>
    %494 = vector.broadcast %493 : vector<16x1xi1> to vector<16x128xi1>
    %495 = vector.broadcast %cst_410 : f32 to vector<16x128xf32>
    %496 = arith.select %494, %492, %495 : vector<16x128xi1>, vector<16x128xf32>
    %497 = arith.truncf %496 : vector<16x128xf32> to vector<16x128xbf16>
    %c2_411 = arith.constant 2 : index
    %c3_412 = arith.constant 3 : index
    %c0_413 = arith.constant 0 : index
    %c0_414 = arith.constant 0 : index
    %498 = vector.load %arg3[%c2_411, %c3_412, %c0_413, %c0_414] : memref<7x9x128x128xbf16, #tpu.memory_space<vmem>>, vector<1x1x128x128xbf16>
    %499 = vector.shape_cast %498 : vector<1x1x128x128xbf16> to vector<128x128xbf16>
    %cst_415 = arith.constant dense<0.000000e+00> : vector<16x128xf32>
    %500 = tpu.matmul %497, %499, %cst_415 {dimension_numbers = #tpu.dot_dimension_numbers<[1], [0], [0], [1], [0, 0, 1, 1], [], []>} : vector<16x128xbf16>, vector<128x128xbf16>, vector<16x128xf32> -> vector<16x128xf32>
    %501 = arith.addf %491, %500 : vector<16x128xf32>
    %c8_416 = arith.constant 8 : index
    %c0_417 = arith.constant 0 : index
    %502 = vector.load %arg12[%c8_416, %c0_417] : memref<32x128xf32, #tpu.memory_space<vmem>>, vector<16x128xf32>
    %503 = arith.truncf %502 : vector<16x128xf32> to vector<16x128xbf16>
    %c2_418 = arith.constant 2 : index
    %c4_419 = arith.constant 4 : index
    %c0_420 = arith.constant 0 : index
    %c0_421 = arith.constant 0 : index
    %504 = vector.load %arg3[%c2_418, %c4_419, %c0_420, %c0_421] : memref<7x9x128x128xbf16, #tpu.memory_space<vmem>>, vector<1x1x128x128xbf16>
    %505 = vector.shape_cast %504 : vector<1x1x128x128xbf16> to vector<128x128xbf16>
    %cst_422 = arith.constant dense<0.000000e+00> : vector<16x128xf32>
    %506 = tpu.matmul %503, %505, %cst_422 {dimension_numbers = #tpu.dot_dimension_numbers<[1], [0], [0], [1], [0, 0, 1, 1], [], []>} : vector<16x128xbf16>, vector<128x128xbf16>, vector<16x128xf32> -> vector<16x128xf32>
    %507 = arith.addf %501, %506 : vector<16x128xf32>
    %c9_423 = arith.constant 9 : index
    %c0_424 = arith.constant 0 : index
    %508 = vector.load %arg12[%c9_423, %c0_424] : memref<32x128xf32, #tpu.memory_space<vmem>>, vector<16x128xf32>
    %cst_425 = arith.constant 0.000000e+00 : f32
    %509 = vector.shape_cast %464 : vector<16x1xi1> to vector<16x1xi1>
    %510 = vector.broadcast %509 : vector<16x1xi1> to vector<16x128xi1>
    %511 = vector.broadcast %cst_425 : f32 to vector<16x128xf32>
    %512 = arith.select %510, %508, %511 : vector<16x128xi1>, vector<16x128xf32>
    %513 = arith.truncf %512 : vector<16x128xf32> to vector<16x128xbf16>
    %c2_426 = arith.constant 2 : index
    %c5_427 = arith.constant 5 : index
    %c0_428 = arith.constant 0 : index
    %c0_429 = arith.constant 0 : index
    %514 = vector.load %arg3[%c2_426, %c5_427, %c0_428, %c0_429] : memref<7x9x128x128xbf16, #tpu.memory_space<vmem>>, vector<1x1x128x128xbf16>
    %515 = vector.shape_cast %514 : vector<1x1x128x128xbf16> to vector<128x128xbf16>
    %cst_430 = arith.constant dense<0.000000e+00> : vector<16x128xf32>
    %516 = tpu.matmul %513, %515, %cst_430 {dimension_numbers = #tpu.dot_dimension_numbers<[1], [0], [0], [1], [0, 0, 1, 1], [], []>} : vector<16x128xbf16>, vector<128x128xbf16>, vector<16x128xf32> -> vector<16x128xf32>
    %517 = arith.addf %507, %516 : vector<16x128xf32>
    %c11 = arith.constant 11 : index
    %c0_431 = arith.constant 0 : index
    %518 = vector.load %arg12[%c11, %c0_431] : memref<32x128xf32, #tpu.memory_space<vmem>>, vector<16x128xf32>
    %cst_432 = arith.constant 0.000000e+00 : f32
    %519 = vector.shape_cast %462 : vector<16x1xi1> to vector<16x1xi1>
    %520 = vector.broadcast %519 : vector<16x1xi1> to vector<16x128xi1>
    %521 = vector.broadcast %cst_432 : f32 to vector<16x128xf32>
    %522 = arith.select %520, %518, %521 : vector<16x128xi1>, vector<16x128xf32>
    %523 = arith.truncf %522 : vector<16x128xf32> to vector<16x128xbf16>
    %c2_433 = arith.constant 2 : index
    %c6_434 = arith.constant 6 : index
    %c0_435 = arith.constant 0 : index
    %c0_436 = arith.constant 0 : index
    %524 = vector.load %arg3[%c2_433, %c6_434, %c0_435, %c0_436] : memref<7x9x128x128xbf16, #tpu.memory_space<vmem>>, vector<1x1x128x128xbf16>
    %525 = vector.shape_cast %524 : vector<1x1x128x128xbf16> to vector<128x128xbf16>
    %cst_437 = arith.constant dense<0.000000e+00> : vector<16x128xf32>
    %526 = tpu.matmul %523, %525, %cst_437 {dimension_numbers = #tpu.dot_dimension_numbers<[1], [0], [0], [1], [0, 0, 1, 1], [], []>} : vector<16x128xbf16>, vector<128x128xbf16>, vector<16x128xf32> -> vector<16x128xf32>
    %527 = arith.addf %517, %526 : vector<16x128xf32>
    %c12_438 = arith.constant 12 : index
    %c0_439 = arith.constant 0 : index
    %528 = vector.load %arg12[%c12_438, %c0_439] : memref<32x128xf32, #tpu.memory_space<vmem>>, vector<16x128xf32>
    %529 = arith.truncf %528 : vector<16x128xf32> to vector<16x128xbf16>
    %c2_440 = arith.constant 2 : index
    %c7_441 = arith.constant 7 : index
    %c0_442 = arith.constant 0 : index
    %c0_443 = arith.constant 0 : index
    %530 = vector.load %arg3[%c2_440, %c7_441, %c0_442, %c0_443] : memref<7x9x128x128xbf16, #tpu.memory_space<vmem>>, vector<1x1x128x128xbf16>
    %531 = vector.shape_cast %530 : vector<1x1x128x128xbf16> to vector<128x128xbf16>
    %cst_444 = arith.constant dense<0.000000e+00> : vector<16x128xf32>
    %532 = tpu.matmul %529, %531, %cst_444 {dimension_numbers = #tpu.dot_dimension_numbers<[1], [0], [0], [1], [0, 0, 1, 1], [], []>} : vector<16x128xbf16>, vector<128x128xbf16>, vector<16x128xf32> -> vector<16x128xf32>
    %533 = arith.addf %527, %532 : vector<16x128xf32>
    %c13 = arith.constant 13 : index
    %c0_445 = arith.constant 0 : index
    %534 = vector.load %arg12[%c13, %c0_445] : memref<32x128xf32, #tpu.memory_space<vmem>>, vector<16x128xf32>
    %cst_446 = arith.constant 0.000000e+00 : f32
    %535 = vector.shape_cast %464 : vector<16x1xi1> to vector<16x1xi1>
    %536 = vector.broadcast %535 : vector<16x1xi1> to vector<16x128xi1>
    %537 = vector.broadcast %cst_446 : f32 to vector<16x128xf32>
    %538 = arith.select %536, %534, %537 : vector<16x128xi1>, vector<16x128xf32>
    %539 = arith.truncf %538 : vector<16x128xf32> to vector<16x128xbf16>
    %c2_447 = arith.constant 2 : index
    %c8_448 = arith.constant 8 : index
    %c0_449 = arith.constant 0 : index
    %c0_450 = arith.constant 0 : index
    %540 = vector.load %arg3[%c2_447, %c8_448, %c0_449, %c0_450] : memref<7x9x128x128xbf16, #tpu.memory_space<vmem>>, vector<1x1x128x128xbf16>
    %541 = vector.shape_cast %540 : vector<1x1x128x128xbf16> to vector<128x128xbf16>
    %cst_451 = arith.constant dense<0.000000e+00> : vector<16x128xf32>
    %542 = tpu.matmul %539, %541, %cst_451 {dimension_numbers = #tpu.dot_dimension_numbers<[1], [0], [0], [1], [0, 0, 1, 1], [], []>} : vector<16x128xbf16>, vector<128x128xbf16>, vector<16x128xf32> -> vector<16x128xf32>
    %543 = arith.addf %533, %542 : vector<16x128xf32>
    %544 = vector.broadcast %162 : vector<1x128xf32> to vector<16x128xf32>
    %545 = arith.addf %543, %544 : vector<16x128xf32>
    %cst_452 = arith.constant 0.000000e+00 : f32
    %546 = vector.broadcast %cst_452 : f32 to vector<16x128xf32>
    %547 = arith.cmpf oge, %545, %546 : vector<16x128xf32>
    %548 = vector.broadcast %163 : vector<1x128xf32> to vector<16x128xf32>
    %549 = arith.mulf %545, %548 : vector<16x128xf32>
    %550 = arith.select %547, %545, %549 : vector<16x128xi1>, vector<16x128xf32>
    %c0_453 = arith.constant 0 : index
    %c0_454 = arith.constant 0 : index
    %c0_455 = arith.constant 0 : index
    %551 = vector.load %arg7[%c0_453, %c0_454, %c0_455] : memref<1x16x128xf32, #tpu.memory_space<vmem>>, vector<1x16x128xf32>
    %552 = vector.shape_cast %551 : vector<1x16x128xf32> to vector<16x128xf32>
    %553 = vector.shape_cast %550 : vector<16x128xf32> to vector<1x16x128xf32>
    tpu.vector_store %arg7[%c0_453, %c0_454, %c0_455], %553 {strides = array<i32>} : memref<1x16x128xf32, #tpu.memory_space<vmem>>, vector<1x16x128xf32>,
    %c8_456 = arith.constant 8 : index
    %c0_457 = arith.constant 0 : index
    %554 = vector.load %arg13[%c8_456, %c0_457] : memref<40x128xf32, #tpu.memory_space<vmem>>, vector<16x128xf32>
    tpu.vector_store %arg13[%c8_456, %c0_457], %550 {strides = array<i32>} : memref<40x128xf32, #tpu.memory_space<vmem>>, vector<16x128xf32>,
    %c4_458 = arith.constant 4 : index
    %c0_459 = arith.constant 0 : index
    %555 = vector.load %arg4[%c4_458, %c0_459] : memref<8x128xf32, #tpu.memory_space<vmem>>, vector<1x128xf32>
    %c4_460 = arith.constant 4 : index
    %c0_461 = arith.constant 0 : index
    %556 = vector.load %arg5[%c4_460, %c0_461] : memref<8x128xf32, #tpu.memory_space<vmem>>, vector<1x128xf32>
    %c5_462 = arith.constant 5 : index
    %c0_463 = arith.constant 0 : index
    %557 = vector.load %arg4[%c5_462, %c0_463] : memref<8x128xf32, #tpu.memory_space<vmem>>, vector<1x128xf32>
    %c5_464 = arith.constant 5 : index
    %c0_465 = arith.constant 0 : index
    %558 = vector.load %arg5[%c5_464, %c0_465] : memref<8x128xf32, #tpu.memory_space<vmem>>, vector<1x128xf32>
    %cst_466 = arith.constant 0.000000e+00 : f32
    %559 = vector.broadcast %cst_466 : f32 to vector<8x128xf32>
    %c3_467 = arith.constant 3 : index
    %c0_468 = arith.constant 0 : index
    %560 = tpu.strided_load %arg13[%c3_467, %c0_468] {strides = array<i32: 2, 1>} : memref<40x128xf32, #tpu.memory_space<vmem>>, vector<8x128xf32>
    %561 = vector.broadcast %32 : vector<8x1xf32> to vector<8x128xf32>
    %562 = arith.mulf %560, %561 : vector<8x128xf32>
    %563 = arith.truncf %562 : vector<8x128xf32> to vector<8x128xbf16>
    %c3_469 = arith.constant 3 : index
    %c0_470 = arith.constant 0 : index
    %c0_471 = arith.constant 0 : index
    %c0_472 = arith.constant 0 : index
    %564 = vector.load %arg3[%c3_469, %c0_470, %c0_471, %c0_472] : memref<7x9x128x128xbf16, #tpu.memory_space<vmem>>, vector<1x1x128x128xbf16>
    %565 = vector.shape_cast %564 : vector<1x1x128x128xbf16> to vector<128x128xbf16>
    %cst_473 = arith.constant dense<0.000000e+00> : vector<8x128xf32>
    %566 = tpu.matmul %563, %565, %cst_473 {dimension_numbers = #tpu.dot_dimension_numbers<[1], [0], [0], [1], [0, 0, 1, 1], [], []>} : vector<8x128xbf16>, vector<128x128xbf16>, vector<8x128xf32> -> vector<8x128xf32>
    %567 = arith.addf %559, %566 : vector<8x128xf32>
    %c4_474 = arith.constant 4 : index
    %c0_475 = arith.constant 0 : index
    %568 = tpu.strided_load %arg13[%c4_474, %c0_475] {strides = array<i32: 2, 1>} : memref<40x128xf32, #tpu.memory_space<vmem>>, vector<8x128xf32>
    %569 = arith.truncf %568 : vector<8x128xf32> to vector<8x128xbf16>
    %c3_476 = arith.constant 3 : index
    %c1_477 = arith.constant 1 : index
    %c0_478 = arith.constant 0 : index
    %c0_479 = arith.constant 0 : index
    %570 = vector.load %arg3[%c3_476, %c1_477, %c0_478, %c0_479] : memref<7x9x128x128xbf16, #tpu.memory_space<vmem>>, vector<1x1x128x128xbf16>
    %571 = vector.shape_cast %570 : vector<1x1x128x128xbf16> to vector<128x128xbf16>
    %cst_480 = arith.constant dense<0.000000e+00> : vector<8x128xf32>
    %572 = tpu.matmul %569, %571, %cst_480 {dimension_numbers = #tpu.dot_dimension_numbers<[1], [0], [0], [1], [0, 0, 1, 1], [], []>} : vector<8x128xbf16>, vector<128x128xbf16>, vector<8x128xf32> -> vector<8x128xf32>
    %573 = arith.addf %567, %572 : vector<8x128xf32>
    %c5_481 = arith.constant 5 : index
    %c0_482 = arith.constant 0 : index
    %574 = tpu.strided_load %arg13[%c5_481, %c0_482] {strides = array<i32: 2, 1>} : memref<40x128xf32, #tpu.memory_space<vmem>>, vector<8x128xf32>
    %575 = arith.truncf %574 : vector<8x128xf32> to vector<8x128xbf16>
    %c3_483 = arith.constant 3 : index
    %c2_484 = arith.constant 2 : index
    %c0_485 = arith.constant 0 : index
    %c0_486 = arith.constant 0 : index
    %576 = vector.load %arg3[%c3_483, %c2_484, %c0_485, %c0_486] : memref<7x9x128x128xbf16, #tpu.memory_space<vmem>>, vector<1x1x128x128xbf16>
    %577 = vector.shape_cast %576 : vector<1x1x128x128xbf16> to vector<128x128xbf16>
    %cst_487 = arith.constant dense<0.000000e+00> : vector<8x128xf32>
    %578 = tpu.matmul %575, %577, %cst_487 {dimension_numbers = #tpu.dot_dimension_numbers<[1], [0], [0], [1], [0, 0, 1, 1], [], []>} : vector<8x128xbf16>, vector<128x128xbf16>, vector<8x128xf32> -> vector<8x128xf32>
    %579 = arith.addf %573, %578 : vector<8x128xf32>
    %c7_488 = arith.constant 7 : index
    %c0_489 = arith.constant 0 : index
    %580 = tpu.strided_load %arg13[%c7_488, %c0_489] {strides = array<i32: 2, 1>} : memref<40x128xf32, #tpu.memory_space<vmem>>, vector<8x128xf32>
    %581 = vector.broadcast %32 : vector<8x1xf32> to vector<8x128xf32>
    %582 = arith.mulf %580, %581 : vector<8x128xf32>
    %583 = arith.truncf %582 : vector<8x128xf32> to vector<8x128xbf16>
    %c3_490 = arith.constant 3 : index
    %c3_491 = arith.constant 3 : index
    %c0_492 = arith.constant 0 : index
    %c0_493 = arith.constant 0 : index
    %584 = vector.load %arg3[%c3_490, %c3_491, %c0_492, %c0_493] : memref<7x9x128x128xbf16, #tpu.memory_space<vmem>>, vector<1x1x128x128xbf16>
    %585 = vector.shape_cast %584 : vector<1x1x128x128xbf16> to vector<128x128xbf16>
    %cst_494 = arith.constant dense<0.000000e+00> : vector<8x128xf32>
    %586 = tpu.matmul %583, %585, %cst_494 {dimension_numbers = #tpu.dot_dimension_numbers<[1], [0], [0], [1], [0, 0, 1, 1], [], []>} : vector<8x128xbf16>, vector<128x128xbf16>, vector<8x128xf32> -> vector<8x128xf32>
    %587 = arith.addf %579, %586 : vector<8x128xf32>
    %c8_495 = arith.constant 8 : index
    %c0_496 = arith.constant 0 : index
    %588 = tpu.strided_load %arg13[%c8_495, %c0_496] {strides = array<i32: 2, 1>} : memref<40x128xf32, #tpu.memory_space<vmem>>, vector<8x128xf32>
    %589 = arith.truncf %588 : vector<8x128xf32> to vector<8x128xbf16>
    %c3_497 = arith.constant 3 : index
    %c4_498 = arith.constant 4 : index
    %c0_499 = arith.constant 0 : index
    %c0_500 = arith.constant 0 : index
    %590 = vector.load %arg3[%c3_497, %c4_498, %c0_499, %c0_500] : memref<7x9x128x128xbf16, #tpu.memory_space<vmem>>, vector<1x1x128x128xbf16>
    %591 = vector.shape_cast %590 : vector<1x1x128x128xbf16> to vector<128x128xbf16>
    %cst_501 = arith.constant dense<0.000000e+00> : vector<8x128xf32>
    %592 = tpu.matmul %589, %591, %cst_501 {dimension_numbers = #tpu.dot_dimension_numbers<[1], [0], [0], [1], [0, 0, 1, 1], [], []>} : vector<8x128xbf16>, vector<128x128xbf16>, vector<8x128xf32> -> vector<8x128xf32>
    %593 = arith.addf %587, %592 : vector<8x128xf32>
    %c9_502 = arith.constant 9 : index
    %c0_503 = arith.constant 0 : index
    %594 = tpu.strided_load %arg13[%c9_502, %c0_503] {strides = array<i32: 2, 1>} : memref<40x128xf32, #tpu.memory_space<vmem>>, vector<8x128xf32>
    %595 = arith.truncf %594 : vector<8x128xf32> to vector<8x128xbf16>
    %c3_504 = arith.constant 3 : index
    %c5_505 = arith.constant 5 : index
    %c0_506 = arith.constant 0 : index
    %c0_507 = arith.constant 0 : index
    %596 = vector.load %arg3[%c3_504, %c5_505, %c0_506, %c0_507] : memref<7x9x128x128xbf16, #tpu.memory_space<vmem>>, vector<1x1x128x128xbf16>
    %597 = vector.shape_cast %596 : vector<1x1x128x128xbf16> to vector<128x128xbf16>
    %cst_508 = arith.constant dense<0.000000e+00> : vector<8x128xf32>
    %598 = tpu.matmul %595, %597, %cst_508 {dimension_numbers = #tpu.dot_dimension_numbers<[1], [0], [0], [1], [0, 0, 1, 1], [], []>} : vector<8x128xbf16>, vector<128x128xbf16>, vector<8x128xf32> -> vector<8x128xf32>
    %599 = arith.addf %593, %598 : vector<8x128xf32>
    %c11_509 = arith.constant 11 : index
    %c0_510 = arith.constant 0 : index
    %600 = tpu.strided_load %arg13[%c11_509, %c0_510] {strides = array<i32: 2, 1>} : memref<40x128xf32, #tpu.memory_space<vmem>>, vector<8x128xf32>
    %601 = vector.broadcast %32 : vector<8x1xf32> to vector<8x128xf32>
    %602 = arith.mulf %600, %601 : vector<8x128xf32>
    %603 = arith.truncf %602 : vector<8x128xf32> to vector<8x128xbf16>
    %c3_511 = arith.constant 3 : index
    %c6_512 = arith.constant 6 : index
    %c0_513 = arith.constant 0 : index
    %c0_514 = arith.constant 0 : index
    %604 = vector.load %arg3[%c3_511, %c6_512, %c0_513, %c0_514] : memref<7x9x128x128xbf16, #tpu.memory_space<vmem>>, vector<1x1x128x128xbf16>
    %605 = vector.shape_cast %604 : vector<1x1x128x128xbf16> to vector<128x128xbf16>
    %cst_515 = arith.constant dense<0.000000e+00> : vector<8x128xf32>
    %606 = tpu.matmul %603, %605, %cst_515 {dimension_numbers = #tpu.dot_dimension_numbers<[1], [0], [0], [1], [0, 0, 1, 1], [], []>} : vector<8x128xbf16>, vector<128x128xbf16>, vector<8x128xf32> -> vector<8x128xf32>
    %607 = arith.addf %599, %606 : vector<8x128xf32>
    %c12_516 = arith.constant 12 : index
    %c0_517 = arith.constant 0 : index
    %608 = tpu.strided_load %arg13[%c12_516, %c0_517] {strides = array<i32: 2, 1>} : memref<40x128xf32, #tpu.memory_space<vmem>>, vector<8x128xf32>
    %609 = arith.truncf %608 : vector<8x128xf32> to vector<8x128xbf16>
    %c3_518 = arith.constant 3 : index
    %c7_519 = arith.constant 7 : index
    %c0_520 = arith.constant 0 : index
    %c0_521 = arith.constant 0 : index
    %610 = vector.load %arg3[%c3_518, %c7_519, %c0_520, %c0_521] : memref<7x9x128x128xbf16, #tpu.memory_space<vmem>>, vector<1x1x128x128xbf16>
    %611 = vector.shape_cast %610 : vector<1x1x128x128xbf16> to vector<128x128xbf16>
    %cst_522 = arith.constant dense<0.000000e+00> : vector<8x128xf32>
    %612 = tpu.matmul %609, %611, %cst_522 {dimension_numbers = #tpu.dot_dimension_numbers<[1], [0], [0], [1], [0, 0, 1, 1], [], []>} : vector<8x128xbf16>, vector<128x128xbf16>, vector<8x128xf32> -> vector<8x128xf32>
    %613 = arith.addf %607, %612 : vector<8x128xf32>
    %c13_523 = arith.constant 13 : index
    %c0_524 = arith.constant 0 : index
    %614 = tpu.strided_load %arg13[%c13_523, %c0_524] {strides = array<i32: 2, 1>} : memref<40x128xf32, #tpu.memory_space<vmem>>, vector<8x128xf32>
    %615 = arith.truncf %614 : vector<8x128xf32> to vector<8x128xbf16>
    %c3_525 = arith.constant 3 : index
    %c8_526 = arith.constant 8 : index
    %c0_527 = arith.constant 0 : index
    %c0_528 = arith.constant 0 : index
    %616 = vector.load %arg3[%c3_525, %c8_526, %c0_527, %c0_528] : memref<7x9x128x128xbf16, #tpu.memory_space<vmem>>, vector<1x1x128x128xbf16>
    %617 = vector.shape_cast %616 : vector<1x1x128x128xbf16> to vector<128x128xbf16>
    %cst_529 = arith.constant dense<0.000000e+00> : vector<8x128xf32>
    %618 = tpu.matmul %615, %617, %cst_529 {dimension_numbers = #tpu.dot_dimension_numbers<[1], [0], [0], [1], [0, 0, 1, 1], [], []>} : vector<8x128xbf16>, vector<128x128xbf16>, vector<8x128xf32> -> vector<8x128xf32>
    %619 = arith.addf %613, %618 : vector<8x128xf32>
    %620 = vector.broadcast %555 : vector<1x128xf32> to vector<8x128xf32>
    %621 = arith.addf %619, %620 : vector<8x128xf32>
    %cst_530 = arith.constant 0.000000e+00 : f32
    %622 = vector.broadcast %cst_530 : f32 to vector<8x128xf32>
    %623 = arith.cmpf oge, %621, %622 : vector<8x128xf32>
    %624 = vector.broadcast %556 : vector<1x128xf32> to vector<8x128xf32>
    %625 = arith.mulf %621, %624 : vector<8x128xf32>
    %626 = arith.select %623, %621, %625 : vector<8x128xi1>, vector<8x128xf32>
    %627 = vector.extract_strided_slice %626 {offsets = [0, 0], sizes = [2, 128], strides = [1, 1]} : vector<8x128xf32> to vector<2x128xf32>
    %c8_531 = arith.constant 8 : index
    %c0_532 = arith.constant 0 : index
    %628 = vector.load %arg14[%c8_531, %c0_532] : memref<24x128xf32, #tpu.memory_space<vmem>>, vector<2x128xf32>
    tpu.vector_store %arg14[%c8_531, %c0_532], %627 {strides = array<i32>} : memref<24x128xf32, #tpu.memory_space<vmem>>, vector<2x128xf32>,
    %cst_533 = arith.constant 0.000000e+00 : f32
    %629 = vector.broadcast %cst_533 : f32 to vector<8x128xf32>
    %c11_534 = arith.constant 11 : index
    %c0_535 = arith.constant 0 : index
    %630 = tpu.strided_load %arg13[%c11_534, %c0_535] {strides = array<i32: 2, 1>} : memref<40x128xf32, #tpu.memory_space<vmem>>, vector<8x128xf32>
    %631 = vector.broadcast %32 : vector<8x1xf32> to vector<8x128xf32>
    %632 = arith.mulf %630, %631 : vector<8x128xf32>
    %633 = arith.truncf %632 : vector<8x128xf32> to vector<8x128xbf16>
    %c3_536 = arith.constant 3 : index
    %c0_537 = arith.constant 0 : index
    %c0_538 = arith.constant 0 : index
    %c0_539 = arith.constant 0 : index
    %634 = vector.load %arg3[%c3_536, %c0_537, %c0_538, %c0_539] : memref<7x9x128x128xbf16, #tpu.memory_space<vmem>>, vector<1x1x128x128xbf16>
    %635 = vector.shape_cast %634 : vector<1x1x128x128xbf16> to vector<128x128xbf16>
    %cst_540 = arith.constant dense<0.000000e+00> : vector<8x128xf32>
    %636 = tpu.matmul %633, %635, %cst_540 {dimension_numbers = #tpu.dot_dimension_numbers<[1], [0], [0], [1], [0, 0, 1, 1], [], []>} : vector<8x128xbf16>, vector<128x128xbf16>, vector<8x128xf32> -> vector<8x128xf32>
    %637 = arith.addf %629, %636 : vector<8x128xf32>
    %c12_541 = arith.constant 12 : index
    %c0_542 = arith.constant 0 : index
    %638 = tpu.strided_load %arg13[%c12_541, %c0_542] {strides = array<i32: 2, 1>} : memref<40x128xf32, #tpu.memory_space<vmem>>, vector<8x128xf32>
    %639 = arith.truncf %638 : vector<8x128xf32> to vector<8x128xbf16>
    %c3_543 = arith.constant 3 : index
    %c1_544 = arith.constant 1 : index
    %c0_545 = arith.constant 0 : index
    %c0_546 = arith.constant 0 : index
    %640 = vector.load %arg3[%c3_543, %c1_544, %c0_545, %c0_546] : memref<7x9x128x128xbf16, #tpu.memory_space<vmem>>, vector<1x1x128x128xbf16>
    %641 = vector.shape_cast %640 : vector<1x1x128x128xbf16> to vector<128x128xbf16>
    %cst_547 = arith.constant dense<0.000000e+00> : vector<8x128xf32>
    %642 = tpu.matmul %639, %641, %cst_547 {dimension_numbers = #tpu.dot_dimension_numbers<[1], [0], [0], [1], [0, 0, 1, 1], [], []>} : vector<8x128xbf16>, vector<128x128xbf16>, vector<8x128xf32> -> vector<8x128xf32>
    %643 = arith.addf %637, %642 : vector<8x128xf32>
    %c13_548 = arith.constant 13 : index
    %c0_549 = arith.constant 0 : index
    %644 = tpu.strided_load %arg13[%c13_548, %c0_549] {strides = array<i32: 2, 1>} : memref<40x128xf32, #tpu.memory_space<vmem>>, vector<8x128xf32>
    %645 = arith.truncf %644 : vector<8x128xf32> to vector<8x128xbf16>
    %c3_550 = arith.constant 3 : index
    %c2_551 = arith.constant 2 : index
    %c0_552 = arith.constant 0 : index
    %c0_553 = arith.constant 0 : index
    %646 = vector.load %arg3[%c3_550, %c2_551, %c0_552, %c0_553] : memref<7x9x128x128xbf16, #tpu.memory_space<vmem>>, vector<1x1x128x128xbf16>
    %647 = vector.shape_cast %646 : vector<1x1x128x128xbf16> to vector<128x128xbf16>
    %cst_554 = arith.constant dense<0.000000e+00> : vector<8x128xf32>
    %648 = tpu.matmul %645, %647, %cst_554 {dimension_numbers = #tpu.dot_dimension_numbers<[1], [0], [0], [1], [0, 0, 1, 1], [], []>} : vector<8x128xbf16>, vector<128x128xbf16>, vector<8x128xf32> -> vector<8x128xf32>
    %649 = arith.addf %643, %648 : vector<8x128xf32>
    %c15_555 = arith.constant 15 : index
    %c0_556 = arith.constant 0 : index
    %650 = tpu.strided_load %arg13[%c15_555, %c0_556] {strides = array<i32: 2, 1>} : memref<40x128xf32, #tpu.memory_space<vmem>>, vector<8x128xf32>
    %651 = vector.broadcast %32 : vector<8x1xf32> to vector<8x128xf32>
    %652 = arith.mulf %650, %651 : vector<8x128xf32>
    %653 = arith.truncf %652 : vector<8x128xf32> to vector<8x128xbf16>
    %c3_557 = arith.constant 3 : index
    %c3_558 = arith.constant 3 : index
    %c0_559 = arith.constant 0 : index
    %c0_560 = arith.constant 0 : index
    %654 = vector.load %arg3[%c3_557, %c3_558, %c0_559, %c0_560] : memref<7x9x128x128xbf16, #tpu.memory_space<vmem>>, vector<1x1x128x128xbf16>
    %655 = vector.shape_cast %654 : vector<1x1x128x128xbf16> to vector<128x128xbf16>
    %cst_561 = arith.constant dense<0.000000e+00> : vector<8x128xf32>
    %656 = tpu.matmul %653, %655, %cst_561 {dimension_numbers = #tpu.dot_dimension_numbers<[1], [0], [0], [1], [0, 0, 1, 1], [], []>} : vector<8x128xbf16>, vector<128x128xbf16>, vector<8x128xf32> -> vector<8x128xf32>
    %657 = arith.addf %649, %656 : vector<8x128xf32>
    %c16_562 = arith.constant 16 : index
    %c0_563 = arith.constant 0 : index
    %658 = tpu.strided_load %arg13[%c16_562, %c0_563] {strides = array<i32: 2, 1>} : memref<40x128xf32, #tpu.memory_space<vmem>>, vector<8x128xf32>
    %659 = arith.truncf %658 : vector<8x128xf32> to vector<8x128xbf16>
    %c3_564 = arith.constant 3 : index
    %c4_565 = arith.constant 4 : index
    %c0_566 = arith.constant 0 : index
    %c0_567 = arith.constant 0 : index
    %660 = vector.load %arg3[%c3_564, %c4_565, %c0_566, %c0_567] : memref<7x9x128x128xbf16, #tpu.memory_space<vmem>>, vector<1x1x128x128xbf16>
    %661 = vector.shape_cast %660 : vector<1x1x128x128xbf16> to vector<128x128xbf16>
    %cst_568 = arith.constant dense<0.000000e+00> : vector<8x128xf32>
    %662 = tpu.matmul %659, %661, %cst_568 {dimension_numbers = #tpu.dot_dimension_numbers<[1], [0], [0], [1], [0, 0, 1, 1], [], []>} : vector<8x128xbf16>, vector<128x128xbf16>, vector<8x128xf32> -> vector<8x128xf32>
    %663 = arith.addf %657, %662 : vector<8x128xf32>
    %c17_569 = arith.constant 17 : index
    %c0_570 = arith.constant 0 : index
    %664 = tpu.strided_load %arg13[%c17_569, %c0_570] {strides = array<i32: 2, 1>} : memref<40x128xf32, #tpu.memory_space<vmem>>, vector<8x128xf32>
    %665 = arith.truncf %664 : vector<8x128xf32> to vector<8x128xbf16>
    %c3_571 = arith.constant 3 : index
    %c5_572 = arith.constant 5 : index
    %c0_573 = arith.constant 0 : index
    %c0_574 = arith.constant 0 : index
    %666 = vector.load %arg3[%c3_571, %c5_572, %c0_573, %c0_574] : memref<7x9x128x128xbf16, #tpu.memory_space<vmem>>, vector<1x1x128x128xbf16>
    %667 = vector.shape_cast %666 : vector<1x1x128x128xbf16> to vector<128x128xbf16>
    %cst_575 = arith.constant dense<0.000000e+00> : vector<8x128xf32>
    %668 = tpu.matmul %665, %667, %cst_575 {dimension_numbers = #tpu.dot_dimension_numbers<[1], [0], [0], [1], [0, 0, 1, 1], [], []>} : vector<8x128xbf16>, vector<128x128xbf16>, vector<8x128xf32> -> vector<8x128xf32>
    %669 = arith.addf %663, %668 : vector<8x128xf32>
    %c19 = arith.constant 19 : index
    %c0_576 = arith.constant 0 : index
    %670 = tpu.strided_load %arg13[%c19, %c0_576] {strides = array<i32: 2, 1>} : memref<40x128xf32, #tpu.memory_space<vmem>>, vector<8x128xf32>
    %671 = vector.broadcast %32 : vector<8x1xf32> to vector<8x128xf32>
    %672 = arith.mulf %670, %671 : vector<8x128xf32>
    %673 = arith.truncf %672 : vector<8x128xf32> to vector<8x128xbf16>
    %c3_577 = arith.constant 3 : index
    %c6_578 = arith.constant 6 : index
    %c0_579 = arith.constant 0 : index
    %c0_580 = arith.constant 0 : index
    %674 = vector.load %arg3[%c3_577, %c6_578, %c0_579, %c0_580] : memref<7x9x128x128xbf16, #tpu.memory_space<vmem>>, vector<1x1x128x128xbf16>
    %675 = vector.shape_cast %674 : vector<1x1x128x128xbf16> to vector<128x128xbf16>
    %cst_581 = arith.constant dense<0.000000e+00> : vector<8x128xf32>
    %676 = tpu.matmul %673, %675, %cst_581 {dimension_numbers = #tpu.dot_dimension_numbers<[1], [0], [0], [1], [0, 0, 1, 1], [], []>} : vector<8x128xbf16>, vector<128x128xbf16>, vector<8x128xf32> -> vector<8x128xf32>
    %677 = arith.addf %669, %676 : vector<8x128xf32>
    %c20_582 = arith.constant 20 : index
    %c0_583 = arith.constant 0 : index
    %678 = tpu.strided_load %arg13[%c20_582, %c0_583] {strides = array<i32: 2, 1>} : memref<40x128xf32, #tpu.memory_space<vmem>>, vector<8x128xf32>
    %679 = arith.truncf %678 : vector<8x128xf32> to vector<8x128xbf16>
    %c3_584 = arith.constant 3 : index
    %c7_585 = arith.constant 7 : index
    %c0_586 = arith.constant 0 : index
    %c0_587 = arith.constant 0 : index
    %680 = vector.load %arg3[%c3_584, %c7_585, %c0_586, %c0_587] : memref<7x9x128x128xbf16, #tpu.memory_space<vmem>>, vector<1x1x128x128xbf16>
    %681 = vector.shape_cast %680 : vector<1x1x128x128xbf16> to vector<128x128xbf16>
    %cst_588 = arith.constant dense<0.000000e+00> : vector<8x128xf32>
    %682 = tpu.matmul %679, %681, %cst_588 {dimension_numbers = #tpu.dot_dimension_numbers<[1], [0], [0], [1], [0, 0, 1, 1], [], []>} : vector<8x128xbf16>, vector<128x128xbf16>, vector<8x128xf32> -> vector<8x128xf32>
    %683 = arith.addf %677, %682 : vector<8x128xf32>
    %c21 = arith.constant 21 : index
    %c0_589 = arith.constant 0 : index
    %684 = tpu.strided_load %arg13[%c21, %c0_589] {strides = array<i32: 2, 1>} : memref<40x128xf32, #tpu.memory_space<vmem>>, vector<8x128xf32>
    %685 = arith.truncf %684 : vector<8x128xf32> to vector<8x128xbf16>
    %c3_590 = arith.constant 3 : index
    %c8_591 = arith.constant 8 : index
    %c0_592 = arith.constant 0 : index
    %c0_593 = arith.constant 0 : index
    %686 = vector.load %arg3[%c3_590, %c8_591, %c0_592, %c0_593] : memref<7x9x128x128xbf16, #tpu.memory_space<vmem>>, vector<1x1x128x128xbf16>
    %687 = vector.shape_cast %686 : vector<1x1x128x128xbf16> to vector<128x128xbf16>
    %cst_594 = arith.constant dense<0.000000e+00> : vector<8x128xf32>
    %688 = tpu.matmul %685, %687, %cst_594 {dimension_numbers = #tpu.dot_dimension_numbers<[1], [0], [0], [1], [0, 0, 1, 1], [], []>} : vector<8x128xbf16>, vector<128x128xbf16>, vector<8x128xf32> -> vector<8x128xf32>
    %689 = arith.addf %683, %688 : vector<8x128xf32>
    %690 = vector.broadcast %555 : vector<1x128xf32> to vector<8x128xf32>
    %691 = arith.addf %689, %690 : vector<8x128xf32>
    %cst_595 = arith.constant 0.000000e+00 : f32
    %692 = vector.broadcast %cst_595 : f32 to vector<8x128xf32>
    %693 = arith.cmpf oge, %691, %692 : vector<8x128xf32>
    %694 = vector.broadcast %556 : vector<1x128xf32> to vector<8x128xf32>
    %695 = arith.mulf %691, %694 : vector<8x128xf32>
    %696 = arith.select %693, %691, %695 : vector<8x128xi1>, vector<8x128xf32>
    %697 = vector.extract_strided_slice %696 {offsets = [0, 0], sizes = [2, 128], strides = [1, 1]} : vector<8x128xf32> to vector<2x128xf32>
    %c10 = arith.constant 10 : index
    %c0_596 = arith.constant 0 : index
    %698 = vector.load %arg14[%c10, %c0_596] : memref<24x128xf32, #tpu.memory_space<vmem>>, vector<2x128xf32>
    tpu.vector_store %arg14[%c10, %c0_596], %697 {strides = array<i32>} : memref<24x128xf32, #tpu.memory_space<vmem>>, vector<2x128xf32>,
    %699 = tpu.iota {dimensions = array<i32: 0>} : vector<8x1xi32>
    %c2_i32 = arith.constant 2 : i32
    %c0_i32_597 = arith.constant 0 : i32
    %700 = arith.cmpi eq, %c2_i32, %c0_i32_597 : i32
    %c1_i32_598 = arith.constant 1 : i32
    %701 = arith.select %700, %c1_i32_598, %c2_i32 : i32
    %702 = vector.broadcast %701 : i32 to vector<8x1xi32>
    %703 = arith.remsi %699, %702 : vector<8x1xi32>
    %c0_i32_599 = arith.constant 0 : i32
    %704 = vector.broadcast %c0_i32_599 : i32 to vector<8x1xi32>
    %705 = arith.cmpi ne, %703, %704 : vector<8x1xi32>
    %c0_i32_600 = arith.constant 0 : i32
    %706 = vector.broadcast %c0_i32_600 : i32 to vector<8x1xi32>
    %707 = arith.cmpi slt, %703, %706 : vector<8x1xi32>
    %c0_i32_601 = arith.constant 0 : i32
    %708 = arith.cmpi slt, %701, %c0_i32_601 : i32
    %709 = vector.broadcast %708 : i1 to vector<8x1xi1>
    %710 = vector.broadcast %709 : vector<8x1xi1> to vector<8x1xi1>
    %711 = arith.xori %707, %710 : vector<8x1xi1>
    %712 = arith.andi %711, %705 : vector<8x1xi1>
    %713 = vector.broadcast %701 : i32 to vector<8x1xi32>
    %714 = arith.addi %703, %713 : vector<8x1xi32>
    %715 = arith.select %712, %714, %703 : vector<8x1xi1>, vector<8x1xi32>
    %c0_i32_602 = arith.constant 0 : i32
    %716 = vector.broadcast %c0_i32_602 : i32 to vector<8x1xi32>
    %717 = arith.cmpi ne, %715, %716 : vector<8x1xi32>
    %c1_i32_603 = arith.constant 1 : i32
    %718 = vector.broadcast %c1_i32_603 : i32 to vector<8x1xi32>
    %719 = arith.cmpi ne, %715, %718 : vector<8x1xi32>
    %cst_604 = arith.constant 0.000000e+00 : f32
    %720 = vector.broadcast %cst_604 : f32 to vector<8x128xf32>
    %c5_605 = arith.constant 5 : index
    %c0_606 = arith.constant 0 : index
    %721 = vector.load %arg14[%c5_605, %c0_606] : memref<24x128xf32, #tpu.memory_space<vmem>>, vector<8x128xf32>
    %cst_607 = arith.constant 0.000000e+00 : f32
    %722 = vector.shape_cast %717 : vector<8x1xi1> to vector<8x1xi1>
    %723 = vector.broadcast %722 : vector<8x1xi1> to vector<8x128xi1>
    %724 = vector.broadcast %cst_607 : f32 to vector<8x128xf32>
    %725 = arith.select %723, %721, %724 : vector<8x128xi1>, vector<8x128xf32>
    %726 = arith.truncf %725 : vector<8x128xf32> to vector<8x128xbf16>
    %c4_608 = arith.constant 4 : index
    %c0_609 = arith.constant 0 : index
    %c0_610 = arith.constant 0 : index
    %c0_611 = arith.constant 0 : index
    %727 = vector.load %arg3[%c4_608, %c0_609, %c0_610, %c0_611] : memref<7x9x128x128xbf16, #tpu.memory_space<vmem>>, vector<1x1x128x128xbf16>
    %728 = vector.shape_cast %727 : vector<1x1x128x128xbf16> to vector<128x128xbf16>
    %cst_612 = arith.constant dense<0.000000e+00> : vector<8x128xf32>
    %729 = tpu.matmul %726, %728, %cst_612 {dimension_numbers = #tpu.dot_dimension_numbers<[1], [0], [0], [1], [0, 0, 1, 1], [], []>} : vector<8x128xbf16>, vector<128x128xbf16>, vector<8x128xf32> -> vector<8x128xf32>
    %730 = arith.addf %720, %729 : vector<8x128xf32>
    %c6_613 = arith.constant 6 : index
    %c0_614 = arith.constant 0 : index
    %731 = vector.load %arg14[%c6_613, %c0_614] : memref<24x128xf32, #tpu.memory_space<vmem>>, vector<8x128xf32>
    %732 = arith.truncf %731 : vector<8x128xf32> to vector<8x128xbf16>
    %c4_615 = arith.constant 4 : index
    %c1_616 = arith.constant 1 : index
    %c0_617 = arith.constant 0 : index
    %c0_618 = arith.constant 0 : index
    %733 = vector.load %arg3[%c4_615, %c1_616, %c0_617, %c0_618] : memref<7x9x128x128xbf16, #tpu.memory_space<vmem>>, vector<1x1x128x128xbf16>
    %734 = vector.shape_cast %733 : vector<1x1x128x128xbf16> to vector<128x128xbf16>
    %cst_619 = arith.constant dense<0.000000e+00> : vector<8x128xf32>
    %735 = tpu.matmul %732, %734, %cst_619 {dimension_numbers = #tpu.dot_dimension_numbers<[1], [0], [0], [1], [0, 0, 1, 1], [], []>} : vector<8x128xbf16>, vector<128x128xbf16>, vector<8x128xf32> -> vector<8x128xf32>
    %736 = arith.addf %730, %735 : vector<8x128xf32>
    %c7_620 = arith.constant 7 : index
    %c0_621 = arith.constant 0 : index
    %737 = vector.load %arg14[%c7_620, %c0_621] : memref<24x128xf32, #tpu.memory_space<vmem>>, vector<8x128xf32>
    %cst_622 = arith.constant 0.000000e+00 : f32
    %738 = vector.shape_cast %719 : vector<8x1xi1> to vector<8x1xi1>
    %739 = vector.broadcast %738 : vector<8x1xi1> to vector<8x128xi1>
    %740 = vector.broadcast %cst_622 : f32 to vector<8x128xf32>
    %741 = arith.select %739, %737, %740 : vector<8x128xi1>, vector<8x128xf32>
    %742 = arith.truncf %741 : vector<8x128xf32> to vector<8x128xbf16>
    %c4_623 = arith.constant 4 : index
    %c2_624 = arith.constant 2 : index
    %c0_625 = arith.constant 0 : index
    %c0_626 = arith.constant 0 : index
    %743 = vector.load %arg3[%c4_623, %c2_624, %c0_625, %c0_626] : memref<7x9x128x128xbf16, #tpu.memory_space<vmem>>, vector<1x1x128x128xbf16>
    %744 = vector.shape_cast %743 : vector<1x1x128x128xbf16> to vector<128x128xbf16>
    %cst_627 = arith.constant dense<0.000000e+00> : vector<8x128xf32>
    %745 = tpu.matmul %742, %744, %cst_627 {dimension_numbers = #tpu.dot_dimension_numbers<[1], [0], [0], [1], [0, 0, 1, 1], [], []>} : vector<8x128xbf16>, vector<128x128xbf16>, vector<8x128xf32> -> vector<8x128xf32>
    %746 = arith.addf %736, %745 : vector<8x128xf32>
    %c7_628 = arith.constant 7 : index
    %c0_629 = arith.constant 0 : index
    %747 = vector.load %arg14[%c7_628, %c0_629] : memref<24x128xf32, #tpu.memory_space<vmem>>, vector<8x128xf32>
    %cst_630 = arith.constant 0.000000e+00 : f32
    %748 = vector.shape_cast %717 : vector<8x1xi1> to vector<8x1xi1>
    %749 = vector.broadcast %748 : vector<8x1xi1> to vector<8x128xi1>
    %750 = vector.broadcast %cst_630 : f32 to vector<8x128xf32>
    %751 = arith.select %749, %747, %750 : vector<8x128xi1>, vector<8x128xf32>
    %752 = arith.truncf %751 : vector<8x128xf32> to vector<8x128xbf16>
    %c4_631 = arith.constant 4 : index
    %c3_632 = arith.constant 3 : index
    %c0_633 = arith.constant 0 : index
    %c0_634 = arith.constant 0 : index
    %753 = vector.load %arg3[%c4_631, %c3_632, %c0_633, %c0_634] : memref<7x9x128x128xbf16, #tpu.memory_space<vmem>>, vector<1x1x128x128xbf16>
    %754 = vector.shape_cast %753 : vector<1x1x128x128xbf16> to vector<128x128xbf16>
    %cst_635 = arith.constant dense<0.000000e+00> : vector<8x128xf32>
    %755 = tpu.matmul %752, %754, %cst_635 {dimension_numbers = #tpu.dot_dimension_numbers<[1], [0], [0], [1], [0, 0, 1, 1], [], []>} : vector<8x128xbf16>, vector<128x128xbf16>, vector<8x128xf32> -> vector<8x128xf32>
    %756 = arith.addf %746, %755 : vector<8x128xf32>
    %c8_636 = arith.constant 8 : index
    %c0_637 = arith.constant 0 : index
    %757 = vector.load %arg14[%c8_636, %c0_637] : memref<24x128xf32, #tpu.memory_space<vmem>>, vector<8x128xf32>
    %758 = arith.truncf %757 : vector<8x128xf32> to vector<8x128xbf16>
    %c4_638 = arith.constant 4 : index
    %c4_639 = arith.constant 4 : index
    %c0_640 = arith.constant 0 : index
    %c0_641 = arith.constant 0 : index
    %759 = vector.load %arg3[%c4_638, %c4_639, %c0_640, %c0_641] : memref<7x9x128x128xbf16, #tpu.memory_space<vmem>>, vector<1x1x128x128xbf16>
    %760 = vector.shape_cast %759 : vector<1x1x128x128xbf16> to vector<128x128xbf16>
    %cst_642 = arith.constant dense<0.000000e+00> : vector<8x128xf32>
    %761 = tpu.matmul %758, %760, %cst_642 {dimension_numbers = #tpu.dot_dimension_numbers<[1], [0], [0], [1], [0, 0, 1, 1], [], []>} : vector<8x128xbf16>, vector<128x128xbf16>, vector<8x128xf32> -> vector<8x128xf32>
    %762 = arith.addf %756, %761 : vector<8x128xf32>
    %c9_643 = arith.constant 9 : index
    %c0_644 = arith.constant 0 : index
    %763 = vector.load %arg14[%c9_643, %c0_644] : memref<24x128xf32, #tpu.memory_space<vmem>>, vector<8x128xf32>
    %cst_645 = arith.constant 0.000000e+00 : f32
    %764 = vector.shape_cast %719 : vector<8x1xi1> to vector<8x1xi1>
    %765 = vector.broadcast %764 : vector<8x1xi1> to vector<8x128xi1>
    %766 = vector.broadcast %cst_645 : f32 to vector<8x128xf32>
    %767 = arith.select %765, %763, %766 : vector<8x128xi1>, vector<8x128xf32>
    %768 = arith.truncf %767 : vector<8x128xf32> to vector<8x128xbf16>
    %c4_646 = arith.constant 4 : index
    %c5_647 = arith.constant 5 : index
    %c0_648 = arith.constant 0 : index
    %c0_649 = arith.constant 0 : index
    %769 = vector.load %arg3[%c4_646, %c5_647, %c0_648, %c0_649] : memref<7x9x128x128xbf16, #tpu.memory_space<vmem>>, vector<1x1x128x128xbf16>
    %770 = vector.shape_cast %769 : vector<1x1x128x128xbf16> to vector<128x128xbf16>
    %cst_650 = arith.constant dense<0.000000e+00> : vector<8x128xf32>
    %771 = tpu.matmul %768, %770, %cst_650 {dimension_numbers = #tpu.dot_dimension_numbers<[1], [0], [0], [1], [0, 0, 1, 1], [], []>} : vector<8x128xbf16>, vector<128x128xbf16>, vector<8x128xf32> -> vector<8x128xf32>
    %772 = arith.addf %762, %771 : vector<8x128xf32>
    %c9_651 = arith.constant 9 : index
    %c0_652 = arith.constant 0 : index
    %773 = vector.load %arg14[%c9_651, %c0_652] : memref<24x128xf32, #tpu.memory_space<vmem>>, vector<8x128xf32>
    %cst_653 = arith.constant 0.000000e+00 : f32
    %774 = vector.shape_cast %717 : vector<8x1xi1> to vector<8x1xi1>
    %775 = vector.broadcast %774 : vector<8x1xi1> to vector<8x128xi1>
    %776 = vector.broadcast %cst_653 : f32 to vector<8x128xf32>
    %777 = arith.select %775, %773, %776 : vector<8x128xi1>, vector<8x128xf32>
    %778 = arith.truncf %777 : vector<8x128xf32> to vector<8x128xbf16>
    %c4_654 = arith.constant 4 : index
    %c6_655 = arith.constant 6 : index
    %c0_656 = arith.constant 0 : index
    %c0_657 = arith.constant 0 : index
    %779 = vector.load %arg3[%c4_654, %c6_655, %c0_656, %c0_657] : memref<7x9x128x128xbf16, #tpu.memory_space<vmem>>, vector<1x1x128x128xbf16>
    %780 = vector.shape_cast %779 : vector<1x1x128x128xbf16> to vector<128x128xbf16>
    %cst_658 = arith.constant dense<0.000000e+00> : vector<8x128xf32>
    %781 = tpu.matmul %778, %780, %cst_658 {dimension_numbers = #tpu.dot_dimension_numbers<[1], [0], [0], [1], [0, 0, 1, 1], [], []>} : vector<8x128xbf16>, vector<128x128xbf16>, vector<8x128xf32> -> vector<8x128xf32>
    %782 = arith.addf %772, %781 : vector<8x128xf32>
    %c10_659 = arith.constant 10 : index
    %c0_660 = arith.constant 0 : index
    %783 = vector.load %arg14[%c10_659, %c0_660] : memref<24x128xf32, #tpu.memory_space<vmem>>, vector<8x128xf32>
    %784 = arith.truncf %783 : vector<8x128xf32> to vector<8x128xbf16>
    %c4_661 = arith.constant 4 : index
    %c7_662 = arith.constant 7 : index
    %c0_663 = arith.constant 0 : index
    %c0_664 = arith.constant 0 : index
    %785 = vector.load %arg3[%c4_661, %c7_662, %c0_663, %c0_664] : memref<7x9x128x128xbf16, #tpu.memory_space<vmem>>, vector<1x1x128x128xbf16>
    %786 = vector.shape_cast %785 : vector<1x1x128x128xbf16> to vector<128x128xbf16>
    %cst_665 = arith.constant dense<0.000000e+00> : vector<8x128xf32>
    %787 = tpu.matmul %784, %786, %cst_665 {dimension_numbers = #tpu.dot_dimension_numbers<[1], [0], [0], [1], [0, 0, 1, 1], [], []>} : vector<8x128xbf16>, vector<128x128xbf16>, vector<8x128xf32> -> vector<8x128xf32>
    %788 = arith.addf %782, %787 : vector<8x128xf32>
    %c11_666 = arith.constant 11 : index
    %c0_667 = arith.constant 0 : index
    %789 = vector.load %arg14[%c11_666, %c0_667] : memref<24x128xf32, #tpu.memory_space<vmem>>, vector<8x128xf32>
    %cst_668 = arith.constant 0.000000e+00 : f32
    %790 = vector.shape_cast %719 : vector<8x1xi1> to vector<8x1xi1>
    %791 = vector.broadcast %790 : vector<8x1xi1> to vector<8x128xi1>
    %792 = vector.broadcast %cst_668 : f32 to vector<8x128xf32>
    %793 = arith.select %791, %789, %792 : vector<8x128xi1>, vector<8x128xf32>
    %794 = arith.truncf %793 : vector<8x128xf32> to vector<8x128xbf16>
    %c4_669 = arith.constant 4 : index
    %c8_670 = arith.constant 8 : index
    %c0_671 = arith.constant 0 : index
    %c0_672 = arith.constant 0 : index
    %795 = vector.load %arg3[%c4_669, %c8_670, %c0_671, %c0_672] : memref<7x9x128x128xbf16, #tpu.memory_space<vmem>>, vector<1x1x128x128xbf16>
    %796 = vector.shape_cast %795 : vector<1x1x128x128xbf16> to vector<128x128xbf16>
    %cst_673 = arith.constant dense<0.000000e+00> : vector<8x128xf32>
    %797 = tpu.matmul %794, %796, %cst_673 {dimension_numbers = #tpu.dot_dimension_numbers<[1], [0], [0], [1], [0, 0, 1, 1], [], []>} : vector<8x128xbf16>, vector<128x128xbf16>, vector<8x128xf32> -> vector<8x128xf32>
    %798 = arith.addf %788, %797 : vector<8x128xf32>
    %799 = vector.broadcast %557 : vector<1x128xf32> to vector<8x128xf32>
    %800 = arith.addf %798, %799 : vector<8x128xf32>
    %cst_674 = arith.constant 0.000000e+00 : f32
    %801 = vector.broadcast %cst_674 : f32 to vector<8x128xf32>
    %802 = arith.cmpf oge, %800, %801 : vector<8x128xf32>
    %803 = vector.broadcast %558 : vector<1x128xf32> to vector<8x128xf32>
    %804 = arith.mulf %800, %803 : vector<8x128xf32>
    %805 = arith.select %802, %800, %804 : vector<8x128xi1>, vector<8x128xf32>
    %c0_675 = arith.constant 0 : index
    %c0_676 = arith.constant 0 : index
    %c0_677 = arith.constant 0 : index
    %806 = vector.load %arg8[%c0_675, %c0_676, %c0_677] : memref<1x8x128xf32, #tpu.memory_space<vmem>>, vector<1x8x128xf32>
    %807 = vector.shape_cast %806 : vector<1x8x128xf32> to vector<8x128xf32>
    %808 = vector.shape_cast %805 : vector<8x128xf32> to vector<1x8x128xf32>
    tpu.vector_store %arg8[%c0_675, %c0_676, %c0_677], %808 {strides = array<i32>} : memref<1x8x128xf32, #tpu.memory_space<vmem>>, vector<1x8x128xf32>,
    %c8_678 = arith.constant 8 : index
    %c0_679 = arith.constant 0 : index
    %809 = vector.load %arg15[%c8_678, %c0_679] : memref<32x128xf32, #tpu.memory_space<vmem>>, vector<8x128xf32>
    tpu.vector_store %arg15[%c8_678, %c0_679], %805 {strides = array<i32>} : memref<32x128xf32, #tpu.memory_space<vmem>>, vector<8x128xf32>,
    %c6_680 = arith.constant 6 : index
    %c0_681 = arith.constant 0 : index
    %810 = vector.load %arg4[%c6_680, %c0_681] : memref<8x128xf32, #tpu.memory_space<vmem>>, vector<1x128xf32>
    %c6_682 = arith.constant 6 : index
    %c0_683 = arith.constant 0 : index
    %811 = vector.load %arg5[%c6_682, %c0_683] : memref<8x128xf32, #tpu.memory_space<vmem>>, vector<1x128xf32>
    %c7_684 = arith.constant 7 : index
    %c0_685 = arith.constant 0 : index
    %812 = vector.load %arg4[%c7_684, %c0_685] : memref<8x128xf32, #tpu.memory_space<vmem>>, vector<1x128xf32>
    %c7_686 = arith.constant 7 : index
    %c0_687 = arith.constant 0 : index
    %813 = vector.load %arg5[%c7_686, %c0_687] : memref<8x128xf32, #tpu.memory_space<vmem>>, vector<1x128xf32>
    %cst_688 = arith.constant 0.000000e+00 : f32
    %814 = vector.broadcast %cst_688 : f32 to vector<8x128xf32>
    %c5_689 = arith.constant 5 : index
    %c0_690 = arith.constant 0 : index
    %815 = tpu.strided_load %arg15[%c5_689, %c0_690] {strides = array<i32: 2, 1>} : memref<32x128xf32, #tpu.memory_space<vmem>>, vector<8x128xf32>
    %816 = vector.broadcast %32 : vector<8x1xf32> to vector<8x128xf32>
    %817 = arith.mulf %815, %816 : vector<8x128xf32>
    %818 = arith.truncf %817 : vector<8x128xf32> to vector<8x128xbf16>
    %c5_691 = arith.constant 5 : index
    %c0_692 = arith.constant 0 : index
    %c0_693 = arith.constant 0 : index
    %c0_694 = arith.constant 0 : index
    %819 = vector.load %arg3[%c5_691, %c0_692, %c0_693, %c0_694] : memref<7x9x128x128xbf16, #tpu.memory_space<vmem>>, vector<1x1x128x128xbf16>
    %820 = vector.shape_cast %819 : vector<1x1x128x128xbf16> to vector<128x128xbf16>
    %cst_695 = arith.constant dense<0.000000e+00> : vector<8x128xf32>
    %821 = tpu.matmul %818, %820, %cst_695 {dimension_numbers = #tpu.dot_dimension_numbers<[1], [0], [0], [1], [0, 0, 1, 1], [], []>} : vector<8x128xbf16>, vector<128x128xbf16>, vector<8x128xf32> -> vector<8x128xf32>
    %822 = arith.addf %814, %821 : vector<8x128xf32>
    %c6_696 = arith.constant 6 : index
    %c0_697 = arith.constant 0 : index
    %823 = tpu.strided_load %arg15[%c6_696, %c0_697] {strides = array<i32: 2, 1>} : memref<32x128xf32, #tpu.memory_space<vmem>>, vector<8x128xf32>
    %824 = arith.truncf %823 : vector<8x128xf32> to vector<8x128xbf16>
    %c5_698 = arith.constant 5 : index
    %c1_699 = arith.constant 1 : index
    %c0_700 = arith.constant 0 : index
    %c0_701 = arith.constant 0 : index
    %825 = vector.load %arg3[%c5_698, %c1_699, %c0_700, %c0_701] : memref<7x9x128x128xbf16, #tpu.memory_space<vmem>>, vector<1x1x128x128xbf16>
    %826 = vector.shape_cast %825 : vector<1x1x128x128xbf16> to vector<128x128xbf16>
    %cst_702 = arith.constant dense<0.000000e+00> : vector<8x128xf32>
    %827 = tpu.matmul %824, %826, %cst_702 {dimension_numbers = #tpu.dot_dimension_numbers<[1], [0], [0], [1], [0, 0, 1, 1], [], []>} : vector<8x128xbf16>, vector<128x128xbf16>, vector<8x128xf32> -> vector<8x128xf32>
    %828 = arith.addf %822, %827 : vector<8x128xf32>
    %c7_703 = arith.constant 7 : index
    %c0_704 = arith.constant 0 : index
    %829 = tpu.strided_load %arg15[%c7_703, %c0_704] {strides = array<i32: 2, 1>} : memref<32x128xf32, #tpu.memory_space<vmem>>, vector<8x128xf32>
    %830 = arith.truncf %829 : vector<8x128xf32> to vector<8x128xbf16>
    %c5_705 = arith.constant 5 : index
    %c2_706 = arith.constant 2 : index
    %c0_707 = arith.constant 0 : index
    %c0_708 = arith.constant 0 : index
    %831 = vector.load %arg3[%c5_705, %c2_706, %c0_707, %c0_708] : memref<7x9x128x128xbf16, #tpu.memory_space<vmem>>, vector<1x1x128x128xbf16>
    %832 = vector.shape_cast %831 : vector<1x1x128x128xbf16> to vector<128x128xbf16>
    %cst_709 = arith.constant dense<0.000000e+00> : vector<8x128xf32>
    %833 = tpu.matmul %830, %832, %cst_709 {dimension_numbers = #tpu.dot_dimension_numbers<[1], [0], [0], [1], [0, 0, 1, 1], [], []>} : vector<8x128xbf16>, vector<128x128xbf16>, vector<8x128xf32> -> vector<8x128xf32>
    %834 = arith.addf %828, %833 : vector<8x128xf32>
    %c7_710 = arith.constant 7 : index
    %c0_711 = arith.constant 0 : index
    %835 = tpu.strided_load %arg15[%c7_710, %c0_711] {strides = array<i32: 2, 1>} : memref<32x128xf32, #tpu.memory_space<vmem>>, vector<8x128xf32>
    %836 = vector.broadcast %32 : vector<8x1xf32> to vector<8x128xf32>
    %837 = arith.mulf %835, %836 : vector<8x128xf32>
    %838 = arith.truncf %837 : vector<8x128xf32> to vector<8x128xbf16>
    %c5_712 = arith.constant 5 : index
    %c3_713 = arith.constant 3 : index
    %c0_714 = arith.constant 0 : index
    %c0_715 = arith.constant 0 : index
    %839 = vector.load %arg3[%c5_712, %c3_713, %c0_714, %c0_715] : memref<7x9x128x128xbf16, #tpu.memory_space<vmem>>, vector<1x1x128x128xbf16>
    %840 = vector.shape_cast %839 : vector<1x1x128x128xbf16> to vector<128x128xbf16>
    %cst_716 = arith.constant dense<0.000000e+00> : vector<8x128xf32>
    %841 = tpu.matmul %838, %840, %cst_716 {dimension_numbers = #tpu.dot_dimension_numbers<[1], [0], [0], [1], [0, 0, 1, 1], [], []>} : vector<8x128xbf16>, vector<128x128xbf16>, vector<8x128xf32> -> vector<8x128xf32>
    %842 = arith.addf %834, %841 : vector<8x128xf32>
    %c8_717 = arith.constant 8 : index
    %c0_718 = arith.constant 0 : index
    %843 = tpu.strided_load %arg15[%c8_717, %c0_718] {strides = array<i32: 2, 1>} : memref<32x128xf32, #tpu.memory_space<vmem>>, vector<8x128xf32>
    %844 = arith.truncf %843 : vector<8x128xf32> to vector<8x128xbf16>
    %c5_719 = arith.constant 5 : index
    %c4_720 = arith.constant 4 : index
    %c0_721 = arith.constant 0 : index
    %c0_722 = arith.constant 0 : index
    %845 = vector.load %arg3[%c5_719, %c4_720, %c0_721, %c0_722] : memref<7x9x128x128xbf16, #tpu.memory_space<vmem>>, vector<1x1x128x128xbf16>
    %846 = vector.shape_cast %845 : vector<1x1x128x128xbf16> to vector<128x128xbf16>
    %cst_723 = arith.constant dense<0.000000e+00> : vector<8x128xf32>
    %847 = tpu.matmul %844, %846, %cst_723 {dimension_numbers = #tpu.dot_dimension_numbers<[1], [0], [0], [1], [0, 0, 1, 1], [], []>} : vector<8x128xbf16>, vector<128x128xbf16>, vector<8x128xf32> -> vector<8x128xf32>
    %848 = arith.addf %842, %847 : vector<8x128xf32>
    %c9_724 = arith.constant 9 : index
    %c0_725 = arith.constant 0 : index
    %849 = tpu.strided_load %arg15[%c9_724, %c0_725] {strides = array<i32: 2, 1>} : memref<32x128xf32, #tpu.memory_space<vmem>>, vector<8x128xf32>
    %850 = arith.truncf %849 : vector<8x128xf32> to vector<8x128xbf16>
    %c5_726 = arith.constant 5 : index
    %c5_727 = arith.constant 5 : index
    %c0_728 = arith.constant 0 : index
    %c0_729 = arith.constant 0 : index
    %851 = vector.load %arg3[%c5_726, %c5_727, %c0_728, %c0_729] : memref<7x9x128x128xbf16, #tpu.memory_space<vmem>>, vector<1x1x128x128xbf16>
    %852 = vector.shape_cast %851 : vector<1x1x128x128xbf16> to vector<128x128xbf16>
    %cst_730 = arith.constant dense<0.000000e+00> : vector<8x128xf32>
    %853 = tpu.matmul %850, %852, %cst_730 {dimension_numbers = #tpu.dot_dimension_numbers<[1], [0], [0], [1], [0, 0, 1, 1], [], []>} : vector<8x128xbf16>, vector<128x128xbf16>, vector<8x128xf32> -> vector<8x128xf32>
    %854 = arith.addf %848, %853 : vector<8x128xf32>
    %c9_731 = arith.constant 9 : index
    %c0_732 = arith.constant 0 : index
    %855 = tpu.strided_load %arg15[%c9_731, %c0_732] {strides = array<i32: 2, 1>} : memref<32x128xf32, #tpu.memory_space<vmem>>, vector<8x128xf32>
    %856 = vector.broadcast %32 : vector<8x1xf32> to vector<8x128xf32>
    %857 = arith.mulf %855, %856 : vector<8x128xf32>
    %858 = arith.truncf %857 : vector<8x128xf32> to vector<8x128xbf16>
    %c5_733 = arith.constant 5 : index
    %c6_734 = arith.constant 6 : index
    %c0_735 = arith.constant 0 : index
    %c0_736 = arith.constant 0 : index
    %859 = vector.load %arg3[%c5_733, %c6_734, %c0_735, %c0_736] : memref<7x9x128x128xbf16, #tpu.memory_space<vmem>>, vector<1x1x128x128xbf16>
    %860 = vector.shape_cast %859 : vector<1x1x128x128xbf16> to vector<128x128xbf16>
    %cst_737 = arith.constant dense<0.000000e+00> : vector<8x128xf32>
    %861 = tpu.matmul %858, %860, %cst_737 {dimension_numbers = #tpu.dot_dimension_numbers<[1], [0], [0], [1], [0, 0, 1, 1], [], []>} : vector<8x128xbf16>, vector<128x128xbf16>, vector<8x128xf32> -> vector<8x128xf32>
    %862 = arith.addf %854, %861 : vector<8x128xf32>
    %c10_738 = arith.constant 10 : index
    %c0_739 = arith.constant 0 : index
    %863 = tpu.strided_load %arg15[%c10_738, %c0_739] {strides = array<i32: 2, 1>} : memref<32x128xf32, #tpu.memory_space<vmem>>, vector<8x128xf32>
    %864 = arith.truncf %863 : vector<8x128xf32> to vector<8x128xbf16>
    %c5_740 = arith.constant 5 : index
    %c7_741 = arith.constant 7 : index
    %c0_742 = arith.constant 0 : index
    %c0_743 = arith.constant 0 : index
    %865 = vector.load %arg3[%c5_740, %c7_741, %c0_742, %c0_743] : memref<7x9x128x128xbf16, #tpu.memory_space<vmem>>, vector<1x1x128x128xbf16>
    %866 = vector.shape_cast %865 : vector<1x1x128x128xbf16> to vector<128x128xbf16>
    %cst_744 = arith.constant dense<0.000000e+00> : vector<8x128xf32>
    %867 = tpu.matmul %864, %866, %cst_744 {dimension_numbers = #tpu.dot_dimension_numbers<[1], [0], [0], [1], [0, 0, 1, 1], [], []>} : vector<8x128xbf16>, vector<128x128xbf16>, vector<8x128xf32> -> vector<8x128xf32>
    %868 = arith.addf %862, %867 : vector<8x128xf32>
    %c11_745 = arith.constant 11 : index
    %c0_746 = arith.constant 0 : index
    %869 = tpu.strided_load %arg15[%c11_745, %c0_746] {strides = array<i32: 2, 1>} : memref<32x128xf32, #tpu.memory_space<vmem>>, vector<8x128xf32>
    %870 = arith.truncf %869 : vector<8x128xf32> to vector<8x128xbf16>
    %c5_747 = arith.constant 5 : index
    %c8_748 = arith.constant 8 : index
    %c0_749 = arith.constant 0 : index
    %c0_750 = arith.constant 0 : index
    %871 = vector.load %arg3[%c5_747, %c8_748, %c0_749, %c0_750] : memref<7x9x128x128xbf16, #tpu.memory_space<vmem>>, vector<1x1x128x128xbf16>
    %872 = vector.shape_cast %871 : vector<1x1x128x128xbf16> to vector<128x128xbf16>
    %cst_751 = arith.constant dense<0.000000e+00> : vector<8x128xf32>
    %873 = tpu.matmul %870, %872, %cst_751 {dimension_numbers = #tpu.dot_dimension_numbers<[1], [0], [0], [1], [0, 0, 1, 1], [], []>} : vector<8x128xbf16>, vector<128x128xbf16>, vector<8x128xf32> -> vector<8x128xf32>
    %874 = arith.addf %868, %873 : vector<8x128xf32>
    %875 = vector.broadcast %810 : vector<1x128xf32> to vector<8x128xf32>
    %876 = arith.addf %874, %875 : vector<8x128xf32>
    %cst_752 = arith.constant 0.000000e+00 : f32
    %877 = vector.broadcast %cst_752 : f32 to vector<8x128xf32>
    %878 = arith.cmpf oge, %876, %877 : vector<8x128xf32>
    %879 = vector.broadcast %811 : vector<1x128xf32> to vector<8x128xf32>
    %880 = arith.mulf %876, %879 : vector<8x128xf32>
    %881 = arith.select %878, %876, %880 : vector<8x128xi1>, vector<8x128xf32>
    %882 = vector.extract_strided_slice %881 {offsets = [0, 0], sizes = [1, 128], strides = [1, 1]} : vector<8x128xf32> to vector<1x128xf32>
    %c8_753 = arith.constant 8 : index
    %c0_754 = arith.constant 0 : index
    %883 = vector.load %arg16[%c8_753, %c0_754] : memref<24x128xf32, #tpu.memory_space<vmem>>, vector<1x128xf32>
    tpu.vector_store %arg16[%c8_753, %c0_754], %882 {strides = array<i32>} : memref<24x128xf32, #tpu.memory_space<vmem>>, vector<1x128xf32>,
    %884 = tpu.iota {dimensions = array<i32: 0>} : vector<8x1xi32>
    %c1_i32_755 = arith.constant 1 : i32
    %c0_i32_756 = arith.constant 0 : i32
    %885 = arith.cmpi eq, %c1_i32_755, %c0_i32_756 : i32
    %c1_i32_757 = arith.constant 1 : i32
    %886 = arith.select %885, %c1_i32_757, %c1_i32_755 : i32
    %887 = vector.broadcast %886 : i32 to vector<8x1xi32>
    %888 = arith.remsi %884, %887 : vector<8x1xi32>
    %c0_i32_758 = arith.constant 0 : i32
    %889 = vector.broadcast %c0_i32_758 : i32 to vector<8x1xi32>
    %890 = arith.cmpi ne, %888, %889 : vector<8x1xi32>
    %c0_i32_759 = arith.constant 0 : i32
    %891 = vector.broadcast %c0_i32_759 : i32 to vector<8x1xi32>
    %892 = arith.cmpi slt, %888, %891 : vector<8x1xi32>
    %c0_i32_760 = arith.constant 0 : i32
    %893 = arith.cmpi slt, %886, %c0_i32_760 : i32
    %894 = vector.broadcast %893 : i1 to vector<8x1xi1>
    %895 = vector.broadcast %894 : vector<8x1xi1> to vector<8x1xi1>
    %896 = arith.xori %892, %895 : vector<8x1xi1>
    %897 = arith.andi %896, %890 : vector<8x1xi1>
    %898 = vector.broadcast %886 : i32 to vector<8x1xi32>
    %899 = arith.addi %888, %898 : vector<8x1xi32>
    %900 = arith.select %897, %899, %888 : vector<8x1xi1>, vector<8x1xi32>
    %c0_i32_761 = arith.constant 0 : i32
    %901 = vector.broadcast %c0_i32_761 : i32 to vector<8x1xi32>
    %902 = arith.cmpi ne, %900, %901 : vector<8x1xi32>
    %c0_i32_762 = arith.constant 0 : i32
    %903 = vector.broadcast %c0_i32_762 : i32 to vector<8x1xi32>
    %904 = arith.cmpi ne, %900, %903 : vector<8x1xi32>
    %cst_763 = arith.constant 0.000000e+00 : f32
    %905 = vector.broadcast %cst_763 : f32 to vector<8x128xf32>
    %c6_764 = arith.constant 6 : index
    %c0_765 = arith.constant 0 : index
    %906 = vector.load %arg16[%c6_764, %c0_765] : memref<24x128xf32, #tpu.memory_space<vmem>>, vector<8x128xf32>
    %cst_766 = arith.constant 0.000000e+00 : f32
    %907 = vector.shape_cast %902 : vector<8x1xi1> to vector<8x1xi1>
    %908 = vector.broadcast %907 : vector<8x1xi1> to vector<8x128xi1>
    %909 = vector.broadcast %cst_766 : f32 to vector<8x128xf32>
    %910 = arith.select %908, %906, %909 : vector<8x128xi1>, vector<8x128xf32>
    %911 = arith.truncf %910 : vector<8x128xf32> to vector<8x128xbf16>
    %c6_767 = arith.constant 6 : index
    %c0_768 = arith.constant 0 : index
    %c0_769 = arith.constant 0 : index
    %c0_770 = arith.constant 0 : index
    %912 = vector.load %arg3[%c6_767, %c0_768, %c0_769, %c0_770] : memref<7x9x128x128xbf16, #tpu.memory_space<vmem>>, vector<1x1x128x128xbf16>
    %913 = vector.shape_cast %912 : vector<1x1x128x128xbf16> to vector<128x128xbf16>
    %cst_771 = arith.constant dense<0.000000e+00> : vector<8x128xf32>
    %914 = tpu.matmul %911, %913, %cst_771 {dimension_numbers = #tpu.dot_dimension_numbers<[1], [0], [0], [1], [0, 0, 1, 1], [], []>} : vector<8x128xbf16>, vector<128x128xbf16>, vector<8x128xf32> -> vector<8x128xf32>
    %915 = arith.addf %905, %914 : vector<8x128xf32>
    %c7_772 = arith.constant 7 : index
    %c0_773 = arith.constant 0 : index
    %916 = vector.load %arg16[%c7_772, %c0_773] : memref<24x128xf32, #tpu.memory_space<vmem>>, vector<8x128xf32>
    %917 = arith.truncf %916 : vector<8x128xf32> to vector<8x128xbf16>
    %c6_774 = arith.constant 6 : index
    %c1_775 = arith.constant 1 : index
    %c0_776 = arith.constant 0 : index
    %c0_777 = arith.constant 0 : index
    %918 = vector.load %arg3[%c6_774, %c1_775, %c0_776, %c0_777] : memref<7x9x128x128xbf16, #tpu.memory_space<vmem>>, vector<1x1x128x128xbf16>
    %919 = vector.shape_cast %918 : vector<1x1x128x128xbf16> to vector<128x128xbf16>
    %cst_778 = arith.constant dense<0.000000e+00> : vector<8x128xf32>
    %920 = tpu.matmul %917, %919, %cst_778 {dimension_numbers = #tpu.dot_dimension_numbers<[1], [0], [0], [1], [0, 0, 1, 1], [], []>} : vector<8x128xbf16>, vector<128x128xbf16>, vector<8x128xf32> -> vector<8x128xf32>
    %921 = arith.addf %915, %920 : vector<8x128xf32>
    %c8_779 = arith.constant 8 : index
    %c0_780 = arith.constant 0 : index
    %922 = vector.load %arg16[%c8_779, %c0_780] : memref<24x128xf32, #tpu.memory_space<vmem>>, vector<8x128xf32>
    %cst_781 = arith.constant 0.000000e+00 : f32
    %923 = vector.shape_cast %904 : vector<8x1xi1> to vector<8x1xi1>
    %924 = vector.broadcast %923 : vector<8x1xi1> to vector<8x128xi1>
    %925 = vector.broadcast %cst_781 : f32 to vector<8x128xf32>
    %926 = arith.select %924, %922, %925 : vector<8x128xi1>, vector<8x128xf32>
    %927 = arith.truncf %926 : vector<8x128xf32> to vector<8x128xbf16>
    %c6_782 = arith.constant 6 : index
    %c2_783 = arith.constant 2 : index
    %c0_784 = arith.constant 0 : index
    %c0_785 = arith.constant 0 : index
    %928 = vector.load %arg3[%c6_782, %c2_783, %c0_784, %c0_785] : memref<7x9x128x128xbf16, #tpu.memory_space<vmem>>, vector<1x1x128x128xbf16>
    %929 = vector.shape_cast %928 : vector<1x1x128x128xbf16> to vector<128x128xbf16>
    %cst_786 = arith.constant dense<0.000000e+00> : vector<8x128xf32>
    %930 = tpu.matmul %927, %929, %cst_786 {dimension_numbers = #tpu.dot_dimension_numbers<[1], [0], [0], [1], [0, 0, 1, 1], [], []>} : vector<8x128xbf16>, vector<128x128xbf16>, vector<8x128xf32> -> vector<8x128xf32>
    %931 = arith.addf %921, %930 : vector<8x128xf32>
    %c7_787 = arith.constant 7 : index
    %c0_788 = arith.constant 0 : index
    %932 = vector.load %arg16[%c7_787, %c0_788] : memref<24x128xf32, #tpu.memory_space<vmem>>, vector<8x128xf32>
    %cst_789 = arith.constant 0.000000e+00 : f32
    %933 = vector.shape_cast %902 : vector<8x1xi1> to vector<8x1xi1>
    %934 = vector.broadcast %933 : vector<8x1xi1> to vector<8x128xi1>
    %935 = vector.broadcast %cst_789 : f32 to vector<8x128xf32>
    %936 = arith.select %934, %932, %935 : vector<8x128xi1>, vector<8x128xf32>
    %937 = arith.truncf %936 : vector<8x128xf32> to vector<8x128xbf16>
    %c6_790 = arith.constant 6 : index
    %c3_791 = arith.constant 3 : index
    %c0_792 = arith.constant 0 : index
    %c0_793 = arith.constant 0 : index
    %938 = vector.load %arg3[%c6_790, %c3_791, %c0_792, %c0_793] : memref<7x9x128x128xbf16, #tpu.memory_space<vmem>>, vector<1x1x128x128xbf16>
    %939 = vector.shape_cast %938 : vector<1x1x128x128xbf16> to vector<128x128xbf16>
    %cst_794 = arith.constant dense<0.000000e+00> : vector<8x128xf32>
    %940 = tpu.matmul %937, %939, %cst_794 {dimension_numbers = #tpu.dot_dimension_numbers<[1], [0], [0], [1], [0, 0, 1, 1], [], []>} : vector<8x128xbf16>, vector<128x128xbf16>, vector<8x128xf32> -> vector<8x128xf32>
    %941 = arith.addf %931, %940 : vector<8x128xf32>
    %c8_795 = arith.constant 8 : index
    %c0_796 = arith.constant 0 : index
    %942 = vector.load %arg16[%c8_795, %c0_796] : memref<24x128xf32, #tpu.memory_space<vmem>>, vector<8x128xf32>
    %943 = arith.truncf %942 : vector<8x128xf32> to vector<8x128xbf16>
    %c6_797 = arith.constant 6 : index
    %c4_798 = arith.constant 4 : index
    %c0_799 = arith.constant 0 : index
    %c0_800 = arith.constant 0 : index
    %944 = vector.load %arg3[%c6_797, %c4_798, %c0_799, %c0_800] : memref<7x9x128x128xbf16, #tpu.memory_space<vmem>>, vector<1x1x128x128xbf16>
    %945 = vector.shape_cast %944 : vector<1x1x128x128xbf16> to vector<128x128xbf16>
    %cst_801 = arith.constant dense<0.000000e+00> : vector<8x128xf32>
    %946 = tpu.matmul %943, %945, %cst_801 {dimension_numbers = #tpu.dot_dimension_numbers<[1], [0], [0], [1], [0, 0, 1, 1], [], []>} : vector<8x128xbf16>, vector<128x128xbf16>, vector<8x128xf32> -> vector<8x128xf32>
    %947 = arith.addf %941, %946 : vector<8x128xf32>
    %c9_802 = arith.constant 9 : index
    %c0_803 = arith.constant 0 : index
    %948 = vector.load %arg16[%c9_802, %c0_803] : memref<24x128xf32, #tpu.memory_space<vmem>>, vector<8x128xf32>
    %cst_804 = arith.constant 0.000000e+00 : f32
    %949 = vector.shape_cast %904 : vector<8x1xi1> to vector<8x1xi1>
    %950 = vector.broadcast %949 : vector<8x1xi1> to vector<8x128xi1>
    %951 = vector.broadcast %cst_804 : f32 to vector<8x128xf32>
    %952 = arith.select %950, %948, %951 : vector<8x128xi1>, vector<8x128xf32>
    %953 = arith.truncf %952 : vector<8x128xf32> to vector<8x128xbf16>
    %c6_805 = arith.constant 6 : index
    %c5_806 = arith.constant 5 : index
    %c0_807 = arith.constant 0 : index
    %c0_808 = arith.constant 0 : index
    %954 = vector.load %arg3[%c6_805, %c5_806, %c0_807, %c0_808] : memref<7x9x128x128xbf16, #tpu.memory_space<vmem>>, vector<1x1x128x128xbf16>
    %955 = vector.shape_cast %954 : vector<1x1x128x128xbf16> to vector<128x128xbf16>
    %cst_809 = arith.constant dense<0.000000e+00> : vector<8x128xf32>
    %956 = tpu.matmul %953, %955, %cst_809 {dimension_numbers = #tpu.dot_dimension_numbers<[1], [0], [0], [1], [0, 0, 1, 1], [], []>} : vector<8x128xbf16>, vector<128x128xbf16>, vector<8x128xf32> -> vector<8x128xf32>
    %957 = arith.addf %947, %956 : vector<8x128xf32>
    %c8_810 = arith.constant 8 : index
    %c0_811 = arith.constant 0 : index
    %958 = vector.load %arg16[%c8_810, %c0_811] : memref<24x128xf32, #tpu.memory_space<vmem>>, vector<8x128xf32>
    %cst_812 = arith.constant 0.000000e+00 : f32
    %959 = vector.shape_cast %902 : vector<8x1xi1> to vector<8x1xi1>
    %960 = vector.broadcast %959 : vector<8x1xi1> to vector<8x128xi1>
    %961 = vector.broadcast %cst_812 : f32 to vector<8x128xf32>
    %962 = arith.select %960, %958, %961 : vector<8x128xi1>, vector<8x128xf32>
    %963 = arith.truncf %962 : vector<8x128xf32> to vector<8x128xbf16>
    %c6_813 = arith.constant 6 : index
    %c6_814 = arith.constant 6 : index
    %c0_815 = arith.constant 0 : index
    %c0_816 = arith.constant 0 : index
    %964 = vector.load %arg3[%c6_813, %c6_814, %c0_815, %c0_816] : memref<7x9x128x128xbf16, #tpu.memory_space<vmem>>, vector<1x1x128x128xbf16>
    %965 = vector.shape_cast %964 : vector<1x1x128x128xbf16> to vector<128x128xbf16>
    %cst_817 = arith.constant dense<0.000000e+00> : vector<8x128xf32>
    %966 = tpu.matmul %963, %965, %cst_817 {dimension_numbers = #tpu.dot_dimension_numbers<[1], [0], [0], [1], [0, 0, 1, 1], [], []>} : vector<8x128xbf16>, vector<128x128xbf16>, vector<8x128xf32> -> vector<8x128xf32>
    %967 = arith.addf %957, %966 : vector<8x128xf32>
    %c9_818 = arith.constant 9 : index
    %c0_819 = arith.constant 0 : index
    %968 = vector.load %arg16[%c9_818, %c0_819] : memref<24x128xf32, #tpu.memory_space<vmem>>, vector<8x128xf32>
    %969 = arith.truncf %968 : vector<8x128xf32> to vector<8x128xbf16>
    %c6_820 = arith.constant 6 : index
    %c7_821 = arith.constant 7 : index
    %c0_822 = arith.constant 0 : index
    %c0_823 = arith.constant 0 : index
    %970 = vector.load %arg3[%c6_820, %c7_821, %c0_822, %c0_823] : memref<7x9x128x128xbf16, #tpu.memory_space<vmem>>, vector<1x1x128x128xbf16>
    %971 = vector.shape_cast %970 : vector<1x1x128x128xbf16> to vector<128x128xbf16>
    %cst_824 = arith.constant dense<0.000000e+00> : vector<8x128xf32>
    %972 = tpu.matmul %969, %971, %cst_824 {dimension_numbers = #tpu.dot_dimension_numbers<[1], [0], [0], [1], [0, 0, 1, 1], [], []>} : vector<8x128xbf16>, vector<128x128xbf16>, vector<8x128xf32> -> vector<8x128xf32>
    %973 = arith.addf %967, %972 : vector<8x128xf32>
    %c10_825 = arith.constant 10 : index
    %c0_826 = arith.constant 0 : index
    %974 = vector.load %arg16[%c10_825, %c0_826] : memref<24x128xf32, #tpu.memory_space<vmem>>, vector<8x128xf32>
    %cst_827 = arith.constant 0.000000e+00 : f32
    %975 = vector.shape_cast %904 : vector<8x1xi1> to vector<8x1xi1>
    %976 = vector.broadcast %975 : vector<8x1xi1> to vector<8x128xi1>
    %977 = vector.broadcast %cst_827 : f32 to vector<8x128xf32>
    %978 = arith.select %976, %974, %977 : vector<8x128xi1>, vector<8x128xf32>
    %979 = arith.truncf %978 : vector<8x128xf32> to vector<8x128xbf16>
    %c6_828 = arith.constant 6 : index
    %c8_829 = arith.constant 8 : index
    %c0_830 = arith.constant 0 : index
    %c0_831 = arith.constant 0 : index
    %980 = vector.load %arg3[%c6_828, %c8_829, %c0_830, %c0_831] : memref<7x9x128x128xbf16, #tpu.memory_space<vmem>>, vector<1x1x128x128xbf16>
    %981 = vector.shape_cast %980 : vector<1x1x128x128xbf16> to vector<128x128xbf16>
    %cst_832 = arith.constant dense<0.000000e+00> : vector<8x128xf32>
    %982 = tpu.matmul %979, %981, %cst_832 {dimension_numbers = #tpu.dot_dimension_numbers<[1], [0], [0], [1], [0, 0, 1, 1], [], []>} : vector<8x128xbf16>, vector<128x128xbf16>, vector<8x128xf32> -> vector<8x128xf32>
    %983 = arith.addf %973, %982 : vector<8x128xf32>
    %984 = vector.broadcast %812 : vector<1x128xf32> to vector<8x128xf32>
    %985 = arith.addf %983, %984 : vector<8x128xf32>
    %cst_833 = arith.constant 0.000000e+00 : f32
    %986 = vector.broadcast %cst_833 : f32 to vector<8x128xf32>
    %987 = arith.cmpf oge, %985, %986 : vector<8x128xf32>
    %988 = vector.broadcast %813 : vector<1x128xf32> to vector<8x128xf32>
    %989 = arith.mulf %985, %988 : vector<8x128xf32>
    %990 = arith.select %987, %985, %989 : vector<8x128xi1>, vector<8x128xf32>
    %c0_834 = arith.constant 0 : index
    %c0_835 = arith.constant 0 : index
    %c0_836 = arith.constant 0 : index
    %991 = vector.load %arg9[%c0_834, %c0_835, %c0_836] : memref<1x8x128xf32, #tpu.memory_space<vmem>>, vector<1x8x128xf32>
    %992 = vector.shape_cast %991 : vector<1x8x128xf32> to vector<8x128xf32>
    %993 = vector.shape_cast %990 : vector<8x128xf32> to vector<1x8x128xf32>
    tpu.vector_store %arg9[%c0_834, %c0_835, %c0_836], %993 {strides = array<i32>} : memref<1x8x128xf32, #tpu.memory_space<vmem>>, vector<1x8x128xf32>,
    return
  }
  func.func @transform_0(%arg0: i32) -> (i32, i32, i32) {
    %c0_i32 = arith.constant 0 : i32
    %c0_i32_0 = arith.constant 0 : i32
    %c0_i32_1 = arith.constant 0 : i32
    return %arg0, %c0_i32, %c0_i32_0 : i32, i32, i32
  }
  func.func @transform_1(%arg0: i32) -> (i32, i32) {
    %c0_i32 = arith.constant 0 : i32
    %c0_i32_0 = arith.constant 0 : i32
    %c0_i32_1 = arith.constant 0 : i32
    return %c0_i32, %c0_i32_0 : i32, i32
  }
  func.func @transform_2(%arg0: i32) -> (i32, i32, i32, i32) {
    %c0_i32 = arith.constant 0 : i32
    %c0_i32_0 = arith.constant 0 : i32
    %c0_i32_1 = arith.constant 0 : i32
    %c0_i32_2 = arith.constant 0 : i32
    %c0_i32_3 = arith.constant 0 : i32
    return %c0_i32, %c0_i32_0, %c0_i32_1, %c0_i32_2 : i32, i32, i32, i32
  }
  func.func @transform_3(%arg0: i32) -> (i32, i32) {
    %c0_i32 = arith.constant 0 : i32
    %c0_i32_0 = arith.constant 0 : i32
    %c0_i32_1 = arith.constant 0 : i32
    return %c0_i32, %c0_i32_0 : i32, i32
  }
  func.func @transform_4(%arg0: i32) -> (i32, i32) {
    %c0_i32 = arith.constant 0 : i32
    %c0_i32_0 = arith.constant 0 : i32
    %c0_i32_1 = arith.constant 0 : i32
    return %c0_i32, %c0_i32_0 : i32, i32
  }
  func.func @transform_5(%arg0: i32) -> (i32, i32, i32) {
    %c0_i32 = arith.constant 0 : i32
    %c0_i32_0 = arith.constant 0 : i32
    %c0_i32_1 = arith.constant 0 : i32
    return %arg0, %c0_i32, %c0_i32_0 : i32, i32, i32
  }
  func.func @transform_6(%arg0: i32) -> (i32, i32, i32) {
    %c0_i32 = arith.constant 0 : i32
    %c0_i32_0 = arith.constant 0 : i32
    %c0_i32_1 = arith.constant 0 : i32
    return %arg0, %c0_i32, %c0_i32_0 : i32, i32, i32
  }
  func.func @transform_7(%arg0: i32) -> (i32, i32, i32) {
    %c0_i32 = arith.constant 0 : i32
    %c0_i32_0 = arith.constant 0 : i32
    %c0_i32_1 = arith.constant 0 : i32
    return %arg0, %c0_i32, %c0_i32_0 : i32, i32, i32
  }
  func.func @transform_8(%arg0: i32) -> (i32, i32, i32) {
    %c0_i32 = arith.constant 0 : i32
    %c0_i32_0 = arith.constant 0 : i32
    %c0_i32_1 = arith.constant 0 : i32
    return %arg0, %c0_i32, %c0_i32_0 : i32, i32, i32
  }
}

</mosaic_0001>

<bundles_post_ra>
// kernel: contextnet_forward.1
= control target key start
LH: loop header
LB: loop body
LE: loop exit
PB: predicated region body
PF: predicated region fallthrough
CT: control target
= control target key end

     0   :  { %s18672_s27 = smov 0   ;;  %s22605_s0 = inlined_call_operand.vmem [shape: bf16[2,64,128], index: 0, kind: input, shape index: {}]   ;;  %s22606_s1 = inlined_call_operand.vmem [shape: bf16[128,128], index: 1, kind: input, shape index: {}]   ;;  %s22607_s2 = inlined_call_operand.vmem [shape: bf16[7,9,128,128], index: 2, kind: input, shape index: {}]   ;;  %s22608_s3 = inlined_call_operand.vmem [shape: f32[8,128], index: 3, kind: input, shape index: {}]   ;;  %s22609_s4 = inlined_call_operand.vmem [shape: f32[8,128], index: 4, kind: input, shape index: {}]   ;;  %s22610_s5 = inlined_call_operand.vmem [shape: f32[2,64,128], index: 5, kind: output, shape index: {0}]   ;;  %s22611_s6 = inlined_call_operand.vmem [shape: f32[2,16,128], index: 6, kind: output, shape index: {1}]   ;;  %s22612_s7 = inlined_call_operand.vmem [shape: f32[2,8,128], index: 7, kind: output, shape index: {2}]   ;;  %s22613_s8 = inlined_call_operand.vmem [shape: f32[2,8,128], index: 8, kind: output, shape index: {3}]  }
   0x1 LB: > { %s12243_s28 = sadd.s32 4294967295, %s18622_s27   ;;  %p12247_p0 = scmp.ge.s32.totalorder %s18622_s27, 1  ;;  %s18622_s27 = sphi %s18672_s27, %s19_s27  }
   0x2   : > { %p269_p1 = scmp.lt.s32.totalorder %s18622_s27, 3 }
   0x4   : > { %p270_p2 = pnand %p12247_p0, %p269_p1 }
   0x5   : > { %v17803_v0 = vld [vmem:[%s22606_s1] sm:$0xff] (!%p270_p2)   ;;  %p316_p3 = scmp.lt.s32.totalorder (!%p270_p2), %s12243_s28, 1  ;;  %v17804_v1 = vld [vmem:[%s22606_s1 + $0x8] sm:$0xff] (!%p270_p2)   ;;  %v17805_v2 = vld [vmem:[%s22606_s1 + $0x10] sm:$0xff] (!%p270_p2)   ;;  %v18624_v20 = vmov (!%p270_p2), 0.0   ;;  %v362_v23 = vlaneseq (!%p270_p2) }
   0x6   : > { %273 = sbr.rel (%p270_p2) target bundleno = 3523 (0xdc3), region = 40  ;;  %15688 = vmatprep.subr.bf16.mxu0 (!%p270_p2), %v17803_v0  ;;  %v17806_v3 = vld [vmem:[%s22606_s1 + $0x18] sm:$0xff] (!%p270_p2)   ;;  %v17807_v5 = vld [vmem:[%s22606_s1 + $0x20] sm:$0xff] (!%p270_p2)   ;;  %v17816_v7 = vld [vmem:[%s22607_s2 + $0x48] sm:$0xff] (!%p270_p2)   ;;  %341 = vst [vmem:[#allocation2 + $0x8] sm:$0xff] (!%p270_p2), %v18624_v20 }
   0x7   : > { %15689 = vmatpush3.bf16.msra.mxu0 (!%p270_p2), %v17803_v0  ;;  %v17815_v6 = vld [vmem:[%s22607_s2 + $0x40] sm:$0xff] (!%p270_p2)   ;;  %v17808_v8 = vld [vmem:[%s22606_s1 + $0x28] sm:$0xff] (!%p270_p2)   ;;  %v17817_v9 = vld [vmem:[%s22607_s2 + $0x50] sm:$0xff] (!%p270_p2)   ;;  %340 = vst [vmem:[#allocation2] sm:$0xff] (!%p270_p2), %v18624_v20  ;;  %v18749_v28 = vshrl.u32 (!%p270_p2), %v362_v23, 7 }
   0x8   : > { %15690 = vmatprep.subr.bf16.mxu0 (!%p270_p2), %v17804_v1  ;;  %15712 = vmatprep.subr.bf16.mxu1 (!%p270_p2), %v17815_v6  ;;  %v17809_v10 = vld [vmem:[%s22606_s1 + $0x30] sm:$0xff] (!%p270_p2)   ;;  %v17818_v11 = vld [vmem:[%s22607_s2 + $0x58] sm:$0xff] (!%p270_p2)   ;;  %v17819_v16 = vld [vmem:[%s22607_s2 + $0x60] sm:$0xff] (!%p270_p2)   ;;  %342 = vst [vmem:[#allocation2 + $0x50] sm:$0xff] (!%p270_p2), %v18624_v20 }
   0x9   : > { %15713 = vmatpush3.bf16.msra.mxu1 (!%p270_p2), %v17815_v6  ;;  %v17810_v12 = vld [vmem:[%s22606_s1 + $0x38] sm:$0xff] (!%p270_p2)   ;;  %v17820_v17 = vld [vmem:[%s22607_s2 + $0x68] sm:$0xff] (!%p270_p2)   ;;  %v17821_v18 = vld [vmem:[%s22607_s2 + $0x70] sm:$0xff] (!%p270_p2)   ;;  %343 = vst [vmem:[#allocation2 + $0x58] sm:$0xff] (!%p270_p2), %v18624_v20  ;;  %v18754_v38 = vadd.s32 (!%p270_p2), 8, %v18749_v28  ;;  %v583_v41 = vand.u32 (!%p270_p2), 7, %v18749_v28 }
   0xa   : > { %15714 = vmatprep.subr.bf16.mxu1 (!%p270_p2), %v17816_v7  ;;  %v17822_v19 = vld [vmem:[%s22607_s2 + $0x78] sm:$0xff] (!%p270_p2)   ;;  %344 = vst [vmem:[#allocation4] sm:$0xff] (!%p270_p2), %v18624_v20  ;;  %345 = vst [vmem:[#allocation4 + $0x18] sm:$0xff] (!%p270_p2), %v18624_v20  ;;  %v17823_v21 = vld [vmem:[%s22607_s2] sm:$0xff] (!%p270_p2)   ;;  %v18791_v62 = vadd.s32 (!%p270_p2), 16, %v18749_v28 }
   0xb   : > { %15691 = vmatpush3.bf16.msra.mxu0 (!%p270_p2), %v17804_v1  ;;  %346 = vst [vmem:[#allocation3] sm:$0xff] (!%p270_p2), %v18624_v20  ;;  %347 = vst [vmem:[#allocation3 + $0x8] sm:$0xff] (!%p270_p2), %v18624_v20  ;;  %v12257_v22 = vld [vmem:[%s22608_s3] ss:$0 sm:$0xff] (!%p270_p2)  ;;  %v17824_v46 = vld [vmem:[%s22607_s2 + $0x8] sm:$0xff] (!%p270_p2)   ;;  %v590_v51 = vand.u32 (!%p270_p2), 7, %v18754_v38 }
   0xc   : > { %15692 = vmatprep.subr.bf16.mxu0 (!%p270_p2), %v17805_v2  ;;  %348 = vst [vmem:[#allocation3 + $0x50] sm:$0xff] (!%p270_p2), %v18624_v20  ;;  %350 = vst [vmem:[#allocation6] sm:$0xff] (!%p270_p2), %v18624_v20  ;;  %v12270_v24 = vld [vmem:[%s22609_s4] ss:$0 sm:$0xff] (!%p270_p2)  ;;  %vm18782_vm4 = vcmp.ne.s32.totalorder (!%p270_p2), %v583_v41, 0  ;;  %v17825_v59 = vld [vmem:[%s22607_s2 + $0x10] sm:$0xff] (!%p270_p2)  }
   0xd   : > { %s22651_s28 = smov (!%p316_p3, %s12243_s28), 1  ;;  %15715 = vmatpush3.bf16.msra.mxu1 %v17816_v7  ;;  %351 = vst [vmem:[#allocation6 + $0xc] sm:$0xff] %v18624_v20  ;;  %353 = vst [vmem:[#allocation5] sm:$0xff] %v18624_v20  ;;  %v18796_v1 = vadd.s32 24, %v18749_v28  ;;  %vm18803_vm9 = vcmp.ne.s32.totalorder %v590_v51, 0  ;;  %v17876_v55 = vld [vmem:[%s22607_s2 + $0x1e8] sm:$0xff]  }
   0xe   : > { %s14755_s13 = sshll.u32 %s22651_s28, 5  ;;  %15716 = vmatprep.subr.bf16.mxu1 %v17817_v9  ;;  %354 = vst [vmem:[#allocation5 + $0x18] sm:$0xff] %v18624_v20  ;;  %355 = vst [vmem:[#allocation5 + $0x20] sm:$0xff] %v18624_v20  ;;  %v691_v7 = vld [vmem:[#allocation2 + $0x7] sm:$0xff]  ;;  %s14756_s9 = sshll.u32 %s22651_s28, 6 }
   0xf   : > { %s18695_s16 = scalar_lea.vmem %s22605_s0, %s14755_s13  ;;  %15693 = vmatpush3.bf16.msra.mxu0 %v17805_v2  ;;  %356 = vst [vmem:[#allocation8] sm:$0xff] %v18624_v20  ;;  %357 = vst [vmem:[#allocation8 + $0x9] sm:$0xff] %v18624_v20  ;;  %s19357_s14 = scalar_lea.vmem %s22610_s5, %s14756_s9 }
  0x10   : > { %v17811_v4 = vld [vmem:[%s18695_s16] sm:$0xff]   ;;  %15694 = vmatprep.subr.bf16.mxu0 %v17806_v3  ;;  %v17812_v13 = vld [vmem:[%s18695_s16 + $0x8] sm:$0xff]   ;;  %v17813_v14 = vld [vmem:[%s18695_s16 + $0x10] sm:$0xff]   ;;  %359 = vst [vmem:[#allocation7] sm:$0xff] %v18624_v20  ;;  %s12254_s25 = sshll.u32 %s22651_s28, 3 }
  0x11   : > { %15704 = vmatprep.mubr.bf16.mxu0 %v17811_v4  ;;  %15717 = vmatpush3.bf16.msra.mxu1 %v17817_v9  ;;  %v17814_v15 = vld [vmem:[%s18695_s16 + $0x18] sm:$0xff]   ;;  %360 = vst [vmem:[#allocation7 + $0x10] sm:$0xff] %v18624_v20  ;;  %361 = vst [vmem:[#allocation7 + $0x18] sm:$0xff] %v18624_v20  ;;  %v17833_v4 = vld [vmem:[%s22607_s2 + $0x90] sm:$0xff]   ;;  %s14757_s16 = sshll.u32 %s22651_s28, 4  ;;  %s334_s10 = scalar_lea.vmem %s22612_s7, %s12254_s25 }
  0x12   : > { %15718 = vmatprep.subr.bf16.mxu1 %v17818_v11  ;;  %vm18839_vm10 = vmpackc.low %vm18803_vm9, %vm18782_vm4  ;;  %vm684_vm4 = vcmp.ne.s32.totalorder %v590_v51, 7  ;;  %s330_s26 = scalar_lea.vmem %s22611_s6, %s14757_s16  ;;  %s338_s11 = scalar_lea.vmem %s22613_s8, %s12254_s25 }
  0x13   : > { %15695 = vmatpush3.bf16.msra.mxu0 %v17806_v3 }
  0x14   : > { %15696 = vmatprep.subr.bf16.mxu0 %v17807_v5 }
  0x15   : > { %15719 = vmatpush3.bf16.msra.mxu1 %v17818_v11  ;;  %v18823_v11 = vadd.s32 32, %v18749_v28 }
  0x16   : > { %15720 = vmatprep.subr.bf16.mxu1 %v17819_v16 }
  0x17   : > { %15697 = vmatpush3.bf16.msra.mxu0 %v17807_v5 }
  0x18   : > { %15698 = vmatprep.subr.bf16.mxu0 %v17808_v8 }
  0x19   : > { %15721 = vmatpush3.bf16.msra.mxu1 %v17819_v16  ;;  %v597_v16 = vand.u32 7, %v18791_v62  ;;  %v17839_v62 = vld [vmem:[%s22607_s2 + $0xc0] sm:$0xff]  }
  0x1a   : > { %15722 = vmatprep.subr.bf16.mxu1 %v17820_v17 }
  0x1b   : > { %15699 = vmatpush3.bf16.msra.mxu0 %v17808_v8  ;;  %vm18880_vm11 = vcmp.ne.s32.totalorder %v597_v16, 0 }
  0x1c   : > { %15700 = vmatprep.subr.bf16.mxu0 %v17809_v10 }
  0x1d   : > { %15723 = vmatpush3.bf16.msra.mxu1 %v17820_v17  ;;  %v604_v17 = vand.u32 7, %v18796_v1  ;;  %v19308_v1 = vld [vmem:[#allocation2 + $0x8] sm:$0xff] }
  0x1e   : > { %15724 = vmatprep.subr.bf16.mxu1 %v17821_v18 }
  0x1f   : > { %15701 = vmatpush3.bf16.msra.mxu0 %v17809_v10  ;;  %v17826_v10 = vld [vmem:[%s22607_s2 + $0x18] sm:$0xff]   ;;  %vm678_vm12 = vcmp.ne.s32.totalorder %v604_v17, 0 }
  0x20   : > { %15702 = vmatprep.subr.bf16.mxu0 %v17810_v12 }
  0x21   : > { %15725 = vmatpush3.bf16.msra.mxu1 %v17821_v18  ;;  %v18846_v18 = vadd.s32 40, %v18749_v28 }
  0x22   : > { %15726 = vmatprep.subr.bf16.mxu1 %v17822_v19 }
  0x23   : > { %15703 = vmatpush3.bf16.msra.mxu0 %v17810_v12 }
  0x24   : > { %15928 = vmatprep.subr.bf16.mxu0 %v18624_v20 }
  0x25   : > { %15727 = vmatpush3.bf16.msra.mxu1 %v17822_v19 }
  0x26   : > { %15705 = vmatmul.mubr.bf16.vlgmr.msra.gmra.mrb[0].mxu0 %v17812_v13  ;;  %15736 = vmatprep.subr.bf16.mxu1 %v17823_v21 }
  0x27   : > { %15708 = vmatprep.mubr.bf16.mxu0 %v17813_v14 }
  0x2e   : > { %15709 = vmatmul.mubr.bf16.gmra.mrb[4].mxu0 %v17814_v15  ;;  %v17871_v15 = vld [vmem:[%s22607_s2 + $0x1c0] sm:$0xff]  }
  0xf9   : > { %v15706_v25 = vpop.f32.mrb[0].mxu0 }
  0xfa   : > { %v514_v26 = vadd.f32 %v15706_v25, %v12257_v22  ;;  %v505_v27 = vpop.f32.mrb[1].mxu0  ;;  %v18863_v25 = vadd.s32 48, %v18749_v28 }
  0xfb   : > { %v506_v29 = vadd.f32 %v12257_v22, %v505_v27  ;;  %v15707_v30 = vpop.f32.mrb[2].mxu0 }
  0xfc   : > { %vm538_vm0 = vcmp.ge.f32.partialorder %v514_v26, 0.0  ;;  %v550_v31 = vmul.f32 %v12270_v24, %v514_v26  ;;  %v517_v32 = vadd.f32 %v15707_v30, %v12257_v22  ;;  %v508_v33 = vpop.f32.mrb[3].mxu0  ;;  %v17828_v30 = vld [vmem:[%s22607_s2 + $0x28] sm:$0xff]  }
  0xfd   : > { %vm536_vm1 = vcmp.ge.f32.partialorder %v506_v29, 0.0  ;;  %v548_v34 = vmul.f32 %v12270_v24, %v506_v29  ;;  %v509_v35 = vadd.f32 %v12257_v22, %v508_v33  ;;  %v17835_v33 = vld [vmem:[%s22607_s2 + $0xa0] sm:$0xff]  }
  0xfe   : > { %v18751_v36 = vsel %vm538_vm0, %v514_v26, %v550_v31  ;;  %vm539_vm2 = vcmp.ge.f32.partialorder %v517_v32, 0.0  ;;  %v551_v37 = vmul.f32 %v12270_v24, %v517_v32  ;;  %v618_v31 = vand.u32 7, %v18846_v18  ;;  %vm18916_vm0 = vmpackc.low %vm678_vm12, %vm18880_vm11  ;;  %v17897_v18 = vld [vmem:[%s22607_s2 + $0x2a8] sm:$0xff]  }
  0xff   : > { %566 = vst [vmem:[#allocation2 + $0x20] sm:$0xff] %v18751_v36  ;;  %v18757_v39 = vsel %vm536_vm1, %v506_v29, %v548_v34  ;;  %vm537_vm3 = vcmp.ge.f32.partialorder %v509_v35, 0.0  ;;  %v549_v40 = vmul.f32 %v12270_v24, %v509_v35  ;;  %v17836_v34 = vld [vmem:[%s22607_s2 + $0xa8] sm:$0xff]  }
 0x100   : > { %564 = vst [vmem:[#allocation2 + $0x10] sm:$0xff] %v18757_v39  ;;  %v18761_v42 = vsel %vm539_vm2, %v517_v32, %v551_v37  ;;  %v751_v43 = vpack.c.bf16 %v18757_v39, %v18624_v20  ;;  %v18876_v32 = vadd.s32 56, %v18749_v28  ;;  %vm680_vm14 = vcmp.ne.s32.totalorder %v618_v31, 0 }
 0x101   : > { %567 = vst [vmem:[#allocation2 + $0x28] sm:$0xff] %v18761_v42  ;;  %v18765_v44 = vsel %vm537_vm3, %v509_v35, %v549_v40  ;;  %v15710_v45 = vpop.f32.mrb[4].mxu0  ;;  %v1339_v47 = vpack.c.bf16 %v18761_v42, %v18751_v36  ;;  %v625_v35 = vand.u32 7, %v18863_v25  ;;  %vm18922_vm2 = vcmp.ne.s32.totalorder %v583_v41, 7 }
 0x102   : > { %565 = vst [vmem:[#allocation2 + $0x18] sm:$0xff] %v18765_v44  ;;  %v530_v48 = vadd.f32 %v15710_v45, %v12257_v22  ;;  %v521_v49 = vpop.f32.mrb[5].mxu0  ;;  %15728 = vmatprep.mubr.bf16.mxu1 %v751_v43  ;;  %v18775_v50 = vpack.c.bf16 %v18751_v36, %v18765_v44  ;;  %v1338_v52 = vpack.c.bf16 %v18765_v44, %v18757_v39  ;;  %v17829_v45 = vld [vmem:[%s22607_s2 + $0x30] sm:$0xff]   ;;  %vm688_vm12 = vcmp.ne.s32.totalorder %v618_v31, 7  ;;  %v17842_v31 = vld [vmem:[%s22607_s2 + $0xd8] sm:$0xff]   ;;  %v17855_v44 = vld [vmem:[%s22607_s2 + $0x140] sm:$0xff]  }
 0x103   : > { %v522_v53 = vadd.f32 %v12257_v22, %v521_v49  ;;  %v15711_v54 = vpop.f32.mrb[6].mxu0  ;;  %vm18907_vm15 = vcmp.ne.s32.totalorder %v625_v35, 0  ;;  %v17830_v49 = vld [vmem:[%s22607_s2 + $0x38] sm:$0xff]   ;;  %v17887_v36 = vld [vmem:[%s22607_s2 + $0x280] sm:$0xff]  }
 0x104   : > { %vm542_vm5 = vcmp.ge.f32.partialorder %v530_v48, 0.0  ;;  %v554_v56 = vmul.f32 %v12270_v24, %v530_v48  ;;  %v533_v57 = vadd.f32 %v15711_v54, %v12257_v22  ;;  %v524_v58 = vpop.f32.mrb[7].mxu0  ;;  %15729 = vmatmul.mubr.bf16.vlgmr.msra.gmra.mrb[0].mxu1 %v18775_v50  ;;  %v17843_v54 = vld [vmem:[%s22607_s2 + $0xe0] sm:$0xff]   ;;  %v17854_v39 = vld [vmem:[%s22607_s2 + $0x138] sm:$0xff]   ;;  %15929 = vmatpush3.bf16.msra.mxu0 %v17887_v36 }
 0x105   : > { %vm540_vm6 = vcmp.ge.f32.partialorder %v522_v53, 0.0  ;;  %v552_v60 = vmul.f32 %v12270_v24, %v522_v53  ;;  %v525_v61 = vadd.f32 %v12257_v22, %v524_v58  ;;  %15737 = vmatpush3.bf16.msra.mxu1 %v17823_v21  ;;  %v17827_v22 = vld [vmem:[%s22607_s2 + $0x20] sm:$0xff]  }
 0x106   : > { %v18793_v63 = vsel %vm542_vm5, %v530_v48, %v554_v56  ;;  %vm543_vm7 = vcmp.ge.f32.partialorder %v533_v57, 0.0  ;;  %v555_v0 = vmul.f32 %v12270_v24, %v533_v57  ;;  %15738 = vmatprep.subr.bf16.mxu1 %v17824_v46  ;;  %v17831_v56 = vld [vmem:[%s22607_s2 + $0x80] sm:$0xff]   ;;  %v17838_v48 = vld [vmem:[%s22607_s2 + $0xb8] sm:$0xff]  }
 0x107   : > { %570 = vst [vmem:[#allocation2 + $0x40] sm:$0xff] %v18793_v63  ;;  %v18799_v2 = vsel %vm540_vm6, %v522_v53, %v552_v60  ;;  %vm541_vm8 = vcmp.ge.f32.partialorder %v525_v61, 0.0  ;;  %v553_v3 = vmul.f32 %v12270_v24, %v525_v61  ;;  %v18814_v8 = vld [vmem:[#allocation2 + $0xf] sm:$0xff]  ;;  %v611_v24 = vand.u32 7, %v18823_v11  ;;  %vm18964_vm6 = vmpackc.low %vm684_vm4, %vm18922_vm2  ;;  %v17875_v53 = vld [vmem:[%s22607_s2 + $0x1e0] sm:$0xff]  }
 0x108   : > { %568 = vst [vmem:[#allocation2 + $0x30] sm:$0xff] %v18799_v2  ;;  %v18808_v5 = vsel %vm543_vm7, %v533_v57, %v555_v0  ;;  %v18812_v6 = vpack.c.bf16 %v18799_v2, %v18761_v42  ;;  %v12304_v20 = vpack.c.bf16 %v18814_v8, %v691_v7  ;;  %v18865_v26 = vld [vmem:[#allocation2 + $0x21] sm:$0xff]  ;;  %vm685_vm7 = vcmp.ne.s32.totalorder %v597_v16, 7 }
 0x109   : > { %571 = vst [vmem:[#allocation2 + $0x48] sm:$0xff] %v18808_v5  ;;  %v18817_v9 = vsel %vm541_vm8, %v525_v61, %v553_v3  ;;  %15739 = vmatpush3.bf16.msra.mxu1 %v17824_v46  ;;  %v18825_v12 = vld [vmem:[#allocation2 + $0x11] sm:$0xff]  ;;  %v1341_v13 = vpack.c.bf16 %v18808_v5, %v18793_v63  ;;  %v18848_v19 = vld [vmem:[#allocation2 + $0x19] sm:$0xff]  ;;  %vm18888_vm13 = vcmp.ne.s32.totalorder %v611_v24, 0  ;;  %v632_v46 = vand.u32 7, %v18876_v32  ;;  %v17832_v60 = vld [vmem:[%s22607_s2 + $0x88] sm:$0xff]  }
 0x10a   : > { %569 = vst [vmem:[#allocation2 + $0x38] sm:$0xff] %v18817_v9  ;;  %15732 = vmatprep.mubr.bf16.mxu1 %v18812_v6  ;;  %15740 = vmatprep.subr.bf16.mxu1 %v17825_v59  ;;  %v18833_v14 = vpack.c.bf16 %v18793_v63, %v18817_v9  ;;  %v1340_v21 = vpack.c.bf16 %v18817_v9, %v18799_v2  ;;  %vm18928_vm3 = vmpackc.low %vm680_vm14, %vm18888_vm13  ;;  %v18935_v57 = vld [vmem:[#allocation2 + $0x17] sm:$0xff]  ;;  %v18937_v58 = vld [vmem:[#allocation2 + $0x1f] sm:$0xff]  ;;  %vm686_vm8 = vcmp.ne.s32.totalorder %v604_v17, 7  ;;  %vm687_vm11 = vcmp.ne.s32.totalorder %v611_v24, 7 }
 0x10b   : > { %v12436_v23 = vpack.c.bf16 %v18848_v19, %v18825_v12  ;;  %vm682_vm1 = vcmp.ne.s32.totalorder %v632_v46, 0  ;;  %v18956_v0 = vpack.c.bf16 %v18937_v58, %v18935_v57  ;;  %vm19010_vm9 = vmpackc.low %vm686_vm8, %vm685_vm7  ;;  %vm689_vm14 = vcmp.ne.s32.totalorder %v625_v35, 7  ;;  %v17840_v11 = vld [vmem:[%s22607_s2 + $0xc8] sm:$0xff]   ;;  %v17841_v24 = vld [vmem:[%s22607_s2 + $0xd0] sm:$0xff]  }
 0x10c   : > { %15733 = vmatmul.mubr.bf16.gmra.mrb[4].mxu1 %v18833_v14  ;;  %vm18950_vm5 = vmpackc.low %vm682_vm1, %vm18907_vm15  ;;  %vm690_vm15 = vcmp.ne.s32.totalorder %v632_v46, 7  ;;  %v19032_v16 = vpack.c.bf16 %v18865_v26, %v18848_v19  ;;  %v12376_v46 = vpack.c.bf16 %v18935_v57, %v18814_v8  ;;  %v17845_v8 = vld [vmem:[%s22607_s2 + $0xf0] sm:$0xff]   ;;  %v17846_v57 = vld [vmem:[%s22607_s2 + $0xf8] sm:$0xff]  }
 0x10d   : > { %15741 = vmatpush3.bf16.msra.mxu1 %v17825_v59  ;;  %15752 = vmatprep.mubr.msk.bf16.mxu1 %vm18839_vm10, %v12304_v20  ;;  %v18943_v59 = vld [vmem:[#allocation2 + $0x27] sm:$0xff]  ;;  %vm19021_vm13 = vmpackc.low %vm688_vm12, %vm687_vm11  ;;  %v17891_v5 = vld [vmem:[%s22607_s2 + $0x290] sm:$0xff]  }
 0x10e   : > { %15742 = vmatprep.subr.bf16.mxu1 %v17826_v10  ;;  %v998_v20 = vld [vmem:[#allocation2 + $0x9] sm:$0xff]  ;;  %vm19038_vm1 = vmpackc.low %vm690_vm15, %vm689_vm14  ;;  %v17859_v42 = vld [vmem:[%s22607_s2 + $0x160] sm:$0xff]  }
 0x10f   : > { %v18867_v27 = vld [vmem:[#allocation2 + $0x29] sm:$0xff]  ;;  %v12340_v32 = vpack.c.bf16 %v18825_v12, %v998_v20  ;;  %v12379_v20 = vpack.c.bf16 %v18943_v59, %v18937_v58  ;;  %v17850_v58 = vld [vmem:[%s22607_s2 + $0x118] sm:$0xff]   ;;  %v17863_v19 = vld [vmem:[%s22607_s2 + $0x180] sm:$0xff]  }
 0x110   : > { %v12439_v29 = vpack.c.bf16 %v18867_v27, %v18865_v26  ;;  %v18941_v41 = vld [vmem:[#allocation2 + $0x2f] sm:$0xff]  ;;  %v19051_v25 = vld [vmem:[#allocation2 + $0x41] sm:$0xff]  ;;  %v17893_v12 = vld [vmem:[%s22607_s2 + $0x298] sm:$0xff]  }
 0x111   : > { %15743 = vmatpush3.bf16.msra.mxu1 %v17826_v10  ;;  %v18893_v37 = vld [vmem:[#allocation2 + $0x31] sm:$0xff]  ;;  %v18895_v40 = vld [vmem:[#allocation2 + $0x39] sm:$0xff]  ;;  %v18960_v51 = vpack.c.bf16 %v18941_v41, %v18943_v59  ;;  %v19155_v63 = vld [vmem:[#allocation2 + $0x8] sm:$0xff] }
 0x112   : > { %15744 = vmatprep.subr.bf16.mxu1 %v17827_v22  ;;  %v12442_v43 = vpack.c.bf16 %v18895_v40, %v18893_v37  ;;  %v18977_v7 = vld [vmem:[#allocation2 + $0x3f] sm:$0xff]  ;;  %v18979_v10 = vld [vmem:[#allocation2 + $0x37] sm:$0xff]  ;;  %v19036_v17 = vpack.c.bf16 %v18893_v37, %v18867_v27  ;;  %v19058_v35 = vpack.c.bf16 %v19051_v25, %v18895_v40  ;;  %15930 = vmatprep.subr.bf16.mxu0 %v19155_v63  ;;  %v17860_v2 = vld [vmem:[%s22607_s2 + $0x168] sm:$0xff]  }
 0x113   : > { %v17851_v59 = vld [vmem:[%s22607_s2 + $0x120] sm:$0xff]   ;;  %v17861_v9 = vld [vmem:[%s22607_s2 + $0x170] sm:$0xff]   ;;  %v17866_v26 = vld [vmem:[%s22607_s2 + $0x198] sm:$0xff]  }
 0x114   : > { %v17868_v37 = vld [vmem:[%s22607_s2 + $0x1a8] sm:$0xff]   ;;  %v17869_v40 = vld [vmem:[%s22607_s2 + $0x1b0] sm:$0xff]   ;;  %v17878_v61 = vld [vmem:[%s22607_s2 + $0x1f8] sm:$0xff]  }
 0x115   : > { %15745 = vmatpush3.bf16.msra.mxu1 %v17827_v22  ;;  %v17834_v22 = vld [vmem:[%s22607_s2 + $0x98] sm:$0xff]   ;;  %v17888_v3 = vld [vmem:[%s22607_s2 + $0x280] sm:$0xff]  }
 0x116   : > { %15746 = vmatprep.subr.bf16.mxu1 %v17828_v30 }
 0x119   : > { %15747 = vmatpush3.bf16.msra.mxu1 %v17828_v30  ;;  %v18986_v30 = vpack.c.bf16 %v18977_v7, %v18979_v10 }
 0x11a   : > { %15748 = vmatprep.subr.bf16.mxu1 %v17829_v45 }
 0x11d   : > { %15749 = vmatpush3.bf16.msra.mxu1 %v17829_v45  ;;  %v17837_v45 = vld [vmem:[%s22607_s2 + $0xb0] sm:$0xff]  }
 0x11e   : > { %15750 = vmatprep.subr.bf16.mxu1 %v17830_v49 }
 0x121   : > { %15751 = vmatpush3.bf16.msra.mxu1 %v17830_v49  ;;  %v17894_v49 = vld [vmem:[%s22607_s2 + $0x298] sm:$0xff]  }
 0x122   : > { %15760 = vmatprep.subr.bf16.mxu1 %v17831_v56 }
 0x124   : > { %15753 = vmatmul.mubr.msk.bf16.vlgmr.msra.gmra.mrb[0].mxu1 %vm18916_vm0, %v18956_v0 }
 0x125   : > { %15756 = vmatprep.mubr.msk.bf16.mxu1 %vm18928_vm3, %v18960_v51  ;;  %15761 = vmatpush3.bf16.msra.mxu1 %v17831_v56  ;;  %v17844_v56 = vld [vmem:[%s22607_s2 + $0xe8] sm:$0xff]  }
 0x126   : > { %15762 = vmatprep.subr.bf16.mxu1 %v17832_v60 }
 0x129   : > { %15763 = vmatpush3.bf16.msra.mxu1 %v17832_v60  ;;  %v17847_v60 = vld [vmem:[%s22607_s2 + $0x100] sm:$0xff]  }
 0x12a   : > { %15764 = vmatprep.subr.bf16.mxu1 %v17833_v4 }
 0x12c   : > { %15757 = vmatmul.mubr.msk.bf16.gmra.mrb[4].mxu1 %vm18950_vm5, %v18986_v30 }
 0x12d   : > { %15765 = vmatpush3.bf16.msra.mxu1 %v17833_v4  ;;  %15776 = vmatprep.mubr.msk.bf16.mxu1 %vm18964_vm6, %v12340_v32  ;;  %v17848_v4 = vld [vmem:[%s22607_s2 + $0x108] sm:$0xff]   ;;  %v17849_v32 = vld [vmem:[%s22607_s2 + $0x110] sm:$0xff]  }
 0x12e   : > { %15766 = vmatprep.subr.bf16.mxu1 %v17834_v22 }
 0x131   : > { %15767 = vmatpush3.bf16.msra.mxu1 %v17834_v22  ;;  %v12382_v22 = vpack.c.bf16 %v18979_v10, %v18941_v41  ;;  %v17852_v10 = vld [vmem:[%s22607_s2 + $0x128] sm:$0xff]  }
 0x132   : > { %15768 = vmatprep.subr.bf16.mxu1 %v17835_v33 }
 0x135   : > { %15769 = vmatpush3.bf16.msra.mxu1 %v17835_v33  ;;  %v19096_v33 = vld [vmem:[#allocation2 + $0x47] sm:$0xff] }
 0x136   : > { %15770 = vmatprep.subr.bf16.mxu1 %v17836_v34  ;;  %v12385_v41 = vpack.c.bf16 %v19096_v33, %v18977_v7  ;;  %v17853_v7 = vld [vmem:[%s22607_s2 + $0x130] sm:$0xff]  }
 0x139   : > { %15771 = vmatpush3.bf16.msra.mxu1 %v17836_v34  ;;  %v17857_v34 = vld [vmem:[%s22607_s2 + $0x150] sm:$0xff]  }
 0x13a   : > { %15772 = vmatprep.subr.bf16.mxu1 %v17837_v45 }
 0x13d   : > { %15773 = vmatpush3.bf16.msra.mxu1 %v17837_v45  ;;  %v17858_v45 = vld [vmem:[%s22607_s2 + $0x158] sm:$0xff]  }
 0x13e   : > { %15774 = vmatprep.subr.bf16.mxu1 %v17838_v48 }
 0x141   : > { %15775 = vmatpush3.bf16.msra.mxu1 %v17838_v48  ;;  %v19195_v48 = vld [vmem:[#allocation2 + $0x49] sm:$0xff] }
 0x142   : > { %15784 = vmatprep.subr.bf16.mxu1 %v17839_v62  ;;  %v12445_v27 = vpack.c.bf16 %v19195_v48, %v19051_v25 }
 0x144   : > { %15777 = vmatmul.mubr.msk.bf16.vlgmr.msra.gmra.mrb[0].mxu1 %vm19010_vm9, %v19032_v16 }
 0x145   : > { %15780 = vmatprep.mubr.msk.bf16.mxu1 %vm19021_vm13, %v19036_v17  ;;  %15785 = vmatpush3.bf16.msra.mxu1 %v17839_v62  ;;  %v17873_v62 = vld [vmem:[%s22607_s2 + $0x1d0] sm:$0xff]  }
 0x146   : > { %15786 = vmatprep.subr.bf16.mxu1 %v17840_v11 }
 0x149   : > { %15787 = vmatpush3.bf16.msra.mxu1 %v17840_v11  ;;  %v1645_v11 = vld [vmem:[#allocation2 + $0x4f] sm:$0xff] }
 0x14a   : > { %15788 = vmatprep.subr.bf16.mxu1 %v17841_v24  ;;  %v12481_v25 = vpack.c.bf16 %v1645_v11, %v19096_v33  ;;  %v17900_v33 = vld [vmem:[%s22607_s2 + $0x2b0] sm:$0xff]  }
 0x14c   : > { %15781 = vmatmul.mubr.msk.bf16.gmra.mrb[4].mxu1 %vm19038_vm1, %v19058_v35 }
 0x14d   : > { %15789 = vmatpush3.bf16.msra.mxu1 %v17841_v24  ;;  %15800 = vmatprep.mubr.msk.bf16.mxu1 %vm18839_vm10, %v12376_v46  ;;  %v17874_v24 = vld [vmem:[%s22607_s2 + $0x1d8] sm:$0xff]  }
 0x14e   : > { %15790 = vmatprep.subr.bf16.mxu1 %v17842_v31  ;;  %v17882_v46 = vld [vmem:[%s22607_s2 + $0x218] sm:$0xff]  }
 0x151   : > { %15791 = vmatpush3.bf16.msra.mxu1 %v17842_v31  ;;  %v17881_v31 = vld [vmem:[%s22607_s2 + $0x210] sm:$0xff]  }
 0x152   : > { %15792 = vmatprep.subr.bf16.mxu1 %v17843_v54 }
 0x155   : > { %15793 = vmatpush3.bf16.msra.mxu1 %v17843_v54  ;;  %v18608_v54 = vld [vmem:[#allocation2 + $0x48] sm:$0xff] }
 0x156   : > { %15794 = vmatprep.subr.bf16.mxu1 %v17844_v56 }
 0x159   : > { %15795 = vmatpush3.bf16.msra.mxu1 %v17844_v56  ;;  %v1807_v56 = vpack.c.bf16 %v19155_v63, %v18608_v54  ;;  %v17906_v54 = vld [vmem:[%s22607_s2 + $0x2c8] sm:$0xff]  }
 0x15a   : > { %15796 = vmatprep.subr.bf16.mxu1 %v17845_v8 }
 0x15d   : > { %15797 = vmatpush3.bf16.msra.mxu1 %v17845_v8  ;;  %v17885_v8 = vld [vmem:[%s22607_s2 + $0x230] sm:$0xff]  }
 0x15e   : > { %15798 = vmatprep.subr.bf16.mxu1 %v17846_v57 }
 0x161   : > { %15799 = vmatpush3.bf16.msra.mxu1 %v17846_v57  ;;  %v17886_v57 = vld [vmem:[%s22607_s2 + $0x238] sm:$0xff]  }
 0x162   : > { %15808 = vmatprep.subr.bf16.mxu1 %v17847_v60 }
 0x164   : > { %15801 = vmatmul.mubr.msk.bf16.vlgmr.msra.gmra.mrb[0].mxu1 %vm18916_vm0, %v12379_v20 }
 0x165   : > { %15804 = vmatprep.mubr.msk.bf16.mxu1 %vm18928_vm3, %v12382_v22  ;;  %15809 = vmatpush3.bf16.msra.mxu1 %v17847_v60  ;;  %v1953_v60 = vld [vmem:[#allocation2 + $0x51] sm:$0xff]  ;;  %v17898_v22 = vld [vmem:[%s22607_s2 + $0x2a8] sm:$0xff]  }
 0x166   : > { %15810 = vmatprep.subr.bf16.mxu1 %v17848_v4  ;;  %v12541_v20 = vpack.c.bf16 %v1953_v60, %v19195_v48  ;;  %v17914_v60 = vld [vmem:[%s22607_s2 + $0x2e8] sm:$0xff]  }
 0x169   : > { %15811 = vmatpush3.bf16.msra.mxu1 %v17848_v4  ;;  %v17892_v4 = vld [vmem:[%s22607_s2 + $0x290] sm:$0xff]  }
 0x16a   : > { %15812 = vmatprep.subr.bf16.mxu1 %v17849_v32 }
 0x16c   : > { %15805 = vmatmul.mubr.msk.bf16.gmra.mrb[4].mxu1 %vm18950_vm5, %v12385_v41  ;;  %v17902_v41 = vld [vmem:[%s22607_s2 + $0x2b8] sm:$0xff]  }
 0x16d   : > { %15813 = vmatpush3.bf16.msra.mxu1 %v17849_v32  ;;  %15824 = vmatprep.mubr.bf16.mxu1 %v1338_v52  ;;  %v17856_v52 = vld [vmem:[%s22607_s2 + $0x148] sm:$0xff]   ;;  %v17899_v32 = vld [vmem:[%s22607_s2 + $0x2b0] sm:$0xff]  }
 0x16e   : > { %15814 = vmatprep.subr.bf16.mxu1 %v17850_v58 }
 0x171   : > { %15815 = vmatpush3.bf16.msra.mxu1 %v17850_v58  ;;  %v17901_v58 = vld [vmem:[%s22607_s2 + $0x2b8] sm:$0xff]  }
 0x172   : > { %15816 = vmatprep.subr.bf16.mxu1 %v17851_v59 }
 0x175   : > { %15817 = vmatpush3.bf16.msra.mxu1 %v17851_v59  ;;  %v12543_v59 = vld [vmem:[%s22608_s3 + $0x1] ss:$0 sm:$0xff] }
 0x176   : > { %15818 = vmatprep.subr.bf16.mxu1 %v17852_v10 }
 0x179   : > { %15819 = vmatpush3.bf16.msra.mxu1 %v17852_v10  ;;  %v12544_v10 = vld [vmem:[%s22609_s4 + $0x1] ss:$0 sm:$0xff] }
 0x17a   : > { %15820 = vmatprep.subr.bf16.mxu1 %v17853_v7 }
 0x17d   : > { %15821 = vmatpush3.bf16.msra.mxu1 %v17853_v7 }
 0x17e   : > { %15822 = vmatprep.subr.bf16.mxu1 %v17854_v39 }
 0x181   : > { %15823 = vmatpush3.bf16.msra.mxu1 %v17854_v39 }
 0x182   : > { %15832 = vmatprep.subr.bf16.mxu1 %v17855_v44 }
 0x184   : > { %15825 = vmatmul.mubr.bf16.vlgmr.msra.gmra.mrb[0].mxu1 %v1339_v47  ;;  %v17889_v47 = vld [vmem:[%s22607_s2 + $0x288] sm:$0xff]  }
 0x185   : > { %15828 = vmatprep.mubr.bf16.mxu1 %v1340_v21  ;;  %15833 = vmatpush3.bf16.msra.mxu1 %v17855_v44  ;;  %v17864_v21 = vld [vmem:[%s22607_s2 + $0x188] sm:$0xff]  }
 0x186   : > { %15834 = vmatprep.subr.bf16.mxu1 %v17856_v52  ;;  %15931 = vmatpush3.bf16.msra.mxu0 %v17889_v47 }
 0x187   : > { %15932 = vmatprep.subr.bf16.mxu0 %v19155_v63 }
 0x189   : > { %15835 = vmatpush3.bf16.msra.mxu1 %v17856_v52 }
 0x18a   : > { %15836 = vmatprep.subr.bf16.mxu1 %v17857_v34  ;;  %15933 = vmatpush3.bf16.msra.mxu0 %v17891_v5 }
 0x18b   : > { %15934 = vmatprep.subr.bf16.mxu0 %v19155_v63 }
 0x18c   : > { %15829 = vmatmul.mubr.bf16.gmra.mrb[4].mxu1 %v1341_v13  ;;  %v17862_v13 = vld [vmem:[%s22607_s2 + $0x178] sm:$0xff]  }
 0x18d   : > { %15837 = vmatpush3.bf16.msra.mxu1 %v17857_v34  ;;  %15848 = vmatprep.mubr.msk.bf16.mxu1 %vm18964_vm6, %v12436_v23  ;;  %v17865_v23 = vld [vmem:[%s22607_s2 + $0x190] sm:$0xff]  }
 0x18e   : > { %15838 = vmatprep.subr.bf16.mxu1 %v17858_v45  ;;  %15935 = vmatpush3.bf16.msra.mxu0 %v17893_v12 }
 0x18f   : > { %15936 = vmatprep.subr.bf16.mxu0 %v19155_v63 }
 0x191   : > { %15839 = vmatpush3.bf16.msra.mxu1 %v17858_v45 }
 0x192   : > { %15840 = vmatprep.subr.bf16.mxu1 %v17859_v42 }
 0x195   : > { %15841 = vmatpush3.bf16.msra.mxu1 %v17859_v42 }
 0x196   : > { %15842 = vmatprep.subr.bf16.mxu1 %v17860_v2 }
 0x199   : > { %15843 = vmatpush3.bf16.msra.mxu1 %v17860_v2 }
 0x19a   : > { %15844 = vmatprep.subr.bf16.mxu1 %v17861_v9 }
 0x19d   : > { %15845 = vmatpush3.bf16.msra.mxu1 %v17861_v9 }
 0x19e   : > { %15846 = vmatprep.subr.bf16.mxu1 %v17862_v13 }
 0x1a1   : > { %15847 = vmatpush3.bf16.msra.mxu1 %v17862_v13 }
 0x1a2   : > { %15856 = vmatprep.subr.bf16.mxu1 %v17863_v19 }
 0x1a4   : > { %15849 = vmatmul.mubr.msk.bf16.vlgmr.msra.gmra.mrb[0].mxu1 %vm19010_vm9, %v12439_v29  ;;  %v17867_v29 = vld [vmem:[%s22607_s2 + $0x1a0] sm:$0xff]  }
 0x1a5   : > { %15852 = vmatprep.mubr.msk.bf16.mxu1 %vm19021_vm13, %v12442_v43  ;;  %15857 = vmatpush3.bf16.msra.mxu1 %v17863_v19  ;;  %v17870_v43 = vld [vmem:[%s22607_s2 + $0x1b8] sm:$0xff]  }
 0x1a6   : > { %15858 = vmatprep.subr.bf16.mxu1 %v17864_v21 }
 0x1a9   : > { %15859 = vmatpush3.bf16.msra.mxu1 %v17864_v21 }
 0x1aa   : > { %15860 = vmatprep.subr.bf16.mxu1 %v17865_v23 }
 0x1ac   : > { %15853 = vmatmul.mubr.msk.bf16.gmra.mrb[4].mxu1 %vm19038_vm1, %v12445_v27 }
 0x1ad   : > { %15861 = vmatpush3.bf16.msra.mxu1 %v17865_v23  ;;  %15872 = vmatprep.mubr.msk.bf16.mxu1 %vm18839_vm10, %v18956_v0  ;;  %v17872_v0 = vld [vmem:[%s22607_s2 + $0x1c8] sm:$0xff]   ;;  %vm18625_vm10 = vmmov 0  }
 0x1ae   : > { %15862 = vmatprep.subr.bf16.mxu1 %v17866_v26  ;;  %15944 = vmatprep.mubr.msk.bf16.mxu0 %vm18625_vm10, %v19308_v1 }
 0x1b1   : > { %15863 = vmatpush3.bf16.msra.mxu1 %v17866_v26 }
 0x1b2   : > { %15864 = vmatprep.subr.bf16.mxu1 %v17867_v29 }
 0x1b5   : > { %15865 = vmatpush3.bf16.msra.mxu1 %v17867_v29 }
 0x1b6   : > { %15866 = vmatprep.subr.bf16.mxu1 %v17868_v37 }
 0x1b9   : > { %15867 = vmatpush3.bf16.msra.mxu1 %v17868_v37 }
 0x1ba   : > { %15868 = vmatprep.subr.bf16.mxu1 %v17869_v40 }
 0x1bd   : > { %15869 = vmatpush3.bf16.msra.mxu1 %v17869_v40 }
 0x1be   : > { %15870 = vmatprep.subr.bf16.mxu1 %v17870_v43 }
 0x1c1   : > { %15871 = vmatpush3.bf16.msra.mxu1 %v17870_v43 }
 0x1c2   : > { %15880 = vmatprep.subr.bf16.mxu1 %v17871_v15 }
 0x1c4   : > { %15873 = vmatmul.mubr.msk.bf16.vlgmr.msra.gmra.mrb[0].mxu1 %vm18916_vm0, %v18960_v51  ;;  %v17877_v51 = vld [vmem:[%s22607_s2 + $0x1f0] sm:$0xff]  }
 0x1c5   : > { %15876 = vmatprep.mubr.msk.bf16.mxu1 %vm18928_vm3, %v18986_v30  ;;  %15881 = vmatpush3.bf16.msra.mxu1 %v17871_v15  ;;  %v17880_v30 = vld [vmem:[%s22607_s2 + $0x208] sm:$0xff]  }
 0x1c6   : > { %15882 = vmatprep.subr.bf16.mxu1 %v17872_v0 }
 0x1c9   : > { %15883 = vmatpush3.bf16.msra.mxu1 %v17872_v0 }
 0x1ca   : > { %15884 = vmatprep.subr.bf16.mxu1 %v17873_v62 }
 0x1cc   : > { %15877 = vmatmul.mubr.msk.bf16.gmra.mrb[4].mxu1 %vm18950_vm5, %v12481_v25 }
 0x1cd   : > { %15885 = vmatpush3.bf16.msra.mxu1 %v17873_v62  ;;  %15896 = vmatprep.mubr.bf16.mxu1 %v18775_v50  ;;  %v17879_v50 = vld [vmem:[%s22607_s2 + $0x200] sm:$0xff]  }
 0x1ce   : > { %15886 = vmatprep.subr.bf16.mxu1 %v17874_v24 }
 0x1d1   : > { %15887 = vmatpush3.bf16.msra.mxu1 %v17874_v24 }
 0x1d2   : > { %15888 = vmatprep.subr.bf16.mxu1 %v17875_v53 }
 0x1d5   : > { %15889 = vmatpush3.bf16.msra.mxu1 %v17875_v53  ;;  %v17903_v53 = vld [vmem:[%s22607_s2 + $0x240] sm:$0xff]  }
 0x1d6   : > { %15890 = vmatprep.subr.bf16.mxu1 %v17876_v55 }
 0x1d9   : > { %15891 = vmatpush3.bf16.msra.mxu1 %v17876_v55 }
 0x1da   : > { %15892 = vmatprep.subr.bf16.mxu1 %v17877_v51 }
 0x1dd   : > { %15893 = vmatpush3.bf16.msra.mxu1 %v17877_v51 }
 0x1de   : > { %15894 = vmatprep.subr.bf16.mxu1 %v17878_v61 }
 0x1e1   : > { %15895 = vmatpush3.bf16.msra.mxu1 %v17878_v61 }
 0x1e2   : > { %15904 = vmatprep.subr.bf16.mxu1 %v17879_v50 }
 0x1e4   : > { %15897 = vmatmul.mubr.bf16.vlgmr.msra.gmra.mrb[0].mxu1 %v18812_v6  ;;  %v17883_v6 = vld [vmem:[%s22607_s2 + $0x220] sm:$0xff]  }
 0x1e5   : > { %15900 = vmatprep.mubr.bf16.mxu1 %v18833_v14  ;;  %15905 = vmatpush3.bf16.msra.mxu1 %v17879_v50  ;;  %v17884_v14 = vld [vmem:[%s22607_s2 + $0x228] sm:$0xff]  }
 0x1e6   : > { %15906 = vmatprep.subr.bf16.mxu1 %v17880_v30 }
 0x1e9   : > { %15907 = vmatpush3.bf16.msra.mxu1 %v17880_v30  ;;  %v17904_v30 = vld [vmem:[%s22607_s2 + $0x2c0] sm:$0xff]  }
 0x1ea   : > { %15908 = vmatprep.subr.bf16.mxu1 %v17881_v31 }
 0x1ec   : > { %15901 = vmatmul.mubr.bf16.gmra.mrb[4].mxu1 %v1807_v56  ;;  %v17907_v56 = vld [vmem:[%s22607_s2 + $0x250] sm:$0xff]  }
 0x1ed   : > { %15909 = vmatpush3.bf16.msra.mxu1 %v17881_v31  ;;  %15920 = vmatprep.mubr.msk.bf16.mxu1 %vm18964_vm6, %v19032_v16  ;;  %v17890_v16 = vld [vmem:[%s22607_s2 + $0x288] sm:$0xff]  }
 0x1ee   : > { %15910 = vmatprep.subr.bf16.mxu1 %v17882_v46 }
 0x1f1   : > { %15911 = vmatpush3.bf16.msra.mxu1 %v17882_v46  ;;  %v17905_v46 = vld [vmem:[%s22607_s2 + $0x248] sm:$0xff]  }
 0x1f2   : > { %15912 = vmatprep.subr.bf16.mxu1 %v17883_v6 }
 0x1f5   : > { %15913 = vmatpush3.bf16.msra.mxu1 %v17883_v6  ;;  %v17908_v6 = vld [vmem:[%s22607_s2 + $0x2d0] sm:$0xff]  }
 0x1f6   : > { %15914 = vmatprep.subr.bf16.mxu1 %v17884_v14 }
 0x1f9   : > { %15915 = vmatpush3.bf16.msra.mxu1 %v17884_v14  ;;  %v17909_v14 = vld [vmem:[%s22607_s2 + $0x258] sm:$0xff]  }
 0x1fa   : > { %15916 = vmatprep.subr.bf16.mxu1 %v17885_v8 }
 0x1fd   : > { %15917 = vmatpush3.bf16.msra.mxu1 %v17885_v8  ;;  %v17910_v8 = vld [vmem:[%s22607_s2 + $0x2d8] sm:$0xff]  }
 0x1fe   : > { %15918 = vmatprep.subr.bf16.mxu1 %v17886_v57 }
 0x201   : > { %15919 = vmatpush3.bf16.msra.mxu1 %v17886_v57  ;;  %v17911_v57 = vld [vmem:[%s22607_s2 + $0x260] sm:$0xff]  }
 0x202   : > { %16108 = vmatprep.subr.bf16.mxu1 %v19155_v63 }
 0x204   : > { %15921 = vmatmul.mubr.msk.bf16.vlgmr.msra.gmra.mrb[0].mxu1 %vm19010_vm9, %v19036_v17  ;;  %v17895_v17 = vld [vmem:[%s22607_s2 + $0x2a0] sm:$0xff]   ;;  %vm364_vm9 = vcmp.ne.s32.totalorder %v18749_v28, 0 }
 0x205   : > { %15924 = vmatprep.mubr.msk.bf16.mxu1 %vm19021_vm13, %v19058_v35  ;;  %16109 = vmatpush3.bf16.msra.mxu1 %v17888_v3  ;;  %v17896_v35 = vld [vmem:[%s22607_s2 + $0x2a0] sm:$0xff]  }
 0x206   : > { %16110 = vmatprep.subr.bf16.mxu1 %v19155_v63  ;;  %15937 = vmatpush3.bf16.msra.mxu0 %v17895_v17  ;;  %v17912_v3 = vld [vmem:[%s22607_s2 + $0x2e0] sm:$0xff]  }
 0x207   : > { %15938 = vmatprep.subr.bf16.mxu0 %v19308_v1 }
 0x209   : > { %16111 = vmatpush3.bf16.msra.mxu1 %v17890_v16  ;;  %v17913_v16 = vld [vmem:[%s22607_s2 + $0x268] sm:$0xff]  }
 0x20a   : > { %16112 = vmatprep.subr.bf16.mxu1 %v19155_v63  ;;  %15939 = vmatpush3.bf16.msra.mxu0 %v17897_v18 }
 0x20b   : > { %15940 = vmatprep.subr.bf16.mxu0 %v19308_v1 }
 0x20c   : > { %15925 = vmatmul.mubr.msk.bf16.gmra.mrb[4].mxu1 %vm19038_vm1, %v12541_v20  ;;  %v17916_v20 = vld [vmem:[%s22607_s2 + $0x2f0] sm:$0xff]  }
 0x20d   : > { %16113 = vmatpush3.bf16.msra.mxu1 %v17892_v4  ;;  %16124 = vmatprep.mubr.msk.bf16.mxu1 %vm18625_vm10, %v19308_v1  ;;  %v17915_v4 = vld [vmem:[%s22607_s2 + $0x270] sm:$0xff]  }
 0x20e   : > { %16114 = vmatprep.subr.bf16.mxu1 %v19155_v63  ;;  %15941 = vmatpush3.bf16.msra.mxu0 %v17899_v32  ;;  %v17919_v32 = vld [vmem:[%s22607_s2 + $0x2c0] sm:$0xff]  }
 0x20f   : > { %15942 = vmatprep.subr.bf16.mxu0 %v19308_v1 }
 0x211   : > { %16115 = vmatpush3.bf16.msra.mxu1 %v17894_v49  ;;  %v19426_v49 = vsel %vm364_vm9, 1.0, %v19308_v1 }
 0x212   : > { %16116 = vmatprep.subr.bf16.mxu1 %v19308_v1  ;;  %15943 = vmatpush3.bf16.msra.mxu0 %v17901_v58 }
 0x213   : > { %15948 = vmatprep.subr.bf16.mxu0 %v19308_v1 }
 0x215   : > { %16117 = vmatpush3.bf16.msra.mxu1 %v17896_v35  ;;  %v17917_v35 = vld [vmem:[%s22607_s2 + $0x278] sm:$0xff]  }
 0x216   : > { %16118 = vmatprep.subr.bf16.mxu1 %v19308_v1 }
 0x219   : > { %16119 = vmatpush3.bf16.msra.mxu1 %v17898_v22  ;;  %v17918_v22 = vld [vmem:[%s22607_s2 + $0x2f8] sm:$0xff]  }
 0x21a   : > { %16120 = vmatprep.subr.bf16.mxu1 %v19308_v1 }
 0x21d   : > { %16121 = vmatpush3.bf16.msra.mxu1 %v17900_v33 }
 0x21e   : > { %16122 = vmatprep.subr.bf16.mxu1 %v19308_v1 }
 0x221   : > { %16123 = vmatpush3.bf16.msra.mxu1 %v17902_v41  ;;  %v17920_v41 = vld [vmem:[%s22607_s2 + $0x340] sm:$0xff]  }
 0x222   : > { %16148 = vmatprep.subr.bf16.mxu1 %v19308_v1 }
 0x2d7   : > { %v15922_v7 = vpop.f32.mrb[0].mxu1 }
 0x2d8   : > { %v2110_v39 = vadd.f32 %v15922_v7, %v12543_v59  ;;  %v2065_v44 = vpop.f32.mrb[1].mxu1  ;;  %v17922_v7 = vld [vmem:[%s22607_s2 + $0x348] sm:$0xff]  }
 0x2d9   : > { %v2108_v52 = vadd.f32 %v12543_v59, %v2065_v44  ;;  %v15923_v34 = vpop.f32.mrb[2].mxu1  ;;  %v17924_v44 = vld [vmem:[%s22607_s2 + $0x350] sm:$0xff]  }
 0x2da   : > { %vm2118_vm0 = vcmp.ge.f32.partialorder %v2110_v39, 0.0  ;;  %v2130_v45 = vmul.f32 %v12544_v10, %v2110_v39  ;;  %v2111_v36 = vadd.f32 %v15923_v34, %v12543_v59  ;;  %v2068_v42 = vpop.f32.mrb[3].mxu1  ;;  %v17926_v34 = vld [vmem:[%s22607_s2 + $0x358] sm:$0xff]  }
 0x2db   : > { %vm2116_vm2 = vcmp.ge.f32.partialorder %v2108_v52, 0.0  ;;  %v2128_v47 = vmul.f32 %v12544_v10, %v2108_v52  ;;  %v2109_v63 = vadd.f32 %v12543_v59, %v2068_v42  ;;  %v17929_v42 = vld [vmem:[%s22607_s2 + $0x2e8] sm:$0xff]  }
 0x2dc   : > { %v2138_v2 = vsel %vm2118_vm0, %v2110_v39, %v2130_v45  ;;  %vm2119_vm3 = vcmp.ge.f32.partialorder %v2111_v36, 0.0  ;;  %v2131_v5 = vmul.f32 %v12544_v10, %v2111_v36  ;;  %v17923_v39 = vld [vmem:[%s22607_s2 + $0x2d0] sm:$0xff]   ;;  %v17927_v45 = vld [vmem:[%s22607_s2 + $0x2e0] sm:$0xff]  }
 0x2dd   : > { %2146 = vst [vmem:[%s19357_s14 + $0x10] sm:$0xff] %v2138_v2  ;;  %2154 = vst [vmem:[#allocation3 + $0x20] sm:$0xff] %v2138_v2  ;;  %v2136_v9 = vsel %vm2116_vm2, %v2108_v52, %v2128_v47  ;;  %vm2117_vm4 = vcmp.ge.f32.partialorder %v2109_v63, 0.0  ;;  %v2129_v12 = vmul.f32 %v12544_v10, %v2109_v63  ;;  %v17925_v52 = vld [vmem:[%s22607_s2 + $0x2d8] sm:$0xff]   ;;  %v17930_v47 = vld [vmem:[%s22607_s2 + $0x368] sm:$0xff]  }
 0x2de   : > { %2144 = vst [vmem:[%s19357_s14] sm:$0xff] %v2136_v9  ;;  %2152 = vst [vmem:[#allocation3 + $0x10] sm:$0xff] %v2136_v9  ;;  %v2139_v13 = vsel %vm2119_vm3, %v2111_v36, %v2131_v5  ;;  %v17928_v36 = vld [vmem:[%s22607_s2 + $0x360] sm:$0xff]   ;;  %v17932_v2 = vld [vmem:[%s22607_s2 + $0x370] sm:$0xff]  }
 0x2df   : > { %2147 = vst [vmem:[%s19357_s14 + $0x18] sm:$0xff] %v2139_v13  ;;  %2155 = vst [vmem:[#allocation3 + $0x28] sm:$0xff] %v2139_v13  ;;  %v2137_v19 = vsel %vm2117_vm4, %v2109_v63, %v2129_v12  ;;  %v15926_v21 = vpop.f32.mrb[4].mxu1  ;;  %v17931_v63 = vld [vmem:[%s22607_s2 + $0x2f0] sm:$0xff]   ;;  %v17933_v5 = vld [vmem:[%s22607_s2 + $0x2f8] sm:$0xff]  }
 0x2e0   : > { %2145 = vst [vmem:[%s19357_s14 + $0x8] sm:$0xff] %v2137_v19  ;;  %2153 = vst [vmem:[#allocation3 + $0x18] sm:$0xff] %v2137_v19  ;;  %v2114_v23 = vadd.f32 %v15926_v21, %v12543_v59  ;;  %v2081_v48 = vpop.f32.mrb[5].mxu1  ;;  %v17934_v9 = vld [vmem:[%s22607_s2 + $0x378] sm:$0xff]   ;;  %v17935_v13 = vld [vmem:[%s22607_s2 + $0x300] sm:$0xff]  }
 0x2e1   : > { %v2112_v26 = vadd.f32 %v12543_v59, %v2081_v48  ;;  %v15927_v27 = vpop.f32.mrb[6].mxu1 }
 0x2e2   : > { %vm2122_vm5 = vcmp.ge.f32.partialorder %v2114_v23, 0.0  ;;  %v2134_v29 = vmul.f32 %v12544_v10, %v2114_v23  ;;  %v2115_v37 = vadd.f32 %v15927_v27, %v12543_v59  ;;  %v2084_v40 = vpop.f32.mrb[7].mxu1  ;;  %v17938_v27 = vld [vmem:[%s22607_s2 + $0x3c8] sm:$0xff]  }
 0x2e3   : > { %vm2120_vm6 = vcmp.ge.f32.partialorder %v2112_v26, 0.0  ;;  %v2132_v43 = vmul.f32 %v12544_v10, %v2112_v26  ;;  %v2113_v15 = vadd.f32 %v12543_v59, %v2084_v40  ;;  %v17941_v40 = vld [vmem:[%s22607_s2 + $0x318] sm:$0xff]  }
 0x2e4   : > { %v2142_v0 = vsel %vm2122_vm5, %v2114_v23, %v2134_v29  ;;  %vm2123_vm7 = vcmp.ge.f32.partialorder %v2115_v37, 0.0  ;;  %v2135_v62 = vmul.f32 %v12544_v10, %v2115_v37  ;;  %v17936_v23 = vld [vmem:[%s22607_s2 + $0x3c0] sm:$0xff]   ;;  %v17939_v29 = vld [vmem:[%s22607_s2 + $0x310] sm:$0xff]  }
 0x2e5   : > { %2150 = vst [vmem:[%s19357_s14 + $0x30] sm:$0xff] %v2142_v0  ;;  %2158 = vst [vmem:[#allocation3 + $0x40] sm:$0xff] %v2142_v0  ;;  %v2140_v11 = vsel %vm2120_vm6, %v2112_v26, %v2132_v43  ;;  %vm2121_vm8 = vcmp.ge.f32.partialorder %v2113_v15, 0.0  ;;  %v2133_v24 = vmul.f32 %v12544_v10, %v2113_v15  ;;  %v2186_v25 = vld [vmem:[#allocation3 + $0x8] ss:$2 sm:$0xff]  ;;  %v17942_v43 = vld [vmem:[%s22607_s2 + $0x3d8] sm:$0xff]  }
 0x2e6   : > { %2148 = vst [vmem:[%s19357_s14 + $0x20] sm:$0xff] %v2140_v11  ;;  %2156 = vst [vmem:[#allocation3 + $0x30] sm:$0xff] %v2140_v11  ;;  %v2143_v55 = vsel %vm2123_vm7, %v2115_v37, %v2135_v62  ;;  %v2187_v51 = vpack.c.bf16 %v2186_v25, %v2186_v25  ;;  %v2165_v17 = vld [vmem:[#allocation3 + $0x7] ss:$2 sm:$0xff]  ;;  %v3589_v19 = vld [vmem:[#allocation3 + $0x20] ss:$2 sm:$0xff] }
 0x2e7   : > { %2151 = vst [vmem:[%s19357_s14 + $0x38] sm:$0xff] %v2143_v55  ;;  %2159 = vst [vmem:[#allocation3 + $0x48] sm:$0xff] %v2143_v55  ;;  %v2141_v61 = vsel %vm2121_vm8, %v2113_v15, %v2133_v24  ;;  %v3178_v50 = vld [vmem:[#allocation3 + $0x18] ss:$2 sm:$0xff]  ;;  %v2166_v18 = vmul.f32 %v19426_v49, %v2165_v17  ;;  %v3372_v33 = vld [vmem:[#allocation3 + $0x19] ss:$2 sm:$0xff]  ;;  %v3590_v48 = vpack.c.bf16 %v3589_v19, %v3589_v19 }
 0x2e8   : > { %2149 = vst [vmem:[%s19357_s14 + $0x28] sm:$0xff] %v2141_v61  ;;  %2157 = vst [vmem:[#allocation3 + $0x38] sm:$0xff] %v2141_v61  ;;  %15945 = vmatmul.mubr.bf16.vlgmr.msra.gmra.mrb[8].mxu0 %v2187_v51  ;;  %v3179_v31 = vpack.c.bf16 %v3178_v50, %v3178_v50  ;;  %v3373_v59 = vpack.c.bf16 %v3372_v33, %v3372_v33  ;;  %v17921_v10 = vld [vmem:[%s22607_s2 + $0x2c8] sm:$0xff]   ;;  %v17940_v37 = vld [vmem:[%s22607_s2 + $0x3d0] sm:$0xff]  }
 0x2e9   : > { %15949 = vmatpush3.bf16.msra.mxu0 %v17903_v53  ;;  %15964 = vmatprep.mubr.msk.bf16.mxu0 %vm18625_vm10, %v19308_v1  ;;  %v2167_v58 = vpack.c.bf16 %v2166_v18, %v2166_v18  ;;  %v2382_v12 = vld [vmem:[#allocation3 + $0x9] ss:$2 sm:$0xff]  ;;  %v17943_v15 = vld [vmem:[%s22607_s2 + $0x320] sm:$0xff]   ;;  %v17949_v55 = vld [vmem:[%s22607_s2 + $0x338] sm:$0xff]  }
 0x2ea   : > { %16125 = vmatmul.mubr.bf16.vlgmr.msra.gmra.mrb[8].mxu1 %v3179_v31  ;;  %15950 = vmatprep.subr.bf16.mxu0 %v19308_v1  ;;  %v2383_v21 = vpack.c.bf16 %v2382_v12, %v2382_v12  ;;  %v17937_v26 = vld [vmem:[%s22607_s2 + $0x308] sm:$0xff]   ;;  %v17944_v0 = vld [vmem:[%s22607_s2 + $0x3e0] sm:$0xff]   ;;  %v17947_v24 = vld [vmem:[%s22607_s2 + $0x330] sm:$0xff]  }
 0x2eb   : > { %16149 = vmatpush3.bf16.msra.mxu1 %v17904_v30  ;;  %16164 = vmatprep.mubr.msk.bf16.mxu1 %vm18625_vm10, %v19308_v1  ;;  %v17945_v62 = vld [vmem:[%s22607_s2 + $0x328] sm:$0xff]   ;;  %v17948_v25 = vld [vmem:[%s22607_s2 + $0x3f0] sm:$0xff]   ;;  %v17950_v50 = vld [vmem:[%s22607_s2 + $0x3f8] sm:$0xff]  }
 0x2ec   : > { %16150 = vmatprep.subr.bf16.mxu1 %v19308_v1  ;;  %v17946_v11 = vld [vmem:[%s22607_s2 + $0x3e8] sm:$0xff]   ;;  %v17951_v31 = vld [vmem:[%s22607_s2 + $0x340] sm:$0xff]   ;;  %v17964_v18 = vld [vmem:[%s22607_s2 + $0x470] sm:$0xff]  }
 0x2ed   : > { %15951 = vmatpush3.bf16.msra.mxu0 %v17905_v46  ;;  %v2491_v53 = vld [vmem:[#allocation3 + $0xf] ss:$2 sm:$0xff]  ;;  %v2601_v33 = vld [vmem:[#allocation3 + $0x10] ss:$2 sm:$0xff] }
 0x2ee   : > { %15952 = vmatprep.subr.bf16.mxu0 %v19308_v1  ;;  %v3805_v51 = vld [vmem:[#allocation3 + $0x27] ss:$2 sm:$0xff]  ;;  %v2492_v61 = vmul.f32 %v19426_v49, %v2491_v53  ;;  %v17981_v12 = vld [vmem:[%s22607_s2 + $0x3b8] sm:$0xff]  }
 0x2ef   : > { %16151 = vmatpush3.bf16.msra.mxu1 %v17906_v54  ;;  %v3806_v30 = vmul.f32 %v19426_v49, %v3805_v51  ;;  %v17952_v54 = vld [vmem:[%s22607_s2 + $0x440] sm:$0xff]   ;;  %v17962_v17 = vld [vmem:[%s22607_s2 + $0x468] sm:$0xff]   ;;  %v17982_v19 = vld [vmem:[%s22607_s2 + $0x278] sm:$0xff]  }
 0x2f0   : > { %16152 = vmatprep.subr.bf16.mxu1 %v19308_v1  ;;  %v2493_v46 = vpack.c.bf16 %v2492_v61, %v2492_v61  ;;  %v17994_v53 = vld [vmem:[%s22607_s2 + $0x328] sm:$0xff]   ;;  %v17996_v51 = vld [vmem:[%s22607_s2 + $0x330] sm:$0xff]  }
 0x2f1   : > { %15953 = vmatpush3.bf16.msra.mxu0 %v17907_v56  ;;  %v3807_v56 = vpack.c.bf16 %v3806_v30, %v3806_v30  ;;  %v2819_v61 = vld [vmem:[#allocation3 + $0x17] ss:$2 sm:$0xff] }
 0x2f2   : > { %15954 = vmatprep.subr.bf16.mxu0 %v19308_v1  ;;  %v4455_v30 = vld [vmem:[#allocation3 + $0x2f] ss:$2 sm:$0xff] }
 0x2f3   : > { %16153 = vmatpush3.bf16.msra.mxu1 %v17908_v6  ;;  %v17953_v6 = vld [vmem:[%s22607_s2 + $0x348] sm:$0xff]  }
 0x2f4   : > { %16154 = vmatprep.subr.bf16.mxu1 %v19308_v1 }
 0x2f5   : > { %15955 = vmatpush3.bf16.msra.mxu0 %v17909_v14  ;;  %v17954_v14 = vld [vmem:[%s22607_s2 + $0x448] sm:$0xff]  }
 0x2f6   : > { %15956 = vmatprep.subr.bf16.mxu0 %v19308_v1 }
 0x2f7   : > { %16155 = vmatpush3.bf16.msra.mxu1 %v17910_v8  ;;  %v17955_v8 = vld [vmem:[%s22607_s2 + $0x350] sm:$0xff]  }
 0x2f8   : > { %16156 = vmatprep.subr.bf16.mxu1 %v19308_v1 }
 0x2f9   : > { %15957 = vmatpush3.bf16.msra.mxu0 %v17911_v57  ;;  %v17956_v57 = vld [vmem:[%s22607_s2 + $0x450] sm:$0xff]  }
 0x2fa   : > { %15958 = vmatprep.subr.bf16.mxu0 %v19308_v1 }
 0x2fb   : > { %16157 = vmatpush3.bf16.msra.mxu1 %v17912_v3  ;;  %v17957_v3 = vld [vmem:[%s22607_s2 + $0x358] sm:$0xff]  }
 0x2fc   : > { %16158 = vmatprep.subr.bf16.mxu1 %v19308_v1 }
 0x2fd   : > { %15959 = vmatpush3.bf16.msra.mxu0 %v17913_v16  ;;  %v17958_v16 = vld [vmem:[%s22607_s2 + $0x458] sm:$0xff]  }
 0x2fe   : > { %15960 = vmatprep.subr.bf16.mxu0 %v19308_v1 }
 0x2ff   : > { %16159 = vmatpush3.bf16.msra.mxu1 %v17914_v60  ;;  %v17959_v60 = vld [vmem:[%s22607_s2 + $0x360] sm:$0xff]  }
 0x300   : > { %16160 = vmatprep.subr.bf16.mxu1 %v19308_v1 }
 0x301   : > { %15961 = vmatpush3.bf16.msra.mxu0 %v17915_v4  ;;  %v17960_v4 = vld [vmem:[%s22607_s2 + $0x460] sm:$0xff]  }
 0x302   : > { %15962 = vmatprep.subr.bf16.mxu0 %v19308_v1 }
 0x303   : > { %16161 = vmatpush3.bf16.msra.mxu1 %v17916_v20  ;;  %v17961_v20 = vld [vmem:[%s22607_s2 + $0x368] sm:$0xff]  }
 0x304   : > { %16162 = vmatprep.subr.bf16.mxu1 %v19308_v1 }
 0x305   : > { %15963 = vmatpush3.bf16.msra.mxu0 %v17917_v35  ;;  %v17963_v35 = vld [vmem:[%s22607_s2 + $0x370] sm:$0xff]  }
 0x306   : > { %15968 = vmatprep.subr.bf16.mxu0 %v19308_v1 }
 0x307   : > { %16163 = vmatpush3.bf16.msra.mxu1 %v17918_v22  ;;  %v17965_v22 = vld [vmem:[%s22607_s2 + $0x378] sm:$0xff]  }
 0x308   : > { %15965 = vmatmul.mubr.bf16.vlgmr.msra.gmra.mrb[12].mxu0 %v2167_v58  ;;  %16188 = vmatprep.subr.bf16.mxu1 %v19308_v1  ;;  %v17967_v58 = vld [vmem:[%s22607_s2 + $0x380] sm:$0xff]  }
 0x309   : > { %15969 = vmatpush3.bf16.msra.mxu0 %v17919_v32  ;;  %15984 = vmatprep.mubr.msk.bf16.mxu0 %vm18625_vm10, %v19308_v1  ;;  %v17966_v32 = vld [vmem:[%s22607_s2 + $0x478] sm:$0xff]  }
 0x30a   : > { %16165 = vmatmul.mubr.bf16.vlgmr.msra.gmra.mrb[12].mxu1 %v3373_v59  ;;  %15970 = vmatprep.subr.bf16.mxu0 %v19308_v1  ;;  %v2602_v59 = vpack.c.bf16 %v2601_v33, %v2601_v33 }
 0x30b   : > { %16189 = vmatpush3.bf16.msra.mxu1 %v17920_v41  ;;  %16204 = vmatprep.mubr.msk.bf16.mxu1 %vm18625_vm10, %v19308_v1  ;;  %v4022_v41 = vld [vmem:[#allocation3 + $0x29] ss:$2 sm:$0xff] }
 0x30c   : > { %16190 = vmatprep.subr.bf16.mxu1 %v19308_v1 }
 0x30d   : > { %15971 = vmatpush3.bf16.msra.mxu0 %v17921_v10  ;;  %v17968_v10 = vld [vmem:[%s22607_s2 + $0x240] sm:$0xff]  }
 0x30e   : > { %15972 = vmatprep.subr.bf16.mxu0 %v19308_v1 }
 0x30f   : > { %16191 = vmatpush3.bf16.msra.mxu1 %v17922_v7  ;;  %v4023_v7 = vpack.c.bf16 %v4022_v41, %v4022_v41 }
 0x310   : > { %16192 = vmatprep.subr.bf16.mxu1 %v19308_v1 }
 0x311   : > { %15973 = vmatpush3.bf16.msra.mxu0 %v17923_v39  ;;  %v17969_v39 = vld [vmem:[%s22607_s2 + $0x388] sm:$0xff]  }
 0x312   : > { %15974 = vmatprep.subr.bf16.mxu0 %v19308_v1 }
 0x313   : > { %16193 = vmatpush3.bf16.msra.mxu1 %v17924_v44  ;;  %v17970_v44 = vld [vmem:[%s22607_s2 + $0x248] sm:$0xff]  }
 0x314   : > { %16194 = vmatprep.subr.bf16.mxu1 %v19308_v1 }
 0x315   : > { %15975 = vmatpush3.bf16.msra.mxu0 %v17925_v52  ;;  %v17971_v52 = vld [vmem:[%s22607_s2 + $0x390] sm:$0xff]  }
 0x316   : > { %15976 = vmatprep.subr.bf16.mxu0 %v19308_v1 }
 0x317   : > { %16195 = vmatpush3.bf16.msra.mxu1 %v17926_v34  ;;  %v19667_v34 = vld [vmem:[#allocation2 + $0x8] sm:$0xff] }
 0x318   : > { %16196 = vmatprep.subr.bf16.mxu1 %v19308_v1 }
 0x319   : > { %15977 = vmatpush3.bf16.msra.mxu0 %v17927_v45  ;;  %v17972_v45 = vld [vmem:[%s22607_s2 + $0x250] sm:$0xff]  }
 0x31a   : > { %15978 = vmatprep.subr.bf16.mxu0 %v19308_v1 }
 0x31b   : > { %16197 = vmatpush3.bf16.msra.mxu1 %v17928_v36  ;;  %v17974_v36 = vld [vmem:[%s22607_s2 + $0x258] sm:$0xff]  }
 0x31c   : > { %16198 = vmatprep.subr.bf16.mxu1 %v19308_v1 }
 0x31d   : > { %15979 = vmatpush3.bf16.msra.mxu0 %v17929_v42  ;;  %v17975_v42 = vld [vmem:[%s22607_s2 + $0x3a0] sm:$0xff]  }
 0x31e   : > { %15980 = vmatprep.subr.bf16.mxu0 %v19308_v1 }
 0x31f   : > { %16199 = vmatpush3.bf16.msra.mxu1 %v17930_v47  ;;  %v17976_v47 = vld [vmem:[%s22607_s2 + $0x260] sm:$0xff]  }
 0x320   : > { %16200 = vmatprep.subr.bf16.mxu1 %v19308_v1 }
 0x321   : > { %15981 = vmatpush3.bf16.msra.mxu0 %v17931_v63  ;;  %v17977_v63 = vld [vmem:[%s22607_s2 + $0x3a8] sm:$0xff]  }
 0x322   : > { %15982 = vmatprep.subr.bf16.mxu0 %v19308_v1 }
 0x323   : > { %16201 = vmatpush3.bf16.msra.mxu1 %v17932_v2  ;;  %v17978_v2 = vld [vmem:[%s22607_s2 + $0x268] sm:$0xff]  }
 0x324   : > { %16202 = vmatprep.subr.bf16.mxu1 %v19308_v1 }
 0x325   : > { %15983 = vmatpush3.bf16.msra.mxu0 %v17933_v5  ;;  %v17979_v5 = vld [vmem:[%s22607_s2 + $0x3b0] sm:$0xff]  }
 0x326   : > { %15988 = vmatprep.subr.bf16.mxu0 %v19308_v1 }
 0x327   : > { %16203 = vmatpush3.bf16.msra.mxu1 %v17934_v9  ;;  %v17980_v9 = vld [vmem:[%s22607_s2 + $0x270] sm:$0xff]  }
 0x328   : > { %15985 = vmatmul.mubr.bf16.vlgmr.msra.gmra.mrb[16].mxu0 %v2383_v21  ;;  %16228 = vmatprep.subr.bf16.mxu1 %v19308_v1  ;;  %v2710_v21 = vld [vmem:[#allocation3 + $0x11] ss:$2 sm:$0xff] }
 0x329   : > { %15989 = vmatpush3.bf16.msra.mxu0 %v17935_v13  ;;  %16004 = vmatprep.mubr.msk.bf16.mxu0 %vm18625_vm10, %v19308_v1  ;;  %v4134_v13 = vld [vmem:[#allocation3 + $0x27] ss:$2 sm:$0xff] }
 0x32a   : > { %16205 = vmatmul.mubr.bf16.vlgmr.msra.gmra.mrb[16].mxu1 %v3590_v48  ;;  %15990 = vmatprep.subr.bf16.mxu0 %v19308_v1  ;;  %v17983_v48 = vld [vmem:[%s22607_s2 + $0x3c0] sm:$0xff]  }
 0x32b   : > { %16229 = vmatpush3.bf16.msra.mxu1 %v17936_v23  ;;  %16244 = vmatprep.mubr.msk.bf16.mxu1 %vm18625_vm10, %v19308_v1  ;;  %v4135_v23 = vmul.f32 %v19426_v49, %v4134_v13  ;;  %v18019_v13 = vld [vmem:[%s22607_s2 + $0x450] sm:$0xff]  }
 0x32c   : > { %16230 = vmatprep.subr.bf16.mxu1 %v19308_v1 }
 0x32d   : > { %15991 = vmatpush3.bf16.msra.mxu0 %v17937_v26  ;;  %v2711_v26 = vpack.c.bf16 %v2710_v21, %v2710_v21  ;;  %v18021_v21 = vld [vmem:[%s22607_s2 + $0x458] sm:$0xff]  }
 0x32e   : > { %15992 = vmatprep.subr.bf16.mxu0 %v19308_v1 }
 0x32f   : > { %16231 = vmatpush3.bf16.msra.mxu1 %v17938_v27  ;;  %v17984_v27 = vld [vmem:[%s22607_s2 + $0x300] sm:$0xff]  }
 0x330   : > { %16232 = vmatprep.subr.bf16.mxu1 %v19308_v1 }
 0x331   : > { %15993 = vmatpush3.bf16.msra.mxu0 %v17939_v29  ;;  %v4136_v29 = vpack.c.bf16 %v4135_v23, %v4135_v23  ;;  %v18022_v23 = vld [vmem:[%s22607_s2 + $0x418] sm:$0xff]  }
 0x332   : > { %15994 = vmatprep.subr.bf16.mxu0 %v19308_v1 }
 0x333   : > { %16233 = vmatpush3.bf16.msra.mxu1 %v17940_v37  ;;  %v17985_v37 = vld [vmem:[%s22607_s2 + $0x3c8] sm:$0xff]  }
 0x334   : > { %16234 = vmatprep.subr.bf16.mxu1 %v19308_v1 }
 0x335   : > { %15995 = vmatpush3.bf16.msra.mxu0 %v17941_v40  ;;  %v17986_v40 = vld [vmem:[%s22607_s2 + $0x308] sm:$0xff]  }
 0x336   : > { %15996 = vmatprep.subr.bf16.mxu0 %v19308_v1 }
 0x337   : > { %16235 = vmatpush3.bf16.msra.mxu1 %v17942_v43  ;;  %v17987_v43 = vld [vmem:[%s22607_s2 + $0x3d0] sm:$0xff]  }
 0x338   : > { %16236 = vmatprep.subr.bf16.mxu1 %v19308_v1 }
 0x339   : > { %15997 = vmatpush3.bf16.msra.mxu0 %v17943_v15  ;;  %v17988_v15 = vld [vmem:[%s22607_s2 + $0x310] sm:$0xff]  }
 0x33a   : > { %15998 = vmatprep.subr.bf16.mxu0 %v19308_v1 }
 0x33b   : > { %16237 = vmatpush3.bf16.msra.mxu1 %v17944_v0  ;;  %v17989_v0 = vld [vmem:[%s22607_s2 + $0x3d8] sm:$0xff]  }
 0x33c   : > { %16238 = vmatprep.subr.bf16.mxu1 %v19308_v1 }
 0x33d   : > { %15999 = vmatpush3.bf16.msra.mxu0 %v17945_v62  ;;  %v17990_v62 = vld [vmem:[%s22607_s2 + $0x318] sm:$0xff]  }
 0x33e   : > { %16000 = vmatprep.subr.bf16.mxu0 %v19308_v1 }
 0x33f   : > { %16239 = vmatpush3.bf16.msra.mxu1 %v17946_v11  ;;  %v17991_v11 = vld [vmem:[%s22607_s2 + $0x3e0] sm:$0xff]  }
 0x340   : > { %16240 = vmatprep.subr.bf16.mxu1 %v19308_v1 }
 0x341   : > { %16001 = vmatpush3.bf16.msra.mxu0 %v17947_v24  ;;  %v17992_v24 = vld [vmem:[%s22607_s2 + $0x320] sm:$0xff]  }
 0x342   : > { %16002 = vmatprep.subr.bf16.mxu0 %v19308_v1 }
 0x343   : > { %16241 = vmatpush3.bf16.msra.mxu1 %v17948_v25  ;;  %v17993_v25 = vld [vmem:[%s22607_s2 + $0x3e8] sm:$0xff]  }
 0x344   : > { %16242 = vmatprep.subr.bf16.mxu1 %v19308_v1 }
 0x345   : > { %16003 = vmatpush3.bf16.msra.mxu0 %v17949_v55  ;;  %v17995_v55 = vld [vmem:[%s22607_s2 + $0x3f0] sm:$0xff]  }
 0x346   : > { %16008 = vmatprep.subr.bf16.mxu0 %v19308_v1 }
 0x347   : > { %16243 = vmatpush3.bf16.msra.mxu1 %v17950_v50  ;;  %v17997_v50 = vld [vmem:[%s22607_s2 + $0x3f8] sm:$0xff]  }
 0x348   : > { %16005 = vmatmul.mubr.bf16.vlgmr.msra.gmra.mrb[20].mxu0 %v2493_v46  ;;  %16268 = vmatprep.subr.bf16.mxu1 %v19308_v1  ;;  %v17998_v46 = vld [vmem:[%s22607_s2 + $0x338] sm:$0xff]  }
 0x349   : > { %16009 = vmatpush3.bf16.msra.mxu0 %v17951_v31  ;;  %16024 = vmatprep.mubr.msk.bf16.mxu0 %vm18625_vm10, %v19308_v1  ;;  %v2820_v31 = vmul.f32 %v19426_v49, %v2819_v61  ;;  %v18030_v61 = vld [vmem:[%s22607_s2 + $0x438] sm:$0xff]  }
 0x34a   : > { %16245 = vmatmul.mubr.bf16.vlgmr.msra.gmra.mrb[20].mxu1 %v3807_v56  ;;  %16010 = vmatprep.subr.bf16.mxu0 %v19308_v1  ;;  %v17999_v56 = vld [vmem:[%s22607_s2 + $0x400] sm:$0xff]  }
 0x34b   : > { %16269 = vmatpush3.bf16.msra.mxu1 %v17952_v54  ;;  %16284 = vmatprep.mubr.msk.bf16.mxu1 %vm18625_vm10, %v19308_v1  ;;  %v4456_v54 = vmul.f32 %v19426_v49, %v4455_v30  ;;  %v18031_v30 = vld [vmem:[%s22607_s2 + $0x240] sm:$0xff]  }
 0x34c   : > { %16270 = vmatprep.subr.bf16.mxu1 %v19308_v1 }
 0x34d   : > { %16011 = vmatpush3.bf16.msra.mxu0 %v17953_v6  ;;  %v2821_v6 = vpack.c.bf16 %v2820_v31, %v2820_v31  ;;  %v4889_v31 = vld [vmem:[#allocation3 + $0x38] ss:$2 sm:$0xff] }
 0x34e   : > { %16012 = vmatprep.subr.bf16.mxu0 %v19308_v1 }
 0x34f   : > { %16271 = vmatpush3.bf16.msra.mxu1 %v17954_v14  ;;  %v18000_v14 = vld [vmem:[%s22607_s2 + $0x380] sm:$0xff]  }
 0x350   : > { %16272 = vmatprep.subr.bf16.mxu1 %v19308_v1 }
 0x351   : > { %16013 = vmatpush3.bf16.msra.mxu0 %v17955_v8  ;;  %v4457_v8 = vpack.c.bf16 %v4456_v54, %v4456_v54  ;;  %v18032_v54 = vld [vmem:[%s22607_s2 + $0x280] sm:$0xff]  }
 0x352   : > { %16014 = vmatprep.subr.bf16.mxu0 %v19308_v1 }
 0x353   : > { %16273 = vmatpush3.bf16.msra.mxu1 %v17956_v57  ;;  %v18001_v57 = vld [vmem:[%s22607_s2 + $0x408] sm:$0xff]  }
 0x354   : > { %16274 = vmatprep.subr.bf16.mxu1 %v19308_v1 }
 0x355   : > { %16015 = vmatpush3.bf16.msra.mxu0 %v17957_v3  ;;  %v18002_v3 = vld [vmem:[%s22607_s2 + $0x388] sm:$0xff]  }
 0x356   : > { %16016 = vmatprep.subr.bf16.mxu0 %v19308_v1 }
 0x357   : > { %16275 = vmatpush3.bf16.msra.mxu1 %v17958_v16  ;;  %v18003_v16 = vld [vmem:[%s22607_s2 + $0x410] sm:$0xff]  }
 0x358   : > { %16276 = vmatprep.subr.bf16.mxu1 %v19308_v1 }
 0x359   : > { %16017 = vmatpush3.bf16.msra.mxu0 %v17959_v60  ;;  %v18004_v60 = vld [vmem:[%s22607_s2 + $0x390] sm:$0xff]  }
 0x35a   : > { %16018 = vmatprep.subr.bf16.mxu0 %v19308_v1 }
 0x35b   : > { %16277 = vmatpush3.bf16.msra.mxu1 %v17960_v4  ;;  %v18005_v4 = vld [vmem:[%s22607_s2 + $0x418] sm:$0xff]  }
 0x35c   : > { %16278 = vmatprep.subr.bf16.mxu1 %v19308_v1 }
 0x35d   : > { %16019 = vmatpush3.bf16.msra.mxu0 %v17961_v20  ;;  %v18006_v20 = vld [vmem:[%s22607_s2 + $0x398] sm:$0xff]  }
 0x35e   : > { %16020 = vmatprep.subr.bf16.mxu0 %v19308_v1 }
 0x35f   : > { %16279 = vmatpush3.bf16.msra.mxu1 %v17962_v17  ;;  %v18007_v17 = vld [vmem:[%s22607_s2 + $0x420] sm:$0xff]  }
 0x360   : > { %16280 = vmatprep.subr.bf16.mxu1 %v19308_v1 }
 0x361   : > { %16021 = vmatpush3.bf16.msra.mxu0 %v17963_v35  ;;  %v18008_v35 = vld [vmem:[%s22607_s2 + $0x3a0] sm:$0xff]  }
 0x362   : > { %16022 = vmatprep.subr.bf16.mxu0 %v19308_v1 }
 0x363   : > { %16281 = vmatpush3.bf16.msra.mxu1 %v17964_v18  ;;  %v18009_v18 = vld [vmem:[%s22607_s2 + $0x428] sm:$0xff]  }
 0x364   : > { %16282 = vmatprep.subr.bf16.mxu1 %v19308_v1 }
 0x365   : > { %16023 = vmatpush3.bf16.msra.mxu0 %v17965_v22 }
 0x366   : > { %16028 = vmatprep.subr.bf16.mxu0 %v19308_v1 }
 0x367   : > { %16283 = vmatpush3.bf16.msra.mxu1 %v17966_v32  ;;  %v18010_v32 = vld [vmem:[%s22607_s2 + $0x3a8] sm:$0xff]  }
 0x368   : > { %16025 = vmatmul.mubr.bf16.vlgmr.msra.gmra.mrb[24].mxu0 %v2602_v59  ;;  %16308 = vmatprep.subr.bf16.mxu1 %v19308_v1  ;;  %v18011_v59 = vld [vmem:[%s22607_s2 + $0x430] sm:$0xff]  }
 0x369   : > { %16029 = vmatpush3.bf16.msra.mxu0 %v17967_v58  ;;  %16044 = vmatprep.mubr.msk.bf16.mxu0 %vm18625_vm10, %v19308_v1 }
 0x36a   : > { %16285 = vmatmul.mubr.bf16.vlgmr.msra.gmra.mrb[24].mxu1 %v4023_v7  ;;  %16030 = vmatprep.subr.bf16.mxu0 %v19308_v1 }
 0x36b   : > { %16309 = vmatpush3.bf16.msra.mxu1 %v17968_v10  ;;  %16324 = vmatprep.mubr.msk.bf16.mxu1 %vm18625_vm10, %v19308_v1 }
 0x36c   : > { %16310 = vmatprep.subr.bf16.mxu1 %v19308_v1  ;;  %v17973_v1 = vld [vmem:[%s22607_s2 + $0x398] sm:$0xff]  }
 0x36d   : > { %16031 = vmatpush3.bf16.msra.mxu0 %v17969_v39 }
 0x36e   : > { %16032 = vmatprep.subr.bf16.mxu0 %v19667_v34 }
 0x36f   : > { %16311 = vmatpush3.bf16.msra.mxu1 %v17970_v44  ;;  %v18012_v44 = vld [vmem:[%s22607_s2 + $0x3b0] sm:$0xff]  }
 0x370   : > { %16312 = vmatprep.subr.bf16.mxu1 %v19667_v34 }
 0x371   : > { %16033 = vmatpush3.bf16.msra.mxu0 %v17971_v52 }
 0x372   : > { %16034 = vmatprep.subr.bf16.mxu0 %v19667_v34 }
 0x373   : > { %16313 = vmatpush3.bf16.msra.mxu1 %v17972_v45  ;;  %v18013_v45 = vld [vmem:[%s22607_s2 + $0x438] sm:$0xff]  }
 0x374   : > { %16314 = vmatprep.subr.bf16.mxu1 %v19667_v34 }
 0x375   : > { %16035 = vmatpush3.bf16.msra.mxu0 %v17973_v1  ;;  %v18014_v1 = vld [vmem:[%s22607_s2 + $0x3b8] sm:$0xff]  }
 0x376   : > { %16036 = vmatprep.subr.bf16.mxu0 %v19667_v34 }
 0x377   : > { %16315 = vmatpush3.bf16.msra.mxu1 %v17974_v36  ;;  %v2929_v36 = vld [vmem:[#allocation3 + $0x18] ss:$2 sm:$0xff] }
 0x378   : > { %16316 = vmatprep.subr.bf16.mxu1 %v19667_v34 }
 0x379   : > { %16037 = vmatpush3.bf16.msra.mxu0 %v17975_v42  ;;  %v18015_v42 = vld [vmem:[%s22607_s2 + $0x440] sm:$0xff]  }
 0x37a   : > { %16038 = vmatprep.subr.bf16.mxu0 %v19667_v34 }
 0x37b   : > { %16317 = vmatpush3.bf16.msra.mxu1 %v17976_v47  ;;  %v4672_v47 = vld [vmem:[#allocation3 + $0x31] ss:$2 sm:$0xff] }
 0x37c   : > { %16318 = vmatprep.subr.bf16.mxu1 %v19667_v34 }
 0x37d   : > { %16039 = vmatpush3.bf16.msra.mxu0 %v17977_v63  ;;  %v2930_v63 = vpack.c.bf16 %v2929_v36, %v2929_v36  ;;  %v18046_v36 = vld [vmem:[%s22607_s2 + $0x2b8] sm:$0xff]  }
 0x37e   : > { %16040 = vmatprep.subr.bf16.mxu0 %v19667_v34 }
 0x37f   : > { %16319 = vmatpush3.bf16.msra.mxu1 %v17978_v2  ;;  %v18016_v2 = vld [vmem:[%s22607_s2 + $0x400] sm:$0xff]  }
 0x380   : > { %16320 = vmatprep.subr.bf16.mxu1 %v19667_v34 }
 0x381   : > { %16041 = vmatpush3.bf16.msra.mxu0 %v17979_v5  ;;  %v4673_v5 = vpack.c.bf16 %v4672_v47, %v4672_v47  ;;  %v5128_v47 = vld [vmem:[#allocation3 + $0x38] ss:$2 sm:$0xff] }
 0x382   : > { %16042 = vmatprep.subr.bf16.mxu0 %v19667_v34 }
 0x383   : > { %16321 = vmatpush3.bf16.msra.mxu1 %v17980_v9  ;;  %v18017_v9 = vld [vmem:[%s22607_s2 + $0x448] sm:$0xff]  }
 0x384   : > { %16322 = vmatprep.subr.bf16.mxu1 %v19667_v34 }
 0x385   : > { %16043 = vmatpush3.bf16.msra.mxu0 %v17981_v12  ;;  %v18018_v12 = vld [vmem:[%s22607_s2 + $0x408] sm:$0xff]  }
 0x386   : > { %16048 = vmatprep.subr.bf16.mxu0 %v19667_v34 }
 0x387   : > { %16323 = vmatpush3.bf16.msra.mxu1 %v17982_v19  ;;  %v18020_v19 = vld [vmem:[%s22607_s2 + $0x410] sm:$0xff]  }
 0x388   : > { %16045 = vmatmul.mubr.bf16.vlgmr.msra.gmra.mrb[28].mxu0 %v2711_v26  ;;  %16348 = vmatprep.subr.bf16.mxu1 %v19667_v34  ;;  %v18024_v26 = vld [vmem:[%s22607_s2 + $0x420] sm:$0xff]  }
 0x389   : > { %16049 = vmatpush3.bf16.msra.mxu0 %v17983_v48  ;;  %16064 = vmatprep.mubr.msk.bf16.mxu0 %vm18625_vm10, %v19667_v34  ;;  %v18023_v48 = vld [vmem:[%s22607_s2 + $0x460] sm:$0xff]  }
 0x38a   : > { %16325 = vmatmul.mubr.bf16.vlgmr.msra.gmra.mrb[28].mxu1 %v4136_v29  ;;  %16050 = vmatprep.subr.bf16.mxu0 %v19667_v34 }
 0x38b   : > { %16349 = vmatpush3.bf16.msra.mxu1 %v17984_v27  ;;  %16364 = vmatprep.mubr.msk.bf16.mxu1 %vm18625_vm10, %v19667_v34  ;;  %v18025_v27 = vld [vmem:[%s22607_s2 + $0x468] sm:$0xff]  }
 0x38c   : > { %16350 = vmatprep.subr.bf16.mxu1 %v19667_v34 }
 0x38d   : > { %16051 = vmatpush3.bf16.msra.mxu0 %v17985_v37  ;;  %v18026_v37 = vld [vmem:[%s22607_s2 + $0x428] sm:$0xff]  }
 0x38e   : > { %16052 = vmatprep.subr.bf16.mxu0 %v19667_v34 }
 0x38f   : > { %16351 = vmatpush3.bf16.msra.mxu1 %v17986_v40 }
 0x390   : > { %16352 = vmatprep.subr.bf16.mxu1 %v19667_v34 }
 0x391   : > { %16053 = vmatpush3.bf16.msra.mxu0 %v17987_v43 }
 0x392   : > { %16054 = vmatprep.subr.bf16.mxu0 %v19667_v34 }
 0x393   : > { %16353 = vmatpush3.bf16.msra.mxu1 %v17988_v15 }
 0x394   : > { %16354 = vmatprep.subr.bf16.mxu1 %v19667_v34 }
 0x395   : > { %16055 = vmatpush3.bf16.msra.mxu0 %v17989_v0 }
 0x396   : > { %16056 = vmatprep.subr.bf16.mxu0 %v19667_v34 }
 0x397   : > { %16355 = vmatpush3.bf16.msra.mxu1 %v17990_v62  ;;  %v18027_v62 = vld [vmem:[%s22607_s2 + $0x470] sm:$0xff]  }
 0x398   : > { %16356 = vmatprep.subr.bf16.mxu1 %v19667_v34 }
 0x399   : > { %16057 = vmatpush3.bf16.msra.mxu0 %v17991_v11 }
 0x39a   : > { %16058 = vmatprep.subr.bf16.mxu0 %v19667_v34 }
 0x39b   : > { %16357 = vmatpush3.bf16.msra.mxu1 %v17992_v24 }
 0x39c   : > { %16358 = vmatprep.subr.bf16.mxu1 %v19667_v34 }
 0x39d   : > { %16059 = vmatpush3.bf16.msra.mxu0 %v17993_v25 }
 0x39e   : > { %16060 = vmatprep.subr.bf16.mxu0 %v19667_v34 }
 0x39f   : > { %16359 = vmatpush3.bf16.msra.mxu1 %v17994_v53  ;;  %v18028_v53 = vld [vmem:[%s22607_s2 + $0x430] sm:$0xff]  }
 0x3a0   : > { %16360 = vmatprep.subr.bf16.mxu1 %v19667_v34 }
 0x3a1   : > { %16061 = vmatpush3.bf16.msra.mxu0 %v17995_v55 }
 0x3a2   : > { %16062 = vmatprep.subr.bf16.mxu0 %v19667_v34 }
 0x3a3   : > { %16361 = vmatpush3.bf16.msra.mxu1 %v17996_v51  ;;  %v18029_v51 = vld [vmem:[%s22607_s2 + $0x478] sm:$0xff]  }
 0x3a4   : > { %16362 = vmatprep.subr.bf16.mxu1 %v19667_v34 }
 0x3a5   : > { %16063 = vmatpush3.bf16.msra.mxu0 %v17997_v50  ;;  %v3038_v50 = vld [vmem:[#allocation3 + $0x19] ss:$2 sm:$0xff] }
 0x3a6   : > { %16068 = vmatprep.subr.bf16.mxu0 %v19667_v34 }
 0x3a7   : > { %16363 = vmatpush3.bf16.msra.mxu1 %v17998_v46  ;;  %v3039_v46 = vpack.c.bf16 %v3038_v50, %v3038_v50  ;;  %v18061_v50 = vld [vmem:[%s22607_s2 + $0x338] sm:$0xff]  }
 0x3a8   : > { %16065 = vmatmul.mubr.bf16.vlgmr.msra.gmra.mrb[32].mxu0 %v2821_v6  ;;  %16388 = vmatprep.subr.bf16.mxu1 %v19667_v34  ;;  %v18033_v6 = vld [vmem:[%s22607_s2 + $0x248] sm:$0xff]  }
 0x3a9   : > { %16069 = vmatpush3.bf16.msra.mxu0 %v17999_v56  ;;  %16084 = vmatprep.mubr.msk.bf16.mxu0 %vm18625_vm10, %v19667_v34  ;;  %v4890_v56 = vpack.c.bf16 %v4889_v31, %v4889_v31  ;;  %v18062_v31 = vld [vmem:[%s22607_s2 + $0x2f8] sm:$0xff]  }
 0x3aa   : > { %16365 = vmatmul.mubr.bf16.vlgmr.msra.gmra.mrb[32].mxu1 %v4457_v8  ;;  %16070 = vmatprep.subr.bf16.mxu0 %v19667_v34  ;;  %v18035_v8 = vld [vmem:[%s22607_s2 + $0x250] sm:$0xff]  }
 0x3ab   : > { %16389 = vmatpush3.bf16.msra.mxu1 %v18000_v14  ;;  %16404 = vmatprep.mubr.msk.bf16.mxu1 %vm18625_vm10, %v19667_v34  ;;  %v18034_v14 = vld [vmem:[%s22607_s2 + $0x288] sm:$0xff]  }
 0x3ac   : > { %16390 = vmatprep.subr.bf16.mxu1 %v19667_v34 }
 0x3ad   : > { %16071 = vmatpush3.bf16.msra.mxu0 %v18001_v57  ;;  %v18036_v57 = vld [vmem:[%s22607_s2 + $0x290] sm:$0xff]  }
 0x3ae   : > { %16072 = vmatprep.subr.bf16.mxu0 %v19667_v34 }
 0x3af   : > { %16391 = vmatpush3.bf16.msra.mxu1 %v18002_v3  ;;  %v18037_v3 = vld [vmem:[%s22607_s2 + $0x258] sm:$0xff]  }
 0x3b0   : > { %16392 = vmatprep.subr.bf16.mxu1 %v19667_v34 }
 0x3b1   : > { %16073 = vmatpush3.bf16.msra.mxu0 %v18003_v16  ;;  %v18038_v16 = vld [vmem:[%s22607_s2 + $0x298] sm:$0xff]  }
 0x3b2   : > { %16074 = vmatprep.subr.bf16.mxu0 %v19667_v34 }
 0x3b3   : > { %16393 = vmatpush3.bf16.msra.mxu1 %v18004_v60  ;;  %v18039_v60 = vld [vmem:[%s22607_s2 + $0x260] sm:$0xff]  }
 0x3b4   : > { %16394 = vmatprep.subr.bf16.mxu1 %v19667_v34 }
 0x3b5   : > { %16075 = vmatpush3.bf16.msra.mxu0 %v18005_v4  ;;  %v18040_v4 = vld [vmem:[%s22607_s2 + $0x2a0] sm:$0xff]  }
 0x3b6   : > { %16076 = vmatprep.subr.bf16.mxu0 %v19667_v34 }
 0x3b7   : > { %16395 = vmatpush3.bf16.msra.mxu1 %v18006_v20  ;;  %v18041_v20 = vld [vmem:[%s22607_s2 + $0x268] sm:$0xff]  }
 0x3b8   : > { %16396 = vmatprep.subr.bf16.mxu1 %v19667_v34 }
 0x3b9   : > { %16077 = vmatpush3.bf16.msra.mxu0 %v18007_v17 }
 0x3ba   : > { %16078 = vmatprep.subr.bf16.mxu0 %v19667_v34 }
 0x3bb   : > { %16397 = vmatpush3.bf16.msra.mxu1 %v18008_v35  ;;  %v19833_v22 = vpop.f32.mrb[8].mxu0  ;;  %v18042_v35 = vld [vmem:[%s22607_s2 + $0x2a8] sm:$0xff]  }
 0x3bc   : > { %v15946_v33 = vpop.f32.mrb[9].mxu0  ;;  %16398 = vmatprep.subr.bf16.mxu1 %v19667_v34 }
 0x3bd   : > { %16079 = vmatpush3.bf16.msra.mxu0 %v18009_v18  ;;  %v2290_v58 = vpop.f32.mrb[10].mxu0  ;;  %v19839_v41 = vpop.f32.mrb[8].mxu1 }
 0x3be   : > { %v15947_v10 = vpop.f32.mrb[11].mxu0  ;;  %v16126_v7 = vpop.f32.mrb[9].mxu1  ;;  %16080 = vmatprep.subr.bf16.mxu0 %v19667_v34  ;;  %v18043_v58 = vld [vmem:[%s22607_s2 + $0x270] sm:$0xff]  }
 0x3bf   : > { %16399 = vmatpush3.bf16.msra.mxu1 %v18010_v32  ;;  %v3281_v39 = vpop.f32.mrb[10].mxu1 }
 0x3c0   : > { %v16127_v52 = vpop.f32.mrb[11].mxu1  ;;  %16400 = vmatprep.subr.bf16.mxu1 %v19667_v34  ;;  %v18044_v39 = vld [vmem:[%s22607_s2 + $0x2b0] sm:$0xff]  }
 0x3c1   : > { %16081 = vmatpush3.bf16.msra.mxu0 %v18011_v59 }
 0x3c2   : > { %16082 = vmatprep.subr.bf16.mxu0 %v19667_v34 }
 0x3c3   : > { %16401 = vmatpush3.bf16.msra.mxu1 %v18012_v44  ;;  %v3159_v44 = vld [vmem:[#allocation3 + $0x17] ss:$2 sm:$0xff] }
 0x3c4   : > { %16402 = vmatprep.subr.bf16.mxu1 %v19667_v34 }
 0x3c5   : > { %16083 = vmatpush3.bf16.msra.mxu0 %v18013_v45  ;;  %v18045_v45 = vld [vmem:[%s22607_s2 + $0x278] sm:$0xff]  }
 0x3c6   : > { %16088 = vmatprep.subr.bf16.mxu0 %v19667_v34 }
 0x3c7   : > { %16403 = vmatpush3.bf16.msra.mxu1 %v18014_v1  ;;  %v3160_v1 = vmul.f32 %v19426_v49, %v3159_v44 }
 0x3c8   : > { %16085 = vmatmul.mubr.bf16.vlgmr.msra.gmra.mrb[36].mxu0 %v2930_v63  ;;  %16428 = vmatprep.subr.bf16.mxu1 %v19667_v34 }
 0x3c9   : > { %16089 = vmatpush3.bf16.msra.mxu0 %v18015_v42  ;;  %16104 = vmatprep.mubr.msk.bf16.mxu0 %vm18625_vm10, %v19667_v34  ;;  %v18047_v42 = vld [vmem:[%s22607_s2 + $0x300] sm:$0xff]   ;;  %v3161_v63 = vpack.c.bf16 %v3160_v1, %v3160_v1 }
 0x3ca   : > { %16405 = vmatmul.mubr.bf16.vlgmr.msra.gmra.mrb[36].mxu1 %v4673_v5  ;;  %16090 = vmatprep.subr.bf16.mxu0 %v19667_v34  ;;  %v5129_v5 = vpack.c.bf16 %v5128_v47, %v5128_v47  ;;  %v3697_v47 = vld [vmem:[#allocation3 + $0x21] ss:$2 sm:$0xff] }
 0x3cb   : > { %16429 = vmatpush3.bf16.msra.mxu1 %v18016_v2  ;;  %16444 = vmatprep.mubr.msk.bf16.mxu1 %vm18625_vm10, %v19667_v34  ;;  %v18048_v2 = vld [vmem:[%s22607_s2 + $0x2c0] sm:$0xff]  }
 0x3cc   : > { %16430 = vmatprep.subr.bf16.mxu1 %v19667_v34 }
 0x3cd   : > { %16091 = vmatpush3.bf16.msra.mxu0 %v18017_v9  ;;  %v18049_v9 = vld [vmem:[%s22607_s2 + $0x308] sm:$0xff]  }
 0x3ce   : > { %16092 = vmatprep.subr.bf16.mxu0 %v19667_v34 }
 0x3cf   : > { %16431 = vmatpush3.bf16.msra.mxu1 %v18018_v12  ;;  %v18050_v12 = vld [vmem:[%s22607_s2 + $0x2c8] sm:$0xff]  }
 0x3d0   : > { %16432 = vmatprep.subr.bf16.mxu1 %v19667_v34 }
 0x3d1   : > { %16093 = vmatpush3.bf16.msra.mxu0 %v18019_v13  ;;  %v18051_v13 = vld [vmem:[%s22607_s2 + $0x310] sm:$0xff]  }
 0x3d2   : > { %16094 = vmatprep.subr.bf16.mxu0 %v19667_v34 }
 0x3d3   : > { %16433 = vmatpush3.bf16.msra.mxu1 %v18020_v19  ;;  %v18052_v19 = vld [vmem:[%s22607_s2 + $0x2d0] sm:$0xff]  }
 0x3d4   : > { %16434 = vmatprep.subr.bf16.mxu1 %v19667_v34 }
 0x3d5   : > { %16095 = vmatpush3.bf16.msra.mxu0 %v18021_v21  ;;  %v18053_v21 = vld [vmem:[%s22607_s2 + $0x318] sm:$0xff]  }
 0x3d6   : > { %16096 = vmatprep.subr.bf16.mxu0 %v19667_v34 }
 0x3d7   : > { %16435 = vmatpush3.bf16.msra.mxu1 %v18022_v23  ;;  %v18054_v23 = vld [vmem:[%s22607_s2 + $0x2d8] sm:$0xff]  }
 0x3d8   : > { %16436 = vmatprep.subr.bf16.mxu1 %v19667_v34 }
 0x3d9   : > { %16097 = vmatpush3.bf16.msra.mxu0 %v18023_v48  ;;  %v18055_v48 = vld [vmem:[%s22607_s2 + $0x320] sm:$0xff]  }
 0x3da   : > { %16098 = vmatprep.subr.bf16.mxu0 %v19667_v34 }
 0x3db   : > { %v2375_v29 = vpop.f32.mrb[12].mxu0  ;;  %16437 = vmatpush3.bf16.msra.mxu1 %v18024_v26  ;;  %v18056_v26 = vld [vmem:[%s22607_s2 + $0x2e0] sm:$0xff]  }
 0x3dc   : > { %v19909_v40 = vadd.f32 %v2375_v29, %v19833_v22  ;;  %v15966_v43 = vpop.f32.mrb[13].mxu0  ;;  %16438 = vmatprep.subr.bf16.mxu1 %v19667_v34 }
 0x3dd   : > { %v2378_v15 = vpop.f32.mrb[14].mxu0  ;;  %16099 = vmatpush3.bf16.msra.mxu0 %v18025_v27  ;;  %v19912_v0 = vpop.f32.mrb[12].mxu1  ;;  %v18057_v27 = vld [vmem:[%s22607_s2 + $0x328] sm:$0xff]  }
 0x3de   : > { %v15967_v11 = vpop.f32.mrb[15].mxu0  ;;  %v16166_v24 = vpop.f32.mrb[13].mxu1  ;;  %16100 = vmatprep.subr.bf16.mxu0 %v19667_v34 }
 0x3df   : > { %v3475_v25 = vpop.f32.mrb[14].mxu1  ;;  %16439 = vmatpush3.bf16.msra.mxu1 %v18026_v37  ;;  %v18058_v37 = vld [vmem:[%s22607_s2 + $0x2e8] sm:$0xff]   ;;  %v18059_v11 = vld [vmem:[%s22607_s2 + $0x330] sm:$0xff]  }
 0x3e0   : > { %v16167_v55 = vpop.f32.mrb[15].mxu1  ;;  %16440 = vmatprep.subr.bf16.mxu1 %v19667_v34 }
 0x3e1   : > { %16101 = vmatpush3.bf16.msra.mxu0 %v18027_v62  ;;  %v18060_v55 = vld [vmem:[%s22607_s2 + $0x2f0] sm:$0xff]  }
 0x3e2   : > { %16102 = vmatprep.subr.bf16.mxu0 %v19667_v34 }
 0x3e3   : > { %16441 = vmatpush3.bf16.msra.mxu1 %v18028_v53 }
 0x3e4   : > { %16442 = vmatprep.subr.bf16.mxu1 %v19667_v34 }
 0x3e5   : > { %16103 = vmatpush3.bf16.msra.mxu0 %v18029_v51  ;;  %v3480_v51 = vld [vmem:[#allocation3 + $0x1f] ss:$2 sm:$0xff] }
 0x3e6   : > { %16128 = vmatprep.subr.bf16.mxu0 %v19667_v34 }
 0x3e7   : > { %16443 = vmatpush3.bf16.msra.mxu1 %v18030_v61 }
 0x3e8   : > { %16105 = vmatmul.mubr.bf16.vlgmr.msra.gmra.mrb[40].mxu0 %v3039_v46  ;;  %16468 = vmatprep.subr.bf16.mxu1 %v19667_v34  ;;  %v18063_v46 = vld [vmem:[%s22607_s2 + $0x380] sm:$0xff]  }
 0x3e9   : > { %16129 = vmatpush3.bf16.msra.mxu0 %v18031_v30  ;;  %16144 = vmatprep.mubr.msk.bf16.mxu0 %vm18625_vm10, %v19667_v34  ;;  %v3481_v30 = vmul.f32 %v19426_v49, %v3480_v51 }
 0x3ea   : > { %16445 = vmatmul.mubr.bf16.vlgmr.msra.gmra.mrb[40].mxu1 %v4890_v56  ;;  %16130 = vmatprep.subr.bf16.mxu0 %v19667_v34 }
 0x3eb   : > { %16469 = vmatpush3.bf16.msra.mxu1 %v18032_v54  ;;  %16484 = vmatprep.mubr.msk.bf16.mxu1 %vm18625_vm10, %v19667_v34  ;;  %v5322_v54 = vld [vmem:[#allocation3 + $0x39] ss:$2 sm:$0xff]  ;;  %v3482_v56 = vpack.c.bf16 %v3481_v30, %v3481_v30 }
 0x3ec   : > { %16470 = vmatprep.subr.bf16.mxu1 %v19667_v34 }
 0x3ed   : > { %16131 = vmatpush3.bf16.msra.mxu0 %v18033_v6  ;;  %v18064_v6 = vld [vmem:[%s22607_s2 + $0x340] sm:$0xff]  }
 0x3ee   : > { %16132 = vmatprep.subr.bf16.mxu0 %v19667_v34 }
 0x3ef   : > { %16471 = vmatpush3.bf16.msra.mxu1 %v18034_v14  ;;  %v5323_v14 = vpack.c.bf16 %v5322_v54, %v5322_v54  ;;  %v18094_v54 = vld [vmem:[%s22607_s2 + $0x3f8] sm:$0xff]  }
 0x3f0   : > { %16472 = vmatprep.subr.bf16.mxu1 %v19667_v34 }
 0x3f1   : > { %16133 = vmatpush3.bf16.msra.mxu0 %v18035_v8  ;;  %v18065_v8 = vld [vmem:[%s22607_s2 + $0x388] sm:$0xff]  }
 0x3f2   : > { %16134 = vmatprep.subr.bf16.mxu0 %v19667_v34 }
 0x3f3   : > { %16473 = vmatpush3.bf16.msra.mxu1 %v18036_v57  ;;  %v18066_v57 = vld [vmem:[%s22607_s2 + $0x348] sm:$0xff]  }
 0x3f4   : > { %16474 = vmatprep.subr.bf16.mxu1 %v19667_v34 }
 0x3f5   : > { %16135 = vmatpush3.bf16.msra.mxu0 %v18037_v3  ;;  %v18067_v3 = vld [vmem:[%s22607_s2 + $0x390] sm:$0xff]  }
 0x3f6   : > { %16136 = vmatprep.subr.bf16.mxu0 %v19667_v34 }
 0x3f7   : > { %16475 = vmatpush3.bf16.msra.mxu1 %v18038_v16  ;;  %v18068_v16 = vld [vmem:[%s22607_s2 + $0x350] sm:$0xff]  }
 0x3f8   : > { %16476 = vmatprep.subr.bf16.mxu1 %v19667_v34 }
 0x3f9   : > { %16137 = vmatpush3.bf16.msra.mxu0 %v18039_v60  ;;  %v18069_v60 = vld [vmem:[%s22607_s2 + $0x398] sm:$0xff]  }
 0x3fa   : > { %16138 = vmatprep.subr.bf16.mxu0 %v19667_v34 }
 0x3fb   : > { %v2483_v17 = vpop.f32.mrb[16].mxu0  ;;  %16477 = vmatpush3.bf16.msra.mxu1 %v18040_v4  ;;  %v18070_v4 = vld [vmem:[%s22607_s2 + $0x358] sm:$0xff]  }
 0x3fc   : > { %v19982_v18 = vadd.f32 %v2483_v17, %v19909_v40  ;;  %v15986_v22 = vpop.f32.mrb[17].mxu0  ;;  %16478 = vmatprep.subr.bf16.mxu1 %v19667_v34  ;;  %v18072_v17 = vld [vmem:[%s22607_s2 + $0x360] sm:$0xff]  }
 0x3fd   : > { %v2486_v32 = vpop.f32.mrb[18].mxu0  ;;  %16139 = vmatpush3.bf16.msra.mxu0 %v18041_v20  ;;  %v19985_v33 = vpop.f32.mrb[16].mxu1  ;;  %v18071_v20 = vld [vmem:[%s22607_s2 + $0x3a0] sm:$0xff]   ;;  %v18074_v22 = vld [vmem:[%s22607_s2 + $0x368] sm:$0xff]  }
 0x3fe   : > { %v15987_v59 = vpop.f32.mrb[19].mxu0  ;;  %v16206_v10 = vpop.f32.mrb[17].mxu1  ;;  %16140 = vmatprep.subr.bf16.mxu0 %v19667_v34 }
 0x3ff   : > { %v3692_v7 = vpop.f32.mrb[18].mxu1  ;;  %16479 = vmatpush3.bf16.msra.mxu1 %v18042_v35  ;;  %v18073_v35 = vld [vmem:[%s22607_s2 + $0x3a8] sm:$0xff]  }
 0x400   : > { %v16207_v52 = vpop.f32.mrb[19].mxu1  ;;  %16480 = vmatprep.subr.bf16.mxu1 %v19667_v34  ;;  %v18075_v7 = vld [vmem:[%s22607_s2 + $0x3b0] sm:$0xff]  }
 0x401   : > { %16141 = vmatpush3.bf16.msra.mxu0 %v18043_v58 }
 0x402   : > { %16142 = vmatprep.subr.bf16.mxu0 %v19667_v34 }
 0x403   : > { %16481 = vmatpush3.bf16.msra.mxu1 %v18044_v39 }
 0x404   : > { %16482 = vmatprep.subr.bf16.mxu1 %v19667_v34 }
 0x405   : > { %16143 = vmatpush3.bf16.msra.mxu0 %v18045_v45  ;;  %v18076_v45 = vld [vmem:[%s22607_s2 + $0x370] sm:$0xff]  }
 0x406   : > { %16168 = vmatprep.subr.bf16.mxu0 %v19667_v34 }
 0x407   : > { %16483 = vmatpush3.bf16.msra.mxu1 %v18046_v36  ;;  %v18077_v36 = vld [vmem:[%s22607_s2 + $0x3b8] sm:$0xff]  }
 0x408   : > { %16145 = vmatmul.mubr.bf16.vlgmr.msra.gmra.mrb[44].mxu0 %v3161_v63  ;;  %16508 = vmatprep.subr.bf16.mxu1 %v19667_v34  ;;  %v18079_v63 = vld [vmem:[%s22607_s2 + $0x400] sm:$0xff]  }
 0x409   : > { %16169 = vmatpush3.bf16.msra.mxu0 %v18047_v42  ;;  %16184 = vmatprep.mubr.msk.bf16.mxu0 %vm18625_vm10, %v19667_v34  ;;  %v18078_v42 = vld [vmem:[%s22607_s2 + $0x378] sm:$0xff]  }
 0x40a   : > { %16485 = vmatmul.mubr.bf16.vlgmr.msra.gmra.mrb[44].mxu1 %v5129_v5  ;;  %16170 = vmatprep.subr.bf16.mxu0 %v19667_v34  ;;  %v3698_v5 = vpack.c.bf16 %v3697_v47, %v3697_v47  ;;  %v18108_v47 = vld [vmem:[%s22607_s2 + $0x470] sm:$0xff]  }
 0x40b   : > { %16509 = vmatpush3.bf16.msra.mxu1 %v18048_v2  ;;  %16524 = vmatprep.mubr.msk.bf16.mxu1 %vm18625_vm10, %v19667_v34  ;;  %v5539_v2 = vld [vmem:[#allocation3 + $0x40] ss:$2 sm:$0xff] }
 0x40c   : > { %16510 = vmatprep.subr.bf16.mxu1 %v19667_v34 }
 0x40d   : > { %16171 = vmatpush3.bf16.msra.mxu0 %v18049_v9  ;;  %v18080_v9 = vld [vmem:[%s22607_s2 + $0x3c0] sm:$0xff]  }
 0x40e   : > { %16172 = vmatprep.subr.bf16.mxu0 %v19667_v34 }
 0x40f   : > { %16511 = vmatpush3.bf16.msra.mxu1 %v18050_v12  ;;  %v5540_v12 = vpack.c.bf16 %v5539_v2, %v5539_v2  ;;  %v18109_v2 = vld [vmem:[%s22607_s2 + $0x2b8] sm:$0xff]  }
 0x410   : > { %16512 = vmatprep.subr.bf16.mxu1 %v19667_v34 }
 0x411   : > { %16173 = vmatpush3.bf16.msra.mxu0 %v18051_v13  ;;  %v18081_v13 = vld [vmem:[%s22607_s2 + $0x408] sm:$0xff]  }
 0x412   : > { %16174 = vmatprep.subr.bf16.mxu0 %v19667_v34 }
 0x413   : > { %16513 = vmatpush3.bf16.msra.mxu1 %v18052_v19  ;;  %v18082_v19 = vld [vmem:[%s22607_s2 + $0x3c8] sm:$0xff]  }
 0x414   : > { %16514 = vmatprep.subr.bf16.mxu1 %v19667_v34 }
 0x415   : > { %16175 = vmatpush3.bf16.msra.mxu0 %v18053_v21  ;;  %v18083_v21 = vld [vmem:[%s22607_s2 + $0x410] sm:$0xff]  }
 0x416   : > { %16176 = vmatprep.subr.bf16.mxu0 %v19667_v34 }
 0x417   : > { %16515 = vmatpush3.bf16.msra.mxu1 %v18054_v23  ;;  %v18084_v23 = vld [vmem:[%s22607_s2 + $0x3d0] sm:$0xff]  }
 0x418   : > { %16516 = vmatprep.subr.bf16.mxu1 %v19667_v34 }
 0x419   : > { %16177 = vmatpush3.bf16.msra.mxu0 %v18055_v48  ;;  %v18085_v48 = vld [vmem:[%s22607_s2 + $0x418] sm:$0xff]  }
 0x41a   : > { %16178 = vmatprep.subr.bf16.mxu0 %v19667_v34 }
 0x41b   : > { %v2593_v29 = vpop.f32.mrb[20].mxu0  ;;  %16517 = vmatpush3.bf16.msra.mxu1 %v18056_v26  ;;  %v18086_v26 = vld [vmem:[%s22607_s2 + $0x3d8] sm:$0xff]  }
 0x41c   : > { %v20056_v40 = vadd.f32 %v2593_v29, %v19982_v18  ;;  %v16006_v43 = vpop.f32.mrb[21].mxu0  ;;  %16518 = vmatprep.subr.bf16.mxu1 %v19667_v34  ;;  %v18088_v29 = vld [vmem:[%s22607_s2 + $0x3e0] sm:$0xff]  }
 0x41d   : > { %v2596_v15 = vpop.f32.mrb[22].mxu0  ;;  %16179 = vmatpush3.bf16.msra.mxu0 %v18057_v27  ;;  %v20059_v62 = vpop.f32.mrb[20].mxu1  ;;  %v18087_v27 = vld [vmem:[%s22607_s2 + $0x420] sm:$0xff]   ;;  %v18090_v43 = vld [vmem:[%s22607_s2 + $0x3e8] sm:$0xff]  }
 0x41e   : > { %v16007_v24 = vpop.f32.mrb[23].mxu0  ;;  %v16246_v25 = vpop.f32.mrb[21].mxu1  ;;  %16180 = vmatprep.subr.bf16.mxu0 %v19667_v34 }
 0x41f   : > { %v3909_v53 = vpop.f32.mrb[22].mxu1  ;;  %16519 = vmatpush3.bf16.msra.mxu1 %v18058_v37  ;;  %v18089_v37 = vld [vmem:[%s22607_s2 + $0x428] sm:$0xff]  }
 0x420   : > { %v16247_v61 = vpop.f32.mrb[23].mxu1  ;;  %16520 = vmatprep.subr.bf16.mxu1 %v19667_v34  ;;  %v18091_v53 = vld [vmem:[%s22607_s2 + $0x430] sm:$0xff]  }
 0x421   : > { %16181 = vmatpush3.bf16.msra.mxu0 %v18059_v11 }
 0x422   : > { %16182 = vmatprep.subr.bf16.mxu0 %v19667_v34 }
 0x423   : > { %16521 = vmatpush3.bf16.msra.mxu1 %v18060_v55 }
 0x424   : > { %16522 = vmatprep.subr.bf16.mxu1 %v19667_v34 }
 0x425   : > { %16183 = vmatpush3.bf16.msra.mxu0 %v18061_v50  ;;  %v18092_v50 = vld [vmem:[%s22607_s2 + $0x3f0] sm:$0xff]  }
 0x426   : > { %16208 = vmatprep.subr.bf16.mxu0 %v19667_v34 }
 0x427   : > { %16523 = vmatpush3.bf16.msra.mxu1 %v18062_v31  ;;  %v18093_v31 = vld [vmem:[%s22607_s2 + $0x438] sm:$0xff]  }
 0x428   : > { %16185 = vmatmul.mubr.bf16.vlgmr.msra.gmra.mrb[48].mxu0 %v3482_v56  ;;  %16548 = vmatprep.subr.bf16.mxu1 %v19667_v34  ;;  %v3914_v56 = vld [vmem:[#allocation3 + $0x28] ss:$2 sm:$0xff] }
 0x429   : > { %16209 = vmatpush3.bf16.msra.mxu0 %v18063_v46  ;;  %16224 = vmatprep.mubr.msk.bf16.mxu0 %vm18625_vm10, %v19667_v34  ;;  %v5755_v46 = vld [vmem:[#allocation3 + $0x47] ss:$2 sm:$0xff] }
 0x42a   : > { %16525 = vmatmul.mubr.bf16.vlgmr.msra.gmra.mrb[48].mxu1 %v5323_v14  ;;  %16210 = vmatprep.subr.bf16.mxu0 %v19667_v34  ;;  %v18095_v14 = vld [vmem:[%s22607_s2 + $0x280] sm:$0xff]  }
 0x42b   : > { %16549 = vmatpush3.bf16.msra.mxu1 %v18064_v6  ;;  %16564 = vmatprep.mubr.msk.bf16.mxu1 %vm18625_vm10, %v19667_v34  ;;  %v5756_v6 = vmul.f32 %v19426_v49, %v5755_v46 }
 0x42c   : > { %16550 = vmatprep.subr.bf16.mxu1 %v19667_v34 }
 0x42d   : > { %16211 = vmatpush3.bf16.msra.mxu0 %v18065_v8  ;;  %v3915_v8 = vpack.c.bf16 %v3914_v56, %v3914_v56  ;;  %v18121_v56 = vld [vmem:[%s22607_s2 + $0x350] sm:$0xff]  }
 0x42e   : > { %16212 = vmatprep.subr.bf16.mxu0 %v19667_v34 }
 0x42f   : > { %16551 = vmatpush3.bf16.msra.mxu1 %v18066_v57  ;;  %v18096_v57 = vld [vmem:[%s22607_s2 + $0x440] sm:$0xff]  }
 0x430   : > { %16552 = vmatprep.subr.bf16.mxu1 %v19667_v34 }
 0x431   : > { %16213 = vmatpush3.bf16.msra.mxu0 %v18067_v3  ;;  %v5757_v3 = vpack.c.bf16 %v5756_v6, %v5756_v6  ;;  %v18122_v6 = vld [vmem:[%s22607_s2 + $0x358] sm:$0xff]  }
 0x432   : > { %16214 = vmatprep.subr.bf16.mxu0 %v19667_v34 }
 0x433   : > { %16553 = vmatpush3.bf16.msra.mxu1 %v18068_v16  ;;  %v18097_v16 = vld [vmem:[%s22607_s2 + $0x288] sm:$0xff]  }
 0x434   : > { %16554 = vmatprep.subr.bf16.mxu1 %v19667_v34 }
 0x435   : > { %16215 = vmatpush3.bf16.msra.mxu0 %v18069_v60  ;;  %v18098_v60 = vld [vmem:[%s22607_s2 + $0x448] sm:$0xff]  }
 0x436   : > { %16216 = vmatprep.subr.bf16.mxu0 %v19667_v34 }
 0x437   : > { %16555 = vmatpush3.bf16.msra.mxu1 %v18070_v4  ;;  %v18099_v4 = vld [vmem:[%s22607_s2 + $0x290] sm:$0xff]  }
 0x438   : > { %16556 = vmatprep.subr.bf16.mxu1 %v19667_v34 }
 0x439   : > { %16217 = vmatpush3.bf16.msra.mxu0 %v18071_v20  ;;  %v18100_v20 = vld [vmem:[%s22607_s2 + $0x450] sm:$0xff]  }
 0x43a   : > { %16218 = vmatprep.subr.bf16.mxu0 %v19667_v34 }
 0x43b   : > { %v2702_v18 = vpop.f32.mrb[24].mxu0  ;;  %16557 = vmatpush3.bf16.msra.mxu1 %v18072_v17  ;;  %v18101_v17 = vld [vmem:[%s22607_s2 + $0x298] sm:$0xff]  }
 0x43c   : > { %v20130_v32 = vadd.f32 %v2702_v18, %v20056_v40  ;;  %v16026_v58 = vpop.f32.mrb[25].mxu0  ;;  %16558 = vmatprep.subr.bf16.mxu1 %v19667_v34  ;;  %v18102_v18 = vld [vmem:[%s22607_s2 + $0x458] sm:$0xff]  }
 0x43d   : > { %v2705_v59 = vpop.f32.mrb[26].mxu0  ;;  %16219 = vmatpush3.bf16.msra.mxu0 %v18073_v35  ;;  %v20133_v10 = vpop.f32.mrb[24].mxu1  ;;  %v20256_v35 = vld [vmem:[#allocation2 + $0x8] sm:$0xff] }
 0x43e   : > { %v16027_v39 = vpop.f32.mrb[27].mxu0  ;;  %v16286_v44 = vpop.f32.mrb[25].mxu1  ;;  %16220 = vmatprep.subr.bf16.mxu0 %v19667_v34  ;;  %v18106_v59 = vld [vmem:[%s22607_s2 + $0x468] sm:$0xff]  }
 0x43f   : > { %v4125_v52 = vpop.f32.mrb[26].mxu1  ;;  %16559 = vmatpush3.bf16.msra.mxu1 %v18074_v22  ;;  %v18104_v22 = vld [vmem:[%s22607_s2 + $0x460] sm:$0xff]  }
 0x440   : > { %v16287_v1 = vpop.f32.mrb[27].mxu1  ;;  %16560 = vmatprep.subr.bf16.mxu1 %v19667_v34 }
 0x441   : > { %16221 = vmatpush3.bf16.msra.mxu0 %v18075_v7 }
 0x442   : > { %16222 = vmatprep.subr.bf16.mxu0 %v19667_v34 }
 0x443   : > { %16561 = vmatpush3.bf16.msra.mxu1 %v18076_v45  ;;  %v18107_v45 = vld [vmem:[%s22607_s2 + $0x2b0] sm:$0xff]  }
 0x444   : > { %16562 = vmatprep.subr.bf16.mxu1 %v19667_v34 }
 0x445   : > { %16223 = vmatpush3.bf16.msra.mxu0 %v18077_v36 }
 0x446   : > { %16248 = vmatprep.subr.bf16.mxu0 %v19667_v34 }
 0x447   : > { %16563 = vmatpush3.bf16.msra.mxu1 %v18078_v42 }
 0x448   : > { %16225 = vmatmul.mubr.bf16.vlgmr.msra.gmra.mrb[52].mxu0 %v3698_v5  ;;  %16588 = vmatprep.subr.bf16.mxu1 %v19667_v34  ;;  %v18110_v5 = vld [vmem:[%s22607_s2 + $0x478] sm:$0xff]  }
 0x449   : > { %16249 = vmatpush3.bf16.msra.mxu0 %v18079_v63  ;;  %16264 = vmatprep.mubr.msk.bf16.mxu0 %vm18625_vm10, %v19667_v34 }
 0x44a   : > { %16565 = vmatmul.mubr.bf16.vlgmr.msra.gmra.mrb[52].mxu1 %v5540_v12  ;;  %16250 = vmatprep.subr.bf16.mxu0 %v19667_v34  ;;  %v18111_v12 = vld [vmem:[%s22607_s2 + $0x2c0] sm:$0xff]  }
 0x44b   : > { %16589 = vmatpush3.bf16.msra.mxu1 %v18080_v9  ;;  %16604 = vmatprep.mubr.msk.bf16.mxu1 %vm18625_vm10, %v19667_v34  ;;  %v4153_v9 = vld [vmem:[#allocation3 + $0x28] ss:$2 sm:$0xff] }
 0x44c   : > { %16590 = vmatprep.subr.bf16.mxu1 %v19667_v34 }
 0x44d   : > { %16251 = vmatpush3.bf16.msra.mxu0 %v18081_v13  ;;  %v5972_v13 = vld [vmem:[#allocation3 + $0x49] ss:$2 sm:$0xff] }
 0x44e   : > { %16252 = vmatprep.subr.bf16.mxu0 %v19667_v34 }
 0x44f   : > { %16591 = vmatpush3.bf16.msra.mxu1 %v18082_v19  ;;  %v4154_v19 = vpack.c.bf16 %v4153_v9, %v4153_v9 }
 0x450   : > { %16592 = vmatprep.subr.bf16.mxu1 %v19667_v34 }
 0x451   : > { %16253 = vmatpush3.bf16.msra.mxu0 %v18083_v21  ;;  %v5973_v21 = vpack.c.bf16 %v5972_v13, %v5972_v13 }
 0x452   : > { %16254 = vmatprep.subr.bf16.mxu0 %v19667_v34 }
 0x453   : > { %16593 = vmatpush3.bf16.msra.mxu1 %v18084_v23  ;;  %v18112_v23 = vld [vmem:[%s22607_s2 + $0x2c8] sm:$0xff]  }
 0x454   : > { %16594 = vmatprep.subr.bf16.mxu1 %v19667_v34 }
 0x455   : > { %16255 = vmatpush3.bf16.msra.mxu0 %v18085_v48  ;;  %v18113_v48 = vld [vmem:[%s22607_s2 + $0x2d0] sm:$0xff]  }
 0x456   : > { %16256 = vmatprep.subr.bf16.mxu0 %v19667_v34 }
 0x457   : > { %16595 = vmatpush3.bf16.msra.mxu1 %v18086_v26  ;;  %v18114_v26 = vld [vmem:[%s22607_s2 + $0x2d8] sm:$0xff]  }
 0x458   : > { %16596 = vmatprep.subr.bf16.mxu1 %v19667_v34 }
 0x459   : > { %16257 = vmatpush3.bf16.msra.mxu0 %v18087_v27  ;;  %v18115_v27 = vld [vmem:[%s22607_s2 + $0x2e0] sm:$0xff]  }
 0x45a   : > { %16258 = vmatprep.subr.bf16.mxu0 %v19667_v34 }
 0x45b   : > { %v2811_v40 = vpop.f32.mrb[28].mxu0  ;;  %16597 = vmatpush3.bf16.msra.mxu1 %v18088_v29  ;;  %v18116_v29 = vld [vmem:[%s22607_s2 + $0x2e8] sm:$0xff]  }
 0x45c   : > { %v20203_v15 = vadd.f32 %v2811_v40, %v20130_v32  ;;  %v16046_v11 = vpop.f32.mrb[29].mxu0  ;;  %16598 = vmatprep.subr.bf16.mxu1 %v19667_v34  ;;  %v18105_v32 = vld [vmem:[%s22607_s2 + $0x2a8] sm:$0xff]  }
 0x45d   : > { %v2814_v24 = vpop.f32.mrb[30].mxu0  ;;  %16259 = vmatpush3.bf16.msra.mxu0 %v18089_v37  ;;  %v20206_v25 = vpop.f32.mrb[28].mxu1 }
 0x45e   : > { %v16047_v55 = vpop.f32.mrb[31].mxu0  ;;  %v16326_v51 = vpop.f32.mrb[29].mxu1  ;;  %16260 = vmatprep.subr.bf16.mxu0 %v19667_v34  ;;  %v18117_v24 = vld [vmem:[%s22607_s2 + $0x2f0] sm:$0xff]  }
 0x45f   : > { %v4344_v61 = vpop.f32.mrb[30].mxu1  ;;  %16599 = vmatpush3.bf16.msra.mxu1 %v18090_v43 }
 0x460   : > { %v16327_v30 = vpop.f32.mrb[31].mxu1  ;;  %16600 = vmatprep.subr.bf16.mxu1 %v19667_v34 }
 0x461   : > { %16261 = vmatpush3.bf16.msra.mxu0 %v18091_v53  ;;  %v4347_v30 = vld [vmem:[#allocation3 + $0x29] ss:$2 sm:$0xff] }
 0x462   : > { %16262 = vmatprep.subr.bf16.mxu0 %v19667_v34  ;;  %v4348_v46 = vpack.c.bf16 %v4347_v30, %v4347_v30 }
 0x463   : > { %16601 = vmatpush3.bf16.msra.mxu1 %v18092_v50  ;;  %v18118_v50 = vld [vmem:[%s22607_s2 + $0x2f8] sm:$0xff]  }
 0x464   : > { %16602 = vmatprep.subr.bf16.mxu1 %v19667_v34 }
 0x465   : > { %16263 = vmatpush3.bf16.msra.mxu0 %v18093_v31  ;;  %v18119_v31 = vld [vmem:[%s22607_s2 + $0x340] sm:$0xff]  }
 0x466   : > { %16288 = vmatprep.subr.bf16.mxu0 %v19667_v34 }
 0x467   : > { %16603 = vmatpush3.bf16.msra.mxu1 %v18094_v54  ;;  %v18120_v54 = vld [vmem:[%s22607_s2 + $0x348] sm:$0xff]  }
 0x468   : > { %16265 = vmatmul.mubr.bf16.vlgmr.msra.gmra.mrb[56].mxu0 %v3915_v8  ;;  %16628 = vmatprep.subr.bf16.mxu1 %v19667_v34  ;;  %v18124_v8 = vld [vmem:[%s22607_s2 + $0x368] sm:$0xff]  }
 0x469   : > { %16289 = vmatpush3.bf16.msra.mxu0 %v18095_v14  ;;  %16304 = vmatprep.mubr.msk.bf16.mxu0 %vm18625_vm10, %v19667_v34  ;;  %v18123_v14 = vld [vmem:[%s22607_s2 + $0x360] sm:$0xff]  }
 0x46a   : > { %16605 = vmatmul.mubr.bf16.vlgmr.msra.gmra.mrb[56].mxu1 %v5757_v3  ;;  %16290 = vmatprep.subr.bf16.mxu0 %v19667_v34 }
 0x46b   : > { %16629 = vmatpush3.bf16.msra.mxu1 %v18096_v57  ;;  %16644 = vmatprep.mubr.msk.bf16.mxu1 %vm18625_vm10, %v19667_v34  ;;  %v20366_v57 = vld [vmem:[%s22608_s3 + $0x2] ss:$0 sm:$0xff] }
 0x46c   : > { %16630 = vmatprep.subr.bf16.mxu1 %v19667_v34 }
 0x46d   : > { %16291 = vmatpush3.bf16.msra.mxu0 %v18097_v16 }
 0x46e   : > { %16292 = vmatprep.subr.bf16.mxu0 %v19667_v34 }
 0x46f   : > { %16631 = vmatpush3.bf16.msra.mxu1 %v18098_v60 }
 0x470   : > { %16632 = vmatprep.subr.bf16.mxu1 %v19667_v34  ;;  %v18103_v34 = vld [vmem:[%s22607_s2 + $0x2a0] sm:$0xff]  }
 0x471   : > { %16293 = vmatpush3.bf16.msra.mxu0 %v18099_v4  ;;  %v20371_v4 = vld [vmem:[%s22609_s4 + $0x2] ss:$0 sm:$0xff] }
 0x472   : > { %16294 = vmatprep.subr.bf16.mxu0 %v20256_v35 }
 0x473   : > { %16633 = vmatpush3.bf16.msra.mxu1 %v18100_v20 }
 0x474   : > { %16634 = vmatprep.subr.bf16.mxu1 %v20256_v35 }
 0x475   : > { %16295 = vmatpush3.bf16.msra.mxu0 %v18101_v17 }
 0x476   : > { %16296 = vmatprep.subr.bf16.mxu0 %v20256_v35 }
 0x477   : > { %16635 = vmatpush3.bf16.msra.mxu1 %v18102_v18  ;;  %v18125_v18 = vld [vmem:[%s22607_s2 + $0x370] sm:$0xff]  }
 0x478   : > { %16636 = vmatprep.subr.bf16.mxu1 %v20256_v35 }
 0x479   : > { %16297 = vmatpush3.bf16.msra.mxu0 %v18103_v34 }
 0x47a   : > { %16298 = vmatprep.subr.bf16.mxu0 %v20256_v35 }
 0x47b   : > { %v2921_v58 = vpop.f32.mrb[32].mxu0  ;;  %16637 = vmatpush3.bf16.msra.mxu1 %v18104_v22 }
 0x47c   : > { %v2927_v7 = vadd.f32 %v2921_v58, %v20203_v15  ;;  %v16066_v39 = vpop.f32.mrb[33].mxu0  ;;  %16638 = vmatprep.subr.bf16.mxu1 %v20256_v35 }
 0x47d   : > { %v2924_v44 = vpop.f32.mrb[34].mxu0  ;;  %16299 = vmatpush3.bf16.msra.mxu0 %v18105_v32  ;;  %v20280_v52 = vpop.f32.mrb[32].mxu1  ;;  %v18126_v39 = vld [vmem:[%s22607_s2 + $0x378] sm:$0xff]  }
 0x47e   : > { %v16067_v1 = vpop.f32.mrb[35].mxu0  ;;  %v16366_v36 = vpop.f32.mrb[33].mxu1  ;;  %16300 = vmatprep.subr.bf16.mxu0 %v20256_v35 }
 0x47f   : > { %v4559_v42 = vpop.f32.mrb[34].mxu1  ;;  %16639 = vmatpush3.bf16.msra.mxu1 %v18106_v59  ;;  %v18127_v1 = vld [vmem:[%s22607_s2 + $0x3c0] sm:$0xff]  }
 0x480   : > { %v16367_v63 = vpop.f32.mrb[35].mxu1  ;;  %16640 = vmatprep.subr.bf16.mxu1 %v20256_v35  ;;  %v18128_v42 = vld [vmem:[%s22607_s2 + $0x3c8] sm:$0xff]  }
 0x481   : > { %16301 = vmatpush3.bf16.msra.mxu0 %v18107_v45  ;;  %v4564_v45 = vld [vmem:[#allocation3 + $0x30] ss:$2 sm:$0xff] }
 0x482   : > { %16302 = vmatprep.subr.bf16.mxu0 %v20256_v35  ;;  %v4565_v36 = vpack.c.bf16 %v4564_v45, %v4564_v45  ;;  %v18130_v63 = vld [vmem:[%s22607_s2 + $0x3d8] sm:$0xff]  }
 0x483   : > { %16641 = vmatpush3.bf16.msra.mxu1 %v18108_v47  ;;  %v18129_v47 = vld [vmem:[%s22607_s2 + $0x3d0] sm:$0xff]  }
 0x484   : > { %16642 = vmatprep.subr.bf16.mxu1 %v20256_v35 }
 0x485   : > { %16303 = vmatpush3.bf16.msra.mxu0 %v18109_v2  ;;  %v18131_v2 = vld [vmem:[%s22607_s2 + $0x3e0] sm:$0xff]  }
 0x486   : > { %16328 = vmatprep.subr.bf16.mxu0 %v20256_v35 }
 0x487   : > { %16643 = vmatpush3.bf16.msra.mxu1 %v18110_v5  ;;  %v18132_v5 = vld [vmem:[%s22607_s2 + $0x3e8] sm:$0xff]  }
 0x488   : > { %16305 = vmatmul.mubr.bf16.vlgmr.msra.gmra.mrb[60].mxu0 %v4154_v19  ;;  %16668 = vmatprep.subr.bf16.mxu1 %v20256_v35 }
 0x489   : > { %16329 = vmatpush3.bf16.msra.mxu0 %v18111_v12  ;;  %16344 = vmatprep.mubr.msk.bf16.mxu0 %vm18625_vm10, %v20256_v35 }
 0x48a   : > { %16645 = vmatmul.mubr.bf16.vlgmr.msra.gmra.mrb[60].mxu1 %v5973_v21  ;;  %16330 = vmatprep.subr.bf16.mxu0 %v20256_v35 }
 0x48b   : > { %16684 = vmatprep.mubr.msk.bf16.mxu1 %vm18625_vm10, %v20256_v35 }
 0x48d   : > { %16331 = vmatpush3.bf16.msra.mxu0 %v18112_v23  ;;  %v18133_v23 = vld [vmem:[%s22607_s2 + $0x3f0] sm:$0xff]  }
 0x48e   : > { %16332 = vmatprep.subr.bf16.mxu0 %v20256_v35 }
 0x491   : > { %16333 = vmatpush3.bf16.msra.mxu0 %v18113_v48 }
 0x492   : > { %16334 = vmatprep.subr.bf16.mxu0 %v20256_v35 }
 0x495   : > { %16335 = vmatpush3.bf16.msra.mxu0 %v18114_v26 }
 0x496   : > { %16336 = vmatprep.subr.bf16.mxu0 %v20256_v35 }
 0x499   : > { %16337 = vmatpush3.bf16.msra.mxu0 %v18115_v27 }
 0x49a   : > { %16338 = vmatprep.subr.bf16.mxu0 %v20256_v35 }
 0x49b   : > { %v3030_v37 = vpop.f32.mrb[36].mxu0 }
 0x49c   : > { %v3036_v40 = vadd.f32 %v3030_v37, %v2927_v7  ;;  %v16086_v43 = vpop.f32.mrb[37].mxu0  ;;  %v4780_v37 = vld [vmem:[#allocation3 + $0x37] ss:$2 sm:$0xff] }
 0x49d   : > { %v3033_v15 = vpop.f32.mrb[38].mxu0  ;;  %16339 = vmatpush3.bf16.msra.mxu0 %v18116_v29  ;;  %v20327_v11 = vpop.f32.mrb[36].mxu1  ;;  %v4781_v43 = vmul.f32 %v19426_v49, %v4780_v37 }
 0x49e   : > { %v16087_v53 = vpop.f32.mrb[39].mxu0  ;;  %v16406_v55 = vpop.f32.mrb[37].mxu1  ;;  %16340 = vmatprep.subr.bf16.mxu0 %v20256_v35  ;;  %v18135_v15 = vld [vmem:[%s22607_s2 + $0x440] sm:$0xff]  }
 0x49f   : > { %v4775_v51 = vpop.f32.mrb[38].mxu1  ;;  %v18137_v53 = vld [vmem:[%s22607_s2 + $0x450] sm:$0xff]   ;;  %v18138_v55 = vld [vmem:[%s22607_s2 + $0x458] sm:$0xff]  }
 0x4a0   : > { %v16407_v61 = vpop.f32.mrb[39].mxu1  ;;  %v18139_v51 = vld [vmem:[%s22607_s2 + $0x460] sm:$0xff]  }
 0x4a1   : > { %16341 = vmatpush3.bf16.msra.mxu0 %v18117_v24  ;;  %v4782_v24 = vpack.c.bf16 %v4781_v43, %v4781_v43  ;;  %v18140_v61 = vld [vmem:[%s22607_s2 + $0x468] sm:$0xff]  }
 0x4a2   : > { %16342 = vmatprep.subr.bf16.mxu0 %v20256_v35 }
 0x4a5   : > { %16343 = vmatpush3.bf16.msra.mxu0 %v18118_v50 }
 0x4a6   : > { %16368 = vmatprep.subr.bf16.mxu0 %v20256_v35 }
 0x4a8   : > { %16345 = vmatmul.mubr.bf16.vlgmr.msra.gmra.mrb[64].mxu0 %v4348_v46 }
 0x4a9   : > { %16369 = vmatpush3.bf16.msra.mxu0 %v18119_v31  ;;  %16384 = vmatprep.mubr.msk.bf16.mxu0 %vm18625_vm10, %v20256_v35 }
 0x4aa   : > { %16370 = vmatprep.subr.bf16.mxu0 %v20256_v35 }
 0x4ad   : > { %16371 = vmatpush3.bf16.msra.mxu0 %v18120_v54 }
 0x4ae   : > { %16372 = vmatprep.subr.bf16.mxu0 %v20256_v35 }
 0x4b1   : > { %16373 = vmatpush3.bf16.msra.mxu0 %v18121_v56  ;;  %v18141_v56 = vld [vmem:[%s22607_s2 + $0x470] sm:$0xff]  }
 0x4b2   : > { %16374 = vmatprep.subr.bf16.mxu0 %v20256_v35 }
 0x4b5   : > { %16375 = vmatpush3.bf16.msra.mxu0 %v18122_v6 }
 0x4b6   : > { %16376 = vmatprep.subr.bf16.mxu0 %v20256_v35 }
 0x4b9   : > { %16377 = vmatpush3.bf16.msra.mxu0 %v18123_v14 }
 0x4ba   : > { %16378 = vmatprep.subr.bf16.mxu0 %v20256_v35 }
 0x4bb   : > { %v3139_v3 = vpop.f32.mrb[40].mxu0 }
 0x4bc   : > { %v3145_v16 = vadd.f32 %v3139_v3, %v3036_v40  ;;  %v16106_v60 = vpop.f32.mrb[41].mxu0 }
 0x4bd   : > { %v3142_v20 = vpop.f32.mrb[42].mxu0  ;;  %16379 = vmatpush3.bf16.msra.mxu0 %v18124_v8  ;;  %v20373_v17 = vpop.f32.mrb[40].mxu1  ;;  %v18142_v60 = vld [vmem:[%s22607_s2 + $0x478] sm:$0xff]  }
 0x4be   : > { %v3150_v34 = vadd.f32 %v20366_v57, %v3145_v16  ;;  %v16107_v22 = vpop.f32.mrb[43].mxu0  ;;  %v16446_v32 = vpop.f32.mrb[41].mxu1  ;;  %16380 = vmatprep.subr.bf16.mxu0 %v20256_v35  ;;  %v4997_v20 = vld [vmem:[#allocation3 + $0x39] ss:$2 sm:$0xff] }
 0x4bf   : > { %v4992_v58 = vpop.f32.mrb[42].mxu1  ;;  %v18145_v22 = vld [vmem:[%s22607_s2 + $0x250] sm:$0xff]   ;;  %v18146_v32 = vld [vmem:[%s22607_s2 + $0x258] sm:$0xff]  }
 0x4c0   : > { %vm3151_vm11 = vcmp.ge.f32.partialorder %v3150_v34, 0.0  ;;  %v3156_v59 = vmul.f32 %v20371_v4, %v3150_v34  ;;  %v16447_v7 = vpop.f32.mrb[43].mxu1  ;;  %v18147_v58 = vld [vmem:[%s22607_s2 + $0x260] sm:$0xff]  }
 0x4c1   : > { %16381 = vmatpush3.bf16.msra.mxu0 %v18125_v18  ;;  %v18143_v18 = vld [vmem:[%s22607_s2 + $0x240] sm:$0xff]  }
 0x4c2   : > { %v3157_v44 = vsel %vm3151_vm11, %v3150_v34, %v3156_v59  ;;  %16382 = vmatprep.subr.bf16.mxu0 %v20256_v35  ;;  %v4998_v34 = vpack.c.bf16 %v4997_v20, %v4997_v20  ;;  %v18148_v59 = vld [vmem:[%s22607_s2 + $0x268] sm:$0xff]  }
 0x4c3   : > { %3158 = vst [vmem:[#allocation4 + $0x8] sm:$0xf] %v3157_v44  ;;  %v18160_v20 = vld [vmem:[%s22607_s2 + $0x388] sm:$0xff]  }
 0x4c5   : > { %16383 = vmatpush3.bf16.msra.mxu0 %v18126_v39 }
 0x4c6   : > { %16408 = vmatprep.subr.bf16.mxu0 %v20256_v35 }
 0x4c8   : > { %16385 = vmatmul.mubr.bf16.vlgmr.msra.gmra.mrb[68].mxu0 %v4565_v36  ;;  %v18149_v36 = vld [vmem:[%s22607_s2 + $0x270] sm:$0xff]  }
 0x4c9   : > { %16409 = vmatpush3.bf16.msra.mxu0 %v18127_v1  ;;  %16424 = vmatprep.mubr.msk.bf16.mxu0 %vm18625_vm10, %v20256_v35 }
 0x4ca   : > { %16410 = vmatprep.subr.bf16.mxu0 %v20256_v35 }
 0x4cd   : > { %16411 = vmatpush3.bf16.msra.mxu0 %v18128_v42 }
 0x4ce   : > { %16412 = vmatprep.subr.bf16.mxu0 %v20256_v35 }
 0x4d1   : > { %16413 = vmatpush3.bf16.msra.mxu0 %v18129_v47 }
 0x4d2   : > { %16414 = vmatprep.subr.bf16.mxu0 %v20256_v35 }
 0x4d5   : > { %16415 = vmatpush3.bf16.msra.mxu0 %v18130_v63 }
 0x4d6   : > { %16416 = vmatprep.subr.bf16.mxu0 %v20256_v35 }
 0x4d9   : > { %16417 = vmatpush3.bf16.msra.mxu0 %v18131_v2 }
 0x4da   : > { %16418 = vmatprep.subr.bf16.mxu0 %v20256_v35 }
 0x4db   : > { %v3366_v9 = vpop.f32.mrb[44].mxu0 }
 0x4dc   : > { %v3367_v12 = vadd.f32 %v3366_v9, %v19839_v41  ;;  %v16146_v13 = vpop.f32.mrb[45].mxu0  ;;  %v18134_v41 = vld [vmem:[%s22607_s2 + $0x3f8] sm:$0xff]  }
 0x4dd   : > { %v3369_v19 = vpop.f32.mrb[46].mxu0  ;;  %16419 = vmatpush3.bf16.msra.mxu0 %v18132_v5  ;;  %v20412_v21 = vpop.f32.mrb[44].mxu1  ;;  %v5109_v5 = vld [vmem:[#allocation3 + $0x37] ss:$2 sm:$0xff] }
 0x4de   : > { %v16147_v48 = vpop.f32.mrb[47].mxu0  ;;  %v16486_v26 = vpop.f32.mrb[45].mxu1  ;;  %16420 = vmatprep.subr.bf16.mxu0 %v20256_v35  ;;  %v3478_v27 = vadd.f32 %v19912_v0, %v3367_v12  ;;  %v18136_v0 = vld [vmem:[%s22607_s2 + $0x448] sm:$0xff]   ;;  %v18150_v12 = vld [vmem:[%s22607_s2 + $0x278] sm:$0xff]   ;;  %v5110_v13 = vmul.f32 %v19426_v49, %v5109_v5  ;;  %v18151_v19 = vld [vmem:[%s22607_s2 + $0x300] sm:$0xff]  }
 0x4df   : > { %v5231_v29 = vpop.f32.mrb[46].mxu1  ;;  %v18153_v48 = vld [vmem:[%s22607_s2 + $0x310] sm:$0xff]   ;;  %v18154_v26 = vld [vmem:[%s22607_s2 + $0x318] sm:$0xff]   ;;  %v18186_v5 = vld [vmem:[%s22607_s2 + $0x4a8] sm:$0xff]  }
 0x4e0   : > { %v16487_v40 = vpop.f32.mrb[47].mxu1  ;;  %v18156_v29 = vld [vmem:[%s22607_s2 + $0x328] sm:$0xff]  }
 0x4e1   : > { %16421 = vmatpush3.bf16.msra.mxu0 %v18133_v23  ;;  %v5111_v23 = vpack.c.bf16 %v5110_v13, %v5110_v13  ;;  %v18188_v13 = vld [vmem:[%s22607_s2 + $0x4b0] sm:$0xff]  }
 0x4e2   : > { %16422 = vmatprep.subr.bf16.mxu0 %v20256_v35 }
 0x4e5   : > { %16423 = vmatpush3.bf16.msra.mxu0 %v18134_v41 }
 0x4e6   : > { %16448 = vmatprep.subr.bf16.mxu0 %v20256_v35 }
 0x4e8   : > { %16425 = vmatmul.mubr.bf16.vlgmr.msra.gmra.mrb[72].mxu0 %v4782_v24  ;;  %v18157_v24 = vld [vmem:[%s22607_s2 + $0x330] sm:$0xff]  }
 0x4e9   : > { %16449 = vmatpush3.bf16.msra.mxu0 %v18135_v15  ;;  %16464 = vmatprep.mubr.msk.bf16.mxu0 %vm18625_vm10, %v20256_v35 }
 0x4ea   : > { %16450 = vmatprep.subr.bf16.mxu0 %v20256_v35 }
 0x4ed   : > { %16451 = vmatpush3.bf16.msra.mxu0 %v18136_v0 }
 0x4ee   : > { %16452 = vmatprep.subr.bf16.mxu0 %v20256_v35 }
 0x4f1   : > { %16453 = vmatpush3.bf16.msra.mxu0 %v18137_v53 }
 0x4f2   : > { %16454 = vmatprep.subr.bf16.mxu0 %v20256_v35 }
 0x4f5   : > { %16455 = vmatpush3.bf16.msra.mxu0 %v18138_v55 }
 0x4f6   : > { %16456 = vmatprep.subr.bf16.mxu0 %v20256_v35 }
 0x4f9   : > { %16457 = vmatpush3.bf16.msra.mxu0 %v18139_v51  ;;  %v18176_v51 = vld [vmem:[%s22607_s2 + $0x480] sm:$0xff]  }
 0x4fa   : > { %16458 = vmatprep.subr.bf16.mxu0 %v20256_v35  ;;  %16669 = vmatpush3.bf16.msra.mxu1 %v18176_v51  ;;  %v18175_v51 = vld [vmem:[%s22607_s2 + $0x4c0] sm:$0xff]  }
 0x4fb   : > { %v3581_v50 = vpop.f32.mrb[48].mxu0  ;;  %16670 = vmatprep.subr.bf16.mxu1 %v20256_v35 }
 0x4fc   : > { %v3587_v30 = vadd.f32 %v3581_v50, %v3478_v27  ;;  %v16186_v31 = vpop.f32.mrb[49].mxu0  ;;  %v18155_v27 = vld [vmem:[%s22607_s2 + $0x320] sm:$0xff]  }
 0x4fd   : > { %v3584_v46 = vpop.f32.mrb[50].mxu0  ;;  %16459 = vmatpush3.bf16.msra.mxu0 %v18140_v61  ;;  %v20450_v54 = vpop.f32.mrb[48].mxu1  ;;  %v5430_v50 = vld [vmem:[#allocation3 + $0x3f] ss:$2 sm:$0xff] }
 0x4fe   : > { %v16187_v6 = vpop.f32.mrb[51].mxu0  ;;  %v16526_v14 = vpop.f32.mrb[49].mxu1  ;;  %16460 = vmatprep.subr.bf16.mxu0 %v20256_v35  ;;  %v3695_v8 = vadd.f32 %v19985_v33, %v3587_v30  ;;  %v18144_v33 = vld [vmem:[%s22607_s2 + $0x248] sm:$0xff]  }
 0x4ff   : > { %v5425_v3 = vpop.f32.mrb[50].mxu1  ;;  %v18178_v46 = vld [vmem:[%s22607_s2 + $0x488] sm:$0xff]   ;;  %v5431_v6 = vmul.f32 %v19426_v49, %v5430_v50  ;;  %v18179_v50 = vld [vmem:[%s22607_s2 + $0x4d0] sm:$0xff]  }
 0x500   : > { %v16527_v16 = vpop.f32.mrb[51].mxu1  ;;  %16671 = vmatpush3.bf16.msra.mxu1 %v18178_v46  ;;  %v18159_v3 = vld [vmem:[%s22607_s2 + $0x380] sm:$0xff]   ;;  %v18185_v46 = vld [vmem:[%s22607_s2 + $0x4e8] sm:$0xff]  }
 0x501   : > { %16461 = vmatpush3.bf16.msra.mxu0 %v18141_v56  ;;  %16672 = vmatprep.subr.bf16.mxu1 %v20256_v35  ;;  %v5432_v16 = vpack.c.bf16 %v5431_v6, %v5431_v6 }
 0x502   : > { %16462 = vmatprep.subr.bf16.mxu0 %v20256_v35 }
 0x505   : > { %16463 = vmatpush3.bf16.msra.mxu0 %v18142_v60  ;;  %v18182_v60 = vld [vmem:[%s22607_s2 + $0x498] sm:$0xff]  }
 0x506   : > { %16488 = vmatprep.subr.bf16.mxu0 %v20256_v35 }
 0x508   : > { %16465 = vmatmul.mubr.bf16.vlgmr.msra.gmra.mrb[76].mxu0 %v4998_v34  ;;  %v18162_v34 = vld [vmem:[%s22607_s2 + $0x398] sm:$0xff]  }
 0x509   : > { %16489 = vmatpush3.bf16.msra.mxu0 %v18143_v18  ;;  %16504 = vmatprep.mubr.msk.bf16.mxu0 %vm18625_vm10, %v20256_v35  ;;  %v18161_v18 = vld [vmem:[%s22607_s2 + $0x390] sm:$0xff]  }
 0x50a   : > { %16490 = vmatprep.subr.bf16.mxu0 %v20256_v35 }
 0x50d   : > { %16491 = vmatpush3.bf16.msra.mxu0 %v18144_v33  ;;  %v18163_v33 = vld [vmem:[%s22607_s2 + $0x3a0] sm:$0xff]  }
 0x50e   : > { %16492 = vmatprep.subr.bf16.mxu0 %v20256_v35 }
 0x511   : > { %16493 = vmatpush3.bf16.msra.mxu0 %v18145_v22  ;;  %v18164_v22 = vld [vmem:[%s22607_s2 + $0x3a8] sm:$0xff]  }
 0x512   : > { %16494 = vmatprep.subr.bf16.mxu0 %v20256_v35 }
 0x515   : > { %16495 = vmatpush3.bf16.msra.mxu0 %v18146_v32 }
 0x516   : > { %16496 = vmatprep.subr.bf16.mxu0 %v20256_v35 }
 0x519   : > { %16497 = vmatpush3.bf16.msra.mxu0 %v18147_v58 }
 0x51a   : > { %16498 = vmatprep.subr.bf16.mxu0 %v20256_v35 }
 0x51b   : > { %v3797_v7 = vpop.f32.mrb[52].mxu0 }
 0x51c   : > { %v3803_v39 = vadd.f32 %v3797_v7, %v3695_v8  ;;  %v16226_v44 = vpop.f32.mrb[53].mxu0  ;;  %v18180_v8 = vld [vmem:[%s22607_s2 + $0x490] sm:$0xff]  }
 0x51d   : > { %v3800_v45 = vpop.f32.mrb[54].mxu0  ;;  %16499 = vmatpush3.bf16.msra.mxu0 %v18148_v59  ;;  %v20487_v1 = vpop.f32.mrb[52].mxu1  ;;  %16673 = vmatpush3.bf16.msra.mxu1 %v18180_v8  ;;  %v18165_v44 = vld [vmem:[%s22607_s2 + $0x3b0] sm:$0xff]  }
 0x51e   : > { %v16227_v42 = vpop.f32.mrb[55].mxu0  ;;  %v16566_v47 = vpop.f32.mrb[53].mxu1  ;;  %16500 = vmatprep.subr.bf16.mxu0 %v20256_v35  ;;  %v3912_v63 = vadd.f32 %v20059_v62, %v3803_v39  ;;  %v18152_v62 = vld [vmem:[%s22607_s2 + $0x308] sm:$0xff]   ;;  %16674 = vmatprep.subr.bf16.mxu1 %v20256_v35  ;;  %v18187_v8 = vld [vmem:[%s22607_s2 + $0x4f0] sm:$0xff]  }
 0x51f   : > { %v5642_v2 = vpop.f32.mrb[54].mxu1 }
 0x520   : > { %v16567_v9 = vpop.f32.mrb[55].mxu1  ;;  %v5647_v2 = vld [vmem:[#allocation3 + $0x41] ss:$2 sm:$0xff] }
 0x521   : > { %16501 = vmatpush3.bf16.msra.mxu0 %v18149_v36  ;;  %16675 = vmatpush3.bf16.msra.mxu1 %v18182_v60  ;;  %v18167_v9 = vld [vmem:[%s22607_s2 + $0x400] sm:$0xff]   ;;  %v18189_v60 = vld [vmem:[%s22607_s2 + $0x4f8] sm:$0xff]  }
 0x522   : > { %16502 = vmatprep.subr.bf16.mxu0 %v20256_v35  ;;  %16676 = vmatprep.subr.bf16.mxu1 %v20256_v35 }
 0x525   : > { %16503 = vmatpush3.bf16.msra.mxu0 %v18150_v12  ;;  %v5648_v12 = vpack.c.bf16 %v5647_v2, %v5647_v2  ;;  %v18241_v2 = vld [vmem:[%s22607_s2 + $0x690] sm:$0xff]  }
 0x526   : > { %16528 = vmatprep.subr.bf16.mxu0 %v20256_v35 }
 0x528   : > { %16505 = vmatmul.mubr.bf16.vlgmr.msra.gmra.mrb[80].mxu0 %v5111_v23  ;;  %v18190_v23 = vld [vmem:[%s22607_s2 + $0x4b8] sm:$0xff]  }
 0x529   : > { %16529 = vmatpush3.bf16.msra.mxu0 %v18151_v19  ;;  %16544 = vmatprep.mubr.msk.bf16.mxu0 %vm18625_vm10, %v20256_v35  ;;  %v18168_v19 = vld [vmem:[%s22607_s2 + $0x408] sm:$0xff]  }
 0x52a   : > { %16530 = vmatprep.subr.bf16.mxu0 %v20256_v35 }
 0x52d   : > { %16531 = vmatpush3.bf16.msra.mxu0 %v18152_v62  ;;  %v18169_v62 = vld [vmem:[%s22607_s2 + $0x410] sm:$0xff]  }
 0x52e   : > { %16532 = vmatprep.subr.bf16.mxu0 %v20256_v35 }
 0x531   : > { %16533 = vmatpush3.bf16.msra.mxu0 %v18153_v48  ;;  %v18170_v48 = vld [vmem:[%s22607_s2 + $0x418] sm:$0xff]  }
 0x532   : > { %16534 = vmatprep.subr.bf16.mxu0 %v20256_v35 }
 0x535   : > { %16535 = vmatpush3.bf16.msra.mxu0 %v18154_v26  ;;  %v18171_v26 = vld [vmem:[%s22607_s2 + $0x420] sm:$0xff]  }
 0x536   : > { %16536 = vmatprep.subr.bf16.mxu0 %v20256_v35 }
 0x539   : > { %16537 = vmatpush3.bf16.msra.mxu0 %v18155_v27  ;;  %v18172_v27 = vld [vmem:[%s22607_s2 + $0x428] sm:$0xff]  }
 0x53a   : > { %16538 = vmatprep.subr.bf16.mxu0 %v20256_v35 }
 0x53b   : > { %v4014_v37 = vpop.f32.mrb[56].mxu0 }
 0x53c   : > { %v4020_v40 = vadd.f32 %v4014_v37, %v3912_v63  ;;  %v16266_v41 = vpop.f32.mrb[57].mxu0  ;;  %v18184_v63 = vld [vmem:[%s22607_s2 + $0x4a0] sm:$0xff]  }
 0x53d   : > { %v4017_v43 = vpop.f32.mrb[58].mxu0  ;;  %16539 = vmatpush3.bf16.msra.mxu0 %v18156_v29  ;;  %v20525_v15 = vpop.f32.mrb[56].mxu1  ;;  %16677 = vmatpush3.bf16.msra.mxu1 %v18184_v63  ;;  %v6112_v63 = vld [vmem:[#allocation4 + $0x3] sm:$0xff] }
 0x53e   : > { %v4128_v0 = vadd.f32 %v20133_v10, %v4020_v40  ;;  %v16267_v53 = vpop.f32.mrb[59].mxu0  ;;  %v16606_v55 = vpop.f32.mrb[57].mxu1  ;;  %16540 = vmatprep.subr.bf16.mxu0 %v20256_v35  ;;  %v18158_v10 = vld [vmem:[%s22607_s2 + $0x338] sm:$0xff]   ;;  %16678 = vmatprep.subr.bf16.mxu1 %v20256_v35  ;;  %v18173_v43 = vld [vmem:[%s22607_s2 + $0x430] sm:$0xff]  }
 0x53f   : > { %v5859_v61 = vpop.f32.mrb[58].mxu1  ;;  %v18174_v53 = vld [vmem:[%s22607_s2 + $0x438] sm:$0xff]   ;;  %v5864_v55 = vld [vmem:[#allocation3 + $0x48] ss:$2 sm:$0xff] }
 0x540   : > { %v4129_v30 = vadd.f32 %v20366_v57, %v4128_v0  ;;  %v16607_v31 = vpop.f32.mrb[59].mxu1  ;;  %v5865_v61 = vpack.c.bf16 %v5864_v55, %v5864_v55 }
 0x541   : > { %16541 = vmatpush3.bf16.msra.mxu0 %v18157_v24  ;;  %16679 = vmatpush3.bf16.msra.mxu1 %v18186_v5  ;;  %v18183_v31 = vld [vmem:[%s22607_s2 + $0x4e0] sm:$0xff]  }
 0x542   : > { %vm4130_vm12 = vcmp.ge.f32.partialorder %v4129_v30, 0.0  ;;  %v4131_v56 = vmul.f32 %v20371_v4, %v4129_v30  ;;  %16542 = vmatprep.subr.bf16.mxu0 %v20256_v35  ;;  %16680 = vmatprep.subr.bf16.mxu1 %v20256_v35  ;;  %v18191_v5 = vld [vmem:[%s22607_s2 + $0x500] sm:$0xff]  }
 0x544   : > { %v4132_v14 = vsel %vm4130_vm12, %v4129_v30, %v4131_v56  ;;  %v18181_v30 = vld [vmem:[%s22607_s2 + $0x4d8] sm:$0xff]  }
 0x545   : > { %4133 = vst [vmem:[#allocation4 + $0xc] sm:$0xf] %v4132_v14  ;;  %16543 = vmatpush3.bf16.msra.mxu0 %v18158_v10  ;;  %16681 = vmatpush3.bf16.msra.mxu1 %v18188_v13  ;;  %v18192_v13 = vld [vmem:[%s22607_s2 + $0x540] sm:$0xff]  }
 0x546   : > { %16568 = vmatprep.subr.bf16.mxu0 %v20256_v35  ;;  %16682 = vmatprep.subr.bf16.mxu1 %v20256_v35 }
 0x548   : > { %16545 = vmatmul.mubr.bf16.vlgmr.msra.gmra.mrb[84].mxu0 %v5432_v16 }
 0x549   : > { %16569 = vmatpush3.bf16.msra.mxu0 %v18159_v3  ;;  %16584 = vmatprep.mubr.msk.bf16.mxu0 %vm18625_vm10, %v20256_v35 }
 0x54a   : > { %16570 = vmatprep.subr.bf16.mxu0 %v20256_v35  ;;  %16683 = vmatpush3.bf16.msra.mxu1 %v18190_v23 }
 0x54b   : > { %16708 = vmatprep.subr.bf16.mxu1 %v20256_v35 }
 0x54d   : > { %16571 = vmatpush3.bf16.msra.mxu0 %v18160_v20 }
 0x54e   : > { %16572 = vmatprep.subr.bf16.mxu0 %v20256_v35 }
 0x551   : > { %16573 = vmatpush3.bf16.msra.mxu0 %v18161_v18 }
 0x552   : > { %16574 = vmatprep.subr.bf16.mxu0 %v20256_v35 }
 0x555   : > { %16575 = vmatpush3.bf16.msra.mxu0 %v18162_v34 }
 0x556   : > { %16576 = vmatprep.subr.bf16.mxu0 %v20256_v35 }
 0x559   : > { %16577 = vmatpush3.bf16.msra.mxu0 %v18163_v33 }
 0x55a   : > { %16578 = vmatprep.subr.bf16.mxu0 %v20256_v35 }
 0x55b   : > { %v4253_v32 = vpop.f32.mrb[60].mxu0 }
 0x55c   : > { %v4342_v58 = vadd.f32 %v20206_v25, %v4253_v32  ;;  %v16306_v59 = vpop.f32.mrb[61].mxu0  ;;  %v18166_v25 = vld [vmem:[%s22607_s2 + $0x3b8] sm:$0xff]  }
 0x55d   : > { %v4256_v7 = vpop.f32.mrb[62].mxu0  ;;  %16579 = vmatpush3.bf16.msra.mxu0 %v18164_v22  ;;  %v20582_v39 = vpop.f32.mrb[60].mxu1 }
 0x55e   : > { %v16307_v45 = vpop.f32.mrb[63].mxu0  ;;  %v16646_v36 = vpop.f32.mrb[61].mxu1  ;;  %16580 = vmatprep.subr.bf16.mxu0 %v20256_v35 }
 0x55f   : > { %v6075_v42 = vpop.f32.mrb[62].mxu1 }
 0x560   : > { %v16647_v47 = vpop.f32.mrb[63].mxu1 }
 0x561   : > { %16581 = vmatpush3.bf16.msra.mxu0 %v18165_v44  ;;  %v6088_v47 = vand.u32 3, %v18749_v28 }
 0x562   : > { %16582 = vmatprep.subr.bf16.mxu0 %v20256_v35 }
 0x563   : > { %vm6108_vm14 = vcmp.ne.s32.totalorder %v6088_v47, 0  ;;  %vm6110_vm2 = vcmp.ne.s32.totalorder %v6088_v47, 3  ;;  %v18210_v47 = vld [vmem:[%s22607_s2 + $0x5c8] sm:$0xff]  }
 0x565   : > { %16583 = vmatpush3.bf16.msra.mxu0 %v18166_v25  ;;  %v6095_v25 = vand.u32 3, %v18754_v38 }
 0x566   : > { %16608 = vmatprep.subr.bf16.mxu0 %v20256_v35 }
 0x567   : > { %vm6109_vm15 = vcmp.ne.s32.totalorder %v6095_v25, 0  ;;  %vm6111_vm3 = vcmp.ne.s32.totalorder %v6095_v25, 3  ;;  %v20802_v25 = vld [vmem:[#allocation2 + $0x8] sm:$0xff] }
 0x568   : > { %16585 = vmatmul.mubr.bf16.vlgmr.msra.gmra.mrb[88].mxu0 %v5648_v12  ;;  %vm20688_vm1 = vmpackc.low %vm6109_vm15, %vm6108_vm14 }
 0x569   : > { %16609 = vmatpush3.bf16.msra.mxu0 %v18167_v9  ;;  %16624 = vmatprep.mubr.msk.bf16.mxu0 %vm18625_vm10, %v20256_v35  ;;  %vm20779_vm4 = vmpackc.low %vm6111_vm3, %vm6110_vm2 }
 0x56a   : > { %16610 = vmatprep.subr.bf16.mxu0 %v20256_v35 }
 0x56d   : > { %16611 = vmatpush3.bf16.msra.mxu0 %v18168_v19 }
 0x56e   : > { %16612 = vmatprep.subr.bf16.mxu0 %v20256_v35 }
 0x571   : > { %16613 = vmatpush3.bf16.msra.mxu0 %v18169_v62  ;;  %v18193_v62 = vld [vmem:[%s22607_s2 + $0x508] sm:$0xff]  }
 0x572   : > { %16614 = vmatprep.subr.bf16.mxu0 %v20256_v35 }
 0x575   : > { %16615 = vmatpush3.bf16.msra.mxu0 %v18170_v48  ;;  %v18194_v48 = vld [vmem:[%s22607_s2 + $0x548] sm:$0xff]  }
 0x576   : > { %16616 = vmatprep.subr.bf16.mxu0 %v20256_v35 }
 0x579   : > { %16617 = vmatpush3.bf16.msra.mxu0 %v18171_v26  ;;  %v18195_v26 = vld [vmem:[%s22607_s2 + $0x510] sm:$0xff]  }
 0x57a   : > { %16618 = vmatprep.subr.bf16.mxu0 %v20256_v35 }
 0x57b   : > { %v4447_v29 = vpop.f32.mrb[64].mxu0 }
 0x57c   : > { %v4453_v37 = vadd.f32 %v4447_v29, %v4342_v58  ;;  %v16346_v40 = vpop.f32.mrb[65].mxu0  ;;  %v18197_v29 = vld [vmem:[%s22607_s2 + $0x518] sm:$0xff]  }
 0x57d   : > { %v4450_v41 = vpop.f32.mrb[66].mxu0  ;;  %16619 = vmatpush3.bf16.msra.mxu0 %v18172_v27  ;;  %v18196_v27 = vld [vmem:[%s22607_s2 + $0x550] sm:$0xff]   ;;  %v18199_v40 = vld [vmem:[%s22607_s2 + $0x520] sm:$0xff]  }
 0x57e   : > { %v16347_v24 = vpop.f32.mrb[67].mxu0  ;;  %16620 = vmatprep.subr.bf16.mxu0 %v20256_v35  ;;  %v4562_v0 = vadd.f32 %v20280_v52, %v4453_v37  ;;  %v18177_v52 = vld [vmem:[%s22607_s2 + $0x4c8] sm:$0xff]   ;;  %v18198_v37 = vld [vmem:[%s22607_s2 + $0x558] sm:$0xff]   ;;  %v18200_v41 = vld [vmem:[%s22607_s2 + $0x560] sm:$0xff]  }
 0x581   : > { %16621 = vmatpush3.bf16.msra.mxu0 %v18173_v43 }
 0x582   : > { %16622 = vmatprep.subr.bf16.mxu0 %v20256_v35 }
 0x585   : > { %16623 = vmatpush3.bf16.msra.mxu0 %v18174_v53 }
 0x586   : > { %16648 = vmatprep.subr.bf16.mxu0 %v20256_v35 }
 0x588   : > { %16625 = vmatmul.mubr.bf16.vlgmr.msra.gmra.mrb[92].mxu0 %v5865_v61  ;;  %v18201_v61 = vld [vmem:[%s22607_s2 + $0x528] sm:$0xff]  }
 0x589   : > { %16649 = vmatpush3.bf16.msra.mxu0 %v18175_v51  ;;  %16664 = vmatprep.mubr.msk.bf16.mxu0 %vm18625_vm10, %v20256_v35 }
 0x58a   : > { %16650 = vmatprep.subr.bf16.mxu0 %v20256_v35 }
 0x58d   : > { %16651 = vmatpush3.bf16.msra.mxu0 %v18177_v52  ;;  %v18202_v52 = vld [vmem:[%s22607_s2 + $0x568] sm:$0xff]  }
 0x58e   : > { %16652 = vmatprep.subr.bf16.mxu0 %v20256_v35 }
 0x591   : > { %16653 = vmatpush3.bf16.msra.mxu0 %v18179_v50  ;;  %v18205_v50 = vld [vmem:[%s22607_s2 + $0x538] sm:$0xff]  }
 0x592   : > { %16654 = vmatprep.subr.bf16.mxu0 %v20256_v35 }
 0x595   : > { %16655 = vmatpush3.bf16.msra.mxu0 %v18181_v30  ;;  %v18206_v30 = vld [vmem:[%s22607_s2 + $0x578] sm:$0xff]  }
 0x596   : > { %16656 = vmatprep.subr.bf16.mxu0 %v20256_v35 }
 0x599   : > { %16657 = vmatpush3.bf16.msra.mxu0 %v18183_v31 }
 0x59a   : > { %16658 = vmatprep.subr.bf16.mxu0 %v20256_v35 }
 0x59b   : > { %v4664_v10 = vpop.f32.mrb[68].mxu0 }
 0x59c   : > { %v4670_v56 = vadd.f32 %v4664_v10, %v4562_v0  ;;  %v16386_v6 = vpop.f32.mrb[69].mxu0 }
 0x59d   : > { %v4667_v14 = vpop.f32.mrb[70].mxu0  ;;  %16659 = vmatpush3.bf16.msra.mxu0 %v18185_v46 }
 0x59e   : > { %v16387_v3 = vpop.f32.mrb[71].mxu0  ;;  %v4778_v16 = vadd.f32 %v20327_v11, %v4670_v56  ;;  %16660 = vmatprep.subr.bf16.mxu0 %v20256_v35 }
 0x5a1   : > { %16661 = vmatpush3.bf16.msra.mxu0 %v18187_v8 }
 0x5a2   : > { %16662 = vmatprep.subr.bf16.mxu0 %v20256_v35 }
 0x5a5   : > { %16663 = vmatpush3.bf16.msra.mxu0 %v18189_v60 }
 0x5a6   : > { %16688 = vmatprep.subr.bf16.mxu0 %v20256_v35 }
 0x5bb   : > { %v4881_v20 = vpop.f32.mrb[72].mxu0 }
 0x5bc   : > { %v4887_v18 = vadd.f32 %v4881_v20, %v4778_v16  ;;  %v16426_v34 = vpop.f32.mrb[73].mxu0 }
 0x5bd   : > { %v4884_v33 = vpop.f32.mrb[74].mxu0 }
 0x5be   : > { %v16427_v22 = vpop.f32.mrb[75].mxu0  ;;  %v4995_v32 = vadd.f32 %v20373_v17, %v4887_v18  ;;  %v6138_v17 = vld [vmem:[#allocation4 + $0x4] sm:$0xff] }
 0x5db   : > { %v5097_v11 = vpop.f32.mrb[76].mxu0 }
 0x5dc   : > { %v5103_v58 = vadd.f32 %v5097_v11, %v4995_v32  ;;  %v16466_v59 = vpop.f32.mrb[77].mxu0 }
 0x5dd   : > { %v5100_v7 = vpop.f32.mrb[78].mxu0 }
 0x5de   : > { %v5104_v44 = vadd.f32 %v20366_v57, %v5103_v58  ;;  %v16467_v45 = vpop.f32.mrb[79].mxu0  ;;  %v18250_v7 = vld [vmem:[%s22607_s2 + $0x6c8] sm:$0xff]  }
 0x5df   : > { %v18208_v45 = vld [vmem:[%s22607_s2 + $0x5c0] sm:$0xff]  }
 0x5e0   : > { %vm5105_vm13 = vcmp.ge.f32.partialorder %v5104_v44, 0.0  ;;  %v5106_v36 = vmul.f32 %v20371_v4, %v5104_v44 }
 0x5e2   : > { %v5107_v42 = vsel %vm5105_vm13, %v5104_v44, %v5106_v36 }
 0x5e3   : > { %5108 = vst [vmem:[#allocation4 + $0x10] sm:$0xf] %v5107_v42  ;;  %v18209_v42 = vld [vmem:[%s22607_s2 + $0x588] sm:$0xff]  }
 0x5ea   : > { %v20695_v9 = vld [vmem:[#allocation4 + $0xc] sm:$0xff] }
 0x5eb   : > { %v20697_v12 = vld [vmem:[#allocation4 + $0xb] sm:$0xff]  ;;  %v6140_v19 = vpack.c.bf16 %v20695_v9, %v6138_v17 }
 0x5ec   : > { %v13460_v23 = vpack.c.bf16 %v20697_v12, %v6112_v63  ;;  %v18211_v17 = vld [vmem:[%s22607_s2 + $0x590] sm:$0xff]  }
 0x5ed   : > { %16665 = vmatmul.mubr.bf16.vlgmr.msra.gmra.mrb[96].mxu0 %v6140_v19  ;;  %v18212_v63 = vld [vmem:[%s22607_s2 + $0x5d0] sm:$0xff]   ;;  %v18215_v19 = vld [vmem:[%s22607_s2 + $0x5a0] sm:$0xff]  }
 0x5ee   : > { %16685 = vmatmul.mubr.msk.bf16.vlgmr.msra.gmra.mrb[64].mxu1 %vm20688_vm1, %v13460_v23  ;;  %16689 = vmatpush3.bf16.msra.mxu0 %v18191_v5  ;;  %v18213_v5 = vld [vmem:[%s22607_s2 + $0x598] sm:$0xff]   ;;  %v18216_v23 = vld [vmem:[%s22607_s2 + $0x5e0] sm:$0xff]  }
 0x5ef   : > { %16709 = vmatpush3.bf16.msra.mxu1 %v18192_v13  ;;  %16690 = vmatprep.subr.bf16.mxu0 %v20256_v35  ;;  %v18214_v13 = vld [vmem:[%s22607_s2 + $0x5d8] sm:$0xff]  }
 0x5f0   : > { %16710 = vmatprep.subr.bf16.mxu1 %v20256_v35  ;;  %16704 = vmatprep.mubr.msk.bf16.mxu0 %vm18625_vm10, %v20256_v35 }
 0x5f1   : > { %16724 = vmatprep.mubr.msk.bf16.mxu1 %vm18625_vm10, %v20256_v35 }
 0x5f2   : > { %16691 = vmatpush3.bf16.msra.mxu0 %v18193_v62  ;;  %v18217_v62 = vld [vmem:[%s22607_s2 + $0x5a8] sm:$0xff]  }
 0x5f3   : > { %16711 = vmatpush3.bf16.msra.mxu1 %v18194_v48  ;;  %16692 = vmatprep.subr.bf16.mxu0 %v20256_v35  ;;  %v18218_v48 = vld [vmem:[%s22607_s2 + $0x5e8] sm:$0xff]  }
 0x5f4   : > { %16712 = vmatprep.subr.bf16.mxu1 %v20256_v35 }
 0x5f6   : > { %16693 = vmatpush3.bf16.msra.mxu0 %v18195_v26  ;;  %v18219_v26 = vld [vmem:[%s22607_s2 + $0x5b0] sm:$0xff]  }
 0x5f7   : > { %16713 = vmatpush3.bf16.msra.mxu1 %v18196_v27  ;;  %16694 = vmatprep.subr.bf16.mxu0 %v20256_v35  ;;  %v18220_v27 = vld [vmem:[%s22607_s2 + $0x5f0] sm:$0xff]  }
 0x5f8   : > { %16714 = vmatprep.subr.bf16.mxu1 %v20256_v35 }
 0x5fa   : > { %16695 = vmatpush3.bf16.msra.mxu0 %v18197_v29  ;;  %v18221_v29 = vld [vmem:[%s22607_s2 + $0x5b8] sm:$0xff]  }
 0x5fb   : > { %16715 = vmatpush3.bf16.msra.mxu1 %v18198_v37  ;;  %v5316_v43 = vpop.f32.mrb[80].mxu0  ;;  %16696 = vmatprep.subr.bf16.mxu0 %v20256_v35  ;;  %v18222_v37 = vld [vmem:[%s22607_s2 + $0x5f8] sm:$0xff]  }
 0x5fc   : > { %16716 = vmatprep.subr.bf16.mxu1 %v20256_v35  ;;  %v5317_v24 = vadd.f32 %v5316_v43, %v20412_v21  ;;  %v16506_v0 = vpop.f32.mrb[81].mxu0  ;;  %v18203_v21 = vld [vmem:[%s22607_s2 + $0x530] sm:$0xff]   ;;  %v6566_v43 = vld [vmem:[#allocation4 + $0x8] sm:$0xff] }
 0x5fd   : > { %v5319_v53 = vpop.f32.mrb[82].mxu0  ;;  %v18223_v0 = vld [vmem:[%s22607_s2 + $0x600] sm:$0xff]  }
 0x5fe   : > { %v16507_v55 = vpop.f32.mrb[83].mxu0  ;;  %v5428_v51 = vadd.f32 %v20450_v54, %v5317_v24  ;;  %16697 = vmatpush3.bf16.msra.mxu0 %v18199_v40  ;;  %v18204_v54 = vld [vmem:[%s22607_s2 + $0x570] sm:$0xff]   ;;  %v18224_v53 = vld [vmem:[%s22607_s2 + $0x640] sm:$0xff]  }
 0x5ff   : > { %16717 = vmatpush3.bf16.msra.mxu1 %v18200_v41  ;;  %16698 = vmatprep.subr.bf16.mxu0 %v20256_v35  ;;  %v6677_v24 = vld [vmem:[#allocation4 + $0x9] sm:$0xff] }
 0x600   : > { %16718 = vmatprep.subr.bf16.mxu1 %v20256_v35 }
 0x602   : > { %16699 = vmatpush3.bf16.msra.mxu0 %v18201_v61  ;;  %v18225_v61 = vld [vmem:[%s22607_s2 + $0x608] sm:$0xff]  }
 0x603   : > { %16719 = vmatpush3.bf16.msra.mxu1 %v18202_v52  ;;  %16700 = vmatprep.subr.bf16.mxu0 %v20256_v35  ;;  %v18226_v52 = vld [vmem:[%s22607_s2 + $0x648] sm:$0xff]  }
 0x604   : > { %16720 = vmatprep.subr.bf16.mxu1 %v20256_v35 }
 0x606   : > { %16701 = vmatpush3.bf16.msra.mxu0 %v18203_v21  ;;  %v18227_v21 = vld [vmem:[%s22607_s2 + $0x610] sm:$0xff]  }
 0x607   : > { %16721 = vmatpush3.bf16.msra.mxu1 %v18204_v54  ;;  %16702 = vmatprep.subr.bf16.mxu0 %v20256_v35  ;;  %v18228_v54 = vld [vmem:[%s22607_s2 + $0x650] sm:$0xff]  }
 0x608   : > { %16722 = vmatprep.subr.bf16.mxu1 %v20256_v35 }
 0x60a   : > { %16703 = vmatpush3.bf16.msra.mxu0 %v18205_v50  ;;  %v18229_v50 = vld [vmem:[%s22607_s2 + $0x618] sm:$0xff]  }
 0x60b   : > { %16723 = vmatpush3.bf16.msra.mxu1 %v18206_v30  ;;  %16728 = vmatprep.subr.bf16.mxu0 %v20256_v35  ;;  %v18230_v30 = vld [vmem:[%s22607_s2 + $0x658] sm:$0xff]  }
 0x60c   : > { %16748 = vmatprep.subr.bf16.mxu1 %v20256_v35 }
 0x61b   : > { %v5531_v31 = vpop.f32.mrb[84].mxu0 }
 0x61c   : > { %v5537_v46 = vadd.f32 %v5531_v31, %v5428_v51  ;;  %v16546_v10 = vpop.f32.mrb[85].mxu0  ;;  %v18231_v31 = vld [vmem:[%s22607_s2 + $0x620] sm:$0xff]  }
 0x61d   : > { %v5534_v56 = vpop.f32.mrb[86].mxu0  ;;  %v18233_v10 = vld [vmem:[%s22607_s2 + $0x628] sm:$0xff]  }
 0x61e   : > { %v16547_v6 = vpop.f32.mrb[87].mxu0  ;;  %v5645_v14 = vadd.f32 %v20487_v1, %v5537_v46  ;;  %v18232_v46 = vld [vmem:[%s22607_s2 + $0x660] sm:$0xff]   ;;  %v18234_v56 = vld [vmem:[%s22607_s2 + $0x668] sm:$0xff]  }
 0x61f   : > { %v18235_v6 = vld [vmem:[%s22607_s2 + $0x630] sm:$0xff]  }
 0x63b   : > { %v5747_v8 = vpop.f32.mrb[88].mxu0 }
 0x63c   : > { %v5753_v3 = vadd.f32 %v5747_v8, %v5645_v14  ;;  %v16586_v16 = vpop.f32.mrb[89].mxu0  ;;  %v18236_v14 = vld [vmem:[%s22607_s2 + $0x670] sm:$0xff]   ;;  %v18237_v8 = vld [vmem:[%s22607_s2 + $0x638] sm:$0xff]  }
 0x63d   : > { %v5750_v60 = vpop.f32.mrb[90].mxu0 }
 0x63e   : > { %v16587_v20 = vpop.f32.mrb[91].mxu0  ;;  %v5862_v18 = vadd.f32 %v20525_v15, %v5753_v3  ;;  %v6336_v15 = vld [vmem:[#allocation4 + $0x5] sm:$0xff]  ;;  %v18238_v3 = vld [vmem:[%s22607_s2 + $0x678] sm:$0xff]  }
 0x63f   : > { %v18239_v20 = vld [vmem:[%s22607_s2 + $0x680] sm:$0xff]  }
 0x65b   : > { %v5964_v34 = vpop.f32.mrb[92].mxu0 }
 0x65c   : > { %v5970_v33 = vadd.f32 %v5964_v34, %v5862_v18  ;;  %v16626_v22 = vpop.f32.mrb[93].mxu0 }
 0x65d   : > { %v5967_v32 = vpop.f32.mrb[94].mxu0 }
 0x65e   : > { %v6078_v35 = vadd.f32 %v20582_v39, %v5970_v33  ;;  %v16627_v11 = vpop.f32.mrb[95].mxu0  ;;  %v6453_v39 = vld [vmem:[#allocation4 + $0x7] sm:$0xff] }
 0x65f   : > { %v18240_v33 = vld [vmem:[%s22607_s2 + $0x688] sm:$0xff]  }
 0x660   : > { %v6079_v58 = vadd.f32 %v20366_v57, %v6078_v35  ;;  %v18207_v57 = vld [vmem:[%s22607_s2 + $0x580] sm:$0xff]   ;;  %v18244_v35 = vld [vmem:[%s22607_s2 + $0x6a8] sm:$0xff]  }
 0x662   : > { %vm6080_vm0 = vcmp.ge.f32.partialorder %v6079_v58, 0.0  ;;  %v6081_v59 = vmul.f32 %v20371_v4, %v6079_v58 }
 0x664   : > { %v6082_v1 = vsel %vm6080_vm0, %v6079_v58, %v6081_v59 }
 0x665   : > { %6083 = vst [vmem:[#allocation4 + $0x14] sm:$0xf] %v6082_v1 }
 0x66c   : > { %v20786_v44 = vld [vmem:[#allocation4 + $0xd] sm:$0xff] }
 0x66d   : > { %v6454_v4 = vld [vmem:[#allocation4 + $0xf] sm:$0xff]  ;;  %v13487_v38 = vpack.c.bf16 %v20786_v44, %v6336_v15 }
 0x66e   : > { %v13514_v36 = vpack.c.bf16 %v6454_v4, %v6453_v39  ;;  %v6567_v40 = vld [vmem:[#allocation4 + $0x10] sm:$0xff] }
 0x66f   : > { %16705 = vmatmul.mubr.msk.bf16.vlgmr.msra.gmra.mrb[100].mxu0 %vm20779_vm4, %v13487_v38  ;;  %v6678_v41 = vld [vmem:[#allocation4 + $0x11] sm:$0xff]  ;;  %v6568_v55 = vpack.c.bf16 %v6567_v40, %v6566_v43 }
 0x670   : > { %16725 = vmatmul.mubr.msk.bf16.vlgmr.msra.gmra.mrb[68].mxu1 %vm20688_vm1, %v13514_v36  ;;  %16729 = vmatpush3.bf16.msra.mxu0 %v18207_v57  ;;  %v13565_v51 = vpack.c.bf16 %v6678_v41, %v6677_v24  ;;  %v6791_v16 = vld [vmem:[#allocation4 + $0x13] sm:$0xff] }
 0x671   : > { %16749 = vmatpush3.bf16.msra.mxu1 %v18208_v45  ;;  %16730 = vmatprep.subr.bf16.mxu0 %v20802_v25  ;;  %v6904_v60 = vld [vmem:[#allocation4 + $0x14] sm:$0xff]  ;;  %v13592_v18 = vpack.c.bf16 %v6791_v16, %v20697_v12  ;;  %v18243_v12 = vld [vmem:[%s22607_s2 + $0x6a0] sm:$0xff]  }
 0x672   : > { %16750 = vmatprep.subr.bf16.mxu1 %v20802_v25  ;;  %16744 = vmatprep.mubr.msk.bf16.mxu0 %vm18625_vm10, %v20802_v25  ;;  %v6905_v34 = vpack.c.bf16 %v6904_v60, %v20695_v9  ;;  %v18242_v9 = vld [vmem:[%s22607_s2 + $0x698] sm:$0xff]   ;;  %v18245_v45 = vld [vmem:[%s22607_s2 + $0x6b0] sm:$0xff]  }
 0x673   : > { %16764 = vmatprep.mubr.msk.bf16.mxu1 %vm18625_vm10, %v20802_v25  ;;  %v18246_v38 = vld [vmem:[%s22607_s2 + $0x6b8] sm:$0xff]  }
 0x674   : > { %16731 = vmatpush3.bf16.msra.mxu0 %v18209_v42  ;;  %v7015_v36 = vld [vmem:[#allocation4 + $0x15] sm:$0xff] }
 0x675   : > { %16751 = vmatpush3.bf16.msra.mxu1 %v18210_v47  ;;  %16732 = vmatprep.subr.bf16.mxu0 %v20802_v25  ;;  %v13643_v42 = vpack.c.bf16 %v7015_v36, %v20786_v44  ;;  %v18247_v47 = vld [vmem:[%s22607_s2 + $0x700] sm:$0xff]   ;;  %v18249_v44 = vld [vmem:[%s22607_s2 + $0x708] sm:$0xff]   ;;  %v18262_v40 = vld [vmem:[%s22607_s2 + $0x6f8] sm:$0xff]  }
 0x676   : > { %16752 = vmatprep.subr.bf16.mxu1 %v20802_v25 }
 0x678   : > { %16733 = vmatpush3.bf16.msra.mxu0 %v18211_v17  ;;  %v18248_v17 = vld [vmem:[%s22607_s2 + $0x6c0] sm:$0xff]  }
 0x679   : > { %16753 = vmatpush3.bf16.msra.mxu1 %v18212_v63  ;;  %16734 = vmatprep.subr.bf16.mxu0 %v20802_v25  ;;  %v18251_v63 = vld [vmem:[%s22607_s2 + $0x710] sm:$0xff]  }
 0x67a   : > { %16754 = vmatprep.subr.bf16.mxu1 %v20802_v25 }
 0x67c   : > { %16735 = vmatpush3.bf16.msra.mxu0 %v18213_v5  ;;  %v18252_v5 = vld [vmem:[%s22607_s2 + $0x6d0] sm:$0xff]  }
 0x67d   : > { %16755 = vmatpush3.bf16.msra.mxu1 %v18214_v13  ;;  %16736 = vmatprep.subr.bf16.mxu0 %v20802_v25  ;;  %v18253_v13 = vld [vmem:[%s22607_s2 + $0x718] sm:$0xff]  }
 0x67e   : > { %16756 = vmatprep.subr.bf16.mxu1 %v20802_v25 }
 0x680   : > { %16737 = vmatpush3.bf16.msra.mxu0 %v18215_v19  ;;  %v18254_v19 = vld [vmem:[%s22607_s2 + $0x6d8] sm:$0xff]  }
 0x681   : > { %16757 = vmatpush3.bf16.msra.mxu1 %v18216_v23  ;;  %16738 = vmatprep.subr.bf16.mxu0 %v20802_v25  ;;  %v18255_v23 = vld [vmem:[%s22607_s2 + $0x720] sm:$0xff]  }
 0x682   : > { %16758 = vmatprep.subr.bf16.mxu1 %v20802_v25 }
 0x684   : > { %16739 = vmatpush3.bf16.msra.mxu0 %v18217_v62  ;;  %v18256_v62 = vld [vmem:[%s22607_s2 + $0x6e0] sm:$0xff]  }
 0x685   : > { %16759 = vmatpush3.bf16.msra.mxu1 %v18218_v48  ;;  %16740 = vmatprep.subr.bf16.mxu0 %v20802_v25  ;;  %v18257_v48 = vld [vmem:[%s22607_s2 + $0x728] sm:$0xff]  }
 0x686   : > { %16760 = vmatprep.subr.bf16.mxu1 %v20802_v25 }
 0x688   : > { %16741 = vmatpush3.bf16.msra.mxu0 %v18219_v26  ;;  %v18258_v26 = vld [vmem:[%s22607_s2 + $0x6e8] sm:$0xff]  }
 0x689   : > { %16761 = vmatpush3.bf16.msra.mxu1 %v18220_v27  ;;  %16742 = vmatprep.subr.bf16.mxu0 %v20802_v25  ;;  %v18259_v27 = vld [vmem:[%s22607_s2 + $0x730] sm:$0xff]  }
 0x68a   : > { %16762 = vmatprep.subr.bf16.mxu1 %v20802_v25 }
 0x68c   : > { %16743 = vmatpush3.bf16.msra.mxu0 %v18221_v29  ;;  %v18260_v29 = vld [vmem:[%s22607_s2 + $0x6f0] sm:$0xff]  }
 0x68d   : > { %16763 = vmatpush3.bf16.msra.mxu1 %v18222_v37  ;;  %16768 = vmatprep.subr.bf16.mxu0 %v20802_v25  ;;  %v18261_v37 = vld [vmem:[%s22607_s2 + $0x738] sm:$0xff]  }
 0x68e   : > { %16788 = vmatprep.subr.bf16.mxu1 %v20802_v25 }
 0x68f   : > { %16745 = vmatmul.mubr.bf16.vlgmr.msra.gmra.mrb[104].mxu0 %v6568_v55 }
 0x690   : > { %16765 = vmatmul.mubr.msk.bf16.vlgmr.msra.gmra.mrb[72].mxu1 %vm20779_vm4, %v13565_v51  ;;  %16769 = vmatpush3.bf16.msra.mxu0 %v18223_v0 }
 0x691   : > { %16789 = vmatpush3.bf16.msra.mxu1 %v18224_v53  ;;  %16770 = vmatprep.subr.bf16.mxu0 %v20802_v25 }
 0x692   : > { %16790 = vmatprep.subr.bf16.mxu1 %v20802_v25  ;;  %16784 = vmatprep.mubr.msk.bf16.mxu0 %vm18625_vm10, %v20802_v25 }
 0x693   : > { %16804 = vmatprep.mubr.msk.bf16.mxu1 %vm18625_vm10, %v20802_v25 }
 0x694   : > { %16771 = vmatpush3.bf16.msra.mxu0 %v18225_v61 }
 0x695   : > { %16791 = vmatpush3.bf16.msra.mxu1 %v18226_v52  ;;  %16772 = vmatprep.subr.bf16.mxu0 %v20802_v25 }
 0x696   : > { %16792 = vmatprep.subr.bf16.mxu1 %v20802_v25 }
 0x698   : > { %16773 = vmatpush3.bf16.msra.mxu0 %v18227_v21 }
 0x699   : > { %16793 = vmatpush3.bf16.msra.mxu1 %v18228_v54  ;;  %16774 = vmatprep.subr.bf16.mxu0 %v20802_v25 }
 0x69a   : > { %16794 = vmatprep.subr.bf16.mxu1 %v20802_v25 }
 0x69c   : > { %16775 = vmatpush3.bf16.msra.mxu0 %v18229_v50 }
 0x69d   : > { %16795 = vmatpush3.bf16.msra.mxu1 %v18230_v30  ;;  %16776 = vmatprep.subr.bf16.mxu0 %v20802_v25 }
 0x69e   : > { %16796 = vmatprep.subr.bf16.mxu1 %v20802_v25 }
 0x6a0   : > { %16777 = vmatpush3.bf16.msra.mxu0 %v18231_v31 }
 0x6a1   : > { %16797 = vmatpush3.bf16.msra.mxu1 %v18232_v46  ;;  %16778 = vmatprep.subr.bf16.mxu0 %v20802_v25 }
 0x6a2   : > { %16798 = vmatprep.subr.bf16.mxu1 %v20802_v25 }
 0x6a4   : > { %16779 = vmatpush3.bf16.msra.mxu0 %v18233_v10 }
 0x6a5   : > { %16799 = vmatpush3.bf16.msra.mxu1 %v18234_v56  ;;  %16780 = vmatprep.subr.bf16.mxu0 %v20802_v25 }
 0x6a6   : > { %16800 = vmatprep.subr.bf16.mxu1 %v20802_v25 }
 0x6a8   : > { %16781 = vmatpush3.bf16.msra.mxu0 %v18235_v6 }
 0x6a9   : > { %16801 = vmatpush3.bf16.msra.mxu1 %v18236_v14  ;;  %16782 = vmatprep.subr.bf16.mxu0 %v20802_v25 }
 0x6aa   : > { %16802 = vmatprep.subr.bf16.mxu1 %v20802_v25 }
 0x6ac   : > { %16783 = vmatpush3.bf16.msra.mxu0 %v18237_v8 }
 0x6ad   : > { %16803 = vmatpush3.bf16.msra.mxu1 %v18238_v3  ;;  %16808 = vmatprep.subr.bf16.mxu0 %v20802_v25 }
 0x6ae   : > { %16828 = vmatprep.subr.bf16.mxu1 %v20802_v25 }
 0x6af   : > { %16785 = vmatmul.mubr.msk.bf16.vlgmr.msra.gmra.mrb[108].mxu0 %vm20688_vm1, %v13592_v18 }
 0x6b0   : > { %16805 = vmatmul.mubr.bf16.vlgmr.msra.gmra.mrb[76].mxu1 %v6905_v34  ;;  %16809 = vmatpush3.bf16.msra.mxu0 %v18239_v20 }
 0x6b1   : > { %16824 = vmatprep.mubr.msk.bf16.mxu0 %vm18625_vm10, %v20802_v25  ;;  %16810 = vmatprep.subr.bf16.mxu0 %v20802_v25 }
 0x6b2   : > { %16844 = vmatprep.mubr.msk.bf16.mxu1 %vm18625_vm10, %v20802_v25  ;;  %16829 = vmatpush3.bf16.msra.mxu1 %v18247_v47 }
 0x6b3   : > { %16830 = vmatprep.subr.bf16.mxu1 %v20802_v25 }
 0x6b4   : > { %16811 = vmatpush3.bf16.msra.mxu0 %v18240_v33 }
 0x6b5   : > { %16812 = vmatprep.subr.bf16.mxu0 %v20802_v25 }
 0x6b6   : > { %16831 = vmatpush3.bf16.msra.mxu1 %v18249_v44 }
 0x6b7   : > { %16832 = vmatprep.subr.bf16.mxu1 %v20802_v25 }
 0x6b8   : > { %16813 = vmatpush3.bf16.msra.mxu0 %v18241_v2 }
 0x6b9   : > { %16814 = vmatprep.subr.bf16.mxu0 %v20802_v25 }
 0x6ba   : > { %16833 = vmatpush3.bf16.msra.mxu1 %v18251_v63 }
 0x6bb   : > { %16834 = vmatprep.subr.bf16.mxu1 %v20802_v25 }
 0x6bc   : > { %16815 = vmatpush3.bf16.msra.mxu0 %v18242_v9 }
 0x6bd   : > { %16816 = vmatprep.subr.bf16.mxu0 %v20802_v25 }
 0x6be   : > { %16835 = vmatpush3.bf16.msra.mxu1 %v18253_v13  ;;  %v18263_v13 = vld [vmem:[%s22607_s2 + $0x740] sm:$0xff]  }
 0x6bf   : > { %16836 = vmatprep.subr.bf16.mxu1 %v20802_v25 }
 0x6c0   : > { %16817 = vmatpush3.bf16.msra.mxu0 %v18243_v12  ;;  %v6240_v22 = vpop.f32.mrb[96].mxu0 }
 0x6c1   : > { %v6329_v32 = vpop.f32.mrb[64].mxu1  ;;  %v16666_v58 = vpop.f32.mrb[97].mxu0  ;;  %16818 = vmatprep.subr.bf16.mxu0 %v20802_v25 }
 0x6c2   : > { %v20960_v11 = vadd.f32 %v6329_v32, %v6240_v22  ;;  %v16686_v59 = vpop.f32.mrb[65].mxu1  ;;  %v6243_v1 = vpop.f32.mrb[98].mxu0  ;;  %16837 = vmatpush3.bf16.msra.mxu1 %v18255_v23 }
 0x6c3   : > { %v6332_v15 = vpop.f32.mrb[66].mxu1  ;;  %v16667_v57 = vpop.f32.mrb[99].mxu0  ;;  %16838 = vmatprep.subr.bf16.mxu1 %v20802_v25 }
 0x6c4   : > { %v20963_v39 = vadd.f32 %v6332_v15, %v6243_v1  ;;  %v16687_v4 = vpop.f32.mrb[67].mxu1  ;;  %16819 = vmatpush3.bf16.msra.mxu0 %v18244_v35  ;;  %v13645_v1 = vld [vmem:[%s22608_s3 + $0x3] ss:$0 sm:$0xff] }
 0x6c5   : > { %16820 = vmatprep.subr.bf16.mxu0 %v20802_v25  ;;  %v13646_v4 = vld [vmem:[%s22609_s4 + $0x3] ss:$0 sm:$0xff] }
 0x6c6   : > { %16839 = vmatpush3.bf16.msra.mxu1 %v18257_v48  ;;  %v18264_v48 = vld [vmem:[%s22607_s2 + $0x780] sm:$0xff]  }
 0x6c7   : > { %16840 = vmatprep.subr.bf16.mxu1 %v20802_v25 }
 0x6c8   : > { %16821 = vmatpush3.bf16.msra.mxu0 %v18245_v45 }
 0x6c9   : > { %16822 = vmatprep.subr.bf16.mxu0 %v20802_v25 }
 0x6ca   : > { %16841 = vmatpush3.bf16.msra.mxu1 %v18259_v27  ;;  %v18265_v27 = vld [vmem:[%s22607_s2 + $0x748] sm:$0xff]  }
 0x6cb   : > { %16842 = vmatprep.subr.bf16.mxu1 %v20802_v25 }
 0x6cc   : > { %16823 = vmatpush3.bf16.msra.mxu0 %v18246_v38 }
 0x6cd   : > { %16848 = vmatprep.subr.bf16.mxu0 %v20802_v25 }
 0x6ce   : > { %16843 = vmatpush3.bf16.msra.mxu1 %v18261_v37  ;;  %v18267_v37 = vld [vmem:[%s22607_s2 + $0x750] sm:$0xff]  }
 0x6cf   : > { %16825 = vmatmul.mubr.msk.bf16.vlgmr.msra.gmra.mrb[112].mxu0 %vm20779_vm4, %v13643_v42  ;;  %16868 = vmatprep.subr.bf16.mxu1 %v20802_v25 }
 0x6d0   : > { %16864 = vmatprep.mubr.msk.bf16.mxu0 %vm18625_vm10, %v20802_v25  ;;  %16849 = vmatpush3.bf16.msra.mxu0 %v18248_v17 }
 0x6d1   : > { %16850 = vmatprep.subr.bf16.mxu0 %v20802_v25 }
 0x6d4   : > { %16851 = vmatpush3.bf16.msra.mxu0 %v18250_v7 }
 0x6d5   : > { %16852 = vmatprep.subr.bf16.mxu0 %v20802_v25 }
 0x6d8   : > { %16853 = vmatpush3.bf16.msra.mxu0 %v18252_v5 }
 0x6d9   : > { %16854 = vmatprep.subr.bf16.mxu0 %v20802_v25 }
 0x6dc   : > { %16855 = vmatpush3.bf16.msra.mxu0 %v18254_v19 }
 0x6dd   : > { %16856 = vmatprep.subr.bf16.mxu0 %v20802_v25 }
 0x6e0   : > { %16857 = vmatpush3.bf16.msra.mxu0 %v18256_v62 }
 0x6e1   : > { %16858 = vmatprep.subr.bf16.mxu0 %v20802_v25 }
 0x6e4   : > { %16859 = vmatpush3.bf16.msra.mxu0 %v18258_v26 }
 0x6e5   : > { %16860 = vmatprep.subr.bf16.mxu0 %v20802_v25 }
 0x6e8   : > { %16861 = vmatpush3.bf16.msra.mxu0 %v18260_v29  ;;  %v18266_v29 = vld [vmem:[%s22607_s2 + $0x788] sm:$0xff]  }
 0x6e9   : > { %16862 = vmatprep.subr.bf16.mxu0 %v20802_v25 }
 0x6ec   : > { %16863 = vmatpush3.bf16.msra.mxu0 %v18262_v40  ;;  %v18268_v40 = vld [vmem:[%s22607_s2 + $0x790] sm:$0xff]  }
 0x6ed   : > { %16888 = vmatprep.subr.bf16.mxu0 %v20802_v25 }
 0x742   : > { %v6444_v41 = vpop.f32.mrb[100].mxu0 }
 0x743   : > { %v6557_v43 = vpop.f32.mrb[68].mxu1  ;;  %v6451_v24 = vadd.f32 %v6444_v41, %v20960_v11  ;;  %v16706_v0 = vpop.f32.mrb[101].mxu0  ;;  %v18269_v41 = vld [vmem:[%s22607_s2 + $0x758] sm:$0xff]  }
 0x744   : > { %v16726_v53 = vpop.f32.mrb[69].mxu1  ;;  %v6447_v55 = vpop.f32.mrb[102].mxu0  ;;  %v18272_v0 = vld [vmem:[%s22607_s2 + $0x7a0] sm:$0xff]  }
 0x745   : > { %v6560_v51 = vpop.f32.mrb[70].mxu1  ;;  %v6564_v61 = vadd.f32 %v6557_v43, %v6451_v24  ;;  %v6452_v52 = vadd.f32 %v6447_v55, %v20963_v39  ;;  %v16707_v21 = vpop.f32.mrb[103].mxu0  ;;  %v18270_v43 = vld [vmem:[%s22607_s2 + $0x798] sm:$0xff]   ;;  %v18271_v24 = vld [vmem:[%s22607_s2 + $0x760] sm:$0xff]   ;;  %v18273_v53 = vld [vmem:[%s22607_s2 + $0x768] sm:$0xff]  }
 0x746   : > { %v16727_v54 = vpop.f32.mrb[71].mxu1  ;;  %v18274_v55 = vld [vmem:[%s22607_s2 + $0x7a8] sm:$0xff]  }
 0x747   : > { %v6565_v50 = vadd.f32 %v6560_v51, %v6452_v52  ;;  %v18275_v51 = vld [vmem:[%s22607_s2 + $0x770] sm:$0xff]   ;;  %v18277_v52 = vld [vmem:[%s22607_s2 + $0x778] sm:$0xff]  }
 0x748   : > { %v18278_v54 = vld [vmem:[%s22607_s2 + $0x7b8] sm:$0xff]  }
 0x762   : > { %v6668_v30 = vpop.f32.mrb[104].mxu0 }
 0x763   : > { %v6781_v31 = vpop.f32.mrb[72].mxu1  ;;  %v6675_v46 = vadd.f32 %v6668_v30, %v6564_v61  ;;  %v16746_v10 = vpop.f32.mrb[105].mxu0  ;;  %v18276_v61 = vld [vmem:[%s22607_s2 + $0x7b0] sm:$0xff]  }
 0x764   : > { %v16766_v56 = vpop.f32.mrb[73].mxu1  ;;  %v6671_v6 = vpop.f32.mrb[106].mxu0  ;;  %v18280_v10 = vld [vmem:[%s22607_s2 + $0x800] sm:$0xff]  }
 0x765   : > { %v6784_v14 = vpop.f32.mrb[74].mxu1  ;;  %v6788_v8 = vadd.f32 %v6781_v31, %v6675_v46  ;;  %v6676_v3 = vadd.f32 %v6671_v6, %v6565_v50  ;;  %v16747_v16 = vpop.f32.mrb[107].mxu0  ;;  %v18279_v31 = vld [vmem:[%s22607_s2 + $0x7c0] sm:$0xff]   ;;  %v18281_v6 = vld [vmem:[%s22607_s2 + $0x7c8] sm:$0xff]  }
 0x766   : > { %v16767_v60 = vpop.f32.mrb[75].mxu1  ;;  %v18285_v16 = vld [vmem:[%s22607_s2 + $0x7d8] sm:$0xff]  }
 0x767   : > { %v6789_v20 = vadd.f32 %v6784_v14, %v6676_v3  ;;  %v18282_v14 = vld [vmem:[%s22607_s2 + $0x808] sm:$0xff]   ;;  %v18284_v3 = vld [vmem:[%s22607_s2 + $0x810] sm:$0xff]   ;;  %v18286_v60 = vld [vmem:[%s22607_s2 + $0x818] sm:$0xff]  }
 0x782   : > { %v6894_v18 = vpop.f32.mrb[108].mxu0 }
 0x783   : > { %v7005_v34 = vpop.f32.mrb[76].mxu1  ;;  %v6901_v33 = vadd.f32 %v6894_v18, %v6788_v8  ;;  %v16786_v2 = vpop.f32.mrb[109].mxu0  ;;  %v18283_v8 = vld [vmem:[%s22607_s2 + $0x7d0] sm:$0xff]   ;;  %v18288_v18 = vld [vmem:[%s22607_s2 + $0x820] sm:$0xff]  }
 0x784   : > { %v16806_v9 = vpop.f32.mrb[77].mxu1  ;;  %v6897_v12 = vpop.f32.mrb[110].mxu0  ;;  %v18291_v2 = vld [vmem:[%s22607_s2 + $0x7f0] sm:$0xff]  }
 0x785   : > { %v7008_v22 = vpop.f32.mrb[78].mxu1  ;;  %v7012_v32 = vadd.f32 %v7005_v34, %v6901_v33  ;;  %v6902_v35 = vadd.f32 %v6897_v12, %v6789_v20  ;;  %v16787_v11 = vpop.f32.mrb[111].mxu0  ;;  %v18287_v20 = vld [vmem:[%s22607_s2 + $0x7e0] sm:$0xff]   ;;  %v18289_v34 = vld [vmem:[%s22607_s2 + $0x7e8] sm:$0xff]   ;;  %v18292_v9 = vld [vmem:[%s22607_s2 + $0x830] sm:$0xff]  }
 0x786   : > { %v16807_v58 = vpop.f32.mrb[79].mxu1  ;;  %v18290_v33 = vld [vmem:[%s22607_s2 + $0x828] sm:$0xff]   ;;  %v18293_v12 = vld [vmem:[%s22607_s2 + $0x7f8] sm:$0xff]  }
 0x787   : > { %v7013_v59 = vadd.f32 %v7008_v22, %v6902_v35  ;;  %v18294_v22 = vld [vmem:[%s22607_s2 + $0x838] sm:$0xff]   ;;  %v18295_v35 = vld [vmem:[%s22607_s2 + $0x840] sm:$0xff]  }
 0x7a2   : > { %v7118_v15 = vpop.f32.mrb[112].mxu0 }
 0x7a3   : > { %v7125_v39 = vadd.f32 %v7118_v15, %v7012_v32  ;;  %v16826_v57 = vpop.f32.mrb[113].mxu0  ;;  %v18297_v15 = vld [vmem:[%s22607_s2 + $0x848] sm:$0xff]  }
 0x7a4   : > { %v7121_v45 = vpop.f32.mrb[114].mxu0  ;;  %v18299_v57 = vld [vmem:[%s22607_s2 + $0x850] sm:$0xff]  }
 0x7a5   : > { %v7131_v38 = vadd.f32 %v13645_v1, %v7125_v39  ;;  %v7126_v36 = vadd.f32 %v7121_v45, %v7013_v59  ;;  %v16827_v42 = vpop.f32.mrb[115].mxu0  ;;  %v18296_v59 = vld [vmem:[%s22607_s2 + $0x880] sm:$0xff]   ;;  %v18298_v39 = vld [vmem:[%s22607_s2 + $0x888] sm:$0xff]   ;;  %v18301_v45 = vld [vmem:[%s22607_s2 + $0x858] sm:$0xff]  }
 0x7a6   : > { %v18304_v42 = vld [vmem:[%s22607_s2 + $0x8a0] sm:$0xff]  }
 0x7a7   : > { %vm7133_vm5 = vcmp.ge.f32.partialorder %v7131_v38, 0.0  ;;  %v7139_v47 = vmul.f32 %v13646_v4, %v7131_v38  ;;  %v7132_v17 = vadd.f32 %v13645_v1, %v7126_v36  ;;  %v18303_v36 = vld [vmem:[%s22607_s2 + $0x860] sm:$0xff]  }
 0x7a9   : > { %v7141_v44 = vsel %vm7133_vm5, %v7131_v38, %v7139_v47  ;;  %vm7134_vm6 = vcmp.ge.f32.partialorder %v7132_v17, 0.0  ;;  %v7140_v7 = vmul.f32 %v13646_v4, %v7132_v17  ;;  %v18300_v4 = vld [vmem:[%s22607_s2 + $0x890] sm:$0xff]   ;;  %v18302_v38 = vld [vmem:[%s22607_s2 + $0x898] sm:$0xff]   ;;  %v18305_v47 = vld [vmem:[%s22607_s2 + $0x868] sm:$0xff]  }
 0x7aa   : > { %7143 = vst [vmem:[%s330_s26] sm:$0xff] %v7141_v44  ;;  %7145 = vst [vmem:[#allocation5 + $0x8] sm:$0xff] %v7141_v44  ;;  %v18307_v44 = vld [vmem:[%s22607_s2 + $0x870] sm:$0xff]  }
 0x7ab   : > { %v7142_v63 = vsel %vm7134_vm6, %v7132_v17, %v7140_v7  ;;  %v18306_v17 = vld [vmem:[%s22607_s2 + $0x8a8] sm:$0xff]   ;;  %v18308_v7 = vld [vmem:[%s22607_s2 + $0x8b0] sm:$0xff]  }
 0x7ac   : > { %7144 = vst [vmem:[%s330_s26 + $0x8] sm:$0xff] %v7142_v63  ;;  %7146 = vst [vmem:[#allocation5 + $0x10] sm:$0xff] %v7142_v63 }
 0x7b3   : > { %v7173_v5 = vld [vmem:[#allocation5 + $0x4] ss:$2 sm:$0xff]  ;;  %v7152_v19 = vld [vmem:[#allocation5 + $0x3] ss:$2 sm:$0xff] }
 0x7b4   : > { %v7174_v23 = vpack.c.bf16 %v7173_v5, %v7173_v5  ;;  %v7153_v62 = vmul.f32 %v19426_v49, %v7152_v19  ;;  %v7478_v21 = vld [vmem:[#allocation5 + $0x7] ss:$2 sm:$0xff]  ;;  %v7588_v32 = vld [vmem:[#allocation5 + $0x8] ss:$2 sm:$0xff]  ;;  %v18309_v5 = vld [vmem:[%s22607_s2 + $0x878] sm:$0xff]  }
 0x7b5   : > { %v7369_v50 = vld [vmem:[#allocation5 + $0x5] ss:$2 sm:$0xff]  ;;  %v7479_v30 = vmul.f32 %v19426_v49, %v7478_v21  ;;  %v7589_v58 = vpack.c.bf16 %v7588_v32, %v7588_v32  ;;  %v18310_v19 = vld [vmem:[%s22607_s2 + $0x8b8] sm:$0xff]  }
 0x7b6   : > { %16845 = vmatmul.mubr.bf16.vlgmr.msra.gmra.mrb[80].mxu1 %v7174_v23  ;;  %v7154_v26 = vpack.c.bf16 %v7153_v62, %v7153_v62  ;;  %v7370_v46 = vpack.c.bf16 %v7369_v50, %v7369_v50  ;;  %v7697_v11 = vld [vmem:[#allocation5 + $0x9] ss:$2 sm:$0xff]  ;;  %v18311_v23 = vld [vmem:[%s22607_s2 + $0x8c0] sm:$0xff]   ;;  %v7916_v62 = vld [vmem:[#allocation5 + $0xc] ss:$2 sm:$0xff] }
 0x7b7   : > { %16869 = vmatpush3.bf16.msra.mxu1 %v18263_v13  ;;  %16884 = vmatprep.mubr.msk.bf16.mxu1 %vm18625_vm10, %v20802_v25  ;;  %v7480_v56 = vpack.c.bf16 %v7479_v30, %v7479_v30  ;;  %v7698_v1 = vpack.c.bf16 %v7697_v11, %v7697_v11  ;;  %v7806_v63 = vld [vmem:[#allocation5 + $0xb] ss:$2 sm:$0xff]  ;;  %v18327_v30 = vld [vmem:[%s22607_s2 + $0x6c0] sm:$0xff]  }
 0x7b8   : > { %16865 = vmatmul.mubr.bf16.vlgmr.msra.gmra.mrb[116].mxu0 %v7154_v26  ;;  %16870 = vmatprep.subr.bf16.mxu1 %v20802_v25  ;;  %v7807_v13 = vmul.f32 %v19426_v49, %v7806_v63  ;;  %v18312_v26 = vld [vmem:[%s22607_s2 + $0x700] sm:$0xff]   ;;  %v18325_v21 = vld [vmem:[%s22607_s2 + $0x8f8] sm:$0xff]   ;;  %v18356_v63 = vld [vmem:[%s22607_s2 + $0x7f0] sm:$0xff]  }
 0x7b9   : > { %16889 = vmatpush3.bf16.msra.mxu0 %v18264_v48  ;;  %16904 = vmatprep.mubr.msk.bf16.mxu0 %vm18625_vm10, %v20802_v25  ;;  %v8025_v50 = vld [vmem:[#allocation5 + $0xd] ss:$2 sm:$0xff]  ;;  %v18343_v11 = vld [vmem:[%s22607_s2 + $0x780] sm:$0xff]  }
 0x7ba   : > { %16890 = vmatprep.subr.bf16.mxu0 %v20802_v25  ;;  %v7808_v48 = vpack.c.bf16 %v7807_v13, %v7807_v13  ;;  %v18357_v13 = vld [vmem:[%s22607_s2 + $0x7b8] sm:$0xff]  }
 0x7bb   : > { %16871 = vmatpush3.bf16.msra.mxu1 %v18265_v27  ;;  %v7917_v27 = vpack.c.bf16 %v7916_v62, %v7916_v62  ;;  %v18359_v62 = vld [vmem:[%s22607_s2 + $0x800] sm:$0xff]  }
 0x7bc   : > { %16872 = vmatprep.subr.bf16.mxu1 %v20802_v25 }
 0x7bd   : > { %16891 = vmatpush3.bf16.msra.mxu0 %v18266_v29  ;;  %v18313_v29 = vld [vmem:[%s22607_s2 + $0x8c8] sm:$0xff]  }
 0x7be   : > { %16892 = vmatprep.subr.bf16.mxu0 %v20802_v25 }
 0x7bf   : > { %16873 = vmatpush3.bf16.msra.mxu1 %v18267_v37  ;;  %v18314_v37 = vld [vmem:[%s22607_s2 + $0x708] sm:$0xff]  }
 0x7c0   : > { %16874 = vmatprep.subr.bf16.mxu1 %v20802_v25 }
 0x7c1   : > { %16893 = vmatpush3.bf16.msra.mxu0 %v18268_v40  ;;  %v18315_v40 = vld [vmem:[%s22607_s2 + $0x8d0] sm:$0xff]  }
 0x7c2   : > { %16894 = vmatprep.subr.bf16.mxu0 %v20802_v25 }
 0x7c3   : > { %16875 = vmatpush3.bf16.msra.mxu1 %v18269_v41  ;;  %v18316_v41 = vld [vmem:[%s22607_s2 + $0x710] sm:$0xff]  }
 0x7c4   : > { %16876 = vmatprep.subr.bf16.mxu1 %v20802_v25 }
 0x7c5   : > { %16895 = vmatpush3.bf16.msra.mxu0 %v18270_v43  ;;  %v18317_v43 = vld [vmem:[%s22607_s2 + $0x8d8] sm:$0xff]  }
 0x7c6   : > { %16896 = vmatprep.subr.bf16.mxu0 %v20802_v25 }
 0x7c7   : > { %16877 = vmatpush3.bf16.msra.mxu1 %v18271_v24  ;;  %v18318_v24 = vld [vmem:[%s22607_s2 + $0x718] sm:$0xff]  }
 0x7c8   : > { %16878 = vmatprep.subr.bf16.mxu1 %v20802_v25 }
 0x7c9   : > { %16897 = vmatpush3.bf16.msra.mxu0 %v18272_v0  ;;  %v18319_v0 = vld [vmem:[%s22607_s2 + $0x8e0] sm:$0xff]  }
 0x7ca   : > { %16898 = vmatprep.subr.bf16.mxu0 %v20802_v25 }
 0x7cb   : > { %16879 = vmatpush3.bf16.msra.mxu1 %v18273_v53  ;;  %v18320_v53 = vld [vmem:[%s22607_s2 + $0x720] sm:$0xff]  }
 0x7cc   : > { %16880 = vmatprep.subr.bf16.mxu1 %v20802_v25 }
 0x7cd   : > { %16899 = vmatpush3.bf16.msra.mxu0 %v18274_v55  ;;  %v18321_v55 = vld [vmem:[%s22607_s2 + $0x8e8] sm:$0xff]  }
 0x7ce   : > { %16900 = vmatprep.subr.bf16.mxu0 %v20802_v25 }
 0x7cf   : > { %16881 = vmatpush3.bf16.msra.mxu1 %v18275_v51  ;;  %v18322_v51 = vld [vmem:[%s22607_s2 + $0x728] sm:$0xff]  }
 0x7d0   : > { %16882 = vmatprep.subr.bf16.mxu1 %v20802_v25 }
 0x7d1   : > { %16901 = vmatpush3.bf16.msra.mxu0 %v18276_v61  ;;  %v18323_v61 = vld [vmem:[%s22607_s2 + $0x8f0] sm:$0xff]  }
 0x7d2   : > { %16902 = vmatprep.subr.bf16.mxu0 %v20802_v25 }
 0x7d3   : > { %16883 = vmatpush3.bf16.msra.mxu1 %v18277_v52  ;;  %v18324_v52 = vld [vmem:[%s22607_s2 + $0x730] sm:$0xff]  }
 0x7d4   : > { %16908 = vmatprep.subr.bf16.mxu1 %v20802_v25 }
 0x7d5   : > { %16903 = vmatpush3.bf16.msra.mxu0 %v18278_v54  ;;  %v18326_v54 = vld [vmem:[%s22607_s2 + $0x738] sm:$0xff]  }
 0x7d6   : > { %16885 = vmatmul.mubr.bf16.vlgmr.msra.gmra.mrb[84].mxu1 %v7370_v46  ;;  %16928 = vmatprep.subr.bf16.mxu0 %v20802_v25  ;;  %v8026_v46 = vpack.c.bf16 %v8025_v50, %v8025_v50 }
 0x7d7   : > { %16909 = vmatpush3.bf16.msra.mxu1 %v18279_v31  ;;  %16924 = vmatprep.mubr.msk.bf16.mxu1 %vm18625_vm10, %v20802_v25  ;;  %v8165_v31 = vld [vmem:[#allocation5 + $0xc] ss:$2 sm:$0xff] }
 0x7d8   : > { %16905 = vmatmul.mubr.bf16.vlgmr.msra.gmra.mrb[120].mxu0 %v7480_v56  ;;  %16910 = vmatprep.subr.bf16.mxu1 %v20802_v25  ;;  %v8166_v56 = vpack.c.bf16 %v8165_v31, %v8165_v31 }
 0x7d9   : > { %16929 = vmatpush3.bf16.msra.mxu0 %v18280_v10  ;;  %16944 = vmatprep.mubr.msk.bf16.mxu0 %vm18625_vm10, %v20802_v25  ;;  %v18328_v10 = vld [vmem:[%s22607_s2 + $0x740] sm:$0xff]  }
 0x7da   : > { %16930 = vmatprep.subr.bf16.mxu0 %v20802_v25 }
 0x7db   : > { %16911 = vmatpush3.bf16.msra.mxu1 %v18281_v6  ;;  %v18329_v6 = vld [vmem:[%s22607_s2 + $0x6c8] sm:$0xff]  }
 0x7dc   : > { %16912 = vmatprep.subr.bf16.mxu1 %v20802_v25 }
 0x7dd   : > { %16931 = vmatpush3.bf16.msra.mxu0 %v18282_v14  ;;  %v18330_v14 = vld [vmem:[%s22607_s2 + $0x748] sm:$0xff]  }
 0x7de   : > { %16932 = vmatprep.subr.bf16.mxu0 %v20802_v25 }
 0x7df   : > { %16913 = vmatpush3.bf16.msra.mxu1 %v18283_v8  ;;  %v18331_v8 = vld [vmem:[%s22607_s2 + $0x6d0] sm:$0xff]  }
 0x7e0   : > { %16914 = vmatprep.subr.bf16.mxu1 %v20802_v25 }
 0x7e1   : > { %16933 = vmatpush3.bf16.msra.mxu0 %v18284_v3  ;;  %v18332_v3 = vld [vmem:[%s22607_s2 + $0x750] sm:$0xff]  }
 0x7e2   : > { %16934 = vmatprep.subr.bf16.mxu0 %v20802_v25 }
 0x7e3   : > { %16915 = vmatpush3.bf16.msra.mxu1 %v18285_v16  ;;  %v18333_v16 = vld [vmem:[%s22607_s2 + $0x6d8] sm:$0xff]  }
 0x7e4   : > { %16916 = vmatprep.subr.bf16.mxu1 %v20802_v25 }
 0x7e5   : > { %16935 = vmatpush3.bf16.msra.mxu0 %v18286_v60  ;;  %v18334_v60 = vld [vmem:[%s22607_s2 + $0x758] sm:$0xff]  }
 0x7e6   : > { %16936 = vmatprep.subr.bf16.mxu0 %v20802_v25 }
 0x7e7   : > { %16917 = vmatpush3.bf16.msra.mxu1 %v18287_v20  ;;  %v18335_v20 = vld [vmem:[%s22607_s2 + $0x6e0] sm:$0xff]  }
 0x7e8   : > { %16918 = vmatprep.subr.bf16.mxu1 %v20802_v25 }
 0x7e9   : > { %16937 = vmatpush3.bf16.msra.mxu0 %v18288_v18  ;;  %v18336_v18 = vld [vmem:[%s22607_s2 + $0x760] sm:$0xff]  }
 0x7ea   : > { %16938 = vmatprep.subr.bf16.mxu0 %v20802_v25 }
 0x7eb   : > { %16919 = vmatpush3.bf16.msra.mxu1 %v18289_v34  ;;  %v21371_v34 = vld [vmem:[#allocation2 + $0x8] sm:$0xff] }
 0x7ec   : > { %16920 = vmatprep.subr.bf16.mxu1 %v20802_v25 }
 0x7ed   : > { %16939 = vmatpush3.bf16.msra.mxu0 %v18290_v33  ;;  %v18337_v33 = vld [vmem:[%s22607_s2 + $0x6e8] sm:$0xff]  }
 0x7ee   : > { %16940 = vmatprep.subr.bf16.mxu0 %v20802_v25 }
 0x7ef   : > { %16921 = vmatpush3.bf16.msra.mxu1 %v18291_v2  ;;  %v18339_v2 = vld [vmem:[%s22607_s2 + $0x6f0] sm:$0xff]  }
 0x7f0   : > { %16922 = vmatprep.subr.bf16.mxu1 %v20802_v25 }
 0x7f1   : > { %16941 = vmatpush3.bf16.msra.mxu0 %v18292_v9  ;;  %v18340_v9 = vld [vmem:[%s22607_s2 + $0x770] sm:$0xff]  }
 0x7f2   : > { %16942 = vmatprep.subr.bf16.mxu0 %v20802_v25 }
 0x7f3   : > { %16923 = vmatpush3.bf16.msra.mxu1 %v18293_v12  ;;  %v8146_v12 = vld [vmem:[#allocation5 + $0xb] ss:$2 sm:$0xff] }
 0x7f4   : > { %16948 = vmatprep.subr.bf16.mxu1 %v20802_v25  ;;  %v8147_v32 = vmul.f32 %v19426_v49, %v8146_v12  ;;  %v18378_v12 = vld [vmem:[%s22607_s2 + $0x8c8] sm:$0xff]  }
 0x7f5   : > { %16943 = vmatpush3.bf16.msra.mxu0 %v18294_v22  ;;  %v18341_v22 = vld [vmem:[%s22607_s2 + $0x6f8] sm:$0xff]  }
 0x7f6   : > { %16925 = vmatmul.mubr.bf16.vlgmr.msra.gmra.mrb[88].mxu1 %v7589_v58  ;;  %16968 = vmatprep.subr.bf16.mxu0 %v20802_v25  ;;  %v8359_v58 = vld [vmem:[#allocation5 + $0xd] ss:$2 sm:$0xff] }
 0x7f7   : > { %16949 = vmatpush3.bf16.msra.mxu1 %v18295_v35  ;;  %16964 = vmatprep.mubr.msk.bf16.mxu1 %vm18625_vm10, %v20802_v25  ;;  %v18342_v35 = vld [vmem:[%s22607_s2 + $0x778] sm:$0xff]  }
 0x7f8   : > { %16945 = vmatmul.mubr.bf16.vlgmr.msra.gmra.mrb[124].mxu0 %v7698_v1  ;;  %16950 = vmatprep.subr.bf16.mxu1 %v20802_v25  ;;  %v18344_v1 = vld [vmem:[%s22607_s2 + $0x7c0] sm:$0xff]  }
 0x7f9   : > { %16969 = vmatpush3.bf16.msra.mxu0 %v18296_v59  ;;  %16984 = vmatprep.mubr.msk.bf16.mxu0 %vm18625_vm10, %v20802_v25  ;;  %v8148_v59 = vpack.c.bf16 %v8147_v32, %v8147_v32  ;;  %v18380_v32 = vld [vmem:[%s22607_s2 + $0x8d0] sm:$0xff]  }
 0x7fa   : > { %16970 = vmatprep.subr.bf16.mxu0 %v20802_v25 }
 0x7fb   : > { %16951 = vmatpush3.bf16.msra.mxu1 %v18297_v15  ;;  %v8360_v15 = vpack.c.bf16 %v8359_v58, %v8359_v58  ;;  %v18383_v58 = vld [vmem:[%s22607_s2 + $0x8a0] sm:$0xff]  }
 0x7fc   : > { %16952 = vmatprep.subr.bf16.mxu1 %v20802_v25 }
 0x7fd   : > { %16971 = vmatpush3.bf16.msra.mxu0 %v18298_v39  ;;  %v18345_v39 = vld [vmem:[%s22607_s2 + $0x788] sm:$0xff]  }
 0x7fe   : > { %16972 = vmatprep.subr.bf16.mxu0 %v20802_v25 }
 0x7ff   : > { %16953 = vmatpush3.bf16.msra.mxu1 %v18299_v57  ;;  %v18346_v57 = vld [vmem:[%s22607_s2 + $0x7c8] sm:$0xff]  }
 0x800   : > { %16954 = vmatprep.subr.bf16.mxu1 %v20802_v25 }
 0x801   : > { %16973 = vmatpush3.bf16.msra.mxu0 %v18300_v4  ;;  %v18347_v4 = vld [vmem:[%s22607_s2 + $0x790] sm:$0xff]  }
 0x802   : > { %16974 = vmatprep.subr.bf16.mxu0 %v20802_v25 }
 0x803   : > { %16955 = vmatpush3.bf16.msra.mxu1 %v18301_v45  ;;  %v18348_v45 = vld [vmem:[%s22607_s2 + $0x7d0] sm:$0xff]  }
 0x804   : > { %16956 = vmatprep.subr.bf16.mxu1 %v20802_v25 }
 0x805   : > { %16975 = vmatpush3.bf16.msra.mxu0 %v18302_v38  ;;  %v18349_v38 = vld [vmem:[%s22607_s2 + $0x798] sm:$0xff]  }
 0x806   : > { %16976 = vmatprep.subr.bf16.mxu0 %v20802_v25 }
 0x807   : > { %16957 = vmatpush3.bf16.msra.mxu1 %v18303_v36  ;;  %v18350_v36 = vld [vmem:[%s22607_s2 + $0x7d8] sm:$0xff]  }
 0x808   : > { %16958 = vmatprep.subr.bf16.mxu1 %v20802_v25 }
 0x809   : > { %16977 = vmatpush3.bf16.msra.mxu0 %v18304_v42  ;;  %v18351_v42 = vld [vmem:[%s22607_s2 + $0x7a0] sm:$0xff]  }
 0x80a   : > { %16978 = vmatprep.subr.bf16.mxu0 %v20802_v25 }
 0x80b   : > { %16959 = vmatpush3.bf16.msra.mxu1 %v18305_v47  ;;  %v18352_v47 = vld [vmem:[%s22607_s2 + $0x7e0] sm:$0xff]  }
 0x80c   : > { %16960 = vmatprep.subr.bf16.mxu1 %v20802_v25 }
 0x80d   : > { %16979 = vmatpush3.bf16.msra.mxu0 %v18306_v17  ;;  %v18353_v17 = vld [vmem:[%s22607_s2 + $0x7a8] sm:$0xff]  }
 0x80e   : > { %16980 = vmatprep.subr.bf16.mxu0 %v20802_v25 }
 0x80f   : > { %16961 = vmatpush3.bf16.msra.mxu1 %v18307_v44  ;;  %v18354_v44 = vld [vmem:[%s22607_s2 + $0x7e8] sm:$0xff]  }
 0x810   : > { %16962 = vmatprep.subr.bf16.mxu1 %v20802_v25 }
 0x811   : > { %16981 = vmatpush3.bf16.msra.mxu0 %v18308_v7  ;;  %v18355_v7 = vld [vmem:[%s22607_s2 + $0x7b0] sm:$0xff]  }
 0x812   : > { %16982 = vmatprep.subr.bf16.mxu0 %v20802_v25 }
 0x813   : > { %16963 = vmatpush3.bf16.msra.mxu1 %v18309_v5  ;;  %v8467_v5 = vld [vmem:[#allocation5 + $0xf] ss:$2 sm:$0xff] }
 0x814   : > { %16988 = vmatprep.subr.bf16.mxu1 %v20802_v25 }
 0x815   : > { %16983 = vmatpush3.bf16.msra.mxu0 %v18310_v19  ;;  %v8468_v19 = vmul.f32 %v19426_v49, %v8467_v5  ;;  %v18389_v5 = vld [vmem:[%s22607_s2 + $0x8b8] sm:$0xff]  }
 0x816   : > { %16965 = vmatmul.mubr.bf16.vlgmr.msra.gmra.mrb[92].mxu1 %v7808_v48  ;;  %17008 = vmatprep.subr.bf16.mxu0 %v20802_v25  ;;  %v8576_v48 = vld [vmem:[#allocation5 + $0x10] ss:$2 sm:$0xff] }
 0x817   : > { %16989 = vmatpush3.bf16.msra.mxu1 %v18311_v23  ;;  %17004 = vmatprep.mubr.msk.bf16.mxu1 %vm18625_vm10, %v20802_v25  ;;  %v18358_v23 = vld [vmem:[%s22607_s2 + $0x7f8] sm:$0xff]  }
 0x818   : > { %16985 = vmatmul.mubr.bf16.vlgmr.msra.gmra.mrb[128].mxu0 %v7917_v27  ;;  %16990 = vmatprep.subr.bf16.mxu1 %v20802_v25  ;;  %v18360_v27 = vld [vmem:[%s22607_s2 + $0x840] sm:$0xff]  }
 0x819   : > { %17009 = vmatpush3.bf16.msra.mxu0 %v18312_v26  ;;  %17024 = vmatprep.mubr.msk.bf16.mxu0 %vm18625_vm10, %v20802_v25  ;;  %v8469_v26 = vpack.c.bf16 %v8468_v19, %v8468_v19  ;;  %v8901_v19 = vld [vmem:[#allocation5 + $0x14] ss:$2 sm:$0xff] }
 0x81a   : > { %17010 = vmatprep.subr.bf16.mxu0 %v20802_v25 }
 0x81b   : > { %16991 = vmatpush3.bf16.msra.mxu1 %v18313_v29  ;;  %v8577_v29 = vpack.c.bf16 %v8576_v48, %v8576_v48 }
 0x81c   : > { %16992 = vmatprep.subr.bf16.mxu1 %v20802_v25 }
 0x81d   : > { %17011 = vmatpush3.bf16.msra.mxu0 %v18314_v37  ;;  %v18361_v37 = vld [vmem:[%s22607_s2 + $0x808] sm:$0xff]  }
 0x81e   : > { %17012 = vmatprep.subr.bf16.mxu0 %v20802_v25 }
 0x81f   : > { %16993 = vmatpush3.bf16.msra.mxu1 %v18315_v40  ;;  %v18362_v40 = vld [vmem:[%s22607_s2 + $0x848] sm:$0xff]  }
 0x820   : > { %16994 = vmatprep.subr.bf16.mxu1 %v20802_v25 }
 0x821   : > { %17013 = vmatpush3.bf16.msra.mxu0 %v18316_v41  ;;  %v18363_v41 = vld [vmem:[%s22607_s2 + $0x810] sm:$0xff]  }
 0x822   : > { %17014 = vmatprep.subr.bf16.mxu0 %v20802_v25 }
 0x823   : > { %16995 = vmatpush3.bf16.msra.mxu1 %v18317_v43  ;;  %v18364_v43 = vld [vmem:[%s22607_s2 + $0x850] sm:$0xff]  }
 0x824   : > { %16996 = vmatprep.subr.bf16.mxu1 %v20802_v25 }
 0x825   : > { %17015 = vmatpush3.bf16.msra.mxu0 %v18318_v24  ;;  %v18365_v24 = vld [vmem:[%s22607_s2 + $0x818] sm:$0xff]  }
 0x826   : > { %17016 = vmatprep.subr.bf16.mxu0 %v20802_v25 }
 0x827   : > { %16997 = vmatpush3.bf16.msra.mxu1 %v18319_v0  ;;  %v18366_v0 = vld [vmem:[%s22607_s2 + $0x858] sm:$0xff]  }
 0x828   : > { %16998 = vmatprep.subr.bf16.mxu1 %v20802_v25 }
 0x829   : > { %17017 = vmatpush3.bf16.msra.mxu0 %v18320_v53  ;;  %v18367_v53 = vld [vmem:[%s22607_s2 + $0x820] sm:$0xff]  }
 0x82a   : > { %17018 = vmatprep.subr.bf16.mxu0 %v20802_v25 }
 0x82b   : > { %16999 = vmatpush3.bf16.msra.mxu1 %v18321_v55  ;;  %v18368_v55 = vld [vmem:[%s22607_s2 + $0x860] sm:$0xff]  }
 0x82c   : > { %17000 = vmatprep.subr.bf16.mxu1 %v20802_v25 }
 0x82d   : > { %17019 = vmatpush3.bf16.msra.mxu0 %v18322_v51  ;;  %v18369_v51 = vld [vmem:[%s22607_s2 + $0x828] sm:$0xff]  }
 0x82e   : > { %17020 = vmatprep.subr.bf16.mxu0 %v20802_v25 }
 0x82f   : > { %17001 = vmatpush3.bf16.msra.mxu1 %v18323_v61 }
 0x830   : > { %17002 = vmatprep.subr.bf16.mxu1 %v20802_v25 }
 0x831   : > { %17021 = vmatpush3.bf16.msra.mxu0 %v18324_v52  ;;  %v18370_v52 = vld [vmem:[%s22607_s2 + $0x868] sm:$0xff]  }
 0x832   : > { %17022 = vmatprep.subr.bf16.mxu0 %v20802_v25 }
 0x833   : > { %17003 = vmatpush3.bf16.msra.mxu1 %v18325_v21 }
 0x834   : > { %17028 = vmatprep.subr.bf16.mxu1 %v20802_v25 }
 0x835   : > { %17023 = vmatpush3.bf16.msra.mxu0 %v18326_v54 }
 0x836   : > { %17005 = vmatmul.mubr.bf16.vlgmr.msra.gmra.mrb[96].mxu1 %v8026_v46  ;;  %17048 = vmatprep.subr.bf16.mxu0 %v20802_v25 }
 0x837   : > { %17029 = vmatpush3.bf16.msra.mxu1 %v18327_v30  ;;  %17044 = vmatprep.mubr.msk.bf16.mxu1 %vm18625_vm10, %v20802_v25  ;;  %v18371_v30 = vld [vmem:[%s22607_s2 + $0x830] sm:$0xff]  }
 0x838   : > { %17025 = vmatmul.mubr.bf16.vlgmr.msra.gmra.mrb[132].mxu0 %v8166_v56  ;;  %17030 = vmatprep.subr.bf16.mxu1 %v20802_v25 }
 0x839   : > { %17049 = vmatpush3.bf16.msra.mxu0 %v18328_v10  ;;  %17064 = vmatprep.mubr.msk.bf16.mxu0 %vm18625_vm10, %v20802_v25 }
 0x83a   : > { %17050 = vmatprep.subr.bf16.mxu0 %v20802_v25 }
 0x83b   : > { %17031 = vmatpush3.bf16.msra.mxu1 %v18329_v6  ;;  %v18372_v6 = vld [vmem:[%s22607_s2 + $0x870] sm:$0xff]  }
 0x83c   : > { %17032 = vmatprep.subr.bf16.mxu1 %v20802_v25 }
 0x83d   : > { %17051 = vmatpush3.bf16.msra.mxu0 %v18330_v14 }
 0x83e   : > { %17052 = vmatprep.subr.bf16.mxu0 %v20802_v25 }
 0x83f   : > { %17033 = vmatpush3.bf16.msra.mxu1 %v18331_v8  ;;  %v18373_v8 = vld [vmem:[%s22607_s2 + $0x838] sm:$0xff]  }
 0x840   : > { %17034 = vmatprep.subr.bf16.mxu1 %v20802_v25 }
 0x841   : > { %17053 = vmatpush3.bf16.msra.mxu0 %v18332_v3  ;;  %v8792_v3 = vld [vmem:[#allocation5 + $0x13] ss:$2 sm:$0xff] }
 0x842   : > { %17054 = vmatprep.subr.bf16.mxu0 %v20802_v25 }
 0x843   : > { %17035 = vmatpush3.bf16.msra.mxu1 %v18333_v16  ;;  %v18374_v16 = vld [vmem:[%s22607_s2 + $0x878] sm:$0xff]  }
 0x844   : > { %17036 = vmatprep.subr.bf16.mxu1 %v20802_v25  ;;  %v18338_v25 = vld [vmem:[%s22607_s2 + $0x768] sm:$0xff]  }
 0x845   : > { %17055 = vmatpush3.bf16.msra.mxu0 %v18334_v60  ;;  %v8684_v60 = vld [vmem:[#allocation5 + $0x11] ss:$2 sm:$0xff] }
 0x846   : > { %17056 = vmatprep.subr.bf16.mxu0 %v21371_v34 }
 0x847   : > { %17037 = vmatpush3.bf16.msra.mxu1 %v18335_v20  ;;  %v8793_v20 = vmul.f32 %v19426_v49, %v8792_v3  ;;  %v18396_v3 = vld [vmem:[%s22607_s2 + $0x910] sm:$0xff]  }
 0x848   : > { %17038 = vmatprep.subr.bf16.mxu1 %v21371_v34 }
 0x849   : > { %17057 = vmatpush3.bf16.msra.mxu0 %v18336_v18  ;;  %v18375_v18 = vld [vmem:[%s22607_s2 + $0x880] sm:$0xff]  }
 0x84a   : > { %17058 = vmatprep.subr.bf16.mxu0 %v21371_v34 }
 0x84b   : > { %17039 = vmatpush3.bf16.msra.mxu1 %v18337_v33  ;;  %v8685_v33 = vpack.c.bf16 %v8684_v60, %v8684_v60 }
 0x84c   : > { %17040 = vmatprep.subr.bf16.mxu1 %v21371_v34 }
 0x84d   : > { %17059 = vmatpush3.bf16.msra.mxu0 %v18338_v25  ;;  %v18376_v25 = vld [vmem:[%s22607_s2 + $0x8c0] sm:$0xff]  }
 0x84e   : > { %17060 = vmatprep.subr.bf16.mxu0 %v21371_v34 }
 0x84f   : > { %17041 = vmatpush3.bf16.msra.mxu1 %v18339_v2  ;;  %v8794_v2 = vpack.c.bf16 %v8793_v20, %v8793_v20 }
 0x850   : > { %17042 = vmatprep.subr.bf16.mxu1 %v21371_v34 }
 0x851   : > { %17061 = vmatpush3.bf16.msra.mxu0 %v18340_v9  ;;  %v18377_v9 = vld [vmem:[%s22607_s2 + $0x888] sm:$0xff]  }
 0x852   : > { %17062 = vmatprep.subr.bf16.mxu0 %v21371_v34 }
 0x853   : > { %17043 = vmatpush3.bf16.msra.mxu1 %v18341_v22  ;;  %v18379_v22 = vld [vmem:[%s22607_s2 + $0x890] sm:$0xff]  }
 0x854   : > { %17068 = vmatprep.subr.bf16.mxu1 %v21371_v34 }
 0x855   : > { %17063 = vmatpush3.bf16.msra.mxu0 %v18342_v35  ;;  %v18381_v35 = vld [vmem:[%s22607_s2 + $0x898] sm:$0xff]  }
 0x856   : > { %17045 = vmatmul.mubr.bf16.vlgmr.msra.gmra.mrb[100].mxu1 %v8148_v59  ;;  %17088 = vmatprep.subr.bf16.mxu0 %v21371_v34  ;;  %v18384_v59 = vld [vmem:[%s22607_s2 + $0x8e0] sm:$0xff]  }
 0x857   : > { %17069 = vmatpush3.bf16.msra.mxu1 %v18343_v11  ;;  %17084 = vmatprep.mubr.msk.bf16.mxu1 %vm18625_vm10, %v21371_v34  ;;  %v18382_v11 = vld [vmem:[%s22607_s2 + $0x8d8] sm:$0xff]  }
 0x858   : > { %17065 = vmatmul.mubr.bf16.vlgmr.msra.gmra.mrb[136].mxu0 %v8360_v15  ;;  %17070 = vmatprep.subr.bf16.mxu1 %v21371_v34 }
 0x859   : > { %17089 = vmatpush3.bf16.msra.mxu0 %v18344_v1  ;;  %17104 = vmatprep.mubr.msk.bf16.mxu0 %vm18625_vm10, %v21371_v34  ;;  %v18385_v1 = vld [vmem:[%s22607_s2 + $0x8a8] sm:$0xff]  }
 0x85a   : > { %17090 = vmatprep.subr.bf16.mxu0 %v21371_v34 }
 0x85b   : > { %17071 = vmatpush3.bf16.msra.mxu1 %v18345_v39  ;;  %v18386_v39 = vld [vmem:[%s22607_s2 + $0x8e8] sm:$0xff]  }
 0x85c   : > { %17072 = vmatprep.subr.bf16.mxu1 %v21371_v34 }
 0x85d   : > { %17091 = vmatpush3.bf16.msra.mxu0 %v18346_v57 }
 0x85e   : > { %17092 = vmatprep.subr.bf16.mxu0 %v21371_v34 }
 0x85f   : > { %17073 = vmatpush3.bf16.msra.mxu1 %v18347_v4 }
 0x860   : > { %17074 = vmatprep.subr.bf16.mxu1 %v21371_v34 }
 0x861   : > { %17093 = vmatpush3.bf16.msra.mxu0 %v18348_v45 }
 0x862   : > { %17094 = vmatprep.subr.bf16.mxu0 %v21371_v34 }
 0x863   : > { %17075 = vmatpush3.bf16.msra.mxu1 %v18349_v38 }
 0x864   : > { %17076 = vmatprep.subr.bf16.mxu1 %v21371_v34 }
 0x865   : > { %17095 = vmatpush3.bf16.msra.mxu0 %v18350_v36  ;;  %v18387_v36 = vld [vmem:[%s22607_s2 + $0x8b0] sm:$0xff]  }
 0x866   : > { %17096 = vmatprep.subr.bf16.mxu0 %v21371_v34 }
 0x867   : > { %17077 = vmatpush3.bf16.msra.mxu1 %v18351_v42 }
 0x868   : > { %17078 = vmatprep.subr.bf16.mxu1 %v21371_v34 }
 0x869   : > { %17097 = vmatpush3.bf16.msra.mxu0 %v18352_v47 }
 0x86a   : > { %17098 = vmatprep.subr.bf16.mxu0 %v21371_v34 }
 0x86b   : > { %17079 = vmatpush3.bf16.msra.mxu1 %v18353_v17 }
 0x86c   : > { %17080 = vmatprep.subr.bf16.mxu1 %v21371_v34 }
 0x86d   : > { %17099 = vmatpush3.bf16.msra.mxu0 %v18354_v44 }
 0x86e   : > { %17100 = vmatprep.subr.bf16.mxu0 %v21371_v34 }
 0x86f   : > { %17081 = vmatpush3.bf16.msra.mxu1 %v18355_v7  ;;  %v18388_v7 = vld [vmem:[%s22607_s2 + $0x8f0] sm:$0xff]  }
 0x870   : > { %17082 = vmatprep.subr.bf16.mxu1 %v21371_v34 }
 0x871   : > { %17101 = vmatpush3.bf16.msra.mxu0 %v18356_v63 }
 0x872   : > { %17102 = vmatprep.subr.bf16.mxu0 %v21371_v34 }
 0x873   : > { %17083 = vmatpush3.bf16.msra.mxu1 %v18357_v13  ;;  %v18390_v13 = vld [vmem:[%s22607_s2 + $0x8f8] sm:$0xff]  }
 0x874   : > { %17108 = vmatprep.subr.bf16.mxu1 %v21371_v34 }
 0x875   : > { %17103 = vmatpush3.bf16.msra.mxu0 %v18358_v23  ;;  %v9009_v23 = vld [vmem:[#allocation5 + $0x15] ss:$2 sm:$0xff] }
 0x876   : > { %17085 = vmatmul.mubr.bf16.vlgmr.msra.gmra.mrb[104].mxu1 %v8469_v26  ;;  %17128 = vmatprep.subr.bf16.mxu0 %v21371_v34  ;;  %v9010_v48 = vpack.c.bf16 %v9009_v23, %v9009_v23 }
 0x877   : > { %17109 = vmatpush3.bf16.msra.mxu1 %v18359_v62  ;;  %17124 = vmatprep.mubr.msk.bf16.mxu1 %vm18625_vm10, %v21371_v34  ;;  %v8902_v62 = vpack.c.bf16 %v8901_v19, %v8901_v19 }
 0x878   : > { %17105 = vmatmul.mubr.bf16.vlgmr.msra.gmra.mrb[140].mxu0 %v8577_v29  ;;  %17110 = vmatprep.subr.bf16.mxu1 %v21371_v34 }
 0x879   : > { %17129 = vmatpush3.bf16.msra.mxu0 %v18360_v27  ;;  %17144 = vmatprep.mubr.msk.bf16.mxu0 %vm18625_vm10, %v21371_v34 }
 0x87a   : > { %17130 = vmatprep.subr.bf16.mxu0 %v21371_v34 }
 0x87b   : > { %17111 = vmatpush3.bf16.msra.mxu1 %v18361_v37 }
 0x87c   : > { %17112 = vmatprep.subr.bf16.mxu1 %v21371_v34 }
 0x87d   : > { %17131 = vmatpush3.bf16.msra.mxu0 %v18362_v40 }
 0x87e   : > { %17132 = vmatprep.subr.bf16.mxu0 %v21371_v34 }
 0x87f   : > { %17113 = vmatpush3.bf16.msra.mxu1 %v18363_v41 }
 0x880   : > { %17114 = vmatprep.subr.bf16.mxu1 %v21371_v34 }
 0x881   : > { %17133 = vmatpush3.bf16.msra.mxu0 %v18364_v43 }
 0x882   : > { %17134 = vmatprep.subr.bf16.mxu0 %v21371_v34 }
 0x883   : > { %17115 = vmatpush3.bf16.msra.mxu1 %v18365_v24 }
 0x884   : > { %17116 = vmatprep.subr.bf16.mxu1 %v21371_v34 }
 0x885   : > { %17135 = vmatpush3.bf16.msra.mxu0 %v18366_v0 }
 0x886   : > { %17136 = vmatprep.subr.bf16.mxu0 %v21371_v34 }
 0x887   : > { %17117 = vmatpush3.bf16.msra.mxu1 %v18367_v53 }
 0x888   : > { %17118 = vmatprep.subr.bf16.mxu1 %v21371_v34 }
 0x889   : > { %17137 = vmatpush3.bf16.msra.mxu0 %v18368_v55  ;;  %v7274_v61 = vpop.f32.mrb[80].mxu1 }
 0x88a   : > { %v16846_v21 = vpop.f32.mrb[81].mxu1  ;;  %17138 = vmatprep.subr.bf16.mxu0 %v21371_v34 }
 0x88b   : > { %17119 = vmatpush3.bf16.msra.mxu1 %v18369_v51  ;;  %v7277_v54 = vpop.f32.mrb[82].mxu1  ;;  %v7362_v50 = vpop.f32.mrb[116].mxu0 }
 0x88c   : > { %v7363_v31 = vadd.f32 %v7362_v50, %v7274_v61  ;;  %v16847_v46 = vpop.f32.mrb[83].mxu1  ;;  %v16866_v10 = vpop.f32.mrb[117].mxu0  ;;  %17120 = vmatprep.subr.bf16.mxu1 %v21371_v34 }
 0x88d   : > { %17139 = vmatpush3.bf16.msra.mxu0 %v18370_v52  ;;  %v7365_v56 = vpop.f32.mrb[118].mxu0  ;;  %v18391_v10 = vld [vmem:[%s22607_s2 + $0x940] sm:$0xff]  }
 0x88e   : > { %v16867_v14 = vpop.f32.mrb[119].mxu0  ;;  %17140 = vmatprep.subr.bf16.mxu0 %v21371_v34  ;;  %v18392_v56 = vld [vmem:[%s22607_s2 + $0x900] sm:$0xff]  }
 0x88f   : > { %17121 = vmatpush3.bf16.msra.mxu1 %v18371_v30  ;;  %v18394_v14 = vld [vmem:[%s22607_s2 + $0x908] sm:$0xff]  }
 0x890   : > { %17122 = vmatprep.subr.bf16.mxu1 %v21371_v34 }
 0x891   : > { %17141 = vmatpush3.bf16.msra.mxu0 %v18372_v6  ;;  %v18393_v6 = vld [vmem:[%s22607_s2 + $0x948] sm:$0xff]  }
 0x892   : > { %17142 = vmatprep.subr.bf16.mxu0 %v21371_v34 }
 0x893   : > { %17123 = vmatpush3.bf16.msra.mxu1 %v18373_v8  ;;  %v18395_v8 = vld [vmem:[%s22607_s2 + $0x950] sm:$0xff]  }
 0x894   : > { %17148 = vmatprep.subr.bf16.mxu1 %v21371_v34 }
 0x895   : > { %17143 = vmatpush3.bf16.msra.mxu0 %v18374_v16  ;;  %v21638_v16 = vld [vmem:[%s22608_s3 + $0x4] ss:$0 sm:$0xff] }
 0x896   : > { %17125 = vmatmul.mubr.bf16.vlgmr.msra.gmra.mrb[108].mxu1 %v8685_v33  ;;  %17168 = vmatprep.subr.bf16.mxu0 %v21371_v34  ;;  %v18397_v33 = vld [vmem:[%s22607_s2 + $0x958] sm:$0xff]  }
 0x897   : > { %17149 = vmatpush3.bf16.msra.mxu1 %v18375_v18  ;;  %17164 = vmatprep.mubr.msk.bf16.mxu1 %vm18625_vm10, %v21371_v34 }
 0x898   : > { %17145 = vmatmul.mubr.bf16.vlgmr.msra.gmra.mrb[144].mxu0 %v8794_v2  ;;  %17150 = vmatprep.subr.bf16.mxu1 %v21371_v34  ;;  %v21649_v2 = vld [vmem:[%s22609_s4 + $0x4] ss:$0 sm:$0xff] }
 0x899   : > { %17169 = vmatpush3.bf16.msra.mxu0 %v18376_v25  ;;  %17184 = vmatprep.mubr.msk.bf16.mxu0 %vm18625_vm10, %v21371_v34  ;;  %v18398_v25 = vld [vmem:[%s22607_s2 + $0x918] sm:$0xff]  }
 0x89a   : > { %17170 = vmatprep.subr.bf16.mxu0 %v21371_v34 }
 0x89b   : > { %17151 = vmatpush3.bf16.msra.mxu1 %v18377_v9 }
 0x89c   : > { %17152 = vmatprep.subr.bf16.mxu1 %v21371_v34 }
 0x89d   : > { %17171 = vmatpush3.bf16.msra.mxu0 %v18378_v12 }
 0x89e   : > { %17172 = vmatprep.subr.bf16.mxu0 %v21371_v34 }
 0x89f   : > { %17153 = vmatpush3.bf16.msra.mxu1 %v18379_v22 }
 0x8a0   : > { %17154 = vmatprep.subr.bf16.mxu1 %v21371_v34 }
 0x8a1   : > { %17173 = vmatpush3.bf16.msra.mxu0 %v18380_v32 }
 0x8a2   : > { %17174 = vmatprep.subr.bf16.mxu0 %v21371_v34 }
 0x8a3   : > { %17155 = vmatpush3.bf16.msra.mxu1 %v18381_v35 }
 0x8a4   : > { %17156 = vmatprep.subr.bf16.mxu1 %v21371_v34 }
 0x8a5   : > { %17175 = vmatpush3.bf16.msra.mxu0 %v18382_v11 }
 0x8a6   : > { %17176 = vmatprep.subr.bf16.mxu0 %v21371_v34 }
 0x8a7   : > { %17157 = vmatpush3.bf16.msra.mxu1 %v18383_v58 }
 0x8a8   : > { %17158 = vmatprep.subr.bf16.mxu1 %v21371_v34 }
 0x8a9   : > { %v7470_v15 = vpop.f32.mrb[84].mxu1  ;;  %17177 = vmatpush3.bf16.msra.mxu0 %v18384_v59 }
 0x8aa   : > { %v7476_v57 = vadd.f32 %v7470_v15, %v7363_v31  ;;  %v16886_v4 = vpop.f32.mrb[85].mxu1  ;;  %17178 = vmatprep.subr.bf16.mxu0 %v21371_v34  ;;  %v18399_v15 = vld [vmem:[%s22607_s2 + $0x960] sm:$0xff]  }
 0x8ab   : > { %v7473_v45 = vpop.f32.mrb[86].mxu1  ;;  %v7580_v38 = vpop.f32.mrb[120].mxu0  ;;  %17159 = vmatpush3.bf16.msra.mxu1 %v18385_v1  ;;  %v18402_v4 = vld [vmem:[%s22607_s2 + $0x928] sm:$0xff]  }
 0x8ac   : > { %v7586_v42 = vadd.f32 %v7580_v38, %v7476_v57  ;;  %v16887_v47 = vpop.f32.mrb[87].mxu1  ;;  %v16906_v17 = vpop.f32.mrb[121].mxu0  ;;  %17160 = vmatprep.subr.bf16.mxu1 %v21371_v34  ;;  %v18401_v57 = vld [vmem:[%s22607_s2 + $0x968] sm:$0xff]   ;;  %v18403_v45 = vld [vmem:[%s22607_s2 + $0x970] sm:$0xff]  }
 0x8ad   : > { %v7583_v44 = vpop.f32.mrb[122].mxu0  ;;  %17179 = vmatpush3.bf16.msra.mxu0 %v18386_v39  ;;  %v18400_v39 = vld [vmem:[%s22607_s2 + $0x920] sm:$0xff]   ;;  %v18404_v38 = vld [vmem:[%s22607_s2 + $0x930] sm:$0xff]  }
 0x8ae   : > { %v16907_v63 = vpop.f32.mrb[123].mxu0  ;;  %17180 = vmatprep.subr.bf16.mxu0 %v21371_v34 }
 0x8af   : > { %17161 = vmatpush3.bf16.msra.mxu1 %v18387_v36  ;;  %v18405_v36 = vld [vmem:[%s22607_s2 + $0x978] sm:$0xff]  }
 0x8b0   : > { %17162 = vmatprep.subr.bf16.mxu1 %v21371_v34 }
 0x8b1   : > { %17181 = vmatpush3.bf16.msra.mxu0 %v18388_v7 }
 0x8b2   : > { %17182 = vmatprep.subr.bf16.mxu0 %v21371_v34 }
 0x8b3   : > { %17163 = vmatpush3.bf16.msra.mxu1 %v18389_v5 }
 0x8b4   : > { %17188 = vmatprep.subr.bf16.mxu1 %v21371_v34 }
 0x8b5   : > { %17183 = vmatpush3.bf16.msra.mxu0 %v18390_v13 }
 0x8b6   : > { %17165 = vmatmul.mubr.bf16.vlgmr.msra.gmra.mrb[112].mxu1 %v8902_v62  ;;  %17208 = vmatprep.subr.bf16.mxu0 %v21371_v34 }
 0x8b7   : > { %17204 = vmatprep.mubr.msk.bf16.mxu1 %vm18625_vm10, %v21371_v34  ;;  %17189 = vmatpush3.bf16.msra.mxu1 %v18391_v10 }
 0x8b8   : > { %17185 = vmatmul.mubr.bf16.vlgmr.msra.gmra.mrb[148].mxu0 %v9010_v48  ;;  %17190 = vmatprep.subr.bf16.mxu1 %v21371_v34 }
 0x8b9   : > { %17224 = vmatprep.mubr.msk.bf16.mxu0 %vm18625_vm10, %v21371_v34  ;;  %17209 = vmatpush3.bf16.msra.mxu0 %v18392_v56 }
 0x8ba   : > { %17210 = vmatprep.subr.bf16.mxu0 %v21371_v34 }
 0x8bb   : > { %17191 = vmatpush3.bf16.msra.mxu1 %v18393_v6 }
 0x8bc   : > { %17192 = vmatprep.subr.bf16.mxu1 %v21371_v34 }
 0x8bd   : > { %17211 = vmatpush3.bf16.msra.mxu0 %v18394_v14 }
 0x8be   : > { %17212 = vmatprep.subr.bf16.mxu0 %v21371_v34 }
 0x8bf   : > { %17193 = vmatpush3.bf16.msra.mxu1 %v18395_v8 }
 0x8c0   : > { %17194 = vmatprep.subr.bf16.mxu1 %v21371_v34 }
 0x8c1   : > { %17213 = vmatpush3.bf16.msra.mxu0 %v18396_v3 }
 0x8c2   : > { %17214 = vmatprep.subr.bf16.mxu0 %v21371_v34 }
 0x8c3   : > { %17195 = vmatpush3.bf16.msra.mxu1 %v18397_v33 }
 0x8c4   : > { %17196 = vmatprep.subr.bf16.mxu1 %v21371_v34 }
 0x8c5   : > { %17215 = vmatpush3.bf16.msra.mxu0 %v18398_v25 }
 0x8c6   : > { %17216 = vmatprep.subr.bf16.mxu0 %v21371_v34 }
 0x8c7   : > { %17197 = vmatpush3.bf16.msra.mxu1 %v18399_v15  ;;  %v18412_v15 = vld [vmem:[%s22607_s2 + $0x9d0] sm:$0xff]  }
 0x8c8   : > { %17198 = vmatprep.subr.bf16.mxu1 %v21371_v34 }
 0x8c9   : > { %v7689_v26 = vpop.f32.mrb[88].mxu1  ;;  %17217 = vmatpush3.bf16.msra.mxu0 %v18400_v39  ;;  %v18413_v39 = vld [vmem:[%s22607_s2 + $0x998] sm:$0xff]  }
 0x8ca   : > { %v7695_v27 = vadd.f32 %v7689_v26, %v7586_v42  ;;  %v16926_v29 = vpop.f32.mrb[89].mxu1  ;;  %17218 = vmatprep.subr.bf16.mxu0 %v21371_v34  ;;  %v18406_v42 = vld [vmem:[%s22607_s2 + $0x938] sm:$0xff]  }
 0x8cb   : > { %v7692_v37 = vpop.f32.mrb[90].mxu1  ;;  %v7798_v40 = vpop.f32.mrb[124].mxu0  ;;  %17199 = vmatpush3.bf16.msra.mxu1 %v18401_v57  ;;  %v18414_v57 = vld [vmem:[%s22607_s2 + $0x9d8] sm:$0xff]  }
 0x8cc   : > { %v7804_v41 = vadd.f32 %v7798_v40, %v7695_v27  ;;  %v16927_v43 = vpop.f32.mrb[91].mxu1  ;;  %v16946_v24 = vpop.f32.mrb[125].mxu0  ;;  %17200 = vmatprep.subr.bf16.mxu1 %v21371_v34 }
 0x8cd   : > { %v7801_v0 = vpop.f32.mrb[126].mxu0  ;;  %17219 = vmatpush3.bf16.msra.mxu0 %v18402_v4  ;;  %v18415_v4 = vld [vmem:[%s22607_s2 + $0x9a0] sm:$0xff]  }
 0x8ce   : > { %v16947_v53 = vpop.f32.mrb[127].mxu0  ;;  %17220 = vmatprep.subr.bf16.mxu0 %v21371_v34 }
 0x8cf   : > { %17201 = vmatpush3.bf16.msra.mxu1 %v18403_v45  ;;  %v18416_v45 = vld [vmem:[%s22607_s2 + $0x9e0] sm:$0xff]  }
 0x8d0   : > { %17202 = vmatprep.subr.bf16.mxu1 %v21371_v34 }
 0x8d1   : > { %17221 = vmatpush3.bf16.msra.mxu0 %v18404_v38  ;;  %v18417_v38 = vld [vmem:[%s22607_s2 + $0x9a8] sm:$0xff]  }
 0x8d2   : > { %17222 = vmatprep.subr.bf16.mxu0 %v21371_v34 }
 0x8d3   : > { %17203 = vmatpush3.bf16.msra.mxu1 %v18405_v36  ;;  %v18418_v36 = vld [vmem:[%s22607_s2 + $0x9e8] sm:$0xff]  }
 0x8d4   : > { %17228 = vmatprep.subr.bf16.mxu1 %v21371_v34 }
 0x8d5   : > { %17223 = vmatpush3.bf16.msra.mxu0 %v18406_v42  ;;  %v18419_v42 = vld [vmem:[%s22607_s2 + $0x9b0] sm:$0xff]  }
 0x8d6   : > { %17248 = vmatprep.subr.bf16.mxu0 %v21371_v34 }
 0x8e9   : > { %v7908_v55 = vpop.f32.mrb[92].mxu1 }
 0x8ea   : > { %v7914_v51 = vadd.f32 %v7908_v55, %v7804_v41  ;;  %v16966_v61 = vpop.f32.mrb[93].mxu1 }
 0x8eb   : > { %v7911_v52 = vpop.f32.mrb[94].mxu1  ;;  %v8017_v21 = vpop.f32.mrb[128].mxu0 }
 0x8ec   : > { %v8023_v54 = vadd.f32 %v8017_v21, %v7914_v51  ;;  %v16967_v50 = vpop.f32.mrb[95].mxu1  ;;  %v16986_v30 = vpop.f32.mrb[129].mxu0 }
 0x8ed   : > { %v8020_v31 = vpop.f32.mrb[130].mxu0 }
 0x8ee   : > { %v16987_v46 = vpop.f32.mrb[131].mxu0 }
 0x909   : > { %v8126_v60 = vpop.f32.mrb[96].mxu1 }
 0x90a   : > { %v8132_v20 = vadd.f32 %v8126_v60, %v8023_v54  ;;  %v17006_v18 = vpop.f32.mrb[97].mxu1 }
 0x90b   : > { %v8129_v9 = vpop.f32.mrb[98].mxu1  ;;  %v8265_v12 = vpop.f32.mrb[132].mxu0 }
 0x90c   : > { %v8137_v22 = vadd.f32 %v21638_v16, %v8132_v20  ;;  %v17007_v32 = vpop.f32.mrb[99].mxu1  ;;  %v17026_v35 = vpop.f32.mrb[133].mxu0 }
 0x90d   : > { %v8268_v11 = vpop.f32.mrb[134].mxu0  ;;  %v18408_v32 = vld [vmem:[%s22607_s2 + $0x9c0] sm:$0xff]  }
 0x90e   : > { %vm8138_vm7 = vcmp.ge.f32.partialorder %v8137_v22, 0.0  ;;  %v8143_v58 = vmul.f32 %v21649_v2, %v8137_v22  ;;  %v17027_v59 = vpop.f32.mrb[135].mxu0 }
 0x90f   : > { %v18410_v59 = vld [vmem:[%s22607_s2 + $0x9c8] sm:$0xff]  }
 0x910   : > { %v8144_v1 = vsel %vm8138_vm7, %v8137_v22, %v8143_v58  ;;  %v18407_v22 = vld [vmem:[%s22607_s2 + $0x980] sm:$0xff]  }
 0x911   : > { %8145 = vst [vmem:[#allocation6 + $0x8] sm:$0x3] %v8144_v1  ;;  %v18411_v1 = vld [vmem:[%s22607_s2 + $0x990] sm:$0xff]  }
 0x929   : > { %v8353_v47 = vpop.f32.mrb[100].mxu1 }
 0x92a   : > { %v8354_v17 = vadd.f32 %v8353_v47, %v8265_v12  ;;  %v17046_v44 = vpop.f32.mrb[101].mxu1  ;;  %v9125_v12 = vand.u32 1, %v18749_v28  ;;  %v18409_v28 = vld [vmem:[%s22607_s2 + $0x988] sm:$0xff]   ;;  %v18420_v47 = vld [vmem:[%s22607_s2 + $0x9f0] sm:$0xff]  }
 0x92b   : > { %v8356_v7 = vpop.f32.mrb[102].mxu1  ;;  %v8459_v63 = vpop.f32.mrb[136].mxu0  ;;  %v18422_v44 = vld [vmem:[%s22607_s2 + $0x9f8] sm:$0xff]  }
 0x92c   : > { %v8465_v5 = vadd.f32 %v8459_v63, %v8354_v17  ;;  %v17047_v13 = vpop.f32.mrb[103].mxu1  ;;  %v17066_v19 = vpop.f32.mrb[137].mxu0  ;;  %vm9133_vm9 = vcmp.ne.s32.totalorder %v9125_v12, 0  ;;  %v18421_v17 = vld [vmem:[%s22607_s2 + $0x9b8] sm:$0xff]   ;;  %vm9134_vm12 = vcmp.ne.s32.totalorder %v9125_v12, 1 }
 0x92d   : > { %v8462_v23 = vpop.f32.mrb[138].mxu0  ;;  %vm21696_vm11 = vmpackc.low %vm9133_vm9, %vm9133_vm9  ;;  %v18424_v13 = vld [vmem:[%s22607_s2 + $0xa40] sm:$0xff]  }
 0x92e   : > { %v17067_v62 = vpop.f32.mrb[139].mxu0  ;;  %vm21762_vm13 = vmpackc.low %vm9134_vm12, %vm9134_vm12  ;;  %v18425_v23 = vld [vmem:[%s22607_s2 + $0xa08] sm:$0xff]  }
 0x92f   : > { %v18426_v62 = vld [vmem:[%s22607_s2 + $0xa48] sm:$0xff]  }
 0x949   : > { %v8568_v48 = vpop.f32.mrb[104].mxu1 }
 0x94a   : > { %v8574_v26 = vadd.f32 %v8568_v48, %v8465_v5  ;;  %v17086_v27 = vpop.f32.mrb[105].mxu1  ;;  %v18423_v5 = vld [vmem:[%s22607_s2 + $0xa00] sm:$0xff]   ;;  %v18427_v48 = vld [vmem:[%s22607_s2 + $0xa10] sm:$0xff]  }
 0x94b   : > { %v8571_v29 = vpop.f32.mrb[106].mxu1  ;;  %v8676_v37 = vpop.f32.mrb[140].mxu0  ;;  %v18429_v27 = vld [vmem:[%s22607_s2 + $0xa18] sm:$0xff]  }
 0x94c   : > { %v8682_v40 = vadd.f32 %v8676_v37, %v8574_v26  ;;  %v17087_v41 = vpop.f32.mrb[107].mxu1  ;;  %v17106_v43 = vpop.f32.mrb[141].mxu0  ;;  %v18428_v26 = vld [vmem:[%s22607_s2 + $0xa50] sm:$0xff]   ;;  %v18430_v29 = vld [vmem:[%s22607_s2 + $0xa58] sm:$0xff]   ;;  %v18431_v37 = vld [vmem:[%s22607_s2 + $0xa20] sm:$0xff]  }
 0x94d   : > { %v8679_v24 = vpop.f32.mrb[142].mxu0  ;;  %v18433_v41 = vld [vmem:[%s22607_s2 + $0xa28] sm:$0xff]  }
 0x94e   : > { %v17107_v0 = vpop.f32.mrb[143].mxu0  ;;  %v18434_v43 = vld [vmem:[%s22607_s2 + $0xa68] sm:$0xff]   ;;  %v18435_v24 = vld [vmem:[%s22607_s2 + $0xa30] sm:$0xff]  }
 0x94f   : > { %v18436_v0 = vld [vmem:[%s22607_s2 + $0xa70] sm:$0xff]  }
 0x969   : > { %v8784_v53 = vpop.f32.mrb[108].mxu1 }
 0x96a   : > { %v8790_v55 = vadd.f32 %v8784_v53, %v8682_v40  ;;  %v17126_v51 = vpop.f32.mrb[109].mxu1  ;;  %v18432_v40 = vld [vmem:[%s22607_s2 + $0xa60] sm:$0xff]   ;;  %v18437_v53 = vld [vmem:[%s22607_s2 + $0xa38] sm:$0xff]  }
 0x96b   : > { %v8787_v61 = vpop.f32.mrb[110].mxu1  ;;  %v8893_v52 = vpop.f32.mrb[144].mxu0 }
 0x96c   : > { %v8899_v21 = vadd.f32 %v8893_v52, %v8790_v55  ;;  %v17127_v54 = vpop.f32.mrb[111].mxu1  ;;  %v17146_v50 = vpop.f32.mrb[145].mxu0  ;;  %v18438_v55 = vld [vmem:[%s22607_s2 + $0xa78] sm:$0xff]   ;;  %v18439_v52 = vld [vmem:[%s22607_s2 + $0xa80] sm:$0xff]  }
 0x96d   : > { %v8896_v30 = vpop.f32.mrb[146].mxu0 }
 0x96e   : > { %v17147_v31 = vpop.f32.mrb[147].mxu0  ;;  %v18441_v30 = vld [vmem:[%s22607_s2 + $0xa88] sm:$0xff]  }
 0x96f   : > { %v18442_v31 = vld [vmem:[%s22607_s2 + $0xac8] sm:$0xff]  }
 0x989   : > { %v9001_v46 = vpop.f32.mrb[112].mxu1 }
 0x98a   : > { %v9007_v10 = vadd.f32 %v9001_v46, %v8899_v21  ;;  %v17166_v56 = vpop.f32.mrb[113].mxu1  ;;  %v18440_v21 = vld [vmem:[%s22607_s2 + $0xac0] sm:$0xff]   ;;  %v18443_v46 = vld [vmem:[%s22607_s2 + $0xa90] sm:$0xff]  }
 0x98b   : > { %v9004_v6 = vpop.f32.mrb[114].mxu1  ;;  %v9109_v14 = vpop.f32.mrb[148].mxu0  ;;  %v18445_v56 = vld [vmem:[%s22607_s2 + $0xa98] sm:$0xff]  }
 0x98c   : > { %v9115_v8 = vadd.f32 %v9109_v14, %v9007_v10  ;;  %v17167_v3 = vpop.f32.mrb[115].mxu1  ;;  %v17186_v60 = vpop.f32.mrb[149].mxu0  ;;  %v18444_v10 = vld [vmem:[%s22607_s2 + $0xad0] sm:$0xff]   ;;  %v18446_v6 = vld [vmem:[%s22607_s2 + $0xad8] sm:$0xff]   ;;  %v18447_v14 = vld [vmem:[%s22607_s2 + $0xaa0] sm:$0xff]  }
 0x98d   : > { %v9112_v20 = vpop.f32.mrb[150].mxu0  ;;  %v18449_v3 = vld [vmem:[%s22607_s2 + $0xaa8] sm:$0xff]  }
 0x98e   : > { %v9116_v18 = vadd.f32 %v21638_v16, %v9115_v8  ;;  %v17187_v33 = vpop.f32.mrb[151].mxu0  ;;  %v18448_v8 = vld [vmem:[%s22607_s2 + $0xae0] sm:$0xff]   ;;  %v18450_v60 = vld [vmem:[%s22607_s2 + $0xae8] sm:$0xff]   ;;  %v18451_v20 = vld [vmem:[%s22607_s2 + $0xab0] sm:$0xff]  }
 0x98f   : > { %v18453_v33 = vld [vmem:[%s22607_s2 + $0xab8] sm:$0xff]   ;;  %v18459_v16 = vld [vmem:[%s22607_s2 + $0xb20] sm:$0xff]  }
 0x990   : > { %vm9117_vm8 = vcmp.ge.f32.partialorder %v9116_v18, 0.0  ;;  %v9118_v25 = vmul.f32 %v21649_v2, %v9116_v18 }
 0x992   : > { %v9119_v9 = vsel %vm9117_vm8, %v9116_v18, %v9118_v25  ;;  %v18452_v18 = vld [vmem:[%s22607_s2 + $0xaf0] sm:$0xff]   ;;  %v18454_v25 = vld [vmem:[%s22607_s2 + $0xaf8] sm:$0xff]  }
 0x993   : > { %9120 = vst [vmem:[#allocation6 + $0xa] sm:$0x3] %v9119_v9  ;;  %v21906_v9 = vld [vmem:[#allocation2 + $0x8] sm:$0xff] }
 0x99a   : > { %v9157_v35 = vld [vmem:[#allocation6 + $0x6] sm:$0xff] }
 0x99b   : > { %v9135_v11 = vld [vmem:[#allocation6 + $0x5] sm:$0xff]  ;;  %v9158_v2 = vpack.c.bf16 %v9157_v35, %v9157_v35 }
 0x99c   : > { %v14130_v58 = vpack.c.bf16 %v9135_v11, %v9135_v11  ;;  %v9352_v7 = vld [vmem:[#allocation6 + $0x7] sm:$0xff]  ;;  %v18458_v11 = vld [vmem:[%s22607_s2 + $0xb18] sm:$0xff]  }
 0x99d   : > { %17205 = vmatmul.mubr.bf16.vlgmr.msra.gmra.mrb[116].mxu1 %v9158_v2  ;;  %v14157_v19 = vpack.c.bf16 %v9352_v7, %v9352_v7  ;;  %v9571_v51 = vld [vmem:[#allocation6 + $0x8] sm:$0xff]  ;;  %v18460_v2 = vld [vmem:[%s22607_s2 + $0xb28] sm:$0xff]  }
 0x99e   : > { %17225 = vmatmul.mubr.msk.bf16.vlgmr.msra.gmra.mrb[152].mxu0 %vm21696_vm11, %v14130_v58  ;;  %17229 = vmatpush3.bf16.msra.mxu1 %v18407_v22  ;;  %v9679_v61 = vld [vmem:[#allocation6 + $0x9] sm:$0xff]  ;;  %v9572_v54 = vpack.c.bf16 %v9571_v51, %v9571_v51 }
 0x99f   : > { %17249 = vmatpush3.bf16.msra.mxu0 %v18408_v32  ;;  %17230 = vmatprep.subr.bf16.mxu1 %v21371_v34  ;;  %v14235_v50 = vpack.c.bf16 %v9679_v61, %v9679_v61  ;;  %v9896_v12 = vld [vmem:[#allocation6 + $0xa] sm:$0xff]  ;;  %v18456_v32 = vld [vmem:[%s22607_s2 + $0xb08] sm:$0xff]  }
 0x9a0   : > { %17250 = vmatprep.subr.bf16.mxu0 %v21371_v34  ;;  %17244 = vmatprep.mubr.msk.bf16.mxu1 %vm18625_vm10, %v21371_v34  ;;  %v9897_v22 = vpack.c.bf16 %v9896_v12, %v9896_v12  ;;  %v18457_v35 = vld [vmem:[%s22607_s2 + $0xb10] sm:$0xff]  }
 0x9a1   : > { %17264 = vmatprep.mubr.msk.bf16.mxu0 %vm18625_vm10, %v21371_v34  ;;  %v18461_v58 = vld [vmem:[%s22607_s2 + $0xb30] sm:$0xff]  }
 0x9a2   : > { %17231 = vmatpush3.bf16.msra.mxu1 %v18409_v28  ;;  %v18462_v28 = vld [vmem:[%s22607_s2 + $0xb38] sm:$0xff]  }
 0x9a3   : > { %17251 = vmatpush3.bf16.msra.mxu0 %v18410_v59  ;;  %17232 = vmatprep.subr.bf16.mxu1 %v21371_v34  ;;  %v10004_v59 = vld [vmem:[#allocation6 + $0xb] sm:$0xff] }
 0x9a4   : > { %17252 = vmatprep.subr.bf16.mxu0 %v21371_v34 }
 0x9a6   : > { %17233 = vmatpush3.bf16.msra.mxu1 %v18411_v1  ;;  %v14313_v1 = vpack.c.bf16 %v10004_v59, %v10004_v59 }
 0x9a7   : > { %17253 = vmatpush3.bf16.msra.mxu0 %v18412_v15  ;;  %17234 = vmatprep.subr.bf16.mxu1 %v21371_v34  ;;  %v18463_v15 = vld [vmem:[%s22607_s2 + $0xb80] sm:$0xff]  }
 0x9a8   : > { %17254 = vmatprep.subr.bf16.mxu0 %v21371_v34 }
 0x9aa   : > { %17235 = vmatpush3.bf16.msra.mxu1 %v18413_v39  ;;  %v18464_v39 = vld [vmem:[%s22607_s2 + $0xb40] sm:$0xff]  }
 0x9ab   : > { %17255 = vmatpush3.bf16.msra.mxu0 %v18414_v57  ;;  %17236 = vmatprep.subr.bf16.mxu1 %v21371_v34  ;;  %v18465_v57 = vld [vmem:[%s22607_s2 + $0xb88] sm:$0xff]  }
 0x9ac   : > { %17256 = vmatprep.subr.bf16.mxu0 %v21371_v34 }
 0x9ae   : > { %17237 = vmatpush3.bf16.msra.mxu1 %v18415_v4  ;;  %v18466_v4 = vld [vmem:[%s22607_s2 + $0xb48] sm:$0xff]  }
 0x9af   : > { %17257 = vmatpush3.bf16.msra.mxu0 %v18416_v45  ;;  %17238 = vmatprep.subr.bf16.mxu1 %v21371_v34  ;;  %v18467_v45 = vld [vmem:[%s22607_s2 + $0xb90] sm:$0xff]  }
 0x9b0   : > { %17258 = vmatprep.subr.bf16.mxu0 %v21371_v34 }
 0x9b2   : > { %17239 = vmatpush3.bf16.msra.mxu1 %v18417_v38  ;;  %v18468_v38 = vld [vmem:[%s22607_s2 + $0xb50] sm:$0xff]  }
 0x9b3   : > { %17259 = vmatpush3.bf16.msra.mxu0 %v18418_v36  ;;  %17240 = vmatprep.subr.bf16.mxu1 %v21371_v34  ;;  %v18469_v36 = vld [vmem:[%s22607_s2 + $0xb98] sm:$0xff]  }
 0x9b4   : > { %17260 = vmatprep.subr.bf16.mxu0 %v21371_v34 }
 0x9b6   : > { %17241 = vmatpush3.bf16.msra.mxu1 %v18419_v42 }
 0x9b7   : > { %17261 = vmatpush3.bf16.msra.mxu0 %v18420_v47  ;;  %17242 = vmatprep.subr.bf16.mxu1 %v21371_v34 }
 0x9b8   : > { %17262 = vmatprep.subr.bf16.mxu0 %v21371_v34 }
 0x9ba   : > { %17243 = vmatpush3.bf16.msra.mxu1 %v18421_v17 }
 0x9bb   : > { %17263 = vmatpush3.bf16.msra.mxu0 %v18422_v44  ;;  %17268 = vmatprep.subr.bf16.mxu1 %v21371_v34 }
 0x9bc   : > { %17288 = vmatprep.subr.bf16.mxu0 %v21371_v34 }
 0x9bd   : > { %17245 = vmatmul.mubr.msk.bf16.vlgmr.msra.gmra.mrb[120].mxu1 %vm21762_vm13, %v14157_v19 }
 0x9be   : > { %17265 = vmatmul.mubr.msk.bf16.vlgmr.msra.gmra.mrb[156].mxu0 %vm21696_vm11, %v14157_v19  ;;  %17269 = vmatpush3.bf16.msra.mxu1 %v18423_v5 }
 0x9bf   : > { %17289 = vmatpush3.bf16.msra.mxu0 %v18424_v13  ;;  %17270 = vmatprep.subr.bf16.mxu1 %v21371_v34 }
 0x9c0   : > { %17290 = vmatprep.subr.bf16.mxu0 %v21371_v34  ;;  %17284 = vmatprep.mubr.msk.bf16.mxu1 %vm18625_vm10, %v21371_v34 }
 0x9c1   : > { %17304 = vmatprep.mubr.msk.bf16.mxu0 %vm18625_vm10, %v21371_v34 }
 0x9c2   : > { %17271 = vmatpush3.bf16.msra.mxu1 %v18425_v23  ;;  %v18470_v23 = vld [vmem:[%s22607_s2 + $0xb58] sm:$0xff]  }
 0x9c3   : > { %17291 = vmatpush3.bf16.msra.mxu0 %v18426_v62  ;;  %17272 = vmatprep.subr.bf16.mxu1 %v21371_v34  ;;  %v18471_v62 = vld [vmem:[%s22607_s2 + $0xba0] sm:$0xff]  }
 0x9c4   : > { %17292 = vmatprep.subr.bf16.mxu0 %v21371_v34 }
 0x9c6   : > { %17273 = vmatpush3.bf16.msra.mxu1 %v18427_v48  ;;  %v18472_v48 = vld [vmem:[%s22607_s2 + $0xb60] sm:$0xff]  }
 0x9c7   : > { %17293 = vmatpush3.bf16.msra.mxu0 %v18428_v26  ;;  %17274 = vmatprep.subr.bf16.mxu1 %v21371_v34  ;;  %v18473_v26 = vld [vmem:[%s22607_s2 + $0xba8] sm:$0xff]  }
 0x9c8   : > { %17294 = vmatprep.subr.bf16.mxu0 %v21371_v34 }
 0x9ca   : > { %17275 = vmatpush3.bf16.msra.mxu1 %v18429_v27  ;;  %v18474_v27 = vld [vmem:[%s22607_s2 + $0xb68] sm:$0xff]  }
 0x9cb   : > { %17295 = vmatpush3.bf16.msra.mxu0 %v18430_v29  ;;  %17276 = vmatprep.subr.bf16.mxu1 %v21371_v34  ;;  %v18475_v29 = vld [vmem:[%s22607_s2 + $0xbb0] sm:$0xff]  }
 0x9cc   : > { %17296 = vmatprep.subr.bf16.mxu0 %v21371_v34 }
 0x9ce   : > { %17277 = vmatpush3.bf16.msra.mxu1 %v18431_v37  ;;  %v18476_v37 = vld [vmem:[%s22607_s2 + $0xb70] sm:$0xff]  }
 0x9cf   : > { %17297 = vmatpush3.bf16.msra.mxu0 %v18432_v40  ;;  %17278 = vmatprep.subr.bf16.mxu1 %v21371_v34  ;;  %v18477_v40 = vld [vmem:[%s22607_s2 + $0xbb8] sm:$0xff]  }
 0x9d0   : > { %17298 = vmatprep.subr.bf16.mxu0 %v21371_v34 }
 0x9d2   : > { %17279 = vmatpush3.bf16.msra.mxu1 %v18433_v41  ;;  %v18478_v41 = vld [vmem:[%s22607_s2 + $0xb78] sm:$0xff]  }
 0x9d3   : > { %17299 = vmatpush3.bf16.msra.mxu0 %v18434_v43  ;;  %17280 = vmatprep.subr.bf16.mxu1 %v21371_v34 }
 0x9d4   : > { %17300 = vmatprep.subr.bf16.mxu0 %v21371_v34 }
 0x9d6   : > { %17281 = vmatpush3.bf16.msra.mxu1 %v18435_v24 }
 0x9d7   : > { %17301 = vmatpush3.bf16.msra.mxu0 %v18436_v0  ;;  %17282 = vmatprep.subr.bf16.mxu1 %v21371_v34 }
 0x9d8   : > { %17302 = vmatprep.subr.bf16.mxu0 %v21371_v34 }
 0x9da   : > { %17283 = vmatpush3.bf16.msra.mxu1 %v18437_v53 }
 0x9db   : > { %17303 = vmatpush3.bf16.msra.mxu0 %v18438_v55  ;;  %17308 = vmatprep.subr.bf16.mxu1 %v21371_v34 }
 0x9dc   : > { %17328 = vmatprep.subr.bf16.mxu0 %v21371_v34 }
 0x9dd   : > { %17285 = vmatmul.mubr.bf16.vlgmr.msra.gmra.mrb[124].mxu1 %v9572_v54 }
 0x9de   : > { %17305 = vmatmul.mubr.msk.bf16.vlgmr.msra.gmra.mrb[160].mxu0 %vm21762_vm13, %v14235_v50  ;;  %17309 = vmatpush3.bf16.msra.mxu1 %v18439_v52 }
 0x9df   : > { %17329 = vmatpush3.bf16.msra.mxu0 %v18440_v21  ;;  %17310 = vmatprep.subr.bf16.mxu1 %v21371_v34 }
 0x9e0   : > { %17330 = vmatprep.subr.bf16.mxu0 %v21371_v34  ;;  %17324 = vmatprep.mubr.msk.bf16.mxu1 %vm18625_vm10, %v21371_v34 }
 0x9e1   : > { %17344 = vmatprep.mubr.msk.bf16.mxu0 %vm18625_vm10, %v21371_v34 }
 0x9e2   : > { %17311 = vmatpush3.bf16.msra.mxu1 %v18441_v30 }
 0x9e3   : > { %17331 = vmatpush3.bf16.msra.mxu0 %v18442_v31  ;;  %17312 = vmatprep.subr.bf16.mxu1 %v21371_v34 }
 0x9e4   : > { %17332 = vmatprep.subr.bf16.mxu0 %v21371_v34 }
 0x9e6   : > { %17313 = vmatpush3.bf16.msra.mxu1 %v18443_v46 }
 0x9e7   : > { %17333 = vmatpush3.bf16.msra.mxu0 %v18444_v10  ;;  %17314 = vmatprep.subr.bf16.mxu1 %v21371_v34 }
 0x9e8   : > { %17334 = vmatprep.subr.bf16.mxu0 %v21371_v34 }
 0x9ea   : > { %17315 = vmatpush3.bf16.msra.mxu1 %v18445_v56 }
 0x9eb   : > { %17335 = vmatpush3.bf16.msra.mxu0 %v18446_v6  ;;  %17316 = vmatprep.subr.bf16.mxu1 %v21371_v34 }
 0x9ec   : > { %17336 = vmatprep.subr.bf16.mxu0 %v21371_v34 }
 0x9ee   : > { %17317 = vmatpush3.bf16.msra.mxu1 %v18447_v14 }
 0x9ef   : > { %17337 = vmatpush3.bf16.msra.mxu0 %v18448_v8  ;;  %17318 = vmatprep.subr.bf16.mxu1 %v21371_v34 }
 0x9f0   : > { %17338 = vmatprep.subr.bf16.mxu0 %v21371_v34 }
 0x9f2   : > { %17319 = vmatpush3.bf16.msra.mxu1 %v18449_v3 }
 0x9f3   : > { %17339 = vmatpush3.bf16.msra.mxu0 %v18450_v60  ;;  %17320 = vmatprep.subr.bf16.mxu1 %v21371_v34 }
 0x9f4   : > { %17340 = vmatprep.subr.bf16.mxu0 %v21371_v34  ;;  %v18455_v34 = vld [vmem:[%s22607_s2 + $0xb00] sm:$0xff]  }
 0x9f6   : > { %17321 = vmatpush3.bf16.msra.mxu1 %v18451_v20 }
 0x9f7   : > { %17341 = vmatpush3.bf16.msra.mxu0 %v18452_v18  ;;  %17322 = vmatprep.subr.bf16.mxu1 %v21906_v9 }
 0x9f8   : > { %17342 = vmatprep.subr.bf16.mxu0 %v21906_v9 }
 0x9fa   : > { %17323 = vmatpush3.bf16.msra.mxu1 %v18453_v33 }
 0x9fb   : > { %17343 = vmatpush3.bf16.msra.mxu0 %v18454_v25  ;;  %17348 = vmatprep.subr.bf16.mxu1 %v21906_v9 }
 0x9fc   : > { %17368 = vmatprep.subr.bf16.mxu0 %v21906_v9 }
 0x9fd   : > { %17325 = vmatmul.mubr.msk.bf16.vlgmr.msra.gmra.mrb[128].mxu1 %vm21696_vm11, %v14235_v50 }
 0x9fe   : > { %17345 = vmatmul.mubr.bf16.vlgmr.msra.gmra.mrb[164].mxu0 %v9897_v22  ;;  %17349 = vmatpush3.bf16.msra.mxu1 %v18455_v34 }
 0x9ff   : > { %17364 = vmatprep.mubr.msk.bf16.mxu1 %vm18625_vm10, %v21906_v9  ;;  %17350 = vmatprep.subr.bf16.mxu1 %v21906_v9 }
 0xa00   : > { %17384 = vmatprep.mubr.msk.bf16.mxu0 %vm18625_vm10, %v21906_v9  ;;  %17369 = vmatpush3.bf16.msra.mxu0 %v18463_v15 }
 0xa01   : > { %17370 = vmatprep.subr.bf16.mxu0 %v21906_v9 }
 0xa02   : > { %17351 = vmatpush3.bf16.msra.mxu1 %v18456_v32 }
 0xa03   : > { %17352 = vmatprep.subr.bf16.mxu1 %v21906_v9 }
 0xa04   : > { %17371 = vmatpush3.bf16.msra.mxu0 %v18465_v57 }
 0xa05   : > { %17372 = vmatprep.subr.bf16.mxu0 %v21906_v9 }
 0xa06   : > { %17353 = vmatpush3.bf16.msra.mxu1 %v18457_v35 }
 0xa07   : > { %17354 = vmatprep.subr.bf16.mxu1 %v21906_v9 }
 0xa08   : > { %17373 = vmatpush3.bf16.msra.mxu0 %v18467_v45  ;;  %v18479_v45 = vld [vmem:[%s22607_s2 + $0xbc0] sm:$0xff]  }
 0xa09   : > { %17374 = vmatprep.subr.bf16.mxu0 %v21906_v9 }
 0xa0a   : > { %17355 = vmatpush3.bf16.msra.mxu1 %v18458_v11  ;;  %v14315_v11 = vld [vmem:[%s22608_s3 + $0x5] ss:$0 sm:$0xff] }
 0xa0b   : > { %17356 = vmatprep.subr.bf16.mxu1 %v21906_v9 }
 0xa0c   : > { %17375 = vmatpush3.bf16.msra.mxu0 %v18469_v36 }
 0xa0d   : > { %17376 = vmatprep.subr.bf16.mxu0 %v21906_v9 }
 0xa0e   : > { %17357 = vmatpush3.bf16.msra.mxu1 %v18459_v16 }
 0xa0f   : > { %17358 = vmatprep.subr.bf16.mxu1 %v21906_v9 }
 0xa10   : > { %17377 = vmatpush3.bf16.msra.mxu0 %v18471_v62  ;;  %v18488_v62 = vld [vmem:[%s22607_s2 + $0xc20] sm:$0xff]  }
 0xa11   : > { %17378 = vmatprep.subr.bf16.mxu0 %v21906_v9 }
 0xa12   : > { %17359 = vmatpush3.bf16.msra.mxu1 %v18460_v2 }
 0xa13   : > { %17360 = vmatprep.subr.bf16.mxu1 %v21906_v9 }
 0xa14   : > { %17379 = vmatpush3.bf16.msra.mxu0 %v18473_v26  ;;  %v18490_v26 = vld [vmem:[%s22607_s2 + $0xc28] sm:$0xff]  }
 0xa15   : > { %17380 = vmatprep.subr.bf16.mxu0 %v21906_v9 }
 0xa16   : > { %17361 = vmatpush3.bf16.msra.mxu1 %v18461_v58 }
 0xa17   : > { %17362 = vmatprep.subr.bf16.mxu1 %v21906_v9 }
 0xa18   : > { %17381 = vmatpush3.bf16.msra.mxu0 %v18475_v29  ;;  %v18492_v29 = vld [vmem:[%s22607_s2 + $0xc30] sm:$0xff]  }
 0xa19   : > { %17382 = vmatprep.subr.bf16.mxu0 %v21906_v9 }
 0xa1a   : > { %17363 = vmatpush3.bf16.msra.mxu1 %v18462_v28  ;;  %v14316_v28 = vld [vmem:[%s22609_s4 + $0x5] ss:$0 sm:$0xff] }
 0xa1b   : > { %17388 = vmatprep.subr.bf16.mxu1 %v21906_v9 }
 0xa1c   : > { %17383 = vmatpush3.bf16.msra.mxu0 %v18477_v40 }
 0xa1d   : > { %17365 = vmatmul.mubr.msk.bf16.vlgmr.msra.gmra.mrb[132].mxu1 %vm21762_vm13, %v14313_v1  ;;  %17408 = vmatprep.subr.bf16.mxu0 %v21906_v9 }
 0xa1e   : > { %17404 = vmatprep.mubr.msk.bf16.mxu1 %vm18625_vm10, %v21906_v9  ;;  %17389 = vmatpush3.bf16.msra.mxu1 %v18464_v39 }
 0xa1f   : > { %17390 = vmatprep.subr.bf16.mxu1 %v21906_v9 }
 0xa22   : > { %17391 = vmatpush3.bf16.msra.mxu1 %v18466_v4 }
 0xa23   : > { %17392 = vmatprep.subr.bf16.mxu1 %v21906_v9 }
 0xa26   : > { %17393 = vmatpush3.bf16.msra.mxu1 %v18468_v38 }
 0xa27   : > { %17394 = vmatprep.subr.bf16.mxu1 %v21906_v9 }
 0xa2a   : > { %17395 = vmatpush3.bf16.msra.mxu1 %v18470_v23  ;;  %v18487_v23 = vld [vmem:[%s22607_s2 + $0xbe0] sm:$0xff]  }
 0xa2b   : > { %17396 = vmatprep.subr.bf16.mxu1 %v21906_v9 }
 0xa2e   : > { %17397 = vmatpush3.bf16.msra.mxu1 %v18472_v48  ;;  %v18489_v48 = vld [vmem:[%s22607_s2 + $0xbe8] sm:$0xff]  }
 0xa2f   : > { %17398 = vmatprep.subr.bf16.mxu1 %v21906_v9 }
 0xa32   : > { %17399 = vmatpush3.bf16.msra.mxu1 %v18474_v27  ;;  %v18491_v27 = vld [vmem:[%s22607_s2 + $0xbf0] sm:$0xff]  }
 0xa33   : > { %17400 = vmatprep.subr.bf16.mxu1 %v21906_v9 }
 0xa36   : > { %17401 = vmatpush3.bf16.msra.mxu1 %v18476_v37  ;;  %v18493_v37 = vld [vmem:[%s22607_s2 + $0xbf8] sm:$0xff]  }
 0xa37   : > { %17402 = vmatprep.subr.bf16.mxu1 %v21906_v9 }
 0xa3a   : > { %17403 = vmatpush3.bf16.msra.mxu1 %v18478_v41  ;;  %v18494_v41 = vld [vmem:[%s22607_s2 + $0xc38] sm:$0xff]  }
 0xa3b   : > { %17428 = vmatprep.subr.bf16.mxu1 %v21906_v9 }
 0xa70   : > { %v9258_v42 = vpop.f32.mrb[116].mxu1 }
 0xa71   : > { %v9346_v47 = vpop.f32.mrb[152].mxu0  ;;  %v17206_v44 = vpop.f32.mrb[117].mxu1 }
 0xa72   : > { %v9347_v17 = vadd.f32 %v9346_v47, %v9258_v42  ;;  %v17226_v7 = vpop.f32.mrb[153].mxu0  ;;  %v9261_v63 = vpop.f32.mrb[118].mxu1  ;;  %v18480_v47 = vld [vmem:[%s22607_s2 + $0xc00] sm:$0xff]   ;;  %v18481_v44 = vld [vmem:[%s22607_s2 + $0xbc8] sm:$0xff]  }
 0xa73   : > { %v9349_v5 = vpop.f32.mrb[154].mxu0  ;;  %v17207_v13 = vpop.f32.mrb[119].mxu1  ;;  %v18482_v7 = vld [vmem:[%s22607_s2 + $0xc08] sm:$0xff]   ;;  %v18483_v63 = vld [vmem:[%s22607_s2 + $0xbd0] sm:$0xff]  }
 0xa74   : > { %v17227_v19 = vpop.f32.mrb[155].mxu0  ;;  %v18484_v5 = vld [vmem:[%s22607_s2 + $0xc10] sm:$0xff]   ;;  %v18485_v13 = vld [vmem:[%s22607_s2 + $0xbd8] sm:$0xff]  }
 0xa75   : > { %v18486_v19 = vld [vmem:[%s22607_s2 + $0xc18] sm:$0xff]  }
 0xa90   : > { %v9456_v43 = vpop.f32.mrb[120].mxu1 }
 0xa91   : > { %v9564_v24 = vpop.f32.mrb[156].mxu0  ;;  %v9462_v0 = vadd.f32 %v9456_v43, %v9347_v17  ;;  %v17246_v53 = vpop.f32.mrb[121].mxu1 }
 0xa92   : > { %v17266_v55 = vpop.f32.mrb[157].mxu0  ;;  %v9459_v51 = vpop.f32.mrb[122].mxu1  ;;  %v18496_v53 = vld [vmem:[%s22607_s2 + $0xc80] sm:$0xff]  }
 0xa93   : > { %v9567_v61 = vpop.f32.mrb[158].mxu0  ;;  %v9570_v52 = vadd.f32 %v9564_v24, %v9462_v0  ;;  %v17247_v21 = vpop.f32.mrb[123].mxu1  ;;  %v18495_v24 = vld [vmem:[%s22607_s2 + $0xc40] sm:$0xff]   ;;  %v18497_v51 = vld [vmem:[%s22607_s2 + $0xc48] sm:$0xff]  }
 0xa94   : > { %v17267_v54 = vpop.f32.mrb[159].mxu0  ;;  %v18498_v61 = vld [vmem:[%s22607_s2 + $0xc88] sm:$0xff]   ;;  %v18500_v21 = vld [vmem:[%s22607_s2 + $0xc90] sm:$0xff]  }
 0xa95   : > { %v18501_v54 = vld [vmem:[%s22607_s2 + $0xc58] sm:$0xff]  }
 0xab0   : > { %v9672_v50 = vpop.f32.mrb[124].mxu1 }
 0xab1   : > { %v9781_v30 = vpop.f32.mrb[160].mxu0  ;;  %v9678_v31 = vadd.f32 %v9672_v50, %v9570_v52  ;;  %v17286_v46 = vpop.f32.mrb[125].mxu1  ;;  %v18499_v52 = vld [vmem:[%s22607_s2 + $0xc50] sm:$0xff]   ;;  %v18502_v50 = vld [vmem:[%s22607_s2 + $0xc98] sm:$0xff]  }
 0xab2   : > { %v17306_v10 = vpop.f32.mrb[161].mxu0  ;;  %v9675_v56 = vpop.f32.mrb[126].mxu1  ;;  %v18505_v46 = vld [vmem:[%s22607_s2 + $0xc68] sm:$0xff]  }
 0xab3   : > { %v9784_v6 = vpop.f32.mrb[162].mxu0  ;;  %v9787_v14 = vadd.f32 %v9781_v30, %v9678_v31  ;;  %v17287_v8 = vpop.f32.mrb[127].mxu1  ;;  %v18503_v30 = vld [vmem:[%s22607_s2 + $0xc60] sm:$0xff]   ;;  %v18506_v10 = vld [vmem:[%s22607_s2 + $0xca8] sm:$0xff]   ;;  %v18507_v56 = vld [vmem:[%s22607_s2 + $0xc70] sm:$0xff]  }
 0xab4   : > { %v17307_v3 = vpop.f32.mrb[163].mxu0  ;;  %v18504_v31 = vld [vmem:[%s22607_s2 + $0xca0] sm:$0xff]   ;;  %v18508_v6 = vld [vmem:[%s22607_s2 + $0xcb0] sm:$0xff]   ;;  %v18510_v8 = vld [vmem:[%s22607_s2 + $0xcb8] sm:$0xff]  }
 0xad0   : > { %v9889_v60 = vpop.f32.mrb[128].mxu1 }
 0xad1   : > { %v9997_v20 = vpop.f32.mrb[164].mxu0  ;;  %v9895_v18 = vadd.f32 %v9889_v60, %v9787_v14  ;;  %v17326_v33 = vpop.f32.mrb[129].mxu1  ;;  %v18509_v14 = vld [vmem:[%s22607_s2 + $0xc78] sm:$0xff]   ;;  %v18511_v60 = vld [vmem:[%s22607_s2 + $0xcc0] sm:$0xff]  }
 0xad2   : > { %v17346_v25 = vpop.f32.mrb[165].mxu0  ;;  %v9892_v12 = vpop.f32.mrb[130].mxu1  ;;  %v18512_v33 = vld [vmem:[%s22607_s2 + $0xd00] sm:$0xff]  }
 0xad3   : > { %v10000_v34 = vpop.f32.mrb[166].mxu0  ;;  %v10003_v22 = vadd.f32 %v9997_v20, %v9895_v18  ;;  %v17327_v32 = vpop.f32.mrb[131].mxu1  ;;  %v18513_v12 = vld [vmem:[%s22607_s2 + $0xcc8] sm:$0xff]  }
 0xad4   : > { %v17347_v35 = vpop.f32.mrb[167].mxu0  ;;  %v18514_v34 = vld [vmem:[%s22607_s2 + $0xd08] sm:$0xff]   ;;  %v18516_v32 = vld [vmem:[%s22607_s2 + $0xd10] sm:$0xff]  }
 0xad5   : > { %v18517_v35 = vld [vmem:[%s22607_s2 + $0xcd8] sm:$0xff]  }
 0xaf0   : > { %v10106_v16 = vpop.f32.mrb[132].mxu1 }
 0xaf1   : > { %v10112_v2 = vadd.f32 %v10106_v16, %v10003_v22  ;;  %v17366_v58 = vpop.f32.mrb[133].mxu1  ;;  %v18515_v22 = vld [vmem:[%s22607_s2 + $0xcd0] sm:$0xff]   ;;  %v18519_v16 = vld [vmem:[%s22607_s2 + $0xce0] sm:$0xff]  }
 0xaf2   : > { %v10109_v59 = vpop.f32.mrb[134].mxu1  ;;  %v18521_v58 = vld [vmem:[%s22607_s2 + $0xce8] sm:$0xff]  }
 0xaf3   : > { %v10117_v1 = vadd.f32 %v14315_v11, %v10112_v2  ;;  %v17367_v15 = vpop.f32.mrb[135].mxu1  ;;  %v18518_v11 = vld [vmem:[%s22607_s2 + $0xd18] sm:$0xff]   ;;  %v18520_v2 = vld [vmem:[%s22607_s2 + $0xd20] sm:$0xff]   ;;  %v18523_v59 = vld [vmem:[%s22607_s2 + $0xcf0] sm:$0xff]  }
 0xaf4   : > { %v18525_v15 = vld [vmem:[%s22607_s2 + $0xcf8] sm:$0xff]  }
 0xaf5   : > { %vm10118_vm14 = vcmp.ge.f32.partialorder %v10117_v1, 0.0  ;;  %v10123_v39 = vmul.f32 %v14316_v28, %v10117_v1  ;;  %v18522_v28 = vld [vmem:[%s22607_s2 + $0xd28] sm:$0xff]  }
 0xaf7   : > { %v10124_v57 = vsel %vm10118_vm14, %v10117_v1, %v10123_v39  ;;  %v18524_v1 = vld [vmem:[%s22607_s2 + $0xd30] sm:$0xff]  }
 0xaf8   : > { %10125 = vst [vmem:[%s334_s10] sm:$0xff] %v10124_v57  ;;  %10126 = vst [vmem:[#allocation7 + $0x8] sm:$0xff] %v10124_v57  ;;  %v18526_v57 = vld [vmem:[%s22607_s2 + $0xd38] sm:$0xff]  }
 0xaff   : > { %v10153_v4 = vld [vmem:[#allocation7 + $0x6] ss:$2 sm:$0xff]  ;;  %v10132_v38 = vld [vmem:[#allocation7 + $0x5] ss:$2 sm:$0xff] }
 0xb00   : > { %v10154_v36 = vpack.c.bf16 %v10153_v4, %v10153_v4  ;;  %v10133_v42 = vmul.f32 %v19426_v49, %v10132_v38  ;;  %v10349_v40 = vld [vmem:[#allocation7 + $0x7] ss:$2 sm:$0xff]  ;;  %v10566_v3 = vld [vmem:[#allocation7 + $0x8] ss:$2 sm:$0xff] }
 0xb01   : > { %v10457_v43 = vmul.f32 %v19426_v49, %v10349_v40  ;;  %v10350_v0 = vpack.c.bf16 %v10349_v40, %v10349_v40  ;;  %v10675_v20 = vld [vmem:[#allocation7 + $0x9] ss:$2 sm:$0xff]  ;;  %v10567_v18 = vpack.c.bf16 %v10566_v3, %v10566_v3  ;;  %v18527_v4 = vld [vmem:[%s22607_s2 + $0xd40] sm:$0xff]   ;;  %v18558_v3 = vld [vmem:[%s22607_s2 + $0xe58] sm:$0xff]  }
 0xb02   : > { %17385 = vmatmul.mubr.bf16.vlgmr.msra.gmra.mrb[168].mxu0 %v10154_v36  ;;  %v10134_v17 = vpack.c.bf16 %v10133_v42, %v10133_v42  ;;  %v10676_v25 = vpack.c.bf16 %v10675_v20, %v10675_v20  ;;  %v10783_v39 = vmul.f32 %v19426_v49, %v10675_v20  ;;  %v18528_v49 = vld [vmem:[%s22607_s2 + $0xd48] sm:$0xff]   ;;  %v18529_v42 = vld [vmem:[%s22607_s2 + $0xd50] sm:$0xff]  }
 0xb03   : > { %17409 = vmatpush3.bf16.msra.mxu0 %v18479_v45  ;;  %17424 = vmatprep.mubr.msk.bf16.mxu0 %vm18625_vm10, %v21906_v9  ;;  %v10458_v55 = vpack.c.bf16 %v10457_v43, %v10457_v43  ;;  %v10892_v45 = vld [vmem:[#allocation7 + $0xa] ss:$2 sm:$0xff] }
 0xb04   : > { %17405 = vmatmul.mubr.bf16.vlgmr.msra.gmra.mrb[136].mxu1 %v10134_v17  ;;  %17410 = vmatprep.subr.bf16.mxu0 %v21906_v9  ;;  %v10784_v38 = vpack.c.bf16 %v10783_v39, %v10783_v39  ;;  %v10893_v36 = vpack.c.bf16 %v10892_v45, %v10892_v45  ;;  %v18531_v17 = vld [vmem:[%s22607_s2 + $0xd60] sm:$0xff]  }
 0xb05   : > { %17429 = vmatpush3.bf16.msra.mxu1 %v18480_v47  ;;  %17444 = vmatprep.mubr.msk.bf16.mxu1 %vm18625_vm10, %v21906_v9  ;;  %v18530_v47 = vld [vmem:[%s22607_s2 + $0xd58] sm:$0xff]  }
 0xb06   : > { %17430 = vmatprep.subr.bf16.mxu1 %v21906_v9 }
 0xb07   : > { %17411 = vmatpush3.bf16.msra.mxu0 %v18481_v44  ;;  %v18532_v44 = vld [vmem:[%s22607_s2 + $0xd68] sm:$0xff]  }
 0xb08   : > { %17412 = vmatprep.subr.bf16.mxu0 %v21906_v9 }
 0xb09   : > { %17431 = vmatpush3.bf16.msra.mxu1 %v18482_v7  ;;  %v18533_v7 = vld [vmem:[%s22607_s2 + $0xd70] sm:$0xff]  }
 0xb0a   : > { %17432 = vmatprep.subr.bf16.mxu1 %v21906_v9 }
 0xb0b   : > { %17413 = vmatpush3.bf16.msra.mxu0 %v18483_v63  ;;  %v18534_v63 = vld [vmem:[%s22607_s2 + $0xd78] sm:$0xff]  }
 0xb0c   : > { %17414 = vmatprep.subr.bf16.mxu0 %v21906_v9 }
 0xb0d   : > { %17433 = vmatpush3.bf16.msra.mxu1 %v18484_v5  ;;  %v11001_v5 = vld [vmem:[#allocation7 + $0xb] ss:$2 sm:$0xff] }
 0xb0e   : > { %17434 = vmatprep.subr.bf16.mxu1 %v21906_v9 }
 0xb0f   : > { %17415 = vmatpush3.bf16.msra.mxu0 %v18485_v13  ;;  %v11002_v13 = vpack.c.bf16 %v11001_v5, %v11001_v5  ;;  %v18582_v5 = vld [vmem:[%s22607_s2 + $0xef8] sm:$0xff]  }
 0xb10   : > { %17416 = vmatprep.subr.bf16.mxu0 %v21906_v9 }
 0xb11   : > { %17435 = vmatpush3.bf16.msra.mxu1 %v18486_v19  ;;  %v18535_v19 = vld [vmem:[%s22607_s2 + $0xdc0] sm:$0xff]  }
 0xb12   : > { %17436 = vmatprep.subr.bf16.mxu1 %v21906_v9 }
 0xb13   : > { %17417 = vmatpush3.bf16.msra.mxu0 %v18487_v23  ;;  %v18536_v23 = vld [vmem:[%s22607_s2 + $0xd80] sm:$0xff]  }
 0xb14   : > { %17418 = vmatprep.subr.bf16.mxu0 %v21906_v9 }
 0xb15   : > { %17437 = vmatpush3.bf16.msra.mxu1 %v18488_v62  ;;  %v18537_v62 = vld [vmem:[%s22607_s2 + $0xdc8] sm:$0xff]  }
 0xb16   : > { %17438 = vmatprep.subr.bf16.mxu1 %v21906_v9 }
 0xb17   : > { %17419 = vmatpush3.bf16.msra.mxu0 %v18489_v48  ;;  %v18538_v48 = vld [vmem:[%s22607_s2 + $0xd88] sm:$0xff]  }
 0xb18   : > { %17420 = vmatprep.subr.bf16.mxu0 %v21906_v9 }
 0xb19   : > { %17439 = vmatpush3.bf16.msra.mxu1 %v18490_v26  ;;  %v18539_v26 = vld [vmem:[%s22607_s2 + $0xdd0] sm:$0xff]  }
 0xb1a   : > { %17440 = vmatprep.subr.bf16.mxu1 %v21906_v9 }
 0xb1b   : > { %17421 = vmatpush3.bf16.msra.mxu0 %v18491_v27  ;;  %v18540_v27 = vld [vmem:[%s22607_s2 + $0xd90] sm:$0xff]  }
 0xb1c   : > { %17422 = vmatprep.subr.bf16.mxu0 %v21906_v9 }
 0xb1d   : > { %17441 = vmatpush3.bf16.msra.mxu1 %v18492_v29  ;;  %v18541_v29 = vld [vmem:[%s22607_s2 + $0xdd8] sm:$0xff]  }
 0xb1e   : > { %17442 = vmatprep.subr.bf16.mxu1 %v21906_v9 }
 0xb1f   : > { %17423 = vmatpush3.bf16.msra.mxu0 %v18493_v37  ;;  %v18542_v37 = vld [vmem:[%s22607_s2 + $0xd98] sm:$0xff]  }
 0xb20   : > { %17448 = vmatprep.subr.bf16.mxu0 %v21906_v9 }
 0xb21   : > { %17443 = vmatpush3.bf16.msra.mxu1 %v18494_v41 }
 0xb22   : > { %17425 = vmatmul.mubr.bf16.vlgmr.msra.gmra.mrb[172].mxu0 %v10350_v0  ;;  %17468 = vmatprep.subr.bf16.mxu1 %v21906_v9 }
 0xb23   : > { %17449 = vmatpush3.bf16.msra.mxu0 %v18495_v24  ;;  %17464 = vmatprep.mubr.msk.bf16.mxu0 %vm18625_vm10, %v21906_v9 }
 0xb24   : > { %17445 = vmatmul.mubr.bf16.vlgmr.msra.gmra.mrb[140].mxu1 %v10458_v55  ;;  %17450 = vmatprep.subr.bf16.mxu0 %v21906_v9 }
 0xb25   : > { %17469 = vmatpush3.bf16.msra.mxu1 %v18496_v53  ;;  %17484 = vmatprep.mubr.msk.bf16.mxu1 %vm18625_vm10, %v21906_v9 }
 0xb26   : > { %17470 = vmatprep.subr.bf16.mxu1 %v21906_v9 }
 0xb27   : > { %17451 = vmatpush3.bf16.msra.mxu0 %v18497_v51 }
 0xb28   : > { %17452 = vmatprep.subr.bf16.mxu0 %v21906_v9 }
 0xb29   : > { %17471 = vmatpush3.bf16.msra.mxu1 %v18498_v61  ;;  %v18543_v61 = vld [vmem:[%s22607_s2 + $0xde0] sm:$0xff]  }
 0xb2a   : > { %17472 = vmatprep.subr.bf16.mxu1 %v21906_v9 }
 0xb2b   : > { %17453 = vmatpush3.bf16.msra.mxu0 %v18499_v52 }
 0xb2c   : > { %17454 = vmatprep.subr.bf16.mxu0 %v21906_v9 }
 0xb2d   : > { %17473 = vmatpush3.bf16.msra.mxu1 %v18500_v21  ;;  %v18544_v21 = vld [vmem:[%s22607_s2 + $0xda0] sm:$0xff]  }
 0xb2e   : > { %17474 = vmatprep.subr.bf16.mxu1 %v21906_v9 }
 0xb2f   : > { %17455 = vmatpush3.bf16.msra.mxu0 %v18501_v54  ;;  %v18545_v54 = vld [vmem:[%s22607_s2 + $0xde8] sm:$0xff]  }
 0xb30   : > { %17456 = vmatprep.subr.bf16.mxu0 %v21906_v9 }
 0xb31   : > { %17475 = vmatpush3.bf16.msra.mxu1 %v18502_v50  ;;  %v18546_v50 = vld [vmem:[%s22607_s2 + $0xda8] sm:$0xff]  }
 0xb32   : > { %17476 = vmatprep.subr.bf16.mxu1 %v21906_v9 }
 0xb33   : > { %17457 = vmatpush3.bf16.msra.mxu0 %v18503_v30  ;;  %v18547_v30 = vld [vmem:[%s22607_s2 + $0xdf0] sm:$0xff]  }
 0xb34   : > { %17458 = vmatprep.subr.bf16.mxu0 %v21906_v9 }
 0xb35   : > { %17477 = vmatpush3.bf16.msra.mxu1 %v18504_v31  ;;  %v18548_v31 = vld [vmem:[%s22607_s2 + $0xdb0] sm:$0xff]  }
 0xb36   : > { %17478 = vmatprep.subr.bf16.mxu1 %v21906_v9 }
 0xb37   : > { %17459 = vmatpush3.bf16.msra.mxu0 %v18505_v46  ;;  %v18549_v46 = vld [vmem:[%s22607_s2 + $0xdf8] sm:$0xff]  }
 0xb38   : > { %17460 = vmatprep.subr.bf16.mxu0 %v21906_v9 }
 0xb39   : > { %17479 = vmatpush3.bf16.msra.mxu1 %v18506_v10  ;;  %v18550_v10 = vld [vmem:[%s22607_s2 + $0xdb8] sm:$0xff]  }
 0xb3a   : > { %17480 = vmatprep.subr.bf16.mxu1 %v21906_v9 }
 0xb3b   : > { %17461 = vmatpush3.bf16.msra.mxu0 %v18507_v56  ;;  %v18552_v56 = vld [vmem:[%s22607_s2 + $0xe40] sm:$0xff]  }
 0xb3c   : > { %17462 = vmatprep.subr.bf16.mxu0 %v21906_v9 }
 0xb3d   : > { %17481 = vmatpush3.bf16.msra.mxu1 %v18508_v6  ;;  %v18626_v6 = vmov 0  }
 0xb3e   : > { %17482 = vmatprep.subr.bf16.mxu1 %v21906_v9 }
 0xb3f   : > { %17463 = vmatpush3.bf16.msra.mxu0 %v18509_v14  ;;  %v18554_v14 = vld [vmem:[%s22607_s2 + $0xe48] sm:$0xff]  }
 0xb40   : > { %17488 = vmatprep.subr.bf16.mxu0 %v21906_v9 }
 0xb41   : > { %17483 = vmatpush3.bf16.msra.mxu1 %v18510_v8  ;;  %v18556_v8 = vld [vmem:[%s22607_s2 + $0xe50] sm:$0xff]  }
 0xb42   : > { %17465 = vmatmul.mubr.bf16.vlgmr.msra.gmra.mrb[176].mxu0 %v10567_v18  ;;  %17508 = vmatprep.subr.bf16.mxu1 %v21906_v9 }
 0xb43   : > { %17489 = vmatpush3.bf16.msra.mxu0 %v18511_v60  ;;  %17504 = vmatprep.mubr.msk.bf16.mxu0 %vm18625_vm10, %v21906_v9 }
 0xb44   : > { %17485 = vmatmul.mubr.bf16.vlgmr.msra.gmra.mrb[144].mxu1 %v10676_v25  ;;  %17490 = vmatprep.subr.bf16.mxu0 %v21906_v9 }
 0xb45   : > { %17509 = vmatpush3.bf16.msra.mxu1 %v18512_v33  ;;  %17524 = vmatprep.mubr.msk.bf16.mxu1 %vm18625_vm10, %v21906_v9 }
 0xb46   : > { %17510 = vmatprep.subr.bf16.mxu1 %v21906_v9 }
 0xb47   : > { %17491 = vmatpush3.bf16.msra.mxu0 %v18513_v12 }
 0xb48   : > { %17492 = vmatprep.subr.bf16.mxu0 %v21906_v9 }
 0xb49   : > { %17511 = vmatpush3.bf16.msra.mxu1 %v18514_v34 }
 0xb4a   : > { %17512 = vmatprep.subr.bf16.mxu1 %v21906_v9 }
 0xb4b   : > { %17493 = vmatpush3.bf16.msra.mxu0 %v18515_v22 }
 0xb4c   : > { %17494 = vmatprep.subr.bf16.mxu0 %v21906_v9 }
 0xb4d   : > { %17513 = vmatpush3.bf16.msra.mxu1 %v18516_v32  ;;  %v18560_v32 = vld [vmem:[%s22607_s2 + $0xe60] sm:$0xff]  }
 0xb4e   : > { %17514 = vmatprep.subr.bf16.mxu1 %v21906_v9 }
 0xb4f   : > { %17495 = vmatpush3.bf16.msra.mxu0 %v18517_v35 }
 0xb50   : > { %17496 = vmatprep.subr.bf16.mxu0 %v21906_v9 }
 0xb51   : > { %17515 = vmatpush3.bf16.msra.mxu1 %v18518_v11 }
 0xb52   : > { %17516 = vmatprep.subr.bf16.mxu1 %v21906_v9 }
 0xb53   : > { %17497 = vmatpush3.bf16.msra.mxu0 %v18519_v16  ;;  %v18562_v16 = vld [vmem:[%s22607_s2 + $0xe68] sm:$0xff]  }
 0xb54   : > { %17498 = vmatprep.subr.bf16.mxu0 %v21906_v9 }
 0xb55   : > { %17517 = vmatpush3.bf16.msra.mxu1 %v18520_v2  ;;  %v18564_v2 = vld [vmem:[%s22607_s2 + $0xe70] sm:$0xff]  }
 0xb56   : > { %17518 = vmatprep.subr.bf16.mxu1 %v21906_v9 }
 0xb57   : > { %17499 = vmatpush3.bf16.msra.mxu0 %v18521_v58  ;;  %v18566_v58 = vld [vmem:[%s22607_s2 + $0xe78] sm:$0xff]  }
 0xb58   : > { %17500 = vmatprep.subr.bf16.mxu0 %v21906_v9 }
 0xb59   : > { %17519 = vmatpush3.bf16.msra.mxu1 %v18522_v28  ;;  %v18568_v28 = vld [vmem:[%s22607_s2 + $0xec0] sm:$0xff]  }
 0xb5a   : > { %17520 = vmatprep.subr.bf16.mxu1 %v21906_v9 }
 0xb5b   : > { %17501 = vmatpush3.bf16.msra.mxu0 %v18523_v59  ;;  %v18570_v59 = vld [vmem:[%s22607_s2 + $0xec8] sm:$0xff]  }
 0xb5c   : > { %17502 = vmatprep.subr.bf16.mxu0 %v21906_v9 }
 0xb5d   : > { %17521 = vmatpush3.bf16.msra.mxu1 %v18524_v1  ;;  %v18572_v1 = vld [vmem:[%s22607_s2 + $0xed0] sm:$0xff]  }
 0xb5e   : > { %17522 = vmatprep.subr.bf16.mxu1 %v21906_v9 }
 0xb5f   : > { %17503 = vmatpush3.bf16.msra.mxu0 %v18525_v15  ;;  %v18574_v15 = vld [vmem:[%s22607_s2 + $0xed8] sm:$0xff]  }
 0xb60   : > { %17528 = vmatprep.subr.bf16.mxu0 %v21906_v9 }
 0xb61   : > { %17523 = vmatpush3.bf16.msra.mxu1 %v18526_v57 }
 0xb62   : > { %17505 = vmatmul.mubr.bf16.vlgmr.msra.gmra.mrb[180].mxu0 %v10784_v38  ;;  %17548 = vmatprep.subr.bf16.mxu1 %v21906_v9 }
 0xb63   : > { %17529 = vmatpush3.bf16.msra.mxu0 %v18527_v4  ;;  %17544 = vmatprep.mubr.msk.bf16.mxu0 %vm18625_vm10, %v21906_v9 }
 0xb64   : > { %17525 = vmatmul.mubr.bf16.vlgmr.msra.gmra.mrb[148].mxu1 %v10893_v36  ;;  %17530 = vmatprep.subr.bf16.mxu0 %v21906_v9 }
 0xb65   : > { %17564 = vmatprep.mubr.msk.bf16.mxu1 %vm18625_vm10, %v21906_v9  ;;  %17549 = vmatpush3.bf16.msra.mxu1 %v18535_v19  ;;  %v18586_v19 = vld [vmem:[%s22607_s2 + $0xf48] sm:$0xff]  }
 0xb66   : > { %17550 = vmatprep.subr.bf16.mxu1 %v21906_v9 }
 0xb67   : > { %17531 = vmatpush3.bf16.msra.mxu0 %v18528_v49 }
 0xb68   : > { %17532 = vmatprep.subr.bf16.mxu0 %v21906_v9 }
 0xb69   : > { %17551 = vmatpush3.bf16.msra.mxu1 %v18537_v62  ;;  %v18590_v62 = vld [vmem:[%s22607_s2 + $0xf58] sm:$0xff]  }
 0xb6a   : > { %17552 = vmatprep.subr.bf16.mxu1 %v21906_v9 }
 0xb6b   : > { %17533 = vmatpush3.bf16.msra.mxu0 %v18529_v42 }
 0xb6c   : > { %17534 = vmatprep.subr.bf16.mxu0 %v21906_v9 }
 0xb6d   : > { %17553 = vmatpush3.bf16.msra.mxu1 %v18539_v26 }
 0xb6e   : > { %17554 = vmatprep.subr.bf16.mxu1 %v21906_v9 }
 0xb6f   : > { %17535 = vmatpush3.bf16.msra.mxu0 %v18530_v47  ;;  %v18576_v47 = vld [vmem:[%s22607_s2 + $0xee0] sm:$0xff]  }
 0xb70   : > { %17536 = vmatprep.subr.bf16.mxu0 %v21906_v9 }
 0xb71   : > { %17555 = vmatpush3.bf16.msra.mxu1 %v18541_v29 }
 0xb72   : > { %17556 = vmatprep.subr.bf16.mxu1 %v21906_v9 }
 0xb73   : > { %17537 = vmatpush3.bf16.msra.mxu0 %v18531_v17 }
 0xb74   : > { %17538 = vmatprep.subr.bf16.mxu0 %v21906_v9 }
 0xb75   : > { %17557 = vmatpush3.bf16.msra.mxu1 %v18543_v61  ;;  %v18598_v61 = vld [vmem:[%s22607_s2 + $0xf78] sm:$0xff]  }
 0xb76   : > { %17558 = vmatprep.subr.bf16.mxu1 %v21906_v9 }
 0xb77   : > { %17539 = vmatpush3.bf16.msra.mxu0 %v18532_v44 }
 0xb78   : > { %17540 = vmatprep.subr.bf16.mxu0 %v21906_v9 }
 0xb79   : > { %17559 = vmatpush3.bf16.msra.mxu1 %v18545_v54  ;;  %v14533_v54 = vld [vmem:[%s22608_s3 + $0x6] ss:$0 sm:$0xff] }
 0xb7a   : > { %17560 = vmatprep.subr.bf16.mxu1 %v21906_v9 }
 0xb7b   : > { %17541 = vmatpush3.bf16.msra.mxu0 %v18533_v7  ;;  %v18578_v7 = vld [vmem:[%s22607_s2 + $0xee8] sm:$0xff]  }
 0xb7c   : > { %17542 = vmatprep.subr.bf16.mxu0 %v21906_v9 }
 0xb7d   : > { %17561 = vmatpush3.bf16.msra.mxu1 %v18547_v30 }
 0xb7e   : > { %17562 = vmatprep.subr.bf16.mxu1 %v21906_v9 }
 0xb7f   : > { %17543 = vmatpush3.bf16.msra.mxu0 %v18534_v63  ;;  %v18580_v63 = vld [vmem:[%s22607_s2 + $0xef0] sm:$0xff]  }
 0xb80   : > { %17568 = vmatprep.subr.bf16.mxu0 %v21906_v9 }
 0xb81   : > { %17563 = vmatpush3.bf16.msra.mxu1 %v18549_v46  ;;  %v14534_v46 = vld [vmem:[%s22609_s4 + $0x6] ss:$0 sm:$0xff] }
 0xb82   : > { %17545 = vmatmul.mubr.bf16.vlgmr.msra.gmra.mrb[184].mxu0 %v11002_v13  ;;  %17588 = vmatprep.subr.bf16.mxu1 %v21906_v9  ;;  %v18584_v13 = vld [vmem:[%s22607_s2 + $0xf40] sm:$0xff]  }
 0xb83   : > { %17584 = vmatprep.mubr.msk.bf16.mxu0 %vm18625_vm10, %v21906_v9  ;;  %17569 = vmatpush3.bf16.msra.mxu0 %v18536_v23  ;;  %v18588_v23 = vld [vmem:[%s22607_s2 + $0xf50] sm:$0xff]  }
 0xb84   : > { %17570 = vmatprep.subr.bf16.mxu0 %v21906_v9 }
 0xb87   : > { %17571 = vmatpush3.bf16.msra.mxu0 %v18538_v48 }
 0xb88   : > { %17572 = vmatprep.subr.bf16.mxu0 %v21906_v9 }
 0xb8b   : > { %17573 = vmatpush3.bf16.msra.mxu0 %v18540_v27 }
 0xb8c   : > { %17574 = vmatprep.subr.bf16.mxu0 %v21906_v9 }
 0xb8f   : > { %17575 = vmatpush3.bf16.msra.mxu0 %v18542_v37 }
 0xb90   : > { %17576 = vmatprep.subr.bf16.mxu0 %v21906_v9 }
 0xb93   : > { %17577 = vmatpush3.bf16.msra.mxu0 %v18544_v21 }
 0xb94   : > { %17578 = vmatprep.subr.bf16.mxu0 %v21906_v9 }
 0xb97   : > { %17579 = vmatpush3.bf16.msra.mxu0 %v18546_v50 }
 0xb98   : > { %17580 = vmatprep.subr.bf16.mxu0 %v21906_v9 }
 0xb9b   : > { %17581 = vmatpush3.bf16.msra.mxu0 %v18548_v31 }
 0xb9c   : > { %17582 = vmatprep.subr.bf16.mxu0 %v21906_v9 }
 0xb9f   : > { %17583 = vmatpush3.bf16.msra.mxu0 %v18550_v10 }
 0xba0   : > { %17608 = vmatprep.subr.bf16.mxu0 %v21906_v9 }
 0xba2   : > { %17585 = vmatmul.mubr.bf16.vlgmr.msra.gmra.mrb[188].mxu0 %v18626_v6 }
 0xba3   : > { %17609 = vmatpush3.bf16.msra.mxu0 %v18552_v56  ;;  %17624 = vmatprep.mubr.msk.bf16.mxu0 %vm18625_vm10, %v21906_v9 }
 0xba4   : > { %17610 = vmatprep.subr.bf16.mxu0 %v21906_v9 }
 0xba7   : > { %17611 = vmatpush3.bf16.msra.mxu0 %v18554_v14 }
 0xba8   : > { %17612 = vmatprep.subr.bf16.mxu0 %v21906_v9 }
 0xbab   : > { %17613 = vmatpush3.bf16.msra.mxu0 %v18556_v8 }
 0xbac   : > { %17614 = vmatprep.subr.bf16.mxu0 %v21906_v9 }
 0xbaf   : > { %17615 = vmatpush3.bf16.msra.mxu0 %v18558_v3 }
 0xbb0   : > { %17616 = vmatprep.subr.bf16.mxu0 %v21906_v9 }
 0xbb3   : > { %17617 = vmatpush3.bf16.msra.mxu0 %v18560_v32  ;;  %v18565_v32 = vld [vmem:[%s22607_s2 + $0xe38] sm:$0xff]  }
 0xbb4   : > { %17618 = vmatprep.subr.bf16.mxu0 %v21906_v9 }
 0xbb7   : > { %17619 = vmatpush3.bf16.msra.mxu0 %v18562_v16  ;;  %v18571_v16 = vld [vmem:[%s22607_s2 + $0xe90] sm:$0xff]  }
 0xbb8   : > { %17620 = vmatprep.subr.bf16.mxu0 %v21906_v9 }
 0xbbb   : > { %17621 = vmatpush3.bf16.msra.mxu0 %v18564_v2  ;;  %v18573_v2 = vld [vmem:[%s22607_s2 + $0xe98] sm:$0xff]  }
 0xbbc   : > { %17622 = vmatprep.subr.bf16.mxu0 %v21906_v9 }
 0xbbf   : > { %17623 = vmatpush3.bf16.msra.mxu0 %v18566_v58  ;;  %v18575_v58 = vld [vmem:[%s22607_s2 + $0xea0] sm:$0xff]  }
 0xbc0   : > { %17648 = vmatprep.subr.bf16.mxu0 %v21906_v9 }
 0xbc2   : > { %17625 = vmatmul.mubr.bf16.vlgmr.msra.gmra.mrb[192].mxu0 %v18626_v6 }
 0xbc3   : > { %17649 = vmatpush3.bf16.msra.mxu0 %v18568_v28  ;;  %17664 = vmatprep.mubr.msk.bf16.mxu0 %vm18625_vm10, %v21906_v9  ;;  %v18577_v28 = vld [vmem:[%s22607_s2 + $0xea8] sm:$0xff]  }
 0xbc4   : > { %17650 = vmatprep.subr.bf16.mxu0 %v21906_v9 }
 0xbc7   : > { %17651 = vmatpush3.bf16.msra.mxu0 %v18570_v59  ;;  %v18579_v59 = vld [vmem:[%s22607_s2 + $0xeb0] sm:$0xff]  }
 0xbc8   : > { %17652 = vmatprep.subr.bf16.mxu0 %v21906_v9 }
 0xbcb   : > { %17653 = vmatpush3.bf16.msra.mxu0 %v18572_v1  ;;  %v18581_v1 = vld [vmem:[%s22607_s2 + $0xeb8] sm:$0xff]  }
 0xbcc   : > { %17654 = vmatprep.subr.bf16.mxu0 %v21906_v9 }
 0xbcf   : > { %17655 = vmatpush3.bf16.msra.mxu0 %v18574_v15 }
 0xbd0   : > { %17656 = vmatprep.subr.bf16.mxu0 %v21906_v9 }
 0xbd3   : > { %17657 = vmatpush3.bf16.msra.mxu0 %v18576_v47 }
 0xbd4   : > { %17658 = vmatprep.subr.bf16.mxu0 %v21906_v9 }
 0xbd5   : > { %v10254_v40 = vpop.f32.mrb[168].mxu0 }
 0xbd6   : > { %v17386_v41 = vpop.f32.mrb[169].mxu0 }
 0xbd7   : > { %v10257_v43 = vpop.f32.mrb[170].mxu0  ;;  %v10342_v24 = vpop.f32.mrb[136].mxu1  ;;  %17659 = vmatpush3.bf16.msra.mxu0 %v18578_v7 }
 0xbd8   : > { %v10343_v0 = vadd.f32 %v10342_v24, %v10254_v40  ;;  %v17387_v53 = vpop.f32.mrb[171].mxu0  ;;  %v17406_v55 = vpop.f32.mrb[137].mxu1  ;;  %17660 = vmatprep.subr.bf16.mxu0 %v21906_v9  ;;  %v18592_v24 = vld [vmem:[%s22607_s2 + $0xf60] sm:$0xff]  }
 0xbd9   : > { %v10345_v51 = vpop.f32.mrb[138].mxu1  ;;  %v18594_v55 = vld [vmem:[%s22607_s2 + $0xf68] sm:$0xff]  }
 0xbda   : > { %v17407_v52 = vpop.f32.mrb[139].mxu1  ;;  %v18596_v51 = vld [vmem:[%s22607_s2 + $0xf70] sm:$0xff]  }
 0xbdb   : > { %17661 = vmatpush3.bf16.msra.mxu0 %v18580_v63  ;;  %v22443_v52 = vld [vmem:[#allocation2 + $0x8] sm:$0xff] }
 0xbdc   : > { %17662 = vmatprep.subr.bf16.mxu0 %v21906_v9  ;;  %v11867_v21 = vpack.c.bf16 %v22443_v52, %v22443_v52 }
 0xbdf   : > { %17663 = vmatpush3.bf16.msra.mxu0 %v18582_v5  ;;  %v18599_v5 = vld [vmem:[%s22607_s2 + $0xf80] sm:$0xff]  }
 0xbe0   : > { %17688 = vmatprep.subr.bf16.mxu0 %v21906_v9 }
 0xbe2   : > { %17665 = vmatmul.mubr.bf16.vlgmr.msra.gmra.mrb[196].mxu0 %v18626_v6 }
 0xbe3   : > { %17689 = vmatpush3.bf16.msra.mxu0 %v18584_v13  ;;  %17704 = vmatprep.mubr.msk.bf16.mxu0 %vm18625_vm10, %v21906_v9  ;;  %v18600_v13 = vld [vmem:[%s22607_s2 + $0xf88] sm:$0xff]  }
 0xbe4   : > { %17690 = vmatprep.subr.bf16.mxu0 %v21906_v9 }
 0xbe7   : > { %17691 = vmatpush3.bf16.msra.mxu0 %v18586_v19  ;;  %v18601_v19 = vld [vmem:[%s22607_s2 + $0xf90] sm:$0xff]  }
 0xbe8   : > { %17692 = vmatprep.subr.bf16.mxu0 %v21906_v9 }
 0xbeb   : > { %17693 = vmatpush3.bf16.msra.mxu0 %v18588_v23  ;;  %v18602_v23 = vld [vmem:[%s22607_s2 + $0xf98] sm:$0xff]  }
 0xbec   : > { %17694 = vmatprep.subr.bf16.mxu0 %v21906_v9 }
 0xbef   : > { %17695 = vmatpush3.bf16.msra.mxu0 %v18590_v62  ;;  %v18603_v62 = vld [vmem:[%s22607_s2 + $0xfa0] sm:$0xff]  }
 0xbf0   : > { %17696 = vmatprep.subr.bf16.mxu0 %v21906_v9 }
 0xbf3   : > { %17697 = vmatpush3.bf16.msra.mxu0 %v18592_v24 }
 0xbf4   : > { %17698 = vmatprep.subr.bf16.mxu0 %v21906_v9 }
 0xbf5   : > { %v10450_v60 = vpop.f32.mrb[172].mxu0 }
 0xbf6   : > { %v10456_v20 = vadd.f32 %v10450_v60, %v10343_v0  ;;  %v17426_v18 = vpop.f32.mrb[173].mxu0  ;;  %v18551_v60 = vld [vmem:[%s22607_s2 + $0xe00] sm:$0xff]  }
 0xbf7   : > { %v10453_v33 = vpop.f32.mrb[174].mxu0  ;;  %v10558_v25 = vpop.f32.mrb[140].mxu1  ;;  %17699 = vmatpush3.bf16.msra.mxu0 %v18594_v55  ;;  %v18553_v18 = vld [vmem:[%s22607_s2 + $0xe08] sm:$0xff]  }
 0xbf8   : > { %v10564_v12 = vadd.f32 %v10558_v25, %v10456_v20  ;;  %v17427_v34 = vpop.f32.mrb[175].mxu0  ;;  %v17446_v22 = vpop.f32.mrb[141].mxu1  ;;  %17700 = vmatprep.subr.bf16.mxu0 %v21906_v9  ;;  %v18555_v33 = vld [vmem:[%s22607_s2 + $0xe10] sm:$0xff]   ;;  %v18557_v25 = vld [vmem:[%s22607_s2 + $0xe18] sm:$0xff]  }
 0xbf9   : > { %v10561_v35 = vpop.f32.mrb[142].mxu1  ;;  %v18561_v34 = vld [vmem:[%s22607_s2 + $0xe28] sm:$0xff]   ;;  %v18563_v22 = vld [vmem:[%s22607_s2 + $0xe30] sm:$0xff]  }
 0xbfa   : > { %v17447_v11 = vpop.f32.mrb[143].mxu1  ;;  %v18567_v35 = vld [vmem:[%s22607_s2 + $0xe80] sm:$0xff]  }
 0xbfb   : > { %17701 = vmatpush3.bf16.msra.mxu0 %v18596_v51  ;;  %v18569_v11 = vld [vmem:[%s22607_s2 + $0xe88] sm:$0xff]  }
 0xbfc   : > { %17702 = vmatprep.subr.bf16.mxu0 %v21906_v9 }
 0xbff   : > { %17703 = vmatpush3.bf16.msra.mxu0 %v18598_v61 }
 0xc02   : > { %17705 = vmatmul.mubr.bf16.vlgmr.msra.gmra.mrb[200].mxu0 %v11867_v21 }
 0xc15   : > { %v10667_v39 = vpop.f32.mrb[176].mxu0 }
 0xc16   : > { %v10673_v57 = vadd.f32 %v10667_v39, %v10564_v12  ;;  %v17466_v4 = vpop.f32.mrb[177].mxu0  ;;  %v18559_v12 = vld [vmem:[%s22607_s2 + $0xe20] sm:$0xff]  }
 0xc17   : > { %v10670_v45 = vpop.f32.mrb[178].mxu0  ;;  %v10776_v38 = vpop.f32.mrb[144].mxu1  ;;  %v18583_v39 = vld [vmem:[%s22607_s2 + $0xf00] sm:$0xff]   ;;  %v18585_v4 = vld [vmem:[%s22607_s2 + $0xf08] sm:$0xff]  }
 0xc18   : > { %v10782_v36 = vadd.f32 %v10776_v38, %v10673_v57  ;;  %v17467_v49 = vpop.f32.mrb[179].mxu0  ;;  %v17486_v42 = vpop.f32.mrb[145].mxu1  ;;  %v18587_v45 = vld [vmem:[%s22607_s2 + $0xf10] sm:$0xff]   ;;  %v18589_v38 = vld [vmem:[%s22607_s2 + $0xf18] sm:$0xff]  }
 0xc19   : > { %v10779_v17 = vpop.f32.mrb[146].mxu1  ;;  %v18593_v49 = vld [vmem:[%s22607_s2 + $0xf28] sm:$0xff]   ;;  %v18595_v42 = vld [vmem:[%s22607_s2 + $0xf30] sm:$0xff]  }
 0xc1a   : > { %v17487_v44 = vpop.f32.mrb[147].mxu1 }
 0xc1b   : > { %v18597_v44 = vld [vmem:[%s22607_s2 + $0xf38] sm:$0xff]  }
 0xc35   : > { %v10884_v48 = vpop.f32.mrb[180].mxu0 }
 0xc36   : > { %v10890_v26 = vadd.f32 %v10884_v48, %v10782_v36  ;;  %v17506_v27 = vpop.f32.mrb[181].mxu0  ;;  %v18591_v36 = vld [vmem:[%s22607_s2 + $0xf20] sm:$0xff]   ;;  %v18604_v48 = vld [vmem:[%s22607_s2 + $0xfa8] sm:$0xff]  }
 0xc37   : > { %v10887_v29 = vpop.f32.mrb[182].mxu0  ;;  %v10993_v37 = vpop.f32.mrb[148].mxu1 }
 0xc38   : > { %v10999_v40 = vadd.f32 %v10993_v37, %v10890_v26  ;;  %v17507_v41 = vpop.f32.mrb[183].mxu0  ;;  %v17526_v43 = vpop.f32.mrb[149].mxu1  ;;  %v18605_v26 = vld [vmem:[%s22607_s2 + $0xfb0] sm:$0xff]   ;;  %v18606_v37 = vld [vmem:[%s22607_s2 + $0xfb8] sm:$0xff]  }
 0xc39   : > { %v10996_v0 = vpop.f32.mrb[150].mxu1 }
 0xc3a   : > { %v17527_v53 = vpop.f32.mrb[151].mxu1 }
 0xc55   : > { %v11102_v50 = vpop.f32.mrb[184].mxu0 }
 0xc56   : > { %v11108_v30 = vadd.f32 %v11102_v50, %v10999_v40  ;;  %v17546_v31 = vpop.f32.mrb[185].mxu0 }
 0xc57   : > { %v11105_v10 = vpop.f32.mrb[186].mxu0 }
 0xc58   : > { %v11113_v9 = vadd.f32 %v14533_v54, %v11108_v30  ;;  %v17547_v56 = vpop.f32.mrb[187].mxu0 }
 0xc5a   : > { %vm11114_vm15 = vcmp.ge.f32.partialorder %v11113_v9, 0.0  ;;  %v11119_v14 = vmul.f32 %v14534_v46, %v11113_v9 }
 0xc5c   : > { %v11120_v8 = vsel %vm11114_vm15, %v11113_v9, %v11119_v14 }
 0xc5d   : > { %11121 = vst [vmem:[#allocation8 + $0x8] sm:$0x1] %v11120_v8 }
 0xc64   : > { %v11139_v3 = vld [vmem:[#allocation8 + $0x7] sm:$0xff] }
 0xc65   : > { %v11140_v20 = vpack.c.bf16 %v11139_v3, %v11139_v3  ;;  %v11546_v15 = vld [vmem:[#allocation8 + $0x8] sm:$0xff] }
 0xc66   : > { %v11547_v57 = vpack.c.bf16 %v11546_v15, %v11546_v15 }
 0xc67   : > { %17565 = vmatmul.mubr.bf16.vlgmr.msra.gmra.mrb[152].mxu1 %v11140_v20 }
 0xc68   : > { %17589 = vmatpush3.bf16.msra.mxu1 %v18551_v60  ;;  %17604 = vmatprep.mubr.msk.bf16.mxu1 %vm18625_vm10, %v22443_v52 }
 0xc69   : > { %17590 = vmatprep.subr.bf16.mxu1 %v22443_v52 }
 0xc6c   : > { %17591 = vmatpush3.bf16.msra.mxu1 %v18553_v18 }
 0xc6d   : > { %17592 = vmatprep.subr.bf16.mxu1 %v22443_v52 }
 0xc70   : > { %17593 = vmatpush3.bf16.msra.mxu1 %v18555_v33 }
 0xc71   : > { %17594 = vmatprep.subr.bf16.mxu1 %v22443_v52 }
 0xc74   : > { %17595 = vmatpush3.bf16.msra.mxu1 %v18557_v25 }
 0xc75   : > { %17596 = vmatprep.subr.bf16.mxu1 %v22443_v52  ;;  %v11328_v47 = vpop.f32.mrb[188].mxu0 }
 0xc76   : > { %v17586_v17 = vpop.f32.mrb[189].mxu0 }
 0xc77   : > { %v11331_v7 = vpop.f32.mrb[190].mxu0 }
 0xc78   : > { %17597 = vmatpush3.bf16.msra.mxu1 %v18559_v12  ;;  %v17587_v63 = vpop.f32.mrb[191].mxu0 }
 0xc79   : > { %17598 = vmatprep.subr.bf16.mxu1 %v22443_v52 }
 0xc7c   : > { %17599 = vmatpush3.bf16.msra.mxu1 %v18561_v34 }
 0xc7d   : > { %17600 = vmatprep.subr.bf16.mxu1 %v22443_v52 }
 0xc80   : > { %17601 = vmatpush3.bf16.msra.mxu1 %v18563_v22 }
 0xc81   : > { %17602 = vmatprep.subr.bf16.mxu1 %v22443_v52 }
 0xc84   : > { %17603 = vmatpush3.bf16.msra.mxu1 %v18565_v32 }
 0xc85   : > { %17628 = vmatprep.subr.bf16.mxu1 %v22443_v52 }
 0xc87   : > { %17605 = vmatmul.mubr.bf16.vlgmr.msra.gmra.mrb[156].mxu1 %v18626_v6 }
 0xc88   : > { %17629 = vmatpush3.bf16.msra.mxu1 %v18567_v35  ;;  %17644 = vmatprep.mubr.msk.bf16.mxu1 %vm18625_vm10, %v22443_v52 }
 0xc89   : > { %17630 = vmatprep.subr.bf16.mxu1 %v22443_v52 }
 0xc8c   : > { %17631 = vmatpush3.bf16.msra.mxu1 %v18569_v11  ;;  %v14751_v11 = vld [vmem:[%s22608_s3 + $0x7] ss:$0 sm:$0xff] }
 0xc8d   : > { %17632 = vmatprep.subr.bf16.mxu1 %v22443_v52 }
 0xc90   : > { %17633 = vmatpush3.bf16.msra.mxu1 %v18571_v16 }
 0xc91   : > { %17634 = vmatprep.subr.bf16.mxu1 %v22443_v52 }
 0xc94   : > { %17635 = vmatpush3.bf16.msra.mxu1 %v18573_v2 }
 0xc95   : > { %17636 = vmatprep.subr.bf16.mxu1 %v22443_v52  ;;  %v11539_v27 = vpop.f32.mrb[192].mxu0 }
 0xc96   : > { %v17626_v29 = vpop.f32.mrb[193].mxu0 }
 0xc97   : > { %v11542_v40 = vpop.f32.mrb[194].mxu0 }
 0xc98   : > { %17637 = vmatpush3.bf16.msra.mxu1 %v18575_v58  ;;  %v17627_v41 = vpop.f32.mrb[195].mxu0 }
 0xc99   : > { %17638 = vmatprep.subr.bf16.mxu1 %v22443_v52 }
 0xc9c   : > { %17639 = vmatpush3.bf16.msra.mxu1 %v18577_v28  ;;  %v14752_v28 = vld [vmem:[%s22609_s4 + $0x7] ss:$0 sm:$0xff] }
 0xc9d   : > { %17640 = vmatprep.subr.bf16.mxu1 %v22443_v52 }
 0xca0   : > { %17641 = vmatpush3.bf16.msra.mxu1 %v18579_v59 }
 0xca1   : > { %17642 = vmatprep.subr.bf16.mxu1 %v22443_v52 }
 0xca4   : > { %17643 = vmatpush3.bf16.msra.mxu1 %v18581_v1 }
 0xca5   : > { %17668 = vmatprep.subr.bf16.mxu1 %v22443_v52 }
 0xca7   : > { %17645 = vmatmul.mubr.bf16.vlgmr.msra.gmra.mrb[160].mxu1 %v11547_v57 }
 0xca8   : > { %17669 = vmatpush3.bf16.msra.mxu1 %v18583_v39  ;;  %17684 = vmatprep.mubr.msk.bf16.mxu1 %vm18625_vm10, %v22443_v52 }
 0xca9   : > { %17670 = vmatprep.subr.bf16.mxu1 %v22443_v52 }
 0xcac   : > { %17671 = vmatpush3.bf16.msra.mxu1 %v18585_v4 }
 0xcad   : > { %17672 = vmatprep.subr.bf16.mxu1 %v22443_v52 }
 0xcb0   : > { %17673 = vmatpush3.bf16.msra.mxu1 %v18587_v45 }
 0xcb1   : > { %17674 = vmatprep.subr.bf16.mxu1 %v22443_v52 }
 0xcb4   : > { %17675 = vmatpush3.bf16.msra.mxu1 %v18589_v38 }
 0xcb5   : > { %17676 = vmatprep.subr.bf16.mxu1 %v22443_v52  ;;  %v11753_v43 = vpop.f32.mrb[196].mxu0 }
 0xcb6   : > { %v17666_v24 = vpop.f32.mrb[197].mxu0 }
 0xcb7   : > { %v11756_v0 = vpop.f32.mrb[198].mxu0 }
 0xcb8   : > { %17677 = vmatpush3.bf16.msra.mxu1 %v18591_v36  ;;  %v17667_v53 = vpop.f32.mrb[199].mxu0 }
 0xcb9   : > { %17678 = vmatprep.subr.bf16.mxu1 %v22443_v52 }
 0xcbc   : > { %17679 = vmatpush3.bf16.msra.mxu1 %v18593_v49 }
 0xcbd   : > { %17680 = vmatprep.subr.bf16.mxu1 %v22443_v52 }
 0xcc0   : > { %17681 = vmatpush3.bf16.msra.mxu1 %v18595_v42 }
 0xcc1   : > { %17682 = vmatprep.subr.bf16.mxu1 %v22443_v52 }
 0xcc4   : > { %17683 = vmatpush3.bf16.msra.mxu1 %v18597_v44 }
 0xcc5   : > { %17708 = vmatprep.subr.bf16.mxu1 %v22443_v52 }
 0xcc7   : > { %17685 = vmatmul.mubr.bf16.vlgmr.msra.gmra.mrb[164].mxu1 %v18626_v6 }
 0xcc8   : > { %17709 = vmatpush3.bf16.msra.mxu1 %v18599_v5  ;;  %17724 = vmatprep.mubr.msk.bf16.mxu1 %vm18625_vm10, %v22443_v52 }
 0xcc9   : > { %17710 = vmatprep.subr.bf16.mxu1 %v22443_v52 }
 0xccc   : > { %17711 = vmatpush3.bf16.msra.mxu1 %v18600_v13 }
 0xccd   : > { %17712 = vmatprep.subr.bf16.mxu1 %v22443_v52 }
 0xcd0   : > { %17713 = vmatpush3.bf16.msra.mxu1 %v18601_v19 }
 0xcd1   : > { %17714 = vmatprep.subr.bf16.mxu1 %v22443_v52 }
 0xcd4   : > { %17715 = vmatpush3.bf16.msra.mxu1 %v18602_v23 }
 0xcd5   : > { %17716 = vmatprep.subr.bf16.mxu1 %v22443_v52  ;;  %v11967_v55 = vpop.f32.mrb[200].mxu0 }
 0xcd6   : > { %v17706_v51 = vpop.f32.mrb[201].mxu0 }
 0xcd7   : > { %v11970_v61 = vpop.f32.mrb[202].mxu0 }
 0xcd8   : > { %17717 = vmatpush3.bf16.msra.mxu1 %v18603_v62  ;;  %v17707_v21 = vpop.f32.mrb[203].mxu0 }
 0xcd9   : > { %17718 = vmatprep.subr.bf16.mxu1 %v22443_v52 }
 0xcdc   : > { %17719 = vmatpush3.bf16.msra.mxu1 %v18604_v48 }
 0xcdd   : > { %17720 = vmatprep.subr.bf16.mxu1 %v22443_v52 }
 0xce0   : > { %17721 = vmatpush3.bf16.msra.mxu1 %v18605_v26 }
 0xce1   : > { %17722 = vmatprep.subr.bf16.mxu1 %v22443_v52 }
 0xce4   : > { %17723 = vmatpush3.bf16.msra.mxu1 %v18606_v37 }
 0xce7   : > { %17725 = vmatmul.mubr.bf16.vlgmr.msra.gmra.mrb[168].mxu1 %v18626_v6 }
 0xd3a   : > { %v11240_v54 = vpop.f32.mrb[152].mxu1 }
 0xd3b   : > { %v11329_v50 = vadd.f32 %v11328_v47, %v11240_v54  ;;  %v17566_v30 = vpop.f32.mrb[153].mxu1 }
 0xd3c   : > { %v11243_v31 = vpop.f32.mrb[154].mxu1 }
 0xd3d   : > { %v17567_v46 = vpop.f32.mrb[155].mxu1 }
 0xd5a   : > { %v11433_v10 = vpop.f32.mrb[156].mxu1 }
 0xd5b   : > { %v11439_v9 = vadd.f32 %v11433_v10, %v11329_v50  ;;  %v17606_v52 = vpop.f32.mrb[157].mxu1 }
 0xd5c   : > { %v11436_v56 = vpop.f32.mrb[158].mxu1 }
 0xd5d   : > { %v11545_v14 = vadd.f32 %v11539_v27, %v11439_v9  ;;  %v17607_v8 = vpop.f32.mrb[159].mxu1 }
 0xd7a   : > { %v11647_v6 = vpop.f32.mrb[160].mxu1 }
 0xd7b   : > { %v11653_v3 = vadd.f32 %v11647_v6, %v11545_v14  ;;  %v17646_v60 = vpop.f32.mrb[161].mxu1 }
 0xd7c   : > { %v11650_v20 = vpop.f32.mrb[162].mxu1 }
 0xd7d   : > { %v11759_v18 = vadd.f32 %v11753_v43, %v11653_v3  ;;  %v17647_v33 = vpop.f32.mrb[163].mxu1 }
 0xd9a   : > { %v11859_v25 = vpop.f32.mrb[164].mxu1 }
 0xd9b   : > { %v11865_v12 = vadd.f32 %v11859_v25, %v11759_v18  ;;  %v17686_v34 = vpop.f32.mrb[165].mxu1 }
 0xd9c   : > { %v11862_v22 = vpop.f32.mrb[166].mxu1 }
 0xd9d   : > { %v11973_v32 = vadd.f32 %v11967_v55, %v11865_v12  ;;  %v17687_v35 = vpop.f32.mrb[167].mxu1 }
 0xdba   : > { %v12073_v16 = vpop.f32.mrb[168].mxu1 }
 0xdbb   : > { %v12079_v2 = vadd.f32 %v12073_v16, %v11973_v32  ;;  %v17726_v58 = vpop.f32.mrb[169].mxu1 }
 0xdbc   : > { %v12076_v59 = vpop.f32.mrb[170].mxu1 }
 0xdbd   : > { %v12084_v1 = vadd.f32 %v14751_v11, %v12079_v2  ;;  %v17727_v15 = vpop.f32.mrb[171].mxu1 }
 0xdbf   : > { %vm12085_vm10 = vcmp.ge.f32.partialorder %v12084_v1, 0.0  ;;  %v12090_v39 = vmul.f32 %v14752_v28, %v12084_v1 }
 0xdc1   : > { %v12091_v57 = vsel %vm12085_vm10, %v12084_v1, %v12090_v39 }
 0xdc2   : > { %12092 = vst [vmem:[%s338_s11] sm:$0xff] %v12091_v57 }
 0xdc3 PF: > { %s19_s27 = sadd.s32 1, %s18622_s27  }
 0xdc4   : > { %p16_p4 = scmp.ge.s32.totalorder %s19_s27, 4  }
 0xdc6   :  { %18 = sbr.rel (!%p16_p4) target bundleno = 1 (0x1), region = 217 }

</bundles_post_ra>
